<compile_context>
chip_gen: v7x
topology: tpu7x:2x2x1
jax: 0.10.0
libtpu: 0.0.40
codegen_flags: <defaults>
</compile_context>

<pallas_src>
import functools

import jax
import jax.numpy as jnp
from jax import lax
from jax.experimental import pallas as pl
from jax.experimental.pallas import tpu as pltpu

BN_EPS = 1e-5
COMPUTE_DTYPE = jnp.float32   # tiny matmuls -> f32 for fidelity; accum f32.


# ----------------------------------------------------------------------------
# Per-view (row-group) training-mode BatchNorm, single pass
# ----------------------------------------------------------------------------
def _group_batchnorm(y, gamma, beta, n_groups):
    """BN over rows; statistics per contiguous row-group (= per view).

    var = E[x^2] - E[x]^2 (biased), matching PyTorch train() normalization.
    """
    m = y.shape[0]
    if n_groups == 1:
        mean = jnp.mean(y, axis=0, keepdims=True)
        var = jnp.mean(y * y, axis=0, keepdims=True) - mean * mean
    else:
        assert n_groups == 2 and m % 2 == 0
        h = m // 2
        row = lax.broadcasted_iota(jnp.int32, (m, 1), 0)
        g1 = (row < h).astype(jnp.float32)                 # (m,1) view-1 mask
        inv = 1.0 / h
        s1 = jnp.sum(y * g1, axis=0, keepdims=True)
        q1 = jnp.sum(y * y * g1, axis=0, keepdims=True)
        s_all = jnp.sum(y, axis=0, keepdims=True)
        q_all = jnp.sum(y * y, axis=0, keepdims=True)
        mean1 = s1 * inv
        mean2 = (s_all - s1) * inv
        var1 = q1 * inv - mean1 * mean1
        var2 = (q_all - q1) * inv - mean2 * mean2
        mean = g1 * mean1 + (1.0 - g1) * mean2             # per-row (per-view)
        var = g1 * var1 + (1.0 - g1) * var2
    var = jnp.maximum(var, 0.0)
    return (y - mean) * lax.rsqrt(var + BN_EPS) * gamma + beta


# ----------------------------------------------------------------------------
# Fused matmul (+bias) (+BN per view) (+residual | +downsample-proj-BN) (+ReLU)
# ----------------------------------------------------------------------------
def _make_fused_kernel(*, has_bias, has_bn, n_groups, relu, residual):
    # residual in {None, "add", "proj_bn"}
    def kernel(*refs):
        it = iter(refs)
        a_ref, b_ref = next(it), next(it)
        bias_ref = next(it) if has_bias else None
        gamma_ref = next(it) if has_bn else None
        beta_ref = next(it) if has_bn else None
        if residual == "add":
            res_ref = next(it)
        elif residual == "proj_bn":
            xs_ref, dw_ref, dg_ref, db_ref = next(it), next(it), next(it), next(it)
        o_ref = next(it)

        y = jnp.dot(a_ref[...], b_ref[...], preferred_element_type=jnp.float32)
        if has_bias:
            y = y + bias_ref[...]
        if has_bn:
            y = _group_batchnorm(y, gamma_ref[...], beta_ref[...], n_groups)
        if residual == "add":
            y = y + res_ref[...]
        elif residual == "proj_bn":
            # downsample branch: 1x1 conv (matmul) + BN, fused into this call
            idn = jnp.dot(xs_ref[...], dw_ref[...],
                          preferred_element_type=jnp.float32)
            idn = _group_batchnorm(idn, dg_ref[...], db_ref[...], n_groups)
            y = y + idn
        if relu:
            y = jnp.maximum(y, 0.0)
        o_ref[...] = y.astype(o_ref.dtype)

    return kernel


def fused_matmul(a, b, *, bias=None, bn=None, relu=False,
                 residual=None, residual_proj=None, n_views=1):
    """y = a @ b [+ bias] [BN per view] [+ residual | + BN(xs @ dw)] [ReLU].

    Grid-free pallas_call: every operand is a whole-array VMEM block (M <= 256,
    K <= 1152, N <= 512 here) => no K loop, no scratch accumulator, no padding,
    one dense store per call.
    """
    m = a.shape[0]
    n = b.shape[-1]
    inputs = [a.astype(COMPUTE_DTYPE), b.astype(COMPUTE_DTYPE)]
    if bias is not None:
        inputs.append(bias.astype(jnp.float32).reshape(1, n))
    if bn is not None:
        gamma, beta = bn
        inputs.append(gamma.astype(jnp.float32).reshape(1, n))
        inputs.append(beta.astype(jnp.float32).reshape(1, n))
    res_mode = None
    if residual is not None:
        res_mode = "add"
        inputs.append(residual.astype(jnp.float32))
    elif residual_proj is not None:
        res_mode = "proj_bn"
        xs, dw, dg, db = residual_proj
        inputs.append(xs.astype(COMPUTE_DTYPE))
        inputs.append(dw.astype(COMPUTE_DTYPE))
        inputs.append(dg.astype(jnp.float32).reshape(1, n))
        inputs.append(db.astype(jnp.float32).reshape(1, n))
    kernel = _make_fused_kernel(
        has_bias=bias is not None, has_bn=bn is not None,
        n_groups=n_views, relu=relu, residual=res_mode)
    return pl.pallas_call(
        kernel,
        out_shape=jax.ShapeDtypeStruct((m, n), jnp.float32),
        in_specs=[pl.BlockSpec(memory_space=pltpu.MemorySpace.VMEM)] * len(inputs),
        out_specs=pl.BlockSpec(memory_space=pltpu.MemorySpace.VMEM),
    )(*inputs)


# ----------------------------------------------------------------------------
# Fused head: avgpool + projection_MLP (2x Linear+BN) + view-concat + fc (2x
# Linear) in ONE kernel.
# ----------------------------------------------------------------------------
def _head_kernel(x_ref, w1_ref, b1_ref, g1_ref, be1_ref,
                 w2_ref, b2_ref, g2_ref, be2_ref,
                 w3a_ref, w3b_ref, b3_ref, w4_ref, b4_ref, o_ref):
    # adaptive avg-pool (1,1): (2B, HW, C) -> (2B, C)
    x = jnp.mean(x_ref[...], axis=1)
    # projection layer 1: Linear + BN (per view) + ReLU
    z = jnp.dot(x, w1_ref[...], preferred_element_type=jnp.float32) + b1_ref[...]
    z = _group_batchnorm(z, g1_ref[...], be1_ref[...], 2)
    z = jnp.maximum(z, 0.0)
    # projection layer 2: Linear + BN (per view)
    z = jnp.dot(z, w2_ref[...], preferred_element_type=jnp.float32) + b2_ref[...]
    z = _group_batchnorm(z, g2_ref[...], be2_ref[...], 2)
    # cross-view concat realised as split-weight matmul:
    #   h[i] = z1[i] @ W_top + z2[i] @ W_bot.  Rows of the other view are
    #   brought in line via a tiny permutation matmul (no unaligned slicing).
    m = z.shape[0]
    half = m // 2
    row = lax.broadcasted_iota(jnp.int32, (m, m), 0)
    col = lax.broadcasted_iota(jnp.int32, (m, m), 1)
    perm = jnp.logical_or(col == row + half, col + half == row).astype(jnp.float32)
    z_swap = jnp.dot(perm, z, preferred_element_type=jnp.float32)  # z[(i+half)%m]
    h = (jnp.dot(z, w3a_ref[...], preferred_element_type=jnp.float32)
         + jnp.dot(z_swap, w3b_ref[...], preferred_element_type=jnp.float32)
         + b3_ref[...])
    y = jnp.dot(h, w4_ref[...], preferred_element_type=jnp.float32) + b4_ref[...]
    o_ref[...] = y[:half, :]       # rows [0:half] are the valid (view1,view2) rows


def head_fwd(x_feat, P):
    n, h, w, c = x_feat.shape
    half_in = P["fc1_w"].shape[0] // 2
    args = [
        x_feat.reshape(n, h * w, c).astype(jnp.float32),
        P["proj1_w"].astype(jnp.float32),
        P["proj1_b"].astype(jnp.float32).reshape(1, -1),
        P["proj_bn1_g"].astype(jnp.float32).reshape(1, -1),
        P["proj_bn1_b"].astype(jnp.float32).reshape(1, -1),
        P["proj2_w"].astype(jnp.float32),
        P["proj2_b"].astype(jnp.float32).reshape(1, -1),
        P["proj_bn2_g"].astype(jnp.float32).reshape(1, -1),
        P["proj_bn2_b"].astype(jnp.float32).reshape(1, -1),
        P["fc1_w"][:half_in].astype(jnp.float32),        # multiplies view-1 features
        P["fc1_w"][half_in:].astype(jnp.float32),        # multiplies view-2 features
        P["fc1_b"].astype(jnp.float32).reshape(1, -1),
        P["fc2_w"].astype(jnp.float32),
        P["fc2_b"].astype(jnp.float32).reshape(1, -1),
    ]
    return pl.pallas_call(
        _head_kernel,
        out_shape=jax.ShapeDtypeStruct((n // 2, P["fc2_w"].shape[-1]), jnp.float32),
        in_specs=[pl.BlockSpec(memory_space=pltpu.MemorySpace.VMEM)] * len(args),
        out_specs=pl.BlockSpec(memory_space=pltpu.MemorySpace.VMEM),
    )(*args)


# ----------------------------------------------------------------------------
# Conv layers (im2col glue + one fused Pallas call each)
# ----------------------------------------------------------------------------
def conv3x3_bn(x, w, gamma, beta, *, stride, relu, residual=None,
               residual_proj=None, n_views=2):
    """3x3 conv (pad 1, no bias) -> BN -> [+residual] -> [ReLU].  NHWC."""
    n, h, wd, c = x.shape
    oc = w.shape[-1]
    oh = (h + 2 - 3) // stride + 1
    ow = (wd + 2 - 3) // stride + 1
    xp = jnp.pad(x, ((0, 0), (1, 1), (1, 1), (0, 0)))
    taps = [xp[:, kh:kh + stride * (oh - 1) + 1:stride,
                  kw:kw + stride * (ow - 1) + 1:stride, :]
            for kh in range(3) for kw in range(3)]
    patches = jnp.stack(taps, axis=3).reshape(n * oh * ow, 9 * c)   # (kh,kw,c)
    wm = w.reshape(9 * c, oc)                                       # same order
    out = fused_matmul(patches, wm, bn=(gamma, beta), relu=relu,
                       residual=residual, residual_proj=residual_proj,
                       n_views=n_views)
    return out.reshape(n, oh, ow, oc)


# ----------------------------------------------------------------------------
# Model: CustomResNet(BasicBlock, [2,2,...]) -> projection_MLP -> fc
# ----------------------------------------------------------------------------
def basic_block_fwd(x, p, stride, n_views):
    out = conv3x3_bn(x, p["conv1_w"], p["bn1_g"], p["bn1_b"],
                     stride=stride, relu=True, n_views=n_views)
    n, oh, ow, oc = out.shape
    if "down_w" in p:
        # downsample branch (1x1 conv stride=s + BN) fused into conv2's kernel
        xs = x[:, ::stride, ::stride, :]
        rp = (xs.reshape(n * oh * ow, xs.shape[-1]),
              p["down_w"], p["dbn_g"], p["dbn_b"])
        out = conv3x3_bn(out, p["conv2_w"], p["bn2_g"], p["bn2_b"],
                         stride=1, relu=True, residual_proj=rp, n_views=n_views)
    else:
        out = conv3x3_bn(out, p["conv2_w"], p["bn2_g"], p["bn2_b"],
                         stride=1, relu=True,
                         residual=x.reshape(n * oh * ow, oc), n_views=n_views)
    return out


def cdnet_forward(x1, x2, P):
    # Both views through the shared encoder in ONE pass (per-view BN inside).
    x = jnp.concatenate([x1, x2], axis=0)                         # (2B,1,H,W)
    x = jnp.transpose(x, (0, 2, 3, 1)).astype(jnp.float32)        # NCHW -> NHWC
    # layer0: conv3x3(1->64, s=2) + BN + ReLU (one fused call)
    x = conv3x3_bn(x, P["l0_conv_w"], P["l0_bn_g"], P["l0_bn_b"],
                   stride=2, relu=True, n_views=2)
    # layer1 (64, 2 blocks, stride 2) / layer2 (128, 2 blocks, stride 2)
    x = basic_block_fwd(x, P["l1b0"], 2, 2)
    x = basic_block_fwd(x, P["l1b1"], 1, 2)
    x = basic_block_fwd(x, P["l2b0"], 2, 2)
    x = basic_block_fwd(x, P["l2b1"], 1, 2)
    # avgpool + projection_MLP + cross-view concat + fc head: one fused call
    return head_fwd(x, P)                                          # (B, 2)


# ----------------------------------------------------------------------------
# Deterministic parameter initialization (matches PyTorch init schemes)
# ----------------------------------------------------------------------------
def _conv_init(key, kh, kw, ic, oc):
    fan_out = oc * kh * kw
    std = (2.0 / fan_out) ** 0.5          # kaiming_normal_ fan_out / relu
    return jax.random.normal(key, (kh, kw, ic, oc), jnp.float32) * std


def _linear_init(key, in_dim, out_dim):
    k1, k2 = jax.random.split(key)
    bound = (1.0 / in_dim) ** 0.5
    w = jax.random.uniform(k1, (in_dim, out_dim), jnp.float32, -bound, bound)
    b = jax.random.uniform(k2, (out_dim,), jnp.float32, -bound, bound)
    return w, b


def _bn_init(c):
    return jnp.ones((c,), jnp.float32), jnp.zeros((c,), jnp.float32)


def _basic_block_params(key, inplanes, planes, downsample):
    ks = jax.random.split(key, 3)
    p = {"conv1_w": _conv_init(ks[0], 3, 3, inplanes, planes),
         "conv2_w": _conv_init(ks[1], 3, 3, planes, planes)}
    p["bn1_g"], p["bn1_b"] = _bn_init(planes)
    p["bn2_g"], p["bn2_b"] = _bn_init(planes)
    if downsample:
        p["down_w"] = _conv_init(ks[2], 1, 1, inplanes, planes).reshape(inplanes, planes)
        p["dbn_g"], p["dbn_b"] = _bn_init(planes)
    return p


def make_params(key):
    ks = jax.random.split(key, 12)
    P = {}
    P["l0_conv_w"] = _conv_init(ks[0], 3, 3, 1, 64)
    P["l0_bn_g"], P["l0_bn_b"] = _bn_init(64)
    P["l1b0"] = _basic_block_params(ks[1], 64, 64, downsample=True)   # stride 2
    P["l1b1"] = _basic_block_params(ks[2], 64, 64, downsample=False)
    P["l2b0"] = _basic_block_params(ks[3], 64, 128, downsample=True)  # stride 2
    P["l2b1"] = _basic_block_params(ks[4], 128, 128, downsample=False)
    P["proj1_w"], P["proj1_b"] = _linear_init(ks[5], 128, 512)
    P["proj_bn1_g"], P["proj_bn1_b"] = _bn_init(512)
    P["proj2_w"], P["proj2_b"] = _linear_init(ks[6], 512, 512)
    P["proj_bn2_g"], P["proj_bn2_b"] = _bn_init(512)
    P["fc1_w"], P["fc1_b"] = _linear_init(ks[7], 1024, 128)
    P["fc2_w"], P["fc2_b"] = _linear_init(ks[8], 128, 2)
    return P


# ----------------------------------------------------------------------------
if __name__ == "__main__":
    key = jax.random.PRNGKey(0)
    kp, k1, k2 = jax.random.split(key, 3)
    params = make_params(kp)

    # Two views, NCHW like the PyTorch module: (batch=2, channels=1, 16, 16)
    x1 = jax.random.normal(k1, (2, 1, 16, 16), jnp.float32)
    x2 = jax.random.normal(k2, (2, 1, 16, 16), jnp.float32)

    fwd = jax.jit(functools.partial(cdnet_forward, P=params))
    out = fwd(x1, x2)
    jax.block_until_ready(out)
    assert out.shape == (2, 2) and out.dtype == jnp.float32
    print("KERNEL_OK")
</pallas_src>

<mosaic_0001>
module attributes {stable_mosaic.version = 11 : i64} {
  func.func @kernel(%arg0: memref<256x9xf32, #tpu.memory_space<vmem>>, %arg1: memref<9x64xf32, #tpu.memory_space<vmem>>, %arg2: memref<1x64xf32, #tpu.memory_space<vmem>>, %arg3: memref<1x64xf32, #tpu.memory_space<vmem>>, %arg4: memref<256x64xf32, #tpu.memory_space<vmem>>) attributes {dimension_semantics = [], scalar_prefetch = 0 : i64, scratch_operands = 0 : i64, tpu.core_type = #tpu.core_type<tc>} {
    %c0 = arith.constant 0 : index
    %c0_0 = arith.constant 0 : index
    %0 = vector.load %arg0[%c0, %c0_0] : memref<256x9xf32, #tpu.memory_space<vmem>>, vector<256x9xf32>
    %c0_1 = arith.constant 0 : index
    %c0_2 = arith.constant 0 : index
    %1 = vector.load %arg1[%c0_1, %c0_2] : memref<9x64xf32, #tpu.memory_space<vmem>>, vector<9x64xf32>
    %cst = arith.constant dense<0.000000e+00> : vector<256x64xf32>
    %2 = tpu.matmul %0, %1, %cst {dimension_numbers = #tpu.dot_dimension_numbers<[1], [0], [0], [1], [0, 0, 1, 1], [], []>} : vector<256x9xf32>, vector<9x64xf32>, vector<256x64xf32> -> vector<256x64xf32>
    %c0_3 = arith.constant 0 : index
    %c0_4 = arith.constant 0 : index
    %3 = vector.load %arg2[%c0_3, %c0_4] : memref<1x64xf32, #tpu.memory_space<vmem>>, vector<1x64xf32>
    %c0_5 = arith.constant 0 : index
    %c0_6 = arith.constant 0 : index
    %4 = vector.load %arg3[%c0_5, %c0_6] : memref<1x64xf32, #tpu.memory_space<vmem>>, vector<1x64xf32>
    %5 = tpu.iota {dimensions = array<i32: 0>} : vector<256x1xi32>
    %c128_i32 = arith.constant 128 : i32
    %6 = vector.broadcast %c128_i32 : i32 to vector<256x1xi32>
    %7 = arith.cmpi slt, %5, %6 : vector<256x1xi32>
    %8 = arith.extui %7 : vector<256x1xi1> to vector<256x1xi32>
    %9 = arith.sitofp %8 : vector<256x1xi32> to vector<256x1xf32>
    %10 = vector.broadcast %9 : vector<256x1xf32> to vector<256x64xf32>
    %11 = arith.mulf %2, %10 : vector<256x64xf32>
    %cst_7 = arith.constant dense<0.000000e+00> : vector<64xf32>
    %12 = vector.multi_reduction <add>, %11, %cst_7 [0] : vector<256x64xf32> to vector<64xf32>
    %13 = vector.shape_cast %12 : vector<64xf32> to vector<1x64xf32>
    %14 = arith.mulf %2, %2 : vector<256x64xf32>
    %15 = vector.broadcast %9 : vector<256x1xf32> to vector<256x64xf32>
    %16 = arith.mulf %14, %15 : vector<256x64xf32>
    %cst_8 = arith.constant dense<0.000000e+00> : vector<64xf32>
    %17 = vector.multi_reduction <add>, %16, %cst_8 [0] : vector<256x64xf32> to vector<64xf32>
    %18 = vector.shape_cast %17 : vector<64xf32> to vector<1x64xf32>
    %cst_9 = arith.constant dense<0.000000e+00> : vector<64xf32>
    %19 = vector.multi_reduction <add>, %2, %cst_9 [0] : vector<256x64xf32> to vector<64xf32>
    %20 = vector.shape_cast %19 : vector<64xf32> to vector<1x64xf32>
    %21 = arith.mulf %2, %2 : vector<256x64xf32>
    %cst_10 = arith.constant dense<0.000000e+00> : vector<64xf32>
    %22 = vector.multi_reduction <add>, %21, %cst_10 [0] : vector<256x64xf32> to vector<64xf32>
    %23 = vector.shape_cast %22 : vector<64xf32> to vector<1x64xf32>
    %cst_11 = arith.constant 7.812500e-03 : f32
    %24 = vector.broadcast %cst_11 : f32 to vector<1x64xf32>
    %25 = arith.mulf %13, %24 : vector<1x64xf32>
    %26 = arith.subf %20, %13 : vector<1x64xf32>
    %cst_12 = arith.constant 7.812500e-03 : f32
    %27 = vector.broadcast %cst_12 : f32 to vector<1x64xf32>
    %28 = arith.mulf %26, %27 : vector<1x64xf32>
    %cst_13 = arith.constant 7.812500e-03 : f32
    %29 = vector.broadcast %cst_13 : f32 to vector<1x64xf32>
    %30 = arith.mulf %18, %29 : vector<1x64xf32>
    %31 = arith.mulf %25, %25 : vector<1x64xf32>
    %32 = arith.subf %30, %31 : vector<1x64xf32>
    %33 = arith.subf %23, %18 : vector<1x64xf32>
    %cst_14 = arith.constant 7.812500e-03 : f32
    %34 = vector.broadcast %cst_14 : f32 to vector<1x64xf32>
    %35 = arith.mulf %33, %34 : vector<1x64xf32>
    %36 = arith.mulf %28, %28 : vector<1x64xf32>
    %37 = arith.subf %35, %36 : vector<1x64xf32>
    %38 = vector.broadcast %9 : vector<256x1xf32> to vector<256x64xf32>
    %39 = vector.broadcast %25 : vector<1x64xf32> to vector<256x64xf32>
    %40 = arith.mulf %38, %39 : vector<256x64xf32>
    %cst_15 = arith.constant 1.000000e+00 : f32
    %41 = vector.broadcast %cst_15 : f32 to vector<256x1xf32>
    %42 = arith.subf %41, %9 : vector<256x1xf32>
    %43 = vector.broadcast %42 : vector<256x1xf32> to vector<256x64xf32>
    %44 = vector.broadcast %28 : vector<1x64xf32> to vector<256x64xf32>
    %45 = arith.mulf %43, %44 : vector<256x64xf32>
    %46 = arith.addf %40, %45 : vector<256x64xf32>
    %47 = vector.broadcast %9 : vector<256x1xf32> to vector<256x64xf32>
    %48 = vector.broadcast %32 : vector<1x64xf32> to vector<256x64xf32>
    %49 = arith.mulf %47, %48 : vector<256x64xf32>
    %cst_16 = arith.constant 1.000000e+00 : f32
    %50 = vector.broadcast %cst_16 : f32 to vector<256x1xf32>
    %51 = arith.subf %50, %9 : vector<256x1xf32>
    %52 = vector.broadcast %51 : vector<256x1xf32> to vector<256x64xf32>
    %53 = vector.broadcast %37 : vector<1x64xf32> to vector<256x64xf32>
    %54 = arith.mulf %52, %53 : vector<256x64xf32>
    %55 = arith.addf %49, %54 : vector<256x64xf32>
    %cst_17 = arith.constant 0.000000e+00 : f32
    %56 = vector.broadcast %cst_17 : f32 to vector<256x64xf32>
    %57 = arith.maximumf %55, %56 : vector<256x64xf32>
    %58 = arith.subf %2, %46 : vector<256x64xf32>
    %cst_18 = arith.constant 9.99999974E-6 : f32
    %59 = vector.broadcast %cst_18 : f32 to vector<256x64xf32>
    %60 = arith.addf %57, %59 : vector<256x64xf32>
    %61 = math.rsqrt %60 : vector<256x64xf32>
    %62 = arith.mulf %58, %61 : vector<256x64xf32>
    %63 = vector.broadcast %3 : vector<1x64xf32> to vector<256x64xf32>
    %64 = arith.mulf %62, %63 : vector<256x64xf32>
    %65 = vector.broadcast %4 : vector<1x64xf32> to vector<256x64xf32>
    %66 = arith.addf %64, %65 : vector<256x64xf32>
    %cst_19 = arith.constant 0.000000e+00 : f32
    %67 = vector.broadcast %cst_19 : f32 to vector<256x64xf32>
    %68 = arith.maximumf %66, %67 : vector<256x64xf32>
    %c0_20 = arith.constant 0 : index
    %c0_21 = arith.constant 0 : index
    %69 = vector.load %arg4[%c0_20, %c0_21] : memref<256x64xf32, #tpu.memory_space<vmem>>, vector<256x64xf32>
    tpu.vector_store %arg4[%c0_20, %c0_21], %68 {strides = array<i32>} : memref<256x64xf32, #tpu.memory_space<vmem>>, vector<256x64xf32>,
    return
  }
}

module attributes {stable_mosaic.version = 11 : i64} {
  func.func @kernel(%arg0: memref<64x576xf32, #tpu.memory_space<vmem>>, %arg1: memref<576x64xf32, #tpu.memory_space<vmem>>, %arg2: memref<1x64xf32, #tpu.memory_space<vmem>>, %arg3: memref<1x64xf32, #tpu.memory_space<vmem>>, %arg4: memref<64x64xf32, #tpu.memory_space<vmem>>) attributes {dimension_semantics = [], scalar_prefetch = 0 : i64, scratch_operands = 0 : i64, tpu.core_type = #tpu.core_type<tc>} {
    %c0 = arith.constant 0 : index
    %c0_0 = arith.constant 0 : index
    %0 = vector.load %arg0[%c0, %c0_0] : memref<64x576xf32, #tpu.memory_space<vmem>>, vector<64x576xf32>
    %c0_1 = arith.constant 0 : index
    %c0_2 = arith.constant 0 : index
    %1 = vector.load %arg1[%c0_1, %c0_2] : memref<576x64xf32, #tpu.memory_space<vmem>>, vector<576x64xf32>
    %cst = arith.constant dense<0.000000e+00> : vector<64x64xf32>
    %2 = tpu.matmul %0, %1, %cst {dimension_numbers = #tpu.dot_dimension_numbers<[1], [0], [0], [1], [0, 0, 1, 1], [], []>} : vector<64x576xf32>, vector<576x64xf32>, vector<64x64xf32> -> vector<64x64xf32>
    %c0_3 = arith.constant 0 : index
    %c0_4 = arith.constant 0 : index
    %3 = vector.load %arg2[%c0_3, %c0_4] : memref<1x64xf32, #tpu.memory_space<vmem>>, vector<1x64xf32>
    %c0_5 = arith.constant 0 : index
    %c0_6 = arith.constant 0 : index
    %4 = vector.load %arg3[%c0_5, %c0_6] : memref<1x64xf32, #tpu.memory_space<vmem>>, vector<1x64xf32>
    %5 = tpu.iota {dimensions = array<i32: 0>} : vector<64x1xi32>
    %c32_i32 = arith.constant 32 : i32
    %6 = vector.broadcast %c32_i32 : i32 to vector<64x1xi32>
    %7 = arith.cmpi slt, %5, %6 : vector<64x1xi32>
    %8 = arith.extui %7 : vector<64x1xi1> to vector<64x1xi32>
    %9 = arith.sitofp %8 : vector<64x1xi32> to vector<64x1xf32>
    %10 = vector.broadcast %9 : vector<64x1xf32> to vector<64x64xf32>
    %11 = arith.mulf %2, %10 : vector<64x64xf32>
    %cst_7 = arith.constant dense<0.000000e+00> : vector<64xf32>
    %12 = vector.multi_reduction <add>, %11, %cst_7 [0] : vector<64x64xf32> to vector<64xf32>
    %13 = vector.shape_cast %12 : vector<64xf32> to vector<1x64xf32>
    %14 = arith.mulf %2, %2 : vector<64x64xf32>
    %15 = vector.broadcast %9 : vector<64x1xf32> to vector<64x64xf32>
    %16 = arith.mulf %14, %15 : vector<64x64xf32>
    %cst_8 = arith.constant dense<0.000000e+00> : vector<64xf32>
    %17 = vector.multi_reduction <add>, %16, %cst_8 [0] : vector<64x64xf32> to vector<64xf32>
    %18 = vector.shape_cast %17 : vector<64xf32> to vector<1x64xf32>
    %cst_9 = arith.constant dense<0.000000e+00> : vector<64xf32>
    %19 = vector.multi_reduction <add>, %2, %cst_9 [0] : vector<64x64xf32> to vector<64xf32>
    %20 = vector.shape_cast %19 : vector<64xf32> to vector<1x64xf32>
    %21 = arith.mulf %2, %2 : vector<64x64xf32>
    %cst_10 = arith.constant dense<0.000000e+00> : vector<64xf32>
    %22 = vector.multi_reduction <add>, %21, %cst_10 [0] : vector<64x64xf32> to vector<64xf32>
    %23 = vector.shape_cast %22 : vector<64xf32> to vector<1x64xf32>
    %cst_11 = arith.constant 3.125000e-02 : f32
    %24 = vector.broadcast %cst_11 : f32 to vector<1x64xf32>
    %25 = arith.mulf %13, %24 : vector<1x64xf32>
    %26 = arith.subf %20, %13 : vector<1x64xf32>
    %cst_12 = arith.constant 3.125000e-02 : f32
    %27 = vector.broadcast %cst_12 : f32 to vector<1x64xf32>
    %28 = arith.mulf %26, %27 : vector<1x64xf32>
    %cst_13 = arith.constant 3.125000e-02 : f32
    %29 = vector.broadcast %cst_13 : f32 to vector<1x64xf32>
    %30 = arith.mulf %18, %29 : vector<1x64xf32>
    %31 = arith.mulf %25, %25 : vector<1x64xf32>
    %32 = arith.subf %30, %31 : vector<1x64xf32>
    %33 = arith.subf %23, %18 : vector<1x64xf32>
    %cst_14 = arith.constant 3.125000e-02 : f32
    %34 = vector.broadcast %cst_14 : f32 to vector<1x64xf32>
    %35 = arith.mulf %33, %34 : vector<1x64xf32>
    %36 = arith.mulf %28, %28 : vector<1x64xf32>
    %37 = arith.subf %35, %36 : vector<1x64xf32>
    %38 = vector.broadcast %9 : vector<64x1xf32> to vector<64x64xf32>
    %39 = vector.broadcast %25 : vector<1x64xf32> to vector<64x64xf32>
    %40 = arith.mulf %38, %39 : vector<64x64xf32>
    %cst_15 = arith.constant 1.000000e+00 : f32
    %41 = vector.broadcast %cst_15 : f32 to vector<64x1xf32>
    %42 = arith.subf %41, %9 : vector<64x1xf32>
    %43 = vector.broadcast %42 : vector<64x1xf32> to vector<64x64xf32>
    %44 = vector.broadcast %28 : vector<1x64xf32> to vector<64x64xf32>
    %45 = arith.mulf %43, %44 : vector<64x64xf32>
    %46 = arith.addf %40, %45 : vector<64x64xf32>
    %47 = vector.broadcast %9 : vector<64x1xf32> to vector<64x64xf32>
    %48 = vector.broadcast %32 : vector<1x64xf32> to vector<64x64xf32>
    %49 = arith.mulf %47, %48 : vector<64x64xf32>
    %cst_16 = arith.constant 1.000000e+00 : f32
    %50 = vector.broadcast %cst_16 : f32 to vector<64x1xf32>
    %51 = arith.subf %50, %9 : vector<64x1xf32>
    %52 = vector.broadcast %51 : vector<64x1xf32> to vector<64x64xf32>
    %53 = vector.broadcast %37 : vector<1x64xf32> to vector<64x64xf32>
    %54 = arith.mulf %52, %53 : vector<64x64xf32>
    %55 = arith.addf %49, %54 : vector<64x64xf32>
    %cst_17 = arith.constant 0.000000e+00 : f32
    %56 = vector.broadcast %cst_17 : f32 to vector<64x64xf32>
    %57 = arith.maximumf %55, %56 : vector<64x64xf32>
    %58 = arith.subf %2, %46 : vector<64x64xf32>
    %cst_18 = arith.constant 9.99999974E-6 : f32
    %59 = vector.broadcast %cst_18 : f32 to vector<64x64xf32>
    %60 = arith.addf %57, %59 : vector<64x64xf32>
    %61 = math.rsqrt %60 : vector<64x64xf32>
    %62 = arith.mulf %58, %61 : vector<64x64xf32>
    %63 = vector.broadcast %3 : vector<1x64xf32> to vector<64x64xf32>
    %64 = arith.mulf %62, %63 : vector<64x64xf32>
    %65 = vector.broadcast %4 : vector<1x64xf32> to vector<64x64xf32>
    %66 = arith.addf %64, %65 : vector<64x64xf32>
    %cst_19 = arith.constant 0.000000e+00 : f32
    %67 = vector.broadcast %cst_19 : f32 to vector<64x64xf32>
    %68 = arith.maximumf %66, %67 : vector<64x64xf32>
    %c0_20 = arith.constant 0 : index
    %c0_21 = arith.constant 0 : index
    %69 = vector.load %arg4[%c0_20, %c0_21] : memref<64x64xf32, #tpu.memory_space<vmem>>, vector<64x64xf32>
    tpu.vector_store %arg4[%c0_20, %c0_21], %68 {strides = array<i32>} : memref<64x64xf32, #tpu.memory_space<vmem>>, vector<64x64xf32>,
    return
  }
}

module attributes {stable_mosaic.version = 11 : i64} {
  func.func @kernel(%arg0: memref<64x576xf32, #tpu.memory_space<vmem>>, %arg1: memref<576x64xf32, #tpu.memory_space<vmem>>, %arg2: memref<1x64xf32, #tpu.memory_space<vmem>>, %arg3: memref<1x64xf32, #tpu.memory_space<vmem>>, %arg4: memref<64x64xf32, #tpu.memory_space<vmem>>, %arg5: memref<64x64xf32, #tpu.memory_space<vmem>>, %arg6: memref<1x64xf32, #tpu.memory_space<vmem>>, %arg7: memref<1x64xf32, #tpu.memory_space<vmem>>, %arg8: memref<64x64xf32, #tpu.memory_space<vmem>>) attributes {dimension_semantics = [], scalar_prefetch = 0 : i64, scratch_operands = 0 : i64, tpu.core_type = #tpu.core_type<tc>} {
    %c0 = arith.constant 0 : index
    %c0_0 = arith.constant 0 : index
    %0 = vector.load %arg0[%c0, %c0_0] : memref<64x576xf32, #tpu.memory_space<vmem>>, vector<64x576xf32>
    %c0_1 = arith.constant 0 : index
    %c0_2 = arith.constant 0 : index
    %1 = vector.load %arg1[%c0_1, %c0_2] : memref<576x64xf32, #tpu.memory_space<vmem>>, vector<576x64xf32>
    %cst = arith.constant dense<0.000000e+00> : vector<64x64xf32>
    %2 = tpu.matmul %0, %1, %cst {dimension_numbers = #tpu.dot_dimension_numbers<[1], [0], [0], [1], [0, 0, 1, 1], [], []>} : vector<64x576xf32>, vector<576x64xf32>, vector<64x64xf32> -> vector<64x64xf32>
    %c0_3 = arith.constant 0 : index
    %c0_4 = arith.constant 0 : index
    %3 = vector.load %arg2[%c0_3, %c0_4] : memref<1x64xf32, #tpu.memory_space<vmem>>, vector<1x64xf32>
    %c0_5 = arith.constant 0 : index
    %c0_6 = arith.constant 0 : index
    %4 = vector.load %arg3[%c0_5, %c0_6] : memref<1x64xf32, #tpu.memory_space<vmem>>, vector<1x64xf32>
    %5 = tpu.iota {dimensions = array<i32: 0>} : vector<64x1xi32>
    %c32_i32 = arith.constant 32 : i32
    %6 = vector.broadcast %c32_i32 : i32 to vector<64x1xi32>
    %7 = arith.cmpi slt, %5, %6 : vector<64x1xi32>
    %8 = arith.extui %7 : vector<64x1xi1> to vector<64x1xi32>
    %9 = arith.sitofp %8 : vector<64x1xi32> to vector<64x1xf32>
    %10 = vector.broadcast %9 : vector<64x1xf32> to vector<64x64xf32>
    %11 = arith.mulf %2, %10 : vector<64x64xf32>
    %cst_7 = arith.constant dense<0.000000e+00> : vector<64xf32>
    %12 = vector.multi_reduction <add>, %11, %cst_7 [0] : vector<64x64xf32> to vector<64xf32>
    %13 = vector.shape_cast %12 : vector<64xf32> to vector<1x64xf32>
    %14 = arith.mulf %2, %2 : vector<64x64xf32>
    %15 = vector.broadcast %9 : vector<64x1xf32> to vector<64x64xf32>
    %16 = arith.mulf %14, %15 : vector<64x64xf32>
    %cst_8 = arith.constant dense<0.000000e+00> : vector<64xf32>
    %17 = vector.multi_reduction <add>, %16, %cst_8 [0] : vector<64x64xf32> to vector<64xf32>
    %18 = vector.shape_cast %17 : vector<64xf32> to vector<1x64xf32>
    %cst_9 = arith.constant dense<0.000000e+00> : vector<64xf32>
    %19 = vector.multi_reduction <add>, %2, %cst_9 [0] : vector<64x64xf32> to vector<64xf32>
    %20 = vector.shape_cast %19 : vector<64xf32> to vector<1x64xf32>
    %21 = arith.mulf %2, %2 : vector<64x64xf32>
    %cst_10 = arith.constant dense<0.000000e+00> : vector<64xf32>
    %22 = vector.multi_reduction <add>, %21, %cst_10 [0] : vector<64x64xf32> to vector<64xf32>
    %23 = vector.shape_cast %22 : vector<64xf32> to vector<1x64xf32>
    %cst_11 = arith.constant 3.125000e-02 : f32
    %24 = vector.broadcast %cst_11 : f32 to vector<1x64xf32>
    %25 = arith.mulf %13, %24 : vector<1x64xf32>
    %26 = arith.subf %20, %13 : vector<1x64xf32>
    %cst_12 = arith.constant 3.125000e-02 : f32
    %27 = vector.broadcast %cst_12 : f32 to vector<1x64xf32>
    %28 = arith.mulf %26, %27 : vector<1x64xf32>
    %cst_13 = arith.constant 3.125000e-02 : f32
    %29 = vector.broadcast %cst_13 : f32 to vector<1x64xf32>
    %30 = arith.mulf %18, %29 : vector<1x64xf32>
    %31 = arith.mulf %25, %25 : vector<1x64xf32>
    %32 = arith.subf %30, %31 : vector<1x64xf32>
    %33 = arith.subf %23, %18 : vector<1x64xf32>
    %cst_14 = arith.constant 3.125000e-02 : f32
    %34 = vector.broadcast %cst_14 : f32 to vector<1x64xf32>
    %35 = arith.mulf %33, %34 : vector<1x64xf32>
    %36 = arith.mulf %28, %28 : vector<1x64xf32>
    %37 = arith.subf %35, %36 : vector<1x64xf32>
    %38 = vector.broadcast %9 : vector<64x1xf32> to vector<64x64xf32>
    %39 = vector.broadcast %25 : vector<1x64xf32> to vector<64x64xf32>
    %40 = arith.mulf %38, %39 : vector<64x64xf32>
    %cst_15 = arith.constant 1.000000e+00 : f32
    %41 = vector.broadcast %cst_15 : f32 to vector<64x1xf32>
    %42 = arith.subf %41, %9 : vector<64x1xf32>
    %43 = vector.broadcast %42 : vector<64x1xf32> to vector<64x64xf32>
    %44 = vector.broadcast %28 : vector<1x64xf32> to vector<64x64xf32>
    %45 = arith.mulf %43, %44 : vector<64x64xf32>
    %46 = arith.addf %40, %45 : vector<64x64xf32>
    %47 = vector.broadcast %9 : vector<64x1xf32> to vector<64x64xf32>
    %48 = vector.broadcast %32 : vector<1x64xf32> to vector<64x64xf32>
    %49 = arith.mulf %47, %48 : vector<64x64xf32>
    %cst_16 = arith.constant 1.000000e+00 : f32
    %50 = vector.broadcast %cst_16 : f32 to vector<64x1xf32>
    %51 = arith.subf %50, %9 : vector<64x1xf32>
    %52 = vector.broadcast %51 : vector<64x1xf32> to vector<64x64xf32>
    %53 = vector.broadcast %37 : vector<1x64xf32> to vector<64x64xf32>
    %54 = arith.mulf %52, %53 : vector<64x64xf32>
    %55 = arith.addf %49, %54 : vector<64x64xf32>
    %cst_17 = arith.constant 0.000000e+00 : f32
    %56 = vector.broadcast %cst_17 : f32 to vector<64x64xf32>
    %57 = arith.maximumf %55, %56 : vector<64x64xf32>
    %58 = arith.subf %2, %46 : vector<64x64xf32>
    %cst_18 = arith.constant 9.99999974E-6 : f32
    %59 = vector.broadcast %cst_18 : f32 to vector<64x64xf32>
    %60 = arith.addf %57, %59 : vector<64x64xf32>
    %61 = math.rsqrt %60 : vector<64x64xf32>
    %62 = arith.mulf %58, %61 : vector<64x64xf32>
    %63 = vector.broadcast %3 : vector<1x64xf32> to vector<64x64xf32>
    %64 = arith.mulf %62, %63 : vector<64x64xf32>
    %65 = vector.broadcast %4 : vector<1x64xf32> to vector<64x64xf32>
    %66 = arith.addf %64, %65 : vector<64x64xf32>
    %c0_19 = arith.constant 0 : index
    %c0_20 = arith.constant 0 : index
    %67 = vector.load %arg4[%c0_19, %c0_20] : memref<64x64xf32, #tpu.memory_space<vmem>>, vector<64x64xf32>
    %c0_21 = arith.constant 0 : index
    %c0_22 = arith.constant 0 : index
    %68 = vector.load %arg5[%c0_21, %c0_22] : memref<64x64xf32, #tpu.memory_space<vmem>>, vector<64x64xf32>
    %cst_23 = arith.constant dense<0.000000e+00> : vector<64x64xf32>
    %69 = tpu.matmul %67, %68, %cst_23 {dimension_numbers = #tpu.dot_dimension_numbers<[1], [0], [0], [1], [0, 0, 1, 1], [], []>} : vector<64x64xf32>, vector<64x64xf32>, vector<64x64xf32> -> vector<64x64xf32>
    %c0_24 = arith.constant 0 : index
    %c0_25 = arith.constant 0 : index
    %70 = vector.load %arg6[%c0_24, %c0_25] : memref<1x64xf32, #tpu.memory_space<vmem>>, vector<1x64xf32>
    %c0_26 = arith.constant 0 : index
    %c0_27 = arith.constant 0 : index
    %71 = vector.load %arg7[%c0_26, %c0_27] : memref<1x64xf32, #tpu.memory_space<vmem>>, vector<1x64xf32>
    %72 = tpu.iota {dimensions = array<i32: 0>} : vector<64x1xi32>
    %c32_i32_28 = arith.constant 32 : i32
    %73 = vector.broadcast %c32_i32_28 : i32 to vector<64x1xi32>
    %74 = arith.cmpi slt, %72, %73 : vector<64x1xi32>
    %75 = arith.extui %74 : vector<64x1xi1> to vector<64x1xi32>
    %76 = arith.sitofp %75 : vector<64x1xi32> to vector<64x1xf32>
    %77 = vector.broadcast %76 : vector<64x1xf32> to vector<64x64xf32>
    %78 = arith.mulf %69, %77 : vector<64x64xf32>
    %cst_29 = arith.constant dense<0.000000e+00> : vector<64xf32>
    %79 = vector.multi_reduction <add>, %78, %cst_29 [0] : vector<64x64xf32> to vector<64xf32>
    %80 = vector.shape_cast %79 : vector<64xf32> to vector<1x64xf32>
    %81 = arith.mulf %69, %69 : vector<64x64xf32>
    %82 = vector.broadcast %76 : vector<64x1xf32> to vector<64x64xf32>
    %83 = arith.mulf %81, %82 : vector<64x64xf32>
    %cst_30 = arith.constant dense<0.000000e+00> : vector<64xf32>
    %84 = vector.multi_reduction <add>, %83, %cst_30 [0] : vector<64x64xf32> to vector<64xf32>
    %85 = vector.shape_cast %84 : vector<64xf32> to vector<1x64xf32>
    %cst_31 = arith.constant dense<0.000000e+00> : vector<64xf32>
    %86 = vector.multi_reduction <add>, %69, %cst_31 [0] : vector<64x64xf32> to vector<64xf32>
    %87 = vector.shape_cast %86 : vector<64xf32> to vector<1x64xf32>
    %88 = arith.mulf %69, %69 : vector<64x64xf32>
    %cst_32 = arith.constant dense<0.000000e+00> : vector<64xf32>
    %89 = vector.multi_reduction <add>, %88, %cst_32 [0] : vector<64x64xf32> to vector<64xf32>
    %90 = vector.shape_cast %89 : vector<64xf32> to vector<1x64xf32>
    %cst_33 = arith.constant 3.125000e-02 : f32
    %91 = vector.broadcast %cst_33 : f32 to vector<1x64xf32>
    %92 = arith.mulf %80, %91 : vector<1x64xf32>
    %93 = arith.subf %87, %80 : vector<1x64xf32>
    %cst_34 = arith.constant 3.125000e-02 : f32
    %94 = vector.broadcast %cst_34 : f32 to vector<1x64xf32>
    %95 = arith.mulf %93, %94 : vector<1x64xf32>
    %cst_35 = arith.constant 3.125000e-02 : f32
    %96 = vector.broadcast %cst_35 : f32 to vector<1x64xf32>
    %97 = arith.mulf %85, %96 : vector<1x64xf32>
    %98 = arith.mulf %92, %92 : vector<1x64xf32>
    %99 = arith.subf %97, %98 : vector<1x64xf32>
    %100 = arith.subf %90, %85 : vector<1x64xf32>
    %cst_36 = arith.constant 3.125000e-02 : f32
    %101 = vector.broadcast %cst_36 : f32 to vector<1x64xf32>
    %102 = arith.mulf %100, %101 : vector<1x64xf32>
    %103 = arith.mulf %95, %95 : vector<1x64xf32>
    %104 = arith.subf %102, %103 : vector<1x64xf32>
    %105 = vector.broadcast %76 : vector<64x1xf32> to vector<64x64xf32>
    %106 = vector.broadcast %92 : vector<1x64xf32> to vector<64x64xf32>
    %107 = arith.mulf %105, %106 : vector<64x64xf32>
    %cst_37 = arith.constant 1.000000e+00 : f32
    %108 = vector.broadcast %cst_37 : f32 to vector<64x1xf32>
    %109 = arith.subf %108, %76 : vector<64x1xf32>
    %110 = vector.broadcast %109 : vector<64x1xf32> to vector<64x64xf32>
    %111 = vector.broadcast %95 : vector<1x64xf32> to vector<64x64xf32>
    %112 = arith.mulf %110, %111 : vector<64x64xf32>
    %113 = arith.addf %107, %112 : vector<64x64xf32>
    %114 = vector.broadcast %76 : vector<64x1xf32> to vector<64x64xf32>
    %115 = vector.broadcast %99 : vector<1x64xf32> to vector<64x64xf32>
    %116 = arith.mulf %114, %115 : vector<64x64xf32>
    %cst_38 = arith.constant 1.000000e+00 : f32
    %117 = vector.broadcast %cst_38 : f32 to vector<64x1xf32>
    %118 = arith.subf %117, %76 : vector<64x1xf32>
    %119 = vector.broadcast %118 : vector<64x1xf32> to vector<64x64xf32>
    %120 = vector.broadcast %104 : vector<1x64xf32> to vector<64x64xf32>
    %121 = arith.mulf %119, %120 : vector<64x64xf32>
    %122 = arith.addf %116, %121 : vector<64x64xf32>
    %cst_39 = arith.constant 0.000000e+00 : f32
    %123 = vector.broadcast %cst_39 : f32 to vector<64x64xf32>
    %124 = arith.maximumf %122, %123 : vector<64x64xf32>
    %125 = arith.subf %69, %113 : vector<64x64xf32>
    %cst_40 = arith.constant 9.99999974E-6 : f32
    %126 = vector.broadcast %cst_40 : f32 to vector<64x64xf32>
    %127 = arith.addf %124, %126 : vector<64x64xf32>
    %128 = math.rsqrt %127 : vector<64x64xf32>
    %129 = arith.mulf %125, %128 : vector<64x64xf32>
    %130 = vector.broadcast %70 : vector<1x64xf32> to vector<64x64xf32>
    %131 = arith.mulf %129, %130 : vector<64x64xf32>
    %132 = vector.broadcast %71 : vector<1x64xf32> to vector<64x64xf32>
    %133 = arith.addf %131, %132 : vector<64x64xf32>
    %134 = arith.addf %66, %133 : vector<64x64xf32>
    %cst_41 = arith.constant 0.000000e+00 : f32
    %135 = vector.broadcast %cst_41 : f32 to vector<64x64xf32>
    %136 = arith.maximumf %134, %135 : vector<64x64xf32>
    %c0_42 = arith.constant 0 : index
    %c0_43 = arith.constant 0 : index
    %137 = vector.load %arg8[%c0_42, %c0_43] : memref<64x64xf32, #tpu.memory_space<vmem>>, vector<64x64xf32>
    tpu.vector_store %arg8[%c0_42, %c0_43], %136 {strides = array<i32>} : memref<64x64xf32, #tpu.memory_space<vmem>>, vector<64x64xf32>,
    return
  }
}

module attributes {stable_mosaic.version = 11 : i64} {
  func.func @kernel(%arg0: memref<64x576xf32, #tpu.memory_space<vmem>>, %arg1: memref<576x64xf32, #tpu.memory_space<vmem>>, %arg2: memref<1x64xf32, #tpu.memory_space<vmem>>, %arg3: memref<1x64xf32, #tpu.memory_space<vmem>>, %arg4: memref<64x64xf32, #tpu.memory_space<vmem>>, %arg5: memref<64x64xf32, #tpu.memory_space<vmem>>) attributes {dimension_semantics = [], scalar_prefetch = 0 : i64, scratch_operands = 0 : i64, tpu.core_type = #tpu.core_type<tc>} {
    %c0 = arith.constant 0 : index
    %c0_0 = arith.constant 0 : index
    %0 = vector.load %arg0[%c0, %c0_0] : memref<64x576xf32, #tpu.memory_space<vmem>>, vector<64x576xf32>
    %c0_1 = arith.constant 0 : index
    %c0_2 = arith.constant 0 : index
    %1 = vector.load %arg1[%c0_1, %c0_2] : memref<576x64xf32, #tpu.memory_space<vmem>>, vector<576x64xf32>
    %cst = arith.constant dense<0.000000e+00> : vector<64x64xf32>
    %2 = tpu.matmul %0, %1, %cst {dimension_numbers = #tpu.dot_dimension_numbers<[1], [0], [0], [1], [0, 0, 1, 1], [], []>} : vector<64x576xf32>, vector<576x64xf32>, vector<64x64xf32> -> vector<64x64xf32>
    %c0_3 = arith.constant 0 : index
    %c0_4 = arith.constant 0 : index
    %3 = vector.load %arg2[%c0_3, %c0_4] : memref<1x64xf32, #tpu.memory_space<vmem>>, vector<1x64xf32>
    %c0_5 = arith.constant 0 : index
    %c0_6 = arith.constant 0 : index
    %4 = vector.load %arg3[%c0_5, %c0_6] : memref<1x64xf32, #tpu.memory_space<vmem>>, vector<1x64xf32>
    %5 = tpu.iota {dimensions = array<i32: 0>} : vector<64x1xi32>
    %c32_i32 = arith.constant 32 : i32
    %6 = vector.broadcast %c32_i32 : i32 to vector<64x1xi32>
    %7 = arith.cmpi slt, %5, %6 : vector<64x1xi32>
    %8 = arith.extui %7 : vector<64x1xi1> to vector<64x1xi32>
    %9 = arith.sitofp %8 : vector<64x1xi32> to vector<64x1xf32>
    %10 = vector.broadcast %9 : vector<64x1xf32> to vector<64x64xf32>
    %11 = arith.mulf %2, %10 : vector<64x64xf32>
    %cst_7 = arith.constant dense<0.000000e+00> : vector<64xf32>
    %12 = vector.multi_reduction <add>, %11, %cst_7 [0] : vector<64x64xf32> to vector<64xf32>
    %13 = vector.shape_cast %12 : vector<64xf32> to vector<1x64xf32>
    %14 = arith.mulf %2, %2 : vector<64x64xf32>
    %15 = vector.broadcast %9 : vector<64x1xf32> to vector<64x64xf32>
    %16 = arith.mulf %14, %15 : vector<64x64xf32>
    %cst_8 = arith.constant dense<0.000000e+00> : vector<64xf32>
    %17 = vector.multi_reduction <add>, %16, %cst_8 [0] : vector<64x64xf32> to vector<64xf32>
    %18 = vector.shape_cast %17 : vector<64xf32> to vector<1x64xf32>
    %cst_9 = arith.constant dense<0.000000e+00> : vector<64xf32>
    %19 = vector.multi_reduction <add>, %2, %cst_9 [0] : vector<64x64xf32> to vector<64xf32>
    %20 = vector.shape_cast %19 : vector<64xf32> to vector<1x64xf32>
    %21 = arith.mulf %2, %2 : vector<64x64xf32>
    %cst_10 = arith.constant dense<0.000000e+00> : vector<64xf32>
    %22 = vector.multi_reduction <add>, %21, %cst_10 [0] : vector<64x64xf32> to vector<64xf32>
    %23 = vector.shape_cast %22 : vector<64xf32> to vector<1x64xf32>
    %cst_11 = arith.constant 3.125000e-02 : f32
    %24 = vector.broadcast %cst_11 : f32 to vector<1x64xf32>
    %25 = arith.mulf %13, %24 : vector<1x64xf32>
    %26 = arith.subf %20, %13 : vector<1x64xf32>
    %cst_12 = arith.constant 3.125000e-02 : f32
    %27 = vector.broadcast %cst_12 : f32 to vector<1x64xf32>
    %28 = arith.mulf %26, %27 : vector<1x64xf32>
    %cst_13 = arith.constant 3.125000e-02 : f32
    %29 = vector.broadcast %cst_13 : f32 to vector<1x64xf32>
    %30 = arith.mulf %18, %29 : vector<1x64xf32>
    %31 = arith.mulf %25, %25 : vector<1x64xf32>
    %32 = arith.subf %30, %31 : vector<1x64xf32>
    %33 = arith.subf %23, %18 : vector<1x64xf32>
    %cst_14 = arith.constant 3.125000e-02 : f32
    %34 = vector.broadcast %cst_14 : f32 to vector<1x64xf32>
    %35 = arith.mulf %33, %34 : vector<1x64xf32>
    %36 = arith.mulf %28, %28 : vector<1x64xf32>
    %37 = arith.subf %35, %36 : vector<1x64xf32>
    %38 = vector.broadcast %9 : vector<64x1xf32> to vector<64x64xf32>
    %39 = vector.broadcast %25 : vector<1x64xf32> to vector<64x64xf32>
    %40 = arith.mulf %38, %39 : vector<64x64xf32>
    %cst_15 = arith.constant 1.000000e+00 : f32
    %41 = vector.broadcast %cst_15 : f32 to vector<64x1xf32>
    %42 = arith.subf %41, %9 : vector<64x1xf32>
    %43 = vector.broadcast %42 : vector<64x1xf32> to vector<64x64xf32>
    %44 = vector.broadcast %28 : vector<1x64xf32> to vector<64x64xf32>
    %45 = arith.mulf %43, %44 : vector<64x64xf32>
    %46 = arith.addf %40, %45 : vector<64x64xf32>
    %47 = vector.broadcast %9 : vector<64x1xf32> to vector<64x64xf32>
    %48 = vector.broadcast %32 : vector<1x64xf32> to vector<64x64xf32>
    %49 = arith.mulf %47, %48 : vector<64x64xf32>
    %cst_16 = arith.constant 1.000000e+00 : f32
    %50 = vector.broadcast %cst_16 : f32 to vector<64x1xf32>
    %51 = arith.subf %50, %9 : vector<64x1xf32>
    %52 = vector.broadcast %51 : vector<64x1xf32> to vector<64x64xf32>
    %53 = vector.broadcast %37 : vector<1x64xf32> to vector<64x64xf32>
    %54 = arith.mulf %52, %53 : vector<64x64xf32>
    %55 = arith.addf %49, %54 : vector<64x64xf32>
    %cst_17 = arith.constant 0.000000e+00 : f32
    %56 = vector.broadcast %cst_17 : f32 to vector<64x64xf32>
    %57 = arith.maximumf %55, %56 : vector<64x64xf32>
    %58 = arith.subf %2, %46 : vector<64x64xf32>
    %cst_18 = arith.constant 9.99999974E-6 : f32
    %59 = vector.broadcast %cst_18 : f32 to vector<64x64xf32>
    %60 = arith.addf %57, %59 : vector<64x64xf32>
    %61 = math.rsqrt %60 : vector<64x64xf32>
    %62 = arith.mulf %58, %61 : vector<64x64xf32>
    %63 = vector.broadcast %3 : vector<1x64xf32> to vector<64x64xf32>
    %64 = arith.mulf %62, %63 : vector<64x64xf32>
    %65 = vector.broadcast %4 : vector<1x64xf32> to vector<64x64xf32>
    %66 = arith.addf %64, %65 : vector<64x64xf32>
    %c0_19 = arith.constant 0 : index
    %c0_20 = arith.constant 0 : index
    %67 = vector.load %arg4[%c0_19, %c0_20] : memref<64x64xf32, #tpu.memory_space<vmem>>, vector<64x64xf32>
    %68 = arith.addf %66, %67 : vector<64x64xf32>
    %cst_21 = arith.constant 0.000000e+00 : f32
    %69 = vector.broadcast %cst_21 : f32 to vector<64x64xf32>
    %70 = arith.maximumf %68, %69 : vector<64x64xf32>
    %c0_22 = arith.constant 0 : index
    %c0_23 = arith.constant 0 : index
    %71 = vector.load %arg5[%c0_22, %c0_23] : memref<64x64xf32, #tpu.memory_space<vmem>>, vector<64x64xf32>
    tpu.vector_store %arg5[%c0_22, %c0_23], %70 {strides = array<i32>} : memref<64x64xf32, #tpu.memory_space<vmem>>, vector<64x64xf32>,
    return
  }
}

module attributes {stable_mosaic.version = 11 : i64} {
  func.func @kernel(%arg0: memref<16x576xf32, #tpu.memory_space<vmem>>, %arg1: memref<576x128xf32, #tpu.memory_space<vmem>>, %arg2: memref<1x128xf32, #tpu.memory_space<vmem>>, %arg3: memref<1x128xf32, #tpu.memory_space<vmem>>, %arg4: memref<16x128xf32, #tpu.memory_space<vmem>>) attributes {dimension_semantics = [], scalar_prefetch = 0 : i64, scratch_operands = 0 : i64, tpu.core_type = #tpu.core_type<tc>} {
    %c0 = arith.constant 0 : index
    %c0_0 = arith.constant 0 : index
    %0 = vector.load %arg0[%c0, %c0_0] : memref<16x576xf32, #tpu.memory_space<vmem>>, vector<16x576xf32>
    %c0_1 = arith.constant 0 : index
    %c0_2 = arith.constant 0 : index
    %1 = vector.load %arg1[%c0_1, %c0_2] : memref<576x128xf32, #tpu.memory_space<vmem>>, vector<576x128xf32>
    %cst = arith.constant dense<0.000000e+00> : vector<16x128xf32>
    %2 = tpu.matmul %0, %1, %cst {dimension_numbers = #tpu.dot_dimension_numbers<[1], [0], [0], [1], [0, 0, 1, 1], [], []>} : vector<16x576xf32>, vector<576x128xf32>, vector<16x128xf32> -> vector<16x128xf32>
    %c0_3 = arith.constant 0 : index
    %c0_4 = arith.constant 0 : index
    %3 = vector.load %arg2[%c0_3, %c0_4] : memref<1x128xf32, #tpu.memory_space<vmem>>, vector<1x128xf32>
    %c0_5 = arith.constant 0 : index
    %c0_6 = arith.constant 0 : index
    %4 = vector.load %arg3[%c0_5, %c0_6] : memref<1x128xf32, #tpu.memory_space<vmem>>, vector<1x128xf32>
    %5 = tpu.iota {dimensions = array<i32: 0>} : vector<16x1xi32>
    %c8_i32 = arith.constant 8 : i32
    %6 = vector.broadcast %c8_i32 : i32 to vector<16x1xi32>
    %7 = arith.cmpi slt, %5, %6 : vector<16x1xi32>
    %8 = arith.extui %7 : vector<16x1xi1> to vector<16x1xi32>
    %9 = arith.sitofp %8 : vector<16x1xi32> to vector<16x1xf32>
    %10 = vector.broadcast %9 : vector<16x1xf32> to vector<16x128xf32>
    %11 = arith.mulf %2, %10 : vector<16x128xf32>
    %cst_7 = arith.constant dense<0.000000e+00> : vector<128xf32>
    %12 = vector.multi_reduction <add>, %11, %cst_7 [0] : vector<16x128xf32> to vector<128xf32>
    %13 = vector.shape_cast %12 : vector<128xf32> to vector<1x128xf32>
    %14 = arith.mulf %2, %2 : vector<16x128xf32>
    %15 = vector.broadcast %9 : vector<16x1xf32> to vector<16x128xf32>
    %16 = arith.mulf %14, %15 : vector<16x128xf32>
    %cst_8 = arith.constant dense<0.000000e+00> : vector<128xf32>
    %17 = vector.multi_reduction <add>, %16, %cst_8 [0] : vector<16x128xf32> to vector<128xf32>
    %18 = vector.shape_cast %17 : vector<128xf32> to vector<1x128xf32>
    %cst_9 = arith.constant dense<0.000000e+00> : vector<128xf32>
    %19 = vector.multi_reduction <add>, %2, %cst_9 [0] : vector<16x128xf32> to vector<128xf32>
    %20 = vector.shape_cast %19 : vector<128xf32> to vector<1x128xf32>
    %21 = arith.mulf %2, %2 : vector<16x128xf32>
    %cst_10 = arith.constant dense<0.000000e+00> : vector<128xf32>
    %22 = vector.multi_reduction <add>, %21, %cst_10 [0] : vector<16x128xf32> to vector<128xf32>
    %23 = vector.shape_cast %22 : vector<128xf32> to vector<1x128xf32>
    %cst_11 = arith.constant 1.250000e-01 : f32
    %24 = vector.broadcast %cst_11 : f32 to vector<1x128xf32>
    %25 = arith.mulf %13, %24 : vector<1x128xf32>
    %26 = arith.subf %20, %13 : vector<1x128xf32>
    %cst_12 = arith.constant 1.250000e-01 : f32
    %27 = vector.broadcast %cst_12 : f32 to vector<1x128xf32>
    %28 = arith.mulf %26, %27 : vector<1x128xf32>
    %cst_13 = arith.constant 1.250000e-01 : f32
    %29 = vector.broadcast %cst_13 : f32 to vector<1x128xf32>
    %30 = arith.mulf %18, %29 : vector<1x128xf32>
    %31 = arith.mulf %25, %25 : vector<1x128xf32>
    %32 = arith.subf %30, %31 : vector<1x128xf32>
    %33 = arith.subf %23, %18 : vector<1x128xf32>
    %cst_14 = arith.constant 1.250000e-01 : f32
    %34 = vector.broadcast %cst_14 : f32 to vector<1x128xf32>
    %35 = arith.mulf %33, %34 : vector<1x128xf32>
    %36 = arith.mulf %28, %28 : vector<1x128xf32>
    %37 = arith.subf %35, %36 : vector<1x128xf32>
    %38 = vector.broadcast %9 : vector<16x1xf32> to vector<16x128xf32>
    %39 = vector.broadcast %25 : vector<1x128xf32> to vector<16x128xf32>
    %40 = arith.mulf %38, %39 : vector<16x128xf32>
    %cst_15 = arith.constant 1.000000e+00 : f32
    %41 = vector.broadcast %cst_15 : f32 to vector<16x1xf32>
    %42 = arith.subf %41, %9 : vector<16x1xf32>
    %43 = vector.broadcast %42 : vector<16x1xf32> to vector<16x128xf32>
    %44 = vector.broadcast %28 : vector<1x128xf32> to vector<16x128xf32>
    %45 = arith.mulf %43, %44 : vector<16x128xf32>
    %46 = arith.addf %40, %45 : vector<16x128xf32>
    %47 = vector.broadcast %9 : vector<16x1xf32> to vector<16x128xf32>
    %48 = vector.broadcast %32 : vector<1x128xf32> to vector<16x128xf32>
    %49 = arith.mulf %47, %48 : vector<16x128xf32>
    %cst_16 = arith.constant 1.000000e+00 : f32
    %50 = vector.broadcast %cst_16 : f32 to vector<16x1xf32>
    %51 = arith.subf %50, %9 : vector<16x1xf32>
    %52 = vector.broadcast %51 : vector<16x1xf32> to vector<16x128xf32>
    %53 = vector.broadcast %37 : vector<1x128xf32> to vector<16x128xf32>
    %54 = arith.mulf %52, %53 : vector<16x128xf32>
    %55 = arith.addf %49, %54 : vector<16x128xf32>
    %cst_17 = arith.constant 0.000000e+00 : f32
    %56 = vector.broadcast %cst_17 : f32 to vector<16x128xf32>
    %57 = arith.maximumf %55, %56 : vector<16x128xf32>
    %58 = arith.subf %2, %46 : vector<16x128xf32>
    %cst_18 = arith.constant 9.99999974E-6 : f32
    %59 = vector.broadcast %cst_18 : f32 to vector<16x128xf32>
    %60 = arith.addf %57, %59 : vector<16x128xf32>
    %61 = math.rsqrt %60 : vector<16x128xf32>
    %62 = arith.mulf %58, %61 : vector<16x128xf32>
    %63 = vector.broadcast %3 : vector<1x128xf32> to vector<16x128xf32>
    %64 = arith.mulf %62, %63 : vector<16x128xf32>
    %65 = vector.broadcast %4 : vector<1x128xf32> to vector<16x128xf32>
    %66 = arith.addf %64, %65 : vector<16x128xf32>
    %cst_19 = arith.constant 0.000000e+00 : f32
    %67 = vector.broadcast %cst_19 : f32 to vector<16x128xf32>
    %68 = arith.maximumf %66, %67 : vector<16x128xf32>
    %c0_20 = arith.constant 0 : index
    %c0_21 = arith.constant 0 : index
    %69 = vector.load %arg4[%c0_20, %c0_21] : memref<16x128xf32, #tpu.memory_space<vmem>>, vector<16x128xf32>
    tpu.vector_store %arg4[%c0_20, %c0_21], %68 {strides = array<i32>} : memref<16x128xf32, #tpu.memory_space<vmem>>, vector<16x128xf32>,
    return
  }
}

module attributes {stable_mosaic.version = 11 : i64} {
  func.func @kernel(%arg0: memref<16x1152xf32, #tpu.memory_space<vmem>>, %arg1: memref<1152x128xf32, #tpu.memory_space<vmem>>, %arg2: memref<1x128xf32, #tpu.memory_space<vmem>>, %arg3: memref<1x128xf32, #tpu.memory_space<vmem>>, %arg4: memref<16x64xf32, #tpu.memory_space<vmem>>, %arg5: memref<64x128xf32, #tpu.memory_space<vmem>>, %arg6: memref<1x128xf32, #tpu.memory_space<vmem>>, %arg7: memref<1x128xf32, #tpu.memory_space<vmem>>, %arg8: memref<16x128xf32, #tpu.memory_space<vmem>>) attributes {dimension_semantics = [], scalar_prefetch = 0 : i64, scratch_operands = 0 : i64, tpu.core_type = #tpu.core_type<tc>} {
    %c0 = arith.constant 0 : index
    %c0_0 = arith.constant 0 : index
    %0 = vector.load %arg0[%c0, %c0_0] : memref<16x1152xf32, #tpu.memory_space<vmem>>, vector<16x1152xf32>
    %c0_1 = arith.constant 0 : index
    %c0_2 = arith.constant 0 : index
    %1 = vector.load %arg1[%c0_1, %c0_2] : memref<1152x128xf32, #tpu.memory_space<vmem>>, vector<1152x128xf32>
    %cst = arith.constant dense<0.000000e+00> : vector<16x128xf32>
    %2 = tpu.matmul %0, %1, %cst {dimension_numbers = #tpu.dot_dimension_numbers<[1], [0], [0], [1], [0, 0, 1, 1], [], []>} : vector<16x1152xf32>, vector<1152x128xf32>, vector<16x128xf32> -> vector<16x128xf32>
    %c0_3 = arith.constant 0 : index
    %c0_4 = arith.constant 0 : index
    %3 = vector.load %arg2[%c0_3, %c0_4] : memref<1x128xf32, #tpu.memory_space<vmem>>, vector<1x128xf32>
    %c0_5 = arith.constant 0 : index
    %c0_6 = arith.constant 0 : index
    %4 = vector.load %arg3[%c0_5, %c0_6] : memref<1x128xf32, #tpu.memory_space<vmem>>, vector<1x128xf32>
    %5 = tpu.iota {dimensions = array<i32: 0>} : vector<16x1xi32>
    %c8_i32 = arith.constant 8 : i32
    %6 = vector.broadcast %c8_i32 : i32 to vector<16x1xi32>
    %7 = arith.cmpi slt, %5, %6 : vector<16x1xi32>
    %8 = arith.extui %7 : vector<16x1xi1> to vector<16x1xi32>
    %9 = arith.sitofp %8 : vector<16x1xi32> to vector<16x1xf32>
    %10 = vector.broadcast %9 : vector<16x1xf32> to vector<16x128xf32>
    %11 = arith.mulf %2, %10 : vector<16x128xf32>
    %cst_7 = arith.constant dense<0.000000e+00> : vector<128xf32>
    %12 = vector.multi_reduction <add>, %11, %cst_7 [0] : vector<16x128xf32> to vector<128xf32>
    %13 = vector.shape_cast %12 : vector<128xf32> to vector<1x128xf32>
    %14 = arith.mulf %2, %2 : vector<16x128xf32>
    %15 = vector.broadcast %9 : vector<16x1xf32> to vector<16x128xf32>
    %16 = arith.mulf %14, %15 : vector<16x128xf32>
    %cst_8 = arith.constant dense<0.000000e+00> : vector<128xf32>
    %17 = vector.multi_reduction <add>, %16, %cst_8 [0] : vector<16x128xf32> to vector<128xf32>
    %18 = vector.shape_cast %17 : vector<128xf32> to vector<1x128xf32>
    %cst_9 = arith.constant dense<0.000000e+00> : vector<128xf32>
    %19 = vector.multi_reduction <add>, %2, %cst_9 [0] : vector<16x128xf32> to vector<128xf32>
    %20 = vector.shape_cast %19 : vector<128xf32> to vector<1x128xf32>
    %21 = arith.mulf %2, %2 : vector<16x128xf32>
    %cst_10 = arith.constant dense<0.000000e+00> : vector<128xf32>
    %22 = vector.multi_reduction <add>, %21, %cst_10 [0] : vector<16x128xf32> to vector<128xf32>
    %23 = vector.shape_cast %22 : vector<128xf32> to vector<1x128xf32>
    %cst_11 = arith.constant 1.250000e-01 : f32
    %24 = vector.broadcast %cst_11 : f32 to vector<1x128xf32>
    %25 = arith.mulf %13, %24 : vector<1x128xf32>
    %26 = arith.subf %20, %13 : vector<1x128xf32>
    %cst_12 = arith.constant 1.250000e-01 : f32
    %27 = vector.broadcast %cst_12 : f32 to vector<1x128xf32>
    %28 = arith.mulf %26, %27 : vector<1x128xf32>
    %cst_13 = arith.constant 1.250000e-01 : f32
    %29 = vector.broadcast %cst_13 : f32 to vector<1x128xf32>
    %30 = arith.mulf %18, %29 : vector<1x128xf32>
    %31 = arith.mulf %25, %25 : vector<1x128xf32>
    %32 = arith.subf %30, %31 : vector<1x128xf32>
    %33 = arith.subf %23, %18 : vector<1x128xf32>
    %cst_14 = arith.constant 1.250000e-01 : f32
    %34 = vector.broadcast %cst_14 : f32 to vector<1x128xf32>
    %35 = arith.mulf %33, %34 : vector<1x128xf32>
    %36 = arith.mulf %28, %28 : vector<1x128xf32>
    %37 = arith.subf %35, %36 : vector<1x128xf32>
    %38 = vector.broadcast %9 : vector<16x1xf32> to vector<16x128xf32>
    %39 = vector.broadcast %25 : vector<1x128xf32> to vector<16x128xf32>
    %40 = arith.mulf %38, %39 : vector<16x128xf32>
    %cst_15 = arith.constant 1.000000e+00 : f32
    %41 = vector.broadcast %cst_15 : f32 to vector<16x1xf32>
    %42 = arith.subf %41, %9 : vector<16x1xf32>
    %43 = vector.broadcast %42 : vector<16x1xf32> to vector<16x128xf32>
    %44 = vector.broadcast %28 : vector<1x128xf32> to vector<16x128xf32>
    %45 = arith.mulf %43, %44 : vector<16x128xf32>
    %46 = arith.addf %40, %45 : vector<16x128xf32>
    %47 = vector.broadcast %9 : vector<16x1xf32> to vector<16x128xf32>
    %48 = vector.broadcast %32 : vector<1x128xf32> to vector<16x128xf32>
    %49 = arith.mulf %47, %48 : vector<16x128xf32>
    %cst_16 = arith.constant 1.000000e+00 : f32
    %50 = vector.broadcast %cst_16 : f32 to vector<16x1xf32>
    %51 = arith.subf %50, %9 : vector<16x1xf32>
    %52 = vector.broadcast %51 : vector<16x1xf32> to vector<16x128xf32>
    %53 = vector.broadcast %37 : vector<1x128xf32> to vector<16x128xf32>
    %54 = arith.mulf %52, %53 : vector<16x128xf32>
    %55 = arith.addf %49, %54 : vector<16x128xf32>
    %cst_17 = arith.constant 0.000000e+00 : f32
    %56 = vector.broadcast %cst_17 : f32 to vector<16x128xf32>
    %57 = arith.maximumf %55, %56 : vector<16x128xf32>
    %58 = arith.subf %2, %46 : vector<16x128xf32>
    %cst_18 = arith.constant 9.99999974E-6 : f32
    %59 = vector.broadcast %cst_18 : f32 to vector<16x128xf32>
    %60 = arith.addf %57, %59 : vector<16x128xf32>
    %61 = math.rsqrt %60 : vector<16x128xf32>
    %62 = arith.mulf %58, %61 : vector<16x128xf32>
    %63 = vector.broadcast %3 : vector<1x128xf32> to vector<16x128xf32>
    %64 = arith.mulf %62, %63 : vector<16x128xf32>
    %65 = vector.broadcast %4 : vector<1x128xf32> to vector<16x128xf32>
    %66 = arith.addf %64, %65 : vector<16x128xf32>
    %c0_19 = arith.constant 0 : index
    %c0_20 = arith.constant 0 : index
    %67 = vector.load %arg4[%c0_19, %c0_20] : memref<16x64xf32, #tpu.memory_space<vmem>>, vector<16x64xf32>
    %c0_21 = arith.constant 0 : index
    %c0_22 = arith.constant 0 : index
    %68 = vector.load %arg5[%c0_21, %c0_22] : memref<64x128xf32, #tpu.memory_space<vmem>>, vector<64x128xf32>
    %cst_23 = arith.constant dense<0.000000e+00> : vector<16x128xf32>
    %69 = tpu.matmul %67, %68, %cst_23 {dimension_numbers = #tpu.dot_dimension_numbers<[1], [0], [0], [1], [0, 0, 1, 1], [], []>} : vector<16x64xf32>, vector<64x128xf32>, vector<16x128xf32> -> vector<16x128xf32>
    %c0_24 = arith.constant 0 : index
    %c0_25 = arith.constant 0 : index
    %70 = vector.load %arg6[%c0_24, %c0_25] : memref<1x128xf32, #tpu.memory_space<vmem>>, vector<1x128xf32>
    %c0_26 = arith.constant 0 : index
    %c0_27 = arith.constant 0 : index
    %71 = vector.load %arg7[%c0_26, %c0_27] : memref<1x128xf32, #tpu.memory_space<vmem>>, vector<1x128xf32>
    %72 = tpu.iota {dimensions = array<i32: 0>} : vector<16x1xi32>
    %c8_i32_28 = arith.constant 8 : i32
    %73 = vector.broadcast %c8_i32_28 : i32 to vector<16x1xi32>
    %74 = arith.cmpi slt, %72, %73 : vector<16x1xi32>
    %75 = arith.extui %74 : vector<16x1xi1> to vector<16x1xi32>
    %76 = arith.sitofp %75 : vector<16x1xi32> to vector<16x1xf32>
    %77 = vector.broadcast %76 : vector<16x1xf32> to vector<16x128xf32>
    %78 = arith.mulf %69, %77 : vector<16x128xf32>
    %cst_29 = arith.constant dense<0.000000e+00> : vector<128xf32>
    %79 = vector.multi_reduction <add>, %78, %cst_29 [0] : vector<16x128xf32> to vector<128xf32>
    %80 = vector.shape_cast %79 : vector<128xf32> to vector<1x128xf32>
    %81 = arith.mulf %69, %69 : vector<16x128xf32>
    %82 = vector.broadcast %76 : vector<16x1xf32> to vector<16x128xf32>
    %83 = arith.mulf %81, %82 : vector<16x128xf32>
    %cst_30 = arith.constant dense<0.000000e+00> : vector<128xf32>
    %84 = vector.multi_reduction <add>, %83, %cst_30 [0] : vector<16x128xf32> to vector<128xf32>
    %85 = vector.shape_cast %84 : vector<128xf32> to vector<1x128xf32>
    %cst_31 = arith.constant dense<0.000000e+00> : vector<128xf32>
    %86 = vector.multi_reduction <add>, %69, %cst_31 [0] : vector<16x128xf32> to vector<128xf32>
    %87 = vector.shape_cast %86 : vector<128xf32> to vector<1x128xf32>
    %88 = arith.mulf %69, %69 : vector<16x128xf32>
    %cst_32 = arith.constant dense<0.000000e+00> : vector<128xf32>
    %89 = vector.multi_reduction <add>, %88, %cst_32 [0] : vector<16x128xf32> to vector<128xf32>
    %90 = vector.shape_cast %89 : vector<128xf32> to vector<1x128xf32>
    %cst_33 = arith.constant 1.250000e-01 : f32
    %91 = vector.broadcast %cst_33 : f32 to vector<1x128xf32>
    %92 = arith.mulf %80, %91 : vector<1x128xf32>
    %93 = arith.subf %87, %80 : vector<1x128xf32>
    %cst_34 = arith.constant 1.250000e-01 : f32
    %94 = vector.broadcast %cst_34 : f32 to vector<1x128xf32>
    %95 = arith.mulf %93, %94 : vector<1x128xf32>
    %cst_35 = arith.constant 1.250000e-01 : f32
    %96 = vector.broadcast %cst_35 : f32 to vector<1x128xf32>
    %97 = arith.mulf %85, %96 : vector<1x128xf32>
    %98 = arith.mulf %92, %92 : vector<1x128xf32>
    %99 = arith.subf %97, %98 : vector<1x128xf32>
    %100 = arith.subf %90, %85 : vector<1x128xf32>
    %cst_36 = arith.constant 1.250000e-01 : f32
    %101 = vector.broadcast %cst_36 : f32 to vector<1x128xf32>
    %102 = arith.mulf %100, %101 : vector<1x128xf32>
    %103 = arith.mulf %95, %95 : vector<1x128xf32>
    %104 = arith.subf %102, %103 : vector<1x128xf32>
    %105 = vector.broadcast %76 : vector<16x1xf32> to vector<16x128xf32>
    %106 = vector.broadcast %92 : vector<1x128xf32> to vector<16x128xf32>
    %107 = arith.mulf %105, %106 : vector<16x128xf32>
    %cst_37 = arith.constant 1.000000e+00 : f32
    %108 = vector.broadcast %cst_37 : f32 to vector<16x1xf32>
    %109 = arith.subf %108, %76 : vector<16x1xf32>
    %110 = vector.broadcast %109 : vector<16x1xf32> to vector<16x128xf32>
    %111 = vector.broadcast %95 : vector<1x128xf32> to vector<16x128xf32>
    %112 = arith.mulf %110, %111 : vector<16x128xf32>
    %113 = arith.addf %107, %112 : vector<16x128xf32>
    %114 = vector.broadcast %76 : vector<16x1xf32> to vector<16x128xf32>
    %115 = vector.broadcast %99 : vector<1x128xf32> to vector<16x128xf32>
    %116 = arith.mulf %114, %115 : vector<16x128xf32>
    %cst_38 = arith.constant 1.000000e+00 : f32
    %117 = vector.broadcast %cst_38 : f32 to vector<16x1xf32>
    %118 = arith.subf %117, %76 : vector<16x1xf32>
    %119 = vector.broadcast %118 : vector<16x1xf32> to vector<16x128xf32>
    %120 = vector.broadcast %104 : vector<1x128xf32> to vector<16x128xf32>
    %121 = arith.mulf %119, %120 : vector<16x128xf32>
    %122 = arith.addf %116, %121 : vector<16x128xf32>
    %cst_39 = arith.constant 0.000000e+00 : f32
    %123 = vector.broadcast %cst_39 : f32 to vector<16x128xf32>
    %124 = arith.maximumf %122, %123 : vector<16x128xf32>
    %125 = arith.subf %69, %113 : vector<16x128xf32>
    %cst_40 = arith.constant 9.99999974E-6 : f32
    %126 = vector.broadcast %cst_40 : f32 to vector<16x128xf32>
    %127 = arith.addf %124, %126 : vector<16x128xf32>
    %128 = math.rsqrt %127 : vector<16x128xf32>
    %129 = arith.mulf %125, %128 : vector<16x128xf32>
    %130 = vector.broadcast %70 : vector<1x128xf32> to vector<16x128xf32>
    %131 = arith.mulf %129, %130 : vector<16x128xf32>
    %132 = vector.broadcast %71 : vector<1x128xf32> to vector<16x128xf32>
    %133 = arith.addf %131, %132 : vector<16x128xf32>
    %134 = arith.addf %66, %133 : vector<16x128xf32>
    %cst_41 = arith.constant 0.000000e+00 : f32
    %135 = vector.broadcast %cst_41 : f32 to vector<16x128xf32>
    %136 = arith.maximumf %134, %135 : vector<16x128xf32>
    %c0_42 = arith.constant 0 : index
    %c0_43 = arith.constant 0 : index
    %137 = vector.load %arg8[%c0_42, %c0_43] : memref<16x128xf32, #tpu.memory_space<vmem>>, vector<16x128xf32>
    tpu.vector_store %arg8[%c0_42, %c0_43], %136 {strides = array<i32>} : memref<16x128xf32, #tpu.memory_space<vmem>>, vector<16x128xf32>,
    return
  }
}

module attributes {stable_mosaic.version = 11 : i64} {
  func.func @kernel(%arg0: memref<16x1152xf32, #tpu.memory_space<vmem>>, %arg1: memref<1152x128xf32, #tpu.memory_space<vmem>>, %arg2: memref<1x128xf32, #tpu.memory_space<vmem>>, %arg3: memref<1x128xf32, #tpu.memory_space<vmem>>, %arg4: memref<16x128xf32, #tpu.memory_space<vmem>>) attributes {dimension_semantics = [], scalar_prefetch = 0 : i64, scratch_operands = 0 : i64, tpu.core_type = #tpu.core_type<tc>} {
    %c0 = arith.constant 0 : index
    %c0_0 = arith.constant 0 : index
    %0 = vector.load %arg0[%c0, %c0_0] : memref<16x1152xf32, #tpu.memory_space<vmem>>, vector<16x1152xf32>
    %c0_1 = arith.constant 0 : index
    %c0_2 = arith.constant 0 : index
    %1 = vector.load %arg1[%c0_1, %c0_2] : memref<1152x128xf32, #tpu.memory_space<vmem>>, vector<1152x128xf32>
    %cst = arith.constant dense<0.000000e+00> : vector<16x128xf32>
    %2 = tpu.matmul %0, %1, %cst {dimension_numbers = #tpu.dot_dimension_numbers<[1], [0], [0], [1], [0, 0, 1, 1], [], []>} : vector<16x1152xf32>, vector<1152x128xf32>, vector<16x128xf32> -> vector<16x128xf32>
    %c0_3 = arith.constant 0 : index
    %c0_4 = arith.constant 0 : index
    %3 = vector.load %arg2[%c0_3, %c0_4] : memref<1x128xf32, #tpu.memory_space<vmem>>, vector<1x128xf32>
    %c0_5 = arith.constant 0 : index
    %c0_6 = arith.constant 0 : index
    %4 = vector.load %arg3[%c0_5, %c0_6] : memref<1x128xf32, #tpu.memory_space<vmem>>, vector<1x128xf32>
    %5 = tpu.iota {dimensions = array<i32: 0>} : vector<16x1xi32>
    %c8_i32 = arith.constant 8 : i32
    %6 = vector.broadcast %c8_i32 : i32 to vector<16x1xi32>
    %7 = arith.cmpi slt, %5, %6 : vector<16x1xi32>
    %8 = arith.extui %7 : vector<16x1xi1> to vector<16x1xi32>
    %9 = arith.sitofp %8 : vector<16x1xi32> to vector<16x1xf32>
    %10 = vector.broadcast %9 : vector<16x1xf32> to vector<16x128xf32>
    %11 = arith.mulf %2, %10 : vector<16x128xf32>
    %cst_7 = arith.constant dense<0.000000e+00> : vector<128xf32>
    %12 = vector.multi_reduction <add>, %11, %cst_7 [0] : vector<16x128xf32> to vector<128xf32>
    %13 = vector.shape_cast %12 : vector<128xf32> to vector<1x128xf32>
    %14 = arith.mulf %2, %2 : vector<16x128xf32>
    %15 = vector.broadcast %9 : vector<16x1xf32> to vector<16x128xf32>
    %16 = arith.mulf %14, %15 : vector<16x128xf32>
    %cst_8 = arith.constant dense<0.000000e+00> : vector<128xf32>
    %17 = vector.multi_reduction <add>, %16, %cst_8 [0] : vector<16x128xf32> to vector<128xf32>
    %18 = vector.shape_cast %17 : vector<128xf32> to vector<1x128xf32>
    %cst_9 = arith.constant dense<0.000000e+00> : vector<128xf32>
    %19 = vector.multi_reduction <add>, %2, %cst_9 [0] : vector<16x128xf32> to vector<128xf32>
    %20 = vector.shape_cast %19 : vector<128xf32> to vector<1x128xf32>
    %21 = arith.mulf %2, %2 : vector<16x128xf32>
    %cst_10 = arith.constant dense<0.000000e+00> : vector<128xf32>
    %22 = vector.multi_reduction <add>, %21, %cst_10 [0] : vector<16x128xf32> to vector<128xf32>
    %23 = vector.shape_cast %22 : vector<128xf32> to vector<1x128xf32>
    %cst_11 = arith.constant 1.250000e-01 : f32
    %24 = vector.broadcast %cst_11 : f32 to vector<1x128xf32>
    %25 = arith.mulf %13, %24 : vector<1x128xf32>
    %26 = arith.subf %20, %13 : vector<1x128xf32>
    %cst_12 = arith.constant 1.250000e-01 : f32
    %27 = vector.broadcast %cst_12 : f32 to vector<1x128xf32>
    %28 = arith.mulf %26, %27 : vector<1x128xf32>
    %cst_13 = arith.constant 1.250000e-01 : f32
    %29 = vector.broadcast %cst_13 : f32 to vector<1x128xf32>
    %30 = arith.mulf %18, %29 : vector<1x128xf32>
    %31 = arith.mulf %25, %25 : vector<1x128xf32>
    %32 = arith.subf %30, %31 : vector<1x128xf32>
    %33 = arith.subf %23, %18 : vector<1x128xf32>
    %cst_14 = arith.constant 1.250000e-01 : f32
    %34 = vector.broadcast %cst_14 : f32 to vector<1x128xf32>
    %35 = arith.mulf %33, %34 : vector<1x128xf32>
    %36 = arith.mulf %28, %28 : vector<1x128xf32>
    %37 = arith.subf %35, %36 : vector<1x128xf32>
    %38 = vector.broadcast %9 : vector<16x1xf32> to vector<16x128xf32>
    %39 = vector.broadcast %25 : vector<1x128xf32> to vector<16x128xf32>
    %40 = arith.mulf %38, %39 : vector<16x128xf32>
    %cst_15 = arith.constant 1.000000e+00 : f32
    %41 = vector.broadcast %cst_15 : f32 to vector<16x1xf32>
    %42 = arith.subf %41, %9 : vector<16x1xf32>
    %43 = vector.broadcast %42 : vector<16x1xf32> to vector<16x128xf32>
    %44 = vector.broadcast %28 : vector<1x128xf32> to vector<16x128xf32>
    %45 = arith.mulf %43, %44 : vector<16x128xf32>
    %46 = arith.addf %40, %45 : vector<16x128xf32>
    %47 = vector.broadcast %9 : vector<16x1xf32> to vector<16x128xf32>
    %48 = vector.broadcast %32 : vector<1x128xf32> to vector<16x128xf32>
    %49 = arith.mulf %47, %48 : vector<16x128xf32>
    %cst_16 = arith.constant 1.000000e+00 : f32
    %50 = vector.broadcast %cst_16 : f32 to vector<16x1xf32>
    %51 = arith.subf %50, %9 : vector<16x1xf32>
    %52 = vector.broadcast %51 : vector<16x1xf32> to vector<16x128xf32>
    %53 = vector.broadcast %37 : vector<1x128xf32> to vector<16x128xf32>
    %54 = arith.mulf %52, %53 : vector<16x128xf32>
    %55 = arith.addf %49, %54 : vector<16x128xf32>
    %cst_17 = arith.constant 0.000000e+00 : f32
    %56 = vector.broadcast %cst_17 : f32 to vector<16x128xf32>
    %57 = arith.maximumf %55, %56 : vector<16x128xf32>
    %58 = arith.subf %2, %46 : vector<16x128xf32>
    %cst_18 = arith.constant 9.99999974E-6 : f32
    %59 = vector.broadcast %cst_18 : f32 to vector<16x128xf32>
    %60 = arith.addf %57, %59 : vector<16x128xf32>
    %61 = math.rsqrt %60 : vector<16x128xf32>
    %62 = arith.mulf %58, %61 : vector<16x128xf32>
    %63 = vector.broadcast %3 : vector<1x128xf32> to vector<16x128xf32>
    %64 = arith.mulf %62, %63 : vector<16x128xf32>
    %65 = vector.broadcast %4 : vector<1x128xf32> to vector<16x128xf32>
    %66 = arith.addf %64, %65 : vector<16x128xf32>
    %cst_19 = arith.constant 0.000000e+00 : f32
    %67 = vector.broadcast %cst_19 : f32 to vector<16x128xf32>
    %68 = arith.maximumf %66, %67 : vector<16x128xf32>
    %c0_20 = arith.constant 0 : index
    %c0_21 = arith.constant 0 : index
    %69 = vector.load %arg4[%c0_20, %c0_21] : memref<16x128xf32, #tpu.memory_space<vmem>>, vector<16x128xf32>
    tpu.vector_store %arg4[%c0_20, %c0_21], %68 {strides = array<i32>} : memref<16x128xf32, #tpu.memory_space<vmem>>, vector<16x128xf32>,
    return
  }
}

module attributes {stable_mosaic.version = 11 : i64} {
  func.func @kernel(%arg0: memref<16x1152xf32, #tpu.memory_space<vmem>>, %arg1: memref<1152x128xf32, #tpu.memory_space<vmem>>, %arg2: memref<1x128xf32, #tpu.memory_space<vmem>>, %arg3: memref<1x128xf32, #tpu.memory_space<vmem>>, %arg4: memref<16x128xf32, #tpu.memory_space<vmem>>, %arg5: memref<16x128xf32, #tpu.memory_space<vmem>>) attributes {dimension_semantics = [], scalar_prefetch = 0 : i64, scratch_operands = 0 : i64, tpu.core_type = #tpu.core_type<tc>} {
    %c0 = arith.constant 0 : index
    %c0_0 = arith.constant 0 : index
    %0 = vector.load %arg0[%c0, %c0_0] : memref<16x1152xf32, #tpu.memory_space<vmem>>, vector<16x1152xf32>
    %c0_1 = arith.constant 0 : index
    %c0_2 = arith.constant 0 : index
    %1 = vector.load %arg1[%c0_1, %c0_2] : memref<1152x128xf32, #tpu.memory_space<vmem>>, vector<1152x128xf32>
    %cst = arith.constant dense<0.000000e+00> : vector<16x128xf32>
    %2 = tpu.matmul %0, %1, %cst {dimension_numbers = #tpu.dot_dimension_numbers<[1], [0], [0], [1], [0, 0, 1, 1], [], []>} : vector<16x1152xf32>, vector<1152x128xf32>, vector<16x128xf32> -> vector<16x128xf32>
    %c0_3 = arith.constant 0 : index
    %c0_4 = arith.constant 0 : index
    %3 = vector.load %arg2[%c0_3, %c0_4] : memref<1x128xf32, #tpu.memory_space<vmem>>, vector<1x128xf32>
    %c0_5 = arith.constant 0 : index
    %c0_6 = arith.constant 0 : index
    %4 = vector.load %arg3[%c0_5, %c0_6] : memref<1x128xf32, #tpu.memory_space<vmem>>, vector<1x128xf32>
    %5 = tpu.iota {dimensions = array<i32: 0>} : vector<16x1xi32>
    %c8_i32 = arith.constant 8 : i32
    %6 = vector.broadcast %c8_i32 : i32 to vector<16x1xi32>
    %7 = arith.cmpi slt, %5, %6 : vector<16x1xi32>
    %8 = arith.extui %7 : vector<16x1xi1> to vector<16x1xi32>
    %9 = arith.sitofp %8 : vector<16x1xi32> to vector<16x1xf32>
    %10 = vector.broadcast %9 : vector<16x1xf32> to vector<16x128xf32>
    %11 = arith.mulf %2, %10 : vector<16x128xf32>
    %cst_7 = arith.constant dense<0.000000e+00> : vector<128xf32>
    %12 = vector.multi_reduction <add>, %11, %cst_7 [0] : vector<16x128xf32> to vector<128xf32>
    %13 = vector.shape_cast %12 : vector<128xf32> to vector<1x128xf32>
    %14 = arith.mulf %2, %2 : vector<16x128xf32>
    %15 = vector.broadcast %9 : vector<16x1xf32> to vector<16x128xf32>
    %16 = arith.mulf %14, %15 : vector<16x128xf32>
    %cst_8 = arith.constant dense<0.000000e+00> : vector<128xf32>
    %17 = vector.multi_reduction <add>, %16, %cst_8 [0] : vector<16x128xf32> to vector<128xf32>
    %18 = vector.shape_cast %17 : vector<128xf32> to vector<1x128xf32>
    %cst_9 = arith.constant dense<0.000000e+00> : vector<128xf32>
    %19 = vector.multi_reduction <add>, %2, %cst_9 [0] : vector<16x128xf32> to vector<128xf32>
    %20 = vector.shape_cast %19 : vector<128xf32> to vector<1x128xf32>
    %21 = arith.mulf %2, %2 : vector<16x128xf32>
    %cst_10 = arith.constant dense<0.000000e+00> : vector<128xf32>
    %22 = vector.multi_reduction <add>, %21, %cst_10 [0] : vector<16x128xf32> to vector<128xf32>
    %23 = vector.shape_cast %22 : vector<128xf32> to vector<1x128xf32>
    %cst_11 = arith.constant 1.250000e-01 : f32
    %24 = vector.broadcast %cst_11 : f32 to vector<1x128xf32>
    %25 = arith.mulf %13, %24 : vector<1x128xf32>
    %26 = arith.subf %20, %13 : vector<1x128xf32>
    %cst_12 = arith.constant 1.250000e-01 : f32
    %27 = vector.broadcast %cst_12 : f32 to vector<1x128xf32>
    %28 = arith.mulf %26, %27 : vector<1x128xf32>
    %cst_13 = arith.constant 1.250000e-01 : f32
    %29 = vector.broadcast %cst_13 : f32 to vector<1x128xf32>
    %30 = arith.mulf %18, %29 : vector<1x128xf32>
    %31 = arith.mulf %25, %25 : vector<1x128xf32>
    %32 = arith.subf %30, %31 : vector<1x128xf32>
    %33 = arith.subf %23, %18 : vector<1x128xf32>
    %cst_14 = arith.constant 1.250000e-01 : f32
    %34 = vector.broadcast %cst_14 : f32 to vector<1x128xf32>
    %35 = arith.mulf %33, %34 : vector<1x128xf32>
    %36 = arith.mulf %28, %28 : vector<1x128xf32>
    %37 = arith.subf %35, %36 : vector<1x128xf32>
    %38 = vector.broadcast %9 : vector<16x1xf32> to vector<16x128xf32>
    %39 = vector.broadcast %25 : vector<1x128xf32> to vector<16x128xf32>
    %40 = arith.mulf %38, %39 : vector<16x128xf32>
    %cst_15 = arith.constant 1.000000e+00 : f32
    %41 = vector.broadcast %cst_15 : f32 to vector<16x1xf32>
    %42 = arith.subf %41, %9 : vector<16x1xf32>
    %43 = vector.broadcast %42 : vector<16x1xf32> to vector<16x128xf32>
    %44 = vector.broadcast %28 : vector<1x128xf32> to vector<16x128xf32>
    %45 = arith.mulf %43, %44 : vector<16x128xf32>
    %46 = arith.addf %40, %45 : vector<16x128xf32>
    %47 = vector.broadcast %9 : vector<16x1xf32> to vector<16x128xf32>
    %48 = vector.broadcast %32 : vector<1x128xf32> to vector<16x128xf32>
    %49 = arith.mulf %47, %48 : vector<16x128xf32>
    %cst_16 = arith.constant 1.000000e+00 : f32
    %50 = vector.broadcast %cst_16 : f32 to vector<16x1xf32>
    %51 = arith.subf %50, %9 : vector<16x1xf32>
    %52 = vector.broadcast %51 : vector<16x1xf32> to vector<16x128xf32>
    %53 = vector.broadcast %37 : vector<1x128xf32> to vector<16x128xf32>
    %54 = arith.mulf %52, %53 : vector<16x128xf32>
    %55 = arith.addf %49, %54 : vector<16x128xf32>
    %cst_17 = arith.constant 0.000000e+00 : f32
    %56 = vector.broadcast %cst_17 : f32 to vector<16x128xf32>
    %57 = arith.maximumf %55, %56 : vector<16x128xf32>
    %58 = arith.subf %2, %46 : vector<16x128xf32>
    %cst_18 = arith.constant 9.99999974E-6 : f32
    %59 = vector.broadcast %cst_18 : f32 to vector<16x128xf32>
    %60 = arith.addf %57, %59 : vector<16x128xf32>
    %61 = math.rsqrt %60 : vector<16x128xf32>
    %62 = arith.mulf %58, %61 : vector<16x128xf32>
    %63 = vector.broadcast %3 : vector<1x128xf32> to vector<16x128xf32>
    %64 = arith.mulf %62, %63 : vector<16x128xf32>
    %65 = vector.broadcast %4 : vector<1x128xf32> to vector<16x128xf32>
    %66 = arith.addf %64, %65 : vector<16x128xf32>
    %c0_19 = arith.constant 0 : index
    %c0_20 = arith.constant 0 : index
    %67 = vector.load %arg4[%c0_19, %c0_20] : memref<16x128xf32, #tpu.memory_space<vmem>>, vector<16x128xf32>
    %68 = arith.addf %66, %67 : vector<16x128xf32>
    %cst_21 = arith.constant 0.000000e+00 : f32
    %69 = vector.broadcast %cst_21 : f32 to vector<16x128xf32>
    %70 = arith.maximumf %68, %69 : vector<16x128xf32>
    %c0_22 = arith.constant 0 : index
    %c0_23 = arith.constant 0 : index
    %71 = vector.load %arg5[%c0_22, %c0_23] : memref<16x128xf32, #tpu.memory_space<vmem>>, vector<16x128xf32>
    tpu.vector_store %arg5[%c0_22, %c0_23], %70 {strides = array<i32>} : memref<16x128xf32, #tpu.memory_space<vmem>>, vector<16x128xf32>,
    return
  }
}

module attributes {stable_mosaic.version = 11 : i64} {
  func.func @_head_kernel(%arg0: memref<4x4x128xf32, #tpu.memory_space<vmem>>, %arg1: memref<128x512xf32, #tpu.memory_space<vmem>>, %arg2: memref<1x512xf32, #tpu.memory_space<vmem>>, %arg3: memref<1x512xf32, #tpu.memory_space<vmem>>, %arg4: memref<1x512xf32, #tpu.memory_space<vmem>>, %arg5: memref<512x512xf32, #tpu.memory_space<vmem>>, %arg6: memref<1x512xf32, #tpu.memory_space<vmem>>, %arg7: memref<1x512xf32, #tpu.memory_space<vmem>>, %arg8: memref<1x512xf32, #tpu.memory_space<vmem>>, %arg9: memref<512x128xf32, #tpu.memory_space<vmem>>, %arg10: memref<512x128xf32, #tpu.memory_space<vmem>>, %arg11: memref<1x128xf32, #tpu.memory_space<vmem>>, %arg12: memref<128x2xf32, #tpu.memory_space<vmem>>, %arg13: memref<1x2xf32, #tpu.memory_space<vmem>>, %arg14: memref<2x2xf32, #tpu.memory_space<vmem>>) attributes {dimension_semantics = [], scalar_prefetch = 0 : i64, scratch_operands = 0 : i64, tpu.core_type = #tpu.core_type<tc>} {
    %c0 = arith.constant 0 : index
    %c0_0 = arith.constant 0 : index
    %c0_1 = arith.constant 0 : index
    %0 = vector.load %arg0[%c0, %c0_0, %c0_1] : memref<4x4x128xf32, #tpu.memory_space<vmem>>, vector<4x4x128xf32>
    %cst = arith.constant dense<0.000000e+00> : vector<4x128xf32>
    %1 = vector.multi_reduction <add>, %0, %cst [1] : vector<4x4x128xf32> to vector<4x128xf32>
    %cst_2 = arith.constant 4.000000e+00 : f32
    %2 = vector.broadcast %cst_2 : f32 to vector<4x128xf32>
    %3 = arith.divf %1, %2 : vector<4x128xf32>
    %c0_3 = arith.constant 0 : index
    %c0_4 = arith.constant 0 : index
    %4 = vector.load %arg1[%c0_3, %c0_4] : memref<128x512xf32, #tpu.memory_space<vmem>>, vector<128x512xf32>
    %cst_5 = arith.constant dense<0.000000e+00> : vector<4x512xf32>
    %5 = tpu.matmul %3, %4, %cst_5 {dimension_numbers = #tpu.dot_dimension_numbers<[1], [0], [0], [1], [0, 0, 1, 1], [], []>} : vector<4x128xf32>, vector<128x512xf32>, vector<4x512xf32> -> vector<4x512xf32>
    %c0_6 = arith.constant 0 : index
    %c0_7 = arith.constant 0 : index
    %6 = vector.load %arg2[%c0_6, %c0_7] : memref<1x512xf32, #tpu.memory_space<vmem>>, vector<1x512xf32>
    %7 = vector.broadcast %6 : vector<1x512xf32> to vector<4x512xf32>
    %8 = arith.addf %5, %7 : vector<4x512xf32>
    %c0_8 = arith.constant 0 : index
    %c0_9 = arith.constant 0 : index
    %9 = vector.load %arg3[%c0_8, %c0_9] : memref<1x512xf32, #tpu.memory_space<vmem>>, vector<1x512xf32>
    %c0_10 = arith.constant 0 : index
    %c0_11 = arith.constant 0 : index
    %10 = vector.load %arg4[%c0_10, %c0_11] : memref<1x512xf32, #tpu.memory_space<vmem>>, vector<1x512xf32>
    %11 = tpu.iota {dimensions = array<i32: 0>} : vector<4x1xi32>
    %c2_i32 = arith.constant 2 : i32
    %12 = vector.broadcast %c2_i32 : i32 to vector<4x1xi32>
    %13 = arith.cmpi slt, %11, %12 : vector<4x1xi32>
    %14 = arith.extui %13 : vector<4x1xi1> to vector<4x1xi32>
    %15 = arith.sitofp %14 : vector<4x1xi32> to vector<4x1xf32>
    %16 = vector.broadcast %15 : vector<4x1xf32> to vector<4x512xf32>
    %17 = arith.mulf %8, %16 : vector<4x512xf32>
    %cst_12 = arith.constant dense<0.000000e+00> : vector<512xf32>
    %18 = vector.multi_reduction <add>, %17, %cst_12 [0] : vector<4x512xf32> to vector<512xf32>
    %19 = vector.shape_cast %18 : vector<512xf32> to vector<1x512xf32>
    %20 = arith.mulf %8, %8 : vector<4x512xf32>
    %21 = vector.broadcast %15 : vector<4x1xf32> to vector<4x512xf32>
    %22 = arith.mulf %20, %21 : vector<4x512xf32>
    %cst_13 = arith.constant dense<0.000000e+00> : vector<512xf32>
    %23 = vector.multi_reduction <add>, %22, %cst_13 [0] : vector<4x512xf32> to vector<512xf32>
    %24 = vector.shape_cast %23 : vector<512xf32> to vector<1x512xf32>
    %cst_14 = arith.constant dense<0.000000e+00> : vector<512xf32>
    %25 = vector.multi_reduction <add>, %8, %cst_14 [0] : vector<4x512xf32> to vector<512xf32>
    %26 = vector.shape_cast %25 : vector<512xf32> to vector<1x512xf32>
    %27 = arith.mulf %8, %8 : vector<4x512xf32>
    %cst_15 = arith.constant dense<0.000000e+00> : vector<512xf32>
    %28 = vector.multi_reduction <add>, %27, %cst_15 [0] : vector<4x512xf32> to vector<512xf32>
    %29 = vector.shape_cast %28 : vector<512xf32> to vector<1x512xf32>
    %cst_16 = arith.constant 5.000000e-01 : f32
    %30 = vector.broadcast %cst_16 : f32 to vector<1x512xf32>
    %31 = arith.mulf %19, %30 : vector<1x512xf32>
    %32 = arith.subf %26, %19 : vector<1x512xf32>
    %cst_17 = arith.constant 5.000000e-01 : f32
    %33 = vector.broadcast %cst_17 : f32 to vector<1x512xf32>
    %34 = arith.mulf %32, %33 : vector<1x512xf32>
    %cst_18 = arith.constant 5.000000e-01 : f32
    %35 = vector.broadcast %cst_18 : f32 to vector<1x512xf32>
    %36 = arith.mulf %24, %35 : vector<1x512xf32>
    %37 = arith.mulf %31, %31 : vector<1x512xf32>
    %38 = arith.subf %36, %37 : vector<1x512xf32>
    %39 = arith.subf %29, %24 : vector<1x512xf32>
    %cst_19 = arith.constant 5.000000e-01 : f32
    %40 = vector.broadcast %cst_19 : f32 to vector<1x512xf32>
    %41 = arith.mulf %39, %40 : vector<1x512xf32>
    %42 = arith.mulf %34, %34 : vector<1x512xf32>
    %43 = arith.subf %41, %42 : vector<1x512xf32>
    %44 = vector.broadcast %15 : vector<4x1xf32> to vector<4x512xf32>
    %45 = vector.broadcast %31 : vector<1x512xf32> to vector<4x512xf32>
    %46 = arith.mulf %44, %45 : vector<4x512xf32>
    %cst_20 = arith.constant 1.000000e+00 : f32
    %47 = vector.broadcast %cst_20 : f32 to vector<4x1xf32>
    %48 = arith.subf %47, %15 : vector<4x1xf32>
    %49 = vector.broadcast %48 : vector<4x1xf32> to vector<4x512xf32>
    %50 = vector.broadcast %34 : vector<1x512xf32> to vector<4x512xf32>
    %51 = arith.mulf %49, %50 : vector<4x512xf32>
    %52 = arith.addf %46, %51 : vector<4x512xf32>
    %53 = vector.broadcast %15 : vector<4x1xf32> to vector<4x512xf32>
    %54 = vector.broadcast %38 : vector<1x512xf32> to vector<4x512xf32>
    %55 = arith.mulf %53, %54 : vector<4x512xf32>
    %cst_21 = arith.constant 1.000000e+00 : f32
    %56 = vector.broadcast %cst_21 : f32 to vector<4x1xf32>
    %57 = arith.subf %56, %15 : vector<4x1xf32>
    %58 = vector.broadcast %57 : vector<4x1xf32> to vector<4x512xf32>
    %59 = vector.broadcast %43 : vector<1x512xf32> to vector<4x512xf32>
    %60 = arith.mulf %58, %59 : vector<4x512xf32>
    %61 = arith.addf %55, %60 : vector<4x512xf32>
    %cst_22 = arith.constant 0.000000e+00 : f32
    %62 = vector.broadcast %cst_22 : f32 to vector<4x512xf32>
    %63 = arith.maximumf %61, %62 : vector<4x512xf32>
    %64 = arith.subf %8, %52 : vector<4x512xf32>
    %cst_23 = arith.constant 9.99999974E-6 : f32
    %65 = vector.broadcast %cst_23 : f32 to vector<4x512xf32>
    %66 = arith.addf %63, %65 : vector<4x512xf32>
    %67 = math.rsqrt %66 : vector<4x512xf32>
    %68 = arith.mulf %64, %67 : vector<4x512xf32>
    %69 = vector.broadcast %9 : vector<1x512xf32> to vector<4x512xf32>
    %70 = arith.mulf %68, %69 : vector<4x512xf32>
    %71 = vector.broadcast %10 : vector<1x512xf32> to vector<4x512xf32>
    %72 = arith.addf %70, %71 : vector<4x512xf32>
    %cst_24 = arith.constant 0.000000e+00 : f32
    %73 = vector.broadcast %cst_24 : f32 to vector<4x512xf32>
    %74 = arith.maximumf %72, %73 : vector<4x512xf32>
    %c0_25 = arith.constant 0 : index
    %c0_26 = arith.constant 0 : index
    %75 = vector.load %arg5[%c0_25, %c0_26] : memref<512x512xf32, #tpu.memory_space<vmem>>, vector<512x512xf32>
    %cst_27 = arith.constant dense<0.000000e+00> : vector<4x512xf32>
    %76 = tpu.matmul %74, %75, %cst_27 {dimension_numbers = #tpu.dot_dimension_numbers<[1], [0], [0], [1], [0, 0, 1, 1], [], []>} : vector<4x512xf32>, vector<512x512xf32>, vector<4x512xf32> -> vector<4x512xf32>
    %c0_28 = arith.constant 0 : index
    %c0_29 = arith.constant 0 : index
    %77 = vector.load %arg6[%c0_28, %c0_29] : memref<1x512xf32, #tpu.memory_space<vmem>>, vector<1x512xf32>
    %78 = vector.broadcast %77 : vector<1x512xf32> to vector<4x512xf32>
    %79 = arith.addf %76, %78 : vector<4x512xf32>
    %c0_30 = arith.constant 0 : index
    %c0_31 = arith.constant 0 : index
    %80 = vector.load %arg7[%c0_30, %c0_31] : memref<1x512xf32, #tpu.memory_space<vmem>>, vector<1x512xf32>
    %c0_32 = arith.constant 0 : index
    %c0_33 = arith.constant 0 : index
    %81 = vector.load %arg8[%c0_32, %c0_33] : memref<1x512xf32, #tpu.memory_space<vmem>>, vector<1x512xf32>
    %82 = tpu.iota {dimensions = array<i32: 0>} : vector<4x1xi32>
    %c2_i32_34 = arith.constant 2 : i32
    %83 = vector.broadcast %c2_i32_34 : i32 to vector<4x1xi32>
    %84 = arith.cmpi slt, %82, %83 : vector<4x1xi32>
    %85 = arith.extui %84 : vector<4x1xi1> to vector<4x1xi32>
    %86 = arith.sitofp %85 : vector<4x1xi32> to vector<4x1xf32>
    %87 = vector.broadcast %86 : vector<4x1xf32> to vector<4x512xf32>
    %88 = arith.mulf %79, %87 : vector<4x512xf32>
    %cst_35 = arith.constant dense<0.000000e+00> : vector<512xf32>
    %89 = vector.multi_reduction <add>, %88, %cst_35 [0] : vector<4x512xf32> to vector<512xf32>
    %90 = vector.shape_cast %89 : vector<512xf32> to vector<1x512xf32>
    %91 = arith.mulf %79, %79 : vector<4x512xf32>
    %92 = vector.broadcast %86 : vector<4x1xf32> to vector<4x512xf32>
    %93 = arith.mulf %91, %92 : vector<4x512xf32>
    %cst_36 = arith.constant dense<0.000000e+00> : vector<512xf32>
    %94 = vector.multi_reduction <add>, %93, %cst_36 [0] : vector<4x512xf32> to vector<512xf32>
    %95 = vector.shape_cast %94 : vector<512xf32> to vector<1x512xf32>
    %cst_37 = arith.constant dense<0.000000e+00> : vector<512xf32>
    %96 = vector.multi_reduction <add>, %79, %cst_37 [0] : vector<4x512xf32> to vector<512xf32>
    %97 = vector.shape_cast %96 : vector<512xf32> to vector<1x512xf32>
    %98 = arith.mulf %79, %79 : vector<4x512xf32>
    %cst_38 = arith.constant dense<0.000000e+00> : vector<512xf32>
    %99 = vector.multi_reduction <add>, %98, %cst_38 [0] : vector<4x512xf32> to vector<512xf32>
    %100 = vector.shape_cast %99 : vector<512xf32> to vector<1x512xf32>
    %cst_39 = arith.constant 5.000000e-01 : f32
    %101 = vector.broadcast %cst_39 : f32 to vector<1x512xf32>
    %102 = arith.mulf %90, %101 : vector<1x512xf32>
    %103 = arith.subf %97, %90 : vector<1x512xf32>
    %cst_40 = arith.constant 5.000000e-01 : f32
    %104 = vector.broadcast %cst_40 : f32 to vector<1x512xf32>
    %105 = arith.mulf %103, %104 : vector<1x512xf32>
    %cst_41 = arith.constant 5.000000e-01 : f32
    %106 = vector.broadcast %cst_41 : f32 to vector<1x512xf32>
    %107 = arith.mulf %95, %106 : vector<1x512xf32>
    %108 = arith.mulf %102, %102 : vector<1x512xf32>
    %109 = arith.subf %107, %108 : vector<1x512xf32>
    %110 = arith.subf %100, %95 : vector<1x512xf32>
    %cst_42 = arith.constant 5.000000e-01 : f32
    %111 = vector.broadcast %cst_42 : f32 to vector<1x512xf32>
    %112 = arith.mulf %110, %111 : vector<1x512xf32>
    %113 = arith.mulf %105, %105 : vector<1x512xf32>
    %114 = arith.subf %112, %113 : vector<1x512xf32>
    %115 = vector.broadcast %86 : vector<4x1xf32> to vector<4x512xf32>
    %116 = vector.broadcast %102 : vector<1x512xf32> to vector<4x512xf32>
    %117 = arith.mulf %115, %116 : vector<4x512xf32>
    %cst_43 = arith.constant 1.000000e+00 : f32
    %118 = vector.broadcast %cst_43 : f32 to vector<4x1xf32>
    %119 = arith.subf %118, %86 : vector<4x1xf32>
    %120 = vector.broadcast %119 : vector<4x1xf32> to vector<4x512xf32>
    %121 = vector.broadcast %105 : vector<1x512xf32> to vector<4x512xf32>
    %122 = arith.mulf %120, %121 : vector<4x512xf32>
    %123 = arith.addf %117, %122 : vector<4x512xf32>
    %124 = vector.broadcast %86 : vector<4x1xf32> to vector<4x512xf32>
    %125 = vector.broadcast %109 : vector<1x512xf32> to vector<4x512xf32>
    %126 = arith.mulf %124, %125 : vector<4x512xf32>
    %cst_44 = arith.constant 1.000000e+00 : f32
    %127 = vector.broadcast %cst_44 : f32 to vector<4x1xf32>
    %128 = arith.subf %127, %86 : vector<4x1xf32>
    %129 = vector.broadcast %128 : vector<4x1xf32> to vector<4x512xf32>
    %130 = vector.broadcast %114 : vector<1x512xf32> to vector<4x512xf32>
    %131 = arith.mulf %129, %130 : vector<4x512xf32>
    %132 = arith.addf %126, %131 : vector<4x512xf32>
    %cst_45 = arith.constant 0.000000e+00 : f32
    %133 = vector.broadcast %cst_45 : f32 to vector<4x512xf32>
    %134 = arith.maximumf %132, %133 : vector<4x512xf32>
    %135 = arith.subf %79, %123 : vector<4x512xf32>
    %cst_46 = arith.constant 9.99999974E-6 : f32
    %136 = vector.broadcast %cst_46 : f32 to vector<4x512xf32>
    %137 = arith.addf %134, %136 : vector<4x512xf32>
    %138 = math.rsqrt %137 : vector<4x512xf32>
    %139 = arith.mulf %135, %138 : vector<4x512xf32>
    %140 = vector.broadcast %80 : vector<1x512xf32> to vector<4x512xf32>
    %141 = arith.mulf %139, %140 : vector<4x512xf32>
    %142 = vector.broadcast %81 : vector<1x512xf32> to vector<4x512xf32>
    %143 = arith.addf %141, %142 : vector<4x512xf32>
    %144 = tpu.iota {dimensions = array<i32: 0>} : vector<4x4xi32>
    %145 = tpu.iota {dimensions = array<i32: 1>} : vector<4x4xi32>
    %c2_i32_47 = arith.constant 2 : i32
    %146 = vector.broadcast %c2_i32_47 : i32 to vector<4x4xi32>
    %147 = arith.addi %144, %146 : vector<4x4xi32>
    %148 = arith.cmpi eq, %145, %147 : vector<4x4xi32>
    %c2_i32_48 = arith.constant 2 : i32
    %149 = vector.broadcast %c2_i32_48 : i32 to vector<4x4xi32>
    %150 = arith.addi %145, %149 : vector<4x4xi32>
    %151 = arith.cmpi eq, %150, %144 : vector<4x4xi32>
    %152 = arith.ori %148, %151 : vector<4x4xi1>
    %153 = arith.extui %152 : vector<4x4xi1> to vector<4x4xi32>
    %154 = arith.sitofp %153 : vector<4x4xi32> to vector<4x4xf32>
    %cst_49 = arith.constant dense<0.000000e+00> : vector<4x512xf32>
    %155 = tpu.matmul %154, %143, %cst_49 {dimension_numbers = #tpu.dot_dimension_numbers<[1], [0], [0], [1], [0, 0, 1, 1], [], []>} : vector<4x4xf32>, vector<4x512xf32>, vector<4x512xf32> -> vector<4x512xf32>
    %c0_50 = arith.constant 0 : index
    %c0_51 = arith.constant 0 : index
    %156 = vector.load %arg9[%c0_50, %c0_51] : memref<512x128xf32, #tpu.memory_space<vmem>>, vector<512x128xf32>
    %cst_52 = arith.constant dense<0.000000e+00> : vector<4x128xf32>
    %157 = tpu.matmul %143, %156, %cst_52 {dimension_numbers = #tpu.dot_dimension_numbers<[1], [0], [0], [1], [0, 0, 1, 1], [], []>} : vector<4x512xf32>, vector<512x128xf32>, vector<4x128xf32> -> vector<4x128xf32>
    %c0_53 = arith.constant 0 : index
    %c0_54 = arith.constant 0 : index
    %158 = vector.load %arg10[%c0_53, %c0_54] : memref<512x128xf32, #tpu.memory_space<vmem>>, vector<512x128xf32>
    %cst_55 = arith.constant dense<0.000000e+00> : vector<4x128xf32>
    %159 = tpu.matmul %155, %158, %cst_55 {dimension_numbers = #tpu.dot_dimension_numbers<[1], [0], [0], [1], [0, 0, 1, 1], [], []>} : vector<4x512xf32>, vector<512x128xf32>, vector<4x128xf32> -> vector<4x128xf32>
    %160 = arith.addf %157, %159 : vector<4x128xf32>
    %c0_56 = arith.constant 0 : index
    %c0_57 = arith.constant 0 : index
    %161 = vector.load %arg11[%c0_56, %c0_57] : memref<1x128xf32, #tpu.memory_space<vmem>>, vector<1x128xf32>
    %162 = vector.broadcast %161 : vector<1x128xf32> to vector<4x128xf32>
    %163 = arith.addf %160, %162 : vector<4x128xf32>
    %c0_58 = arith.constant 0 : index
    %c0_59 = arith.constant 0 : index
    %164 = vector.load %arg12[%c0_58, %c0_59] : memref<128x2xf32, #tpu.memory_space<vmem>>, vector<128x2xf32>
    %cst_60 = arith.constant dense<0.000000e+00> : vector<4x2xf32>
    %165 = tpu.matmul %163, %164, %cst_60 {dimension_numbers = #tpu.dot_dimension_numbers<[1], [0], [0], [1], [0, 0, 1, 1], [], []>} : vector<4x128xf32>, vector<128x2xf32>, vector<4x2xf32> -> vector<4x2xf32>
    %c0_61 = arith.constant 0 : index
    %c0_62 = arith.constant 0 : index
    %166 = vector.load %arg13[%c0_61, %c0_62] : memref<1x2xf32, #tpu.memory_space<vmem>>, vector<1x2xf32>
    %167 = vector.broadcast %166 : vector<1x2xf32> to vector<4x2xf32>
    %168 = arith.addf %165, %167 : vector<4x2xf32>
    %169 = vector.extract_strided_slice %168 {offsets = [0, 0], sizes = [2, 2], strides = [1, 1]} : vector<4x2xf32> to vector<2x2xf32>
    %c0_63 = arith.constant 0 : index
    %c0_64 = arith.constant 0 : index
    %170 = vector.load %arg14[%c0_63, %c0_64] : memref<2x2xf32, #tpu.memory_space<vmem>>, vector<2x2xf32>
    tpu.vector_store %arg14[%c0_63, %c0_64], %169 {strides = array<i32>} : memref<2x2xf32, #tpu.memory_space<vmem>>, vector<2x2xf32>,
    return
  }
}

</mosaic_0001>

<bundles_post_ra>
// kernel: cdnet_forward.11
= control target key start
LH: loop header
LB: loop body
LE: loop exit
PB: predicated region body
PF: predicated region fallthrough
CT: control target
= control target key end

     0   :  { %vm129_vm0 = vcmask 523264   ;;  %s1507_s1 = inlined_call_operand.vmem [shape: f32[576,64], index: 1, kind: input, shape index: {}]   ;;  %s1508_s0 = inlined_call_operand.vmem [shape: f32[64,576], index: 0, kind: input, shape index: {}]   ;;  %s1509_s2 = inlined_call_operand.vmem [shape: f32[1,64], index: 2, kind: input, shape index: {}]   ;;  %s1510_s3 = inlined_call_operand.vmem [shape: f32[1,64], index: 3, kind: input, shape index: {}]   ;;  %s1511_s4 = inlined_call_operand.vmem [shape: f32[64,64], index: 4, kind: output, shape index: {}]  }
   0x1   :  { %v73_v0 = vld [vmem:[%s1507_s1 + $0x80] sm:$0xff]  ;;  %v74_v1 = vld [vmem:[%s1507_s1 + $0x88] sm:$0xff]  ;;  %v75_v11 = vld [vmem:[%s1507_s1 + $0x90] sm:$0xff] }
   0x2   :  { %v105_v2 = vld [vmem:[%s1507_s1 + $0x180] sm:$0xff]  ;;  %v932_v3 = vpack.c.bf16 %v74_v1, %v73_v0  ;;  %v106_v4 = vld [vmem:[%s1507_s1 + $0x188] sm:$0xff]  ;;  %v76_v13 = vld [vmem:[%s1507_s1 + $0x98] sm:$0xff] }
   0x3   :  { %v57_v5 = vld [vmem:[%s1507_s1] sm:$0xff]  ;;  %v58_v6 = vld [vmem:[%s1507_s1 + $0x8] sm:$0xff]  ;;  %v964_v7 = vpack.c.bf16 %v106_v4, %v105_v2  ;;  %v107_v14 = vld [vmem:[%s1507_s1 + $0x190] sm:$0xff]  ;;  %v936_v16 = vpack.c.bf16 %v76_v13, %v75_v11 }
   0x4   :  { %v934_v8 = vpack.c.bf16 %v58_v6, %v57_v5  ;;  %v89_v9 = vld [vmem:[%s1507_s1 + $0x100] sm:$0xff]  ;;  %v90_v10 = vld [vmem:[%s1507_s1 + $0x108] sm:$0xff]  ;;  %933 = vmatprep.subr.bf16.mxu0 %v932_v3  ;;  %v108_v15 = vld [vmem:[%s1507_s1 + $0x198] sm:$0xff] }
   0x5   :  { %v966_v12 = vpack.c.bf16 %v90_v10, %v89_v9  ;;  %965 = vmatprep.subr.bf16.mxu1 %v964_v7  ;;  %v968_v17 = vpack.c.bf16 %v108_v15, %v107_v14  ;;  %v59_v18 = vld [vmem:[%s1507_s1 + $0x10] sm:$0xff]  ;;  %v60_v19 = vld [vmem:[%s1507_s1 + $0x18] sm:$0xff]  ;;  %v77_v23 = vld [vmem:[%s1507_s1 + $0xa0] sm:$0xff] }
   0x6   :  { %935 = vmatpush3.bf16.msra.mxu0 %v934_v8  ;;  %v91_v20 = vld [vmem:[%s1507_s1 + $0x110] sm:$0xff]  ;;  %v938_v21 = vpack.c.bf16 %v60_v19, %v59_v18  ;;  %v92_v22 = vld [vmem:[%s1507_s1 + $0x118] sm:$0xff]  ;;  %v78_v24 = vld [vmem:[%s1507_s1 + $0xa8] sm:$0xff] }
   0x7   :  { %967 = vmatpush3.bf16.msra.mxu1 %v966_v12  ;;  %937 = vmatprep.subr.bf16.mxu0 %v936_v16  ;;  %v970_v25 = vpack.c.bf16 %v92_v22, %v91_v20  ;;  %v940_v26 = vpack.c.bf16 %v78_v24, %v77_v23  ;;  %v109_v27 = vld [vmem:[%s1507_s1 + $0x1a0] sm:$0xff]  ;;  %v110_v28 = vld [vmem:[%s1507_s1 + $0x1a8] sm:$0xff]  ;;  %v79_v35 = vld [vmem:[%s1507_s1 + $0xb0] sm:$0xff] }
   0x8   :  { %969 = vmatprep.subr.bf16.mxu1 %v968_v17  ;;  %v61_v29 = vld [vmem:[%s1507_s1 + $0x20] sm:$0xff]  ;;  %v972_v30 = vpack.c.bf16 %v110_v28, %v109_v27  ;;  %v62_v31 = vld [vmem:[%s1507_s1 + $0x28] sm:$0xff]  ;;  %v80_v36 = vld [vmem:[%s1507_s1 + $0xb8] sm:$0xff] }
   0x9   :  { %v93_v32 = vld [vmem:[%s1507_s1 + $0x120] sm:$0xff]  ;;  %v94_v33 = vld [vmem:[%s1507_s1 + $0x128] sm:$0xff]  ;;  %v942_v34 = vpack.c.bf16 %v62_v31, %v61_v29  ;;  %v111_v37 = vld [vmem:[%s1507_s1 + $0x1b0] sm:$0xff]  ;;  %v944_v39 = vpack.c.bf16 %v80_v36, %v79_v35 }
   0xa   :  { %939 = vmatpush3.bf16.msra.mxu0 %v938_v21  ;;  %v974_v38 = vpack.c.bf16 %v94_v33, %v93_v32  ;;  %v112_v40 = vld [vmem:[%s1507_s1 + $0x1b8] sm:$0xff]  ;;  %v63_v41 = vld [vmem:[%s1507_s1 + $0x30] sm:$0xff]  ;;  %v81_v46 = vld [vmem:[%s1507_s1 + $0xc0] sm:$0xff] }
   0xb   :  { %971 = vmatpush3.bf16.msra.mxu1 %v970_v25  ;;  %941 = vmatprep.subr.bf16.mxu0 %v940_v26  ;;  %v64_v42 = vld [vmem:[%s1507_s1 + $0x38] sm:$0xff]  ;;  %v976_v43 = vpack.c.bf16 %v112_v40, %v111_v37  ;;  %v95_v44 = vld [vmem:[%s1507_s1 + $0x130] sm:$0xff]  ;;  %v82_v47 = vld [vmem:[%s1507_s1 + $0xc8] sm:$0xff] }
   0xc   :  { %973 = vmatprep.subr.bf16.mxu1 %v972_v30  ;;  %v96_v45 = vld [vmem:[%s1507_s1 + $0x138] sm:$0xff]  ;;  %v113_v48 = vld [vmem:[%s1507_s1 + $0x1c0] sm:$0xff]  ;;  %v114_v49 = vld [vmem:[%s1507_s1 + $0x1c8] sm:$0xff]  ;;  %v946_v50 = vpack.c.bf16 %v64_v42, %v63_v41  ;;  %v948_v52 = vpack.c.bf16 %v82_v47, %v81_v46 }
   0xd   :  { %v978_v51 = vpack.c.bf16 %v96_v45, %v95_v44  ;;  %v65_v53 = vld [vmem:[%s1507_s1 + $0x40] sm:$0xff]  ;;  %v66_v54 = vld [vmem:[%s1507_s1 + $0x48] sm:$0xff]  ;;  %v980_v56 = vpack.c.bf16 %v114_v49, %v113_v48  ;;  %v83_v58 = vld [vmem:[%s1507_s1 + $0xd0] sm:$0xff] }
   0xe   :  { %943 = vmatpush3.bf16.msra.mxu0 %v942_v34  ;;  %v97_v55 = vld [vmem:[%s1507_s1 + $0x140] sm:$0xff]  ;;  %v98_v57 = vld [vmem:[%s1507_s1 + $0x148] sm:$0xff]  ;;  %v84_v59 = vld [vmem:[%s1507_s1 + $0xd8] sm:$0xff]  ;;  %v950_v62 = vpack.c.bf16 %v66_v54, %v65_v53 }
   0xf   :  { %975 = vmatpush3.bf16.msra.mxu1 %v974_v38  ;;  %945 = vmatprep.subr.bf16.mxu0 %v944_v39  ;;  %v115_v60 = vld [vmem:[%s1507_s1 + $0x1d0] sm:$0xff]  ;;  %v116_v61 = vld [vmem:[%s1507_s1 + $0x1d8] sm:$0xff]  ;;  %v982_v63 = vpack.c.bf16 %v98_v57, %v97_v55  ;;  %v952_v0 = vpack.c.bf16 %v84_v59, %v83_v58  ;;  %v85_v6 = vld [vmem:[%s1507_s1 + $0xe0] sm:$0xff] }
  0x10   :  { %977 = vmatprep.subr.bf16.mxu1 %v976_v43  ;;  %v67_v1 = vld [vmem:[%s1507_s1 + $0x50] sm:$0xff]  ;;  %v68_v2 = vld [vmem:[%s1507_s1 + $0x58] sm:$0xff]  ;;  %v984_v4 = vpack.c.bf16 %v116_v61, %v115_v60  ;;  %v86_v7 = vld [vmem:[%s1507_s1 + $0xe8] sm:$0xff] }
  0x11   :  { %v99_v3 = vld [vmem:[%s1507_s1 + $0x150] sm:$0xff]  ;;  %v100_v5 = vld [vmem:[%s1507_s1 + $0x158] sm:$0xff]  ;;  %v117_v8 = vld [vmem:[%s1507_s1 + $0x1e0] sm:$0xff]  ;;  %v954_v10 = vpack.c.bf16 %v68_v2, %v67_v1  ;;  %v956_v14 = vpack.c.bf16 %v86_v7, %v85_v6 }
  0x12   :  { %947 = vmatpush3.bf16.msra.mxu0 %v946_v50  ;;  %v118_v9 = vld [vmem:[%s1507_s1 + $0x1e8] sm:$0xff]  ;;  %v69_v11 = vld [vmem:[%s1507_s1 + $0x60] sm:$0xff]  ;;  %v986_v13 = vpack.c.bf16 %v100_v5, %v99_v3  ;;  %v20_v17 = vld [vmem:[%s1508_s0 + $0x18] sm:$0xff] }
  0x13   :  { %979 = vmatpush3.bf16.msra.mxu1 %v978_v51  ;;  %949 = vmatprep.subr.bf16.mxu0 %v948_v52  ;;  %v70_v12 = vld [vmem:[%s1507_s1 + $0x68] sm:$0xff]  ;;  %v101_v15 = vld [vmem:[%s1507_s1 + $0x160] sm:$0xff]  ;;  %v988_v18 = vpack.c.bf16 %v118_v9, %v117_v8  ;;  %v87_v20 = vld [vmem:[%s1507_s1 + $0xf0] sm:$0xff] }
  0x14   :  { %981 = vmatprep.subr.bf16.mxu1 %v980_v56  ;;  %v18_v16 = vld [vmem:[%s1508_s0 + $0x8] sm:$0xff]  ;;  %v88_v21 = vld [vmem:[%s1507_s1 + $0xf8] sm:$0xff]  ;;  %v119_v22 = vld [vmem:[%s1507_s1 + $0x1f0] sm:$0xff]  ;;  %323 = vmatprep.mubr.f32.mxu1 %v20_v17  ;;  %v958_v24 = vpack.c.bf16 %v70_v12, %v69_v11 }
  0x15   :  { %v102_v19 = vld [vmem:[%s1507_s1 + $0x168] sm:$0xff]  ;;  %218 = vmatprep.mubr.f32.mxu0 %v18_v16  ;;  %v120_v23 = vld [vmem:[%s1507_s1 + $0x1f8] sm:$0xff]  ;;  %v960_v26 = vpack.c.bf16 %v88_v21, %v87_v20  ;;  %v71_v27 = vld [vmem:[%s1507_s1 + $0x70] sm:$0xff] }
  0x16   :  { %951 = vmatpush3.bf16.msra.mxu0 %v950_v62  ;;  %v990_v25 = vpack.c.bf16 %v102_v19, %v101_v15  ;;  %v72_v28 = vld [vmem:[%s1507_s1 + $0x78] sm:$0xff]  ;;  %v103_v29 = vld [vmem:[%s1507_s1 + $0x170] sm:$0xff]  ;;  %v992_v30 = vpack.c.bf16 %v120_v23, %v119_v22  ;;  %v121_v32 = vld [vmem:[%s1507_s1 + $0x200] sm:$0xff] }
  0x17   :  { %983 = vmatpush3.bf16.msra.mxu1 %v982_v63  ;;  %953 = vmatprep.subr.bf16.mxu0 %v952_v0  ;;  %v104_v31 = vld [vmem:[%s1507_s1 + $0x178] sm:$0xff]  ;;  %v122_v33 = vld [vmem:[%s1507_s1 + $0x208] sm:$0xff]  ;;  %v962_v34 = vpack.c.bf16 %v72_v28, %v71_v27  ;;  %v123_v37 = vld [vmem:[%s1507_s1 + $0x210] sm:$0xff] }
  0x18   :  { %985 = vmatprep.subr.bf16.mxu1 %v984_v4  ;;  %v994_v35 = vpack.c.bf16 %v104_v31, %v103_v29  ;;  %v996_v36 = vpack.c.bf16 %v122_v33, %v121_v32  ;;  %v124_v38 = vld [vmem:[%s1507_s1 + $0x218] sm:$0xff]  ;;  %v17_v39 = vld [vmem:[%s1508_s0] sm:$0xff]  ;;  %v19_v40 = vld [vmem:[%s1508_s0 + $0x10] sm:$0xff] }
  0x19   :  { %v23_v41 = vld [vmem:[%s1508_s0 + $0x30] sm:$0xff]  ;;  %v25_v42 = vld [vmem:[%s1508_s0 + $0x40] sm:$0xff]  ;;  %v1000_v43 = vpack.c.bf16 %v124_v38, %v123_v37  ;;  %v126_v45 = vld [vmem:[%s1507_s1 + $0x228] sm:$0xff] }
  0x1a   :  { %955 = vmatpush3.bf16.msra.mxu0 %v954_v10  ;;  %v125_v44 = vld [vmem:[%s1507_s1 + $0x220] sm:$0xff]  ;;  %v22_v46 = vld [vmem:[%s1508_s0 + $0x28] sm:$0xff]  ;;  %v24_v47 = vld [vmem:[%s1508_s0 + $0x38] sm:$0xff] }
  0x1b   :  { %987 = vmatpush3.bf16.msra.mxu1 %v986_v13  ;;  %957 = vmatprep.subr.bf16.mxu0 %v956_v14  ;;  %v28_v48 = vld [vmem:[%s1508_s0 + $0x58] sm:$0xff]  ;;  %v30_v49 = vld [vmem:[%s1508_s0 + $0x68] sm:$0xff]  ;;  %v1004_v50 = vpack.c.bf16 %v126_v45, %v125_v44  ;;  %v127_v51 = vld [vmem:[%s1507_s1 + $0x230] sm:$0xff] }
  0x1c   :  { %989 = vmatprep.subr.bf16.mxu1 %v988_v18  ;;  %v128_v52 = vld [vmem:[%s1507_s1 + $0x238] sm:$0xff]  ;;  %v27_v53 = vld [vmem:[%s1508_s0 + $0x50] sm:$0xff]  ;;  %v29_v54 = vld [vmem:[%s1508_s0 + $0x60] sm:$0xff] }
  0x1d   :  { %v33_v55 = vld [vmem:[%s1508_s0 + $0x80] sm:$0xff]  ;;  %v35_v56 = vld [vmem:[%s1508_s0 + $0x90] sm:$0xff]  ;;  %v1008_v57 = vpack.c.bf16 %v128_v52, %v127_v51  ;;  %v32_v58 = vld [vmem:[%s1508_s0 + $0x78] sm:$0xff] }
  0x1e   :  { %959 = vmatpush3.bf16.msra.mxu0 %v958_v24  ;;  %v34_v59 = vld [vmem:[%s1508_s0 + $0x88] sm:$0xff]  ;;  %v40_v61 = vld [vmem:[%s1508_s0 + $0xb8] sm:$0xff]  ;;  %v37_v62 = vld [vmem:[%s1508_s0 + $0xa0] sm:$0xff] }
  0x1f   :  { %991 = vmatpush3.bf16.msra.mxu1 %v990_v25  ;;  %961 = vmatprep.subr.bf16.mxu0 %v960_v26  ;;  %v38_v60 = vld [vmem:[%s1508_s0 + $0xa8] sm:$0xff]  ;;  %v39_v63 = vld [vmem:[%s1508_s0 + $0xb0] sm:$0xff]  ;;  %v45_v1 = vld [vmem:[%s1508_s0 + $0xe0] sm:$0xff] }
  0x20   :  { %993 = vmatprep.subr.bf16.mxu1 %v992_v30  ;;  %v43_v0 = vld [vmem:[%s1508_s0 + $0xd0] sm:$0xff]  ;;  %v42_v2 = vld [vmem:[%s1508_s0 + $0xc8] sm:$0xff]  ;;  %v44_v3 = vld [vmem:[%s1508_s0 + $0xd8] sm:$0xff] }
  0x21   :  { %v48_v4 = vld [vmem:[%s1508_s0 + $0xf8] sm:$0xff]  ;;  %v50_v5 = vld [vmem:[%s1508_s0 + $0x108] sm:$0xff]  ;;  %v47_v6 = vld [vmem:[%s1508_s0 + $0xf0] sm:$0xff] }
  0x22   :  { %963 = vmatpush3.bf16.msra.mxu0 %v962_v34  ;;  %v49_v7 = vld [vmem:[%s1508_s0 + $0x100] sm:$0xff]  ;;  %v55_v9 = vld [vmem:[%s1508_s0 + $0x130] sm:$0xff]  ;;  %v52_v10 = vld [vmem:[%s1508_s0 + $0x118] sm:$0xff] }
  0x23   :  { %995 = vmatpush3.bf16.msra.mxu1 %v994_v35  ;;  %997 = vmatprep.subr.bf16.mxu0 %v996_v36  ;;  %v53_v8 = vld [vmem:[%s1508_s0 + $0x120] sm:$0xff]  ;;  %v54_v11 = vld [vmem:[%s1508_s0 + $0x128] sm:$0xff]  ;;  %v31_v16 = vld [vmem:[%s1508_s0 + $0x70] sm:$0xff] }
  0x24   :  { %1012 = vmatprep.subr.bf16.mxu1 %v996_v36  ;;  %v21_v12 = vld [vmem:[%s1508_s0 + $0x20] sm:$0xff]  ;;  %v26_v14 = vld [vmem:[%s1508_s0 + $0x48] sm:$0xff]  ;;  %v51_v17 = vld [vmem:[%s1508_s0 + $0x110] sm:$0xff] }
  0x25   :  { %219 = vmatmul.mubr.f32.vlgmr.msra.gmra.mrb[0].mxu0 %v17_v39  ;;  %v41_v13 = vld [vmem:[%s1508_s0 + $0xc0] sm:$0xff]  ;;  %v46_v15 = vld [vmem:[%s1508_s0 + $0xe8] sm:$0xff]  ;;  %v36_v18 = vld [vmem:[%s1508_s0 + $0x98] sm:$0xff] }
  0x26   :  { %324 = vmatmul.mubr.f32.vlgmr.msra.gmra.mrb[0].mxu1 %v19_v40  ;;  %999 = vmatpush3.bf16.msra.mxu0 %v996_v36  ;;  %v56_v19 = vld [vmem:[%s1508_s0 + $0x138] sm:$0xff] }
  0x27   :  { %223 = vmatprep.mubr.f32.mxu0 %v23_v41  ;;  %328 = vmatprep.mubr.f32.mxu1 %v25_v42 }
  0x28   :  { %1016 = vmatpush3.bf16.msra.mxu1 %v996_v36  ;;  %1001 = vmatprep.subr.bf16.mxu0 %v1000_v43 }
  0x29   :  { %224 = vmatmul.mubr.f32.gmra.mrb[2].mxu0 %v22_v46  ;;  %1013 = vmatprep.subr.bf16.mxu1 %v1000_v43 }
  0x2a   :  { %329 = vmatmul.mubr.f32.gmra.mrb[2].mxu1 %v24_v47  ;;  %228 = vmatprep.mubr.f32.mxu0 %v28_v48 }
  0x2b   :  { %333 = vmatprep.mubr.f32.mxu1 %v30_v49  ;;  %1003 = vmatpush3.bf16.msra.mxu0 %v1000_v43 }
  0x2c   :  { %1017 = vmatpush3.bf16.msra.mxu1 %v1000_v43  ;;  %1005 = vmatprep.subr.bf16.mxu0 %v1004_v50 }
  0x2d   :  { %229 = vmatmul.mubr.f32.gmra.mrb[4].mxu0 %v27_v53  ;;  %1014 = vmatprep.subr.bf16.mxu1 %v1004_v50 }
  0x2e   :  { %334 = vmatmul.mubr.f32.gmra.mrb[4].mxu1 %v29_v54  ;;  %233 = vmatprep.mubr.f32.mxu0 %v33_v55 }
  0x2f   :  { %338 = vmatprep.mubr.f32.mxu1 %v35_v56  ;;  %1007 = vmatpush3.bf16.msra.mxu0 %v1004_v50 }
  0x30   :  { %1018 = vmatpush3.bf16.msra.mxu1 %v1004_v50  ;;  %1009 = vmatprep.subr.bf16.mxu0 %v1008_v57 }
  0x31   :  { %234 = vmatmul.mubr.f32.gmra.mrb[6].mxu0 %v32_v58  ;;  %1015 = vmatprep.subr.bf16.mxu1 %v1008_v57 }
  0x32   :  { %339 = vmatmul.mubr.f32.gmra.mrb[6].mxu1 %v34_v59  ;;  %238 = vmatprep.mubr.f32.mxu0 %v38_v60 }
  0x33   :  { %343 = vmatprep.mubr.f32.mxu1 %v40_v61  ;;  %1011 = vmatpush3.bf16.msra.mxu0 %v1008_v57 }
  0x34   :  { %1019 = vmatpush3.bf16.msra.mxu1 %v1008_v57 }
  0x35   :  { %239 = vmatmul.mubr.f32.gmra.mrb[8].mxu0 %v37_v62 }
  0x36   :  { %344 = vmatmul.mubr.f32.gmra.mrb[8].mxu1 %v39_v63  ;;  %243 = vmatprep.mubr.f32.mxu0 %v43_v0 }
  0x37   :  { %348 = vmatprep.mubr.f32.mxu1 %v45_v1 }
  0x39   :  { %244 = vmatmul.mubr.f32.gmra.mrb[10].mxu0 %v42_v2 }
  0x3a   :  { %349 = vmatmul.mubr.f32.gmra.mrb[10].mxu1 %v44_v3  ;;  %248 = vmatprep.mubr.f32.mxu0 %v48_v4 }
  0x3b   :  { %353 = vmatprep.mubr.f32.mxu1 %v50_v5 }
  0x3d   :  { %249 = vmatmul.mubr.f32.gmra.mrb[12].mxu0 %v47_v6 }
  0x3e   :  { %354 = vmatmul.mubr.f32.gmra.mrb[12].mxu1 %v49_v7  ;;  %253 = vmatprep.mubr.f32.mxu0 %v53_v8 }
  0x3f   :  { %358 = vmatprep.mubr.f32.mxu1 %v55_v9 }
  0x41   :  { %254 = vmatmul.mubr.f32.gmra.mrb[14].mxu0 %v52_v10 }
  0x42   :  { %359 = vmatmul.mubr.f32.gmra.mrb[14].mxu1 %v54_v11  ;;  %920 = vmatprep.mubr.msk.f32.mxu0 %vm129_vm0, %v21_v12 }
  0x43   :  { %926 = vmatprep.mubr.msk.f32.mxu1 %vm129_vm0, %v41_v13 }
  0x45   :  { %921 = vmatmul.mubr.msk.f32.vlgmr.msra.gmra.mrb[16].mxu0 %vm129_vm0, %v26_v14 }
  0x46   :  { %927 = vmatmul.mubr.msk.f32.vlgmr.msra.gmra.mrb[16].mxu1 %vm129_vm0, %v46_v15  ;;  %923 = vmatprep.mubr.msk.f32.mxu0 %vm129_vm0, %v31_v16 }
  0x47   :  { %929 = vmatprep.mubr.msk.f32.mxu1 %vm129_vm0, %v51_v17 }
  0x49   :  { %924 = vmatmul.mubr.msk.f32.gmra.mrb[18].mxu0 %vm129_vm0, %v36_v18 }
  0x4a   :  { %930 = vmatmul.mubr.msk.f32.gmra.mrb[18].mxu1 %vm129_vm0, %v56_v19 }
  0xf8   :  { %v808_v20 = vpop.f32.mrb[0].mxu0 }
  0xf9   :  { %v864_v21 = vpop.f32.mrb[0].mxu1  ;;  %v809_v22 = vpop.f32.mrb[1].mxu0 }
  0xfa   :  { %v810_v23 = vadd.f32 %v809_v22, %v808_v20  ;;  %v865_v24 = vpop.f32.mrb[1].mxu1 }
  0xfb   :  { %v866_v25 = vadd.f32 %v865_v24, %v864_v21 }
  0xfc   :  { %v811_v26 = vpop.f32.mrb[2].mxu0 }
  0xfd   :  { %v867_v27 = vpop.f32.mrb[2].mxu1  ;;  %v812_v28 = vpop.f32.mrb[3].mxu0  ;;  %v326_v29 = vadd.f32 %v866_v25, %v810_v23 }
  0xfe   :  { %v813_v30 = vadd.f32 %v812_v28, %v811_v26  ;;  %v868_v31 = vpop.f32.mrb[3].mxu1 }
  0xff   :  { %v869_v32 = vadd.f32 %v868_v31, %v867_v27 }
 0x100   :  { %v814_v33 = vpop.f32.mrb[4].mxu0 }
 0x101   :  { %v870_v34 = vpop.f32.mrb[4].mxu1  ;;  %v815_v35 = vpop.f32.mrb[5].mxu0  ;;  %v331_v36 = vadd.f32 %v869_v32, %v813_v30 }
 0x102   :  { %v816_v37 = vadd.f32 %v815_v35, %v814_v33  ;;  %v871_v38 = vpop.f32.mrb[5].mxu1 }
 0x103   :  { %v872_v39 = vadd.f32 %v871_v38, %v870_v34 }
 0x104   :  { %v817_v40 = vpop.f32.mrb[6].mxu0 }
 0x105   :  { %v873_v41 = vpop.f32.mrb[6].mxu1  ;;  %v818_v42 = vpop.f32.mrb[7].mxu0  ;;  %v336_v43 = vadd.f32 %v872_v39, %v816_v37 }
 0x106   :  { %v819_v44 = vadd.f32 %v818_v42, %v817_v40  ;;  %v874_v45 = vpop.f32.mrb[7].mxu1 }
 0x107   :  { %v875_v46 = vadd.f32 %v874_v45, %v873_v41 }
 0x108   :  { %v820_v47 = vpop.f32.mrb[8].mxu0 }
 0x109   :  { %v876_v48 = vpop.f32.mrb[8].mxu1  ;;  %v821_v49 = vpop.f32.mrb[9].mxu0  ;;  %v341_v50 = vadd.f32 %v875_v46, %v819_v44 }
 0x10a   :  { %v822_v51 = vadd.f32 %v821_v49, %v820_v47  ;;  %v877_v52 = vpop.f32.mrb[9].mxu1 }
 0x10b   :  { %v878_v53 = vadd.f32 %v877_v52, %v876_v48 }
 0x10c   :  { %v823_v54 = vpop.f32.mrb[10].mxu0 }
 0x10d   :  { %v879_v55 = vpop.f32.mrb[10].mxu1  ;;  %v824_v56 = vpop.f32.mrb[11].mxu0  ;;  %v346_v57 = vadd.f32 %v878_v53, %v822_v51 }
 0x10e   :  { %v825_v58 = vadd.f32 %v824_v56, %v823_v54  ;;  %v880_v59 = vpop.f32.mrb[11].mxu1 }
 0x10f   :  { %v881_v60 = vadd.f32 %v880_v59, %v879_v55 }
 0x110   :  { %v826_v61 = vpop.f32.mrb[12].mxu0 }
 0x111   :  { %v882_v62 = vpop.f32.mrb[12].mxu1  ;;  %v827_v63 = vpop.f32.mrb[13].mxu0  ;;  %v351_v0 = vadd.f32 %v881_v60, %v825_v58 }
 0x112   :  { %v828_v1 = vadd.f32 %v827_v63, %v826_v61  ;;  %v883_v2 = vpop.f32.mrb[13].mxu1 }
 0x113   :  { %v884_v3 = vadd.f32 %v883_v2, %v882_v62 }
 0x114   :  { %v829_v4 = vpop.f32.mrb[14].mxu0 }
 0x115   :  { %v885_v5 = vpop.f32.mrb[14].mxu1  ;;  %v830_v6 = vpop.f32.mrb[15].mxu0  ;;  %v356_v7 = vadd.f32 %v884_v3, %v828_v1 }
 0x116   :  { %v831_v8 = vadd.f32 %v830_v6, %v829_v4  ;;  %v886_v9 = vpop.f32.mrb[15].mxu1 }
 0x117   :  { %v887_v10 = vadd.f32 %v886_v9, %v885_v5 }
 0x118   :  { %v922_v11 = vpop.f32.mrb[16].mxu0 }
 0x119   :  { %v1393_v12 = vadd.f32 %v922_v11, %v331_v36  ;;  %v928_v13 = vpop.f32.mrb[16].mxu1  ;;  %v430_v14 = vpop.f32.mrb[17].mxu0  ;;  %v361_v15 = vadd.f32 %v887_v10, %v831_v8 }
 0x11a   :  { %v1395_v16 = vadd.f32 %v928_v13, %v351_v0  ;;  %v1397_v17 = vadd.f32 %v430_v14, %v326_v29  ;;  %v450_v18 = vpop.f32.mrb[17].mxu1 }
 0x11b   :  { %v513_v19 = vsel %vm129_vm0, %v1393_v12, 0.0  ;;  %v534_v20 = vmul.f32 %v1393_v12, %v1393_v12  ;;  %v1403_v21 = vadd.f32 %v450_v18, %v346_v57 }
 0x11c   :  { %v512_v22 = vsel %vm129_vm0, %v1397_v17, 0.0  ;;  %v925_v23 = vpop.f32.mrb[18].mxu0  ;;  %v533_v26 = vmul.f32 %v1397_v17, %v1397_v17  ;;  %v509_v33 = vmul.f32 0.0, %v1395_v16  ;;  %v538_v38 = vmul.f32 %v1395_v16, %v1395_v16 }
 0x11d   :  { %v550_v24 = vsel %vm129_vm0, %v534_v20, 0.0  ;;  %v514_v25 = vadd.f32 %v513_v19, %v512_v22  ;;  %v931_v27 = vpop.f32.mrb[18].mxu1  ;;  %v440_v28 = vpop.f32.mrb[19].mxu0  ;;  %v1411_v31 = vadd.f32 %v925_v23, %v341_v50  ;;  %v537_v36 = vmul.f32 %v1403_v21, %v1403_v21 }
 0x11e   :  { %v460_v29 = vpop.f32.mrb[19].mxu1  ;;  %v549_v30 = vsel %vm129_vm0, %v533_v26, 0.0  ;;  %v1414_v34 = vadd.f32 %v931_v27, %v361_v15  ;;  %v1416_v35 = vadd.f32 %v440_v28, %v336_v43  ;;  %v508_v39 = vmul.f32 0.0, %v1403_v21 }
 0x11f   :  { %v551_v32 = vadd.f32 %v550_v24, %v549_v30  ;;  %v1420_v37 = vadd.f32 %v460_v29, %v356_v7  ;;  %v536_v40 = vmul.f32 %v1411_v31, %v1411_v31  ;;  %v521_v43 = vsel %vm129_vm0, %v509_v33, 0.0 }
 0x120   :  { %v515_v41 = vsel %vm129_vm0, %v1416_v35, 0.0  ;;  %v535_v42 = vmul.f32 %v1416_v35, %v1416_v35  ;;  %v579_v44 = vsel %vm129_vm0, %v1395_v16, 0.0  ;;  %v545_v46 = vmul.f32 0.0, %v537_v36 }
 0x121   :  { %v516_v45 = vadd.f32 %v515_v41, %v514_v25  ;;  %v517_v47 = vsel %vm129_vm0, %v1411_v31, 0.0  ;;  %v539_v49 = vmul.f32 %v1420_v37, %v1420_v37  ;;  %v546_v50 = vmul.f32 0.0, %v538_v38 }
 0x122   :  { %v552_v48 = vsel %vm129_vm0, %v535_v42, 0.0  ;;  %v519_v51 = vsel %vm129_vm0, %v508_v39, 0.0  ;;  %v577_v54 = vsel %vm129_vm0, %v1403_v21, 0.0  ;;  %v554_v55 = vsel %vm129_vm0, %v536_v40, 0.0 }
 0x123   :  { %v518_v52 = vadd.f32 %v517_v47, %v516_v45  ;;  %v553_v53 = vadd.f32 %v552_v48, %v551_v32  ;;  %v540_v56 = vmul.f32 %v1414_v34, %v1414_v34  ;;  %v510_v57 = vmul.f32 0.0, %v1420_v37 }
 0x124   :  { %v600_v58 = vsel %vm129_vm0, %v538_v38, 0.0  ;;  %v556_v62 = vsel %vm129_vm0, %v545_v46, 0.0  ;;  %v598_v63 = vsel %vm129_vm0, %v537_v36, 0.0  ;;  %v511_v0 = vmul.f32 0.0, %v1414_v34 }
 0x125   :  { %v520_v59 = vadd.f32 %v519_v51, %v518_v52  ;;  %v555_v60 = vadd.f32 %v554_v55, %v553_v53  ;;  %v578_v61 = vadd.f32 %v577_v54, %v518_v52  ;;  %v547_v1 = vmul.f32 0.0, %v539_v49 }
 0x126   :  { %v558_v6 = vsel %vm129_vm0, %v546_v50, 0.0  ;;  %v548_v7 = vmul.f32 0.0, %v540_v56  ;;  %v523_v8 = vsel %vm129_vm0, %v510_v57, 0.0  ;;  %v581_v9 = vsel %vm129_vm0, %v1420_v37, 0.0 }
 0x127   :  { %v522_v2 = vadd.f32 %v521_v43, %v520_v59  ;;  %v557_v3 = vadd.f32 %v556_v62, %v555_v60  ;;  %v599_v4 = vadd.f32 %v598_v63, %v555_v60  ;;  %v580_v5 = vadd.f32 %v579_v44, %v578_v61 }
 0x128   :  { %v525_v15 = vsel %vm129_vm0, %v511_v0, 0.0  ;;  %v583_v18 = vsel %vm129_vm0, %v1414_v34, 0.0  ;;  %v560_v19 = vsel %vm129_vm0, %v547_v1, 0.0  ;;  %v602_v20 = vsel %vm129_vm0, %v539_v49, 0.0 }
 0x129   :  { %v559_v10 = vadd.f32 %v558_v6, %v557_v3  ;;  %v524_v11 = vadd.f32 %v523_v8, %v522_v2  ;;  %v582_v13 = vadd.f32 %v581_v9, %v580_v5  ;;  %v601_v14 = vadd.f32 %v600_v58, %v599_v4 }
 0x12a   :  { %v562_v26 = vsel %vm129_vm0, %v548_v7, 0.0  ;;  %v604_v27 = vsel %vm129_vm0, %v540_v56, 0.0 }
 0x12b   :  { %v526_v22 = vadd.f32 %v525_v15, %v524_v11  ;;  %v561_v23 = vadd.f32 %v560_v19, %v559_v10  ;;  %v584_v24 = vadd.f32 %v583_v18, %v582_v13  ;;  %v603_v25 = vadd.f32 %v602_v20, %v601_v14 }
 0x12d   :  { %v527_v28 = vrot.slane %v526_v22, 4  ;;  %v563_v29 = vadd.f32 %v562_v26, %v561_v23  ;;  %v585_v30 = vrot.slane %v584_v24, 4  ;;  %v605_v32 = vadd.f32 %v604_v27, %v603_v25 }
 0x12f   :  { %v528_v33 = vadd.f32 %v527_v28, %v526_v22  ;;  %v564_v36 = vrot.slane %v563_v29, 4  ;;  %v586_v38 = vadd.f32 %v585_v30, %v584_v24  ;;  %v606_v39 = vrot.slane %v605_v32, 4 }
 0x131   :  { %v529_v40 = vrot.slane %v528_v33, 2  ;;  %v565_v41 = vadd.f32 %v564_v36, %v563_v29  ;;  %v587_v42 = vrot.slane %v586_v38, 2  ;;  %v607_v43 = vadd.f32 %v606_v39, %v605_v32 }
 0x133   :  { %v530_v44 = vadd.f32 %v529_v40, %v528_v33  ;;  %v566_v45 = vrot.slane %v565_v41, 2  ;;  %v588_v46 = vadd.f32 %v587_v42, %v586_v38  ;;  %v608_v47 = vrot.slane %v607_v43, 2 }
 0x135   :  { %v531_v48 = vrot.slane %v530_v44, 1  ;;  %v567_v49 = vadd.f32 %v566_v45, %v565_v41  ;;  %v589_v50 = vrot.slane %v588_v46, 1  ;;  %v609_v51 = vadd.f32 %v608_v47, %v607_v43 }
 0x137   :  { %v532_v52 = vadd.f32 %v531_v48, %v530_v44  ;;  %v568_v53 = vrot.slane %v567_v49, 1  ;;  %v590_v54 = vadd.f32 %v589_v50, %v588_v46  ;;  %v610_v55 = vrot.slane %v609_v51, 1 }
 0x139   :  { %v569_v56 = vadd.f32 %v568_v53, %v567_v49  ;;  %v611_v57 = vadd.f32 %v610_v55, %v609_v51  ;;  %v612_v58 = vmul.f32 0.03125, %v532_v52  ;;  %v613_v59 = vsub.f32 %v590_v54, %v532_v52 }
 0x13b   :  { %v614_v60 = vmul.f32 0.03125, %v613_v59  ;;  %v615_v61 = vmul.f32 0.03125, %v569_v56  ;;  %v616_v62 = vmul.f32 %v612_v58, %v612_v58  ;;  %v618_v63 = vsub.f32 %v611_v57, %v569_v56 }
 0x13c   :  { %v626_v0 = vmul.f32 0.0, %v612_v58 }
 0x13d   :  { %v617_v1 = vsub.f32 %v615_v61, %v616_v62  ;;  %v619_v2 = vmul.f32 0.03125, %v618_v63  ;;  %v620_v3 = vmul.f32 %v614_v60, %v614_v60  ;;  %v638_v4 = vmul.f32 0.0, %v614_v60 }
 0x13e   :  { %v650_v5 = vadd.f32 %v626_v0, %v614_v60 }
 0x13f   :  { %v621_v6 = vsub.f32 %v619_v2, %v620_v3  ;;  %v646_v7 = vadd.f32 %v638_v4, %v612_v58  ;;  %v658_v8 = vmul.f32 0.0, %v617_v1 }
 0x140   :  { %v690_v9 = vsub.f32 %v1403_v21, %v650_v5  ;;  %v691_v10 = vsub.f32 %v1395_v16, %v650_v5  ;;  %v692_v11 = vsub.f32 %v1420_v37, %v650_v5  ;;  %v693_v13 = vsub.f32 %v1414_v34, %v650_v5  ;;  %v774_v34 = vld [vmem:[%s1509_s2] ss:$0 sm:$0xff] }
 0x141   :  { %v662_v14 = vmul.f32 0.0, %v621_v6  ;;  %v674_v15 = vadd.f32 %v658_v8, %v621_v6  ;;  %v686_v18 = vsub.f32 %v1397_v17, %v646_v7  ;;  %v687_v19 = vsub.f32 %v1393_v12, %v646_v7 }
 0x142   :  { %v688_v20 = vsub.f32 %v1416_v35, %v646_v7  ;;  %v689_v22 = vsub.f32 %v1411_v31, %v646_v7  ;;  %v775_v31 = vld [vmem:[%s1510_s3] ss:$0 sm:$0xff] }
 0x143   :  { %v670_v23 = vadd.f32 %v662_v14, %v617_v1  ;;  %v682_v24 = vmax.f32 %v674_v15, 0.0 }
 0x145   :  { %v678_v25 = vmax.f32 %v670_v23, 0.0  ;;  %v698_v21 = vadd.f32 1e-05, %v682_v24 }
 0x147   :  { %v694_v26 = vadd.f32 1e-05, %v678_v25  ;;  %1020 = vrsqrt.f32 %v698_v21 }
 0x149   :  { %1022 = vrsqrt.f32 %v694_v26 }
 0x151   :  { %v1021_v16 = vpop.eup %1020 }
 0x152   :  { %v714_v37 = vmul.f32 %v1021_v16, %v690_v9  ;;  %v715_v17 = vmul.f32 %v1021_v16, %v691_v10  ;;  %v716_v27 = vmul.f32 %v1021_v16, %v692_v11  ;;  %v717_v12 = vmul.f32 %v1021_v16, %v693_v13 }
 0x153   :  { %v1023_v28 = vpop.eup %1022 }
 0x154   :  { %v710_v35 = vmul.f32 %v1023_v28, %v686_v18  ;;  %v711_v29 = vmul.f32 %v1023_v28, %v687_v19  ;;  %v712_v30 = vmul.f32 %v1023_v28, %v688_v20  ;;  %v713_v32 = vmul.f32 %v1023_v28, %v689_v22 }
 0x155   :  { %v728_v33 = vmul.f32 %v774_v34, %v714_v37  ;;  %v729_v36 = vmul.f32 %v774_v34, %v715_v17  ;;  %v730_v38 = vmul.f32 %v774_v34, %v716_v27  ;;  %v731_v39 = vmul.f32 %v774_v34, %v717_v12 }
 0x156   :  { %v724_v40 = vmul.f32 %v774_v34, %v710_v35  ;;  %v725_v41 = vmul.f32 %v774_v34, %v711_v29  ;;  %v726_v42 = vmul.f32 %v774_v34, %v712_v30  ;;  %v727_v43 = vmul.f32 %v774_v34, %v713_v32 }
 0x157   :  { %v742_v44 = vadd.f32 %v775_v31, %v728_v33  ;;  %v743_v45 = vadd.f32 %v775_v31, %v729_v36  ;;  %v744_v46 = vadd.f32 %v775_v31, %v730_v38  ;;  %v745_v47 = vadd.f32 %v775_v31, %v731_v39 }
 0x158   :  { %v738_v48 = vadd.f32 %v775_v31, %v724_v40  ;;  %v739_v49 = vadd.f32 %v775_v31, %v725_v41  ;;  %v740_v50 = vadd.f32 %v775_v31, %v726_v42  ;;  %v741_v51 = vadd.f32 %v775_v31, %v727_v43 }
 0x159   :  { %v750_v52 = vmax.f32 %v742_v44, 0.0  ;;  %v751_v53 = vmax.f32 %v743_v45, 0.0  ;;  %v752_v54 = vmax.f32 %v744_v46, 0.0  ;;  %v753_v55 = vmax.f32 %v745_v47, 0.0 }
 0x15a   :  { %v746_v56 = vmax.f32 %v738_v48, 0.0  ;;  %v747_v57 = vmax.f32 %v739_v49, 0.0  ;;  %v748_v58 = vmax.f32 %v740_v50, 0.0  ;;  %v749_v59 = vmax.f32 %v741_v51, 0.0 }
 0x15b   :  { %758 = vst.msk [vmem:[%s1511_s4 + $0x20] sm:$0xff] %vm129_vm0, %v750_v52  ;;  %759 = vst.msk [vmem:[%s1511_s4 + $0x28] sm:$0xff] %vm129_vm0, %v751_v53 }
 0x15c   :  { %760 = vst.msk [vmem:[%s1511_s4 + $0x30] sm:$0xff] %vm129_vm0, %v752_v54  ;;  %761 = vst.msk [vmem:[%s1511_s4 + $0x38] sm:$0xff] %vm129_vm0, %v753_v55 }
 0x15d   :  { %754 = vst.msk [vmem:[%s1511_s4] sm:$0xff] %vm129_vm0, %v746_v56  ;;  %755 = vst.msk [vmem:[%s1511_s4 + $0x8] sm:$0xff] %vm129_vm0, %v747_v57 }
 0x15e   :  { %756 = vst.msk [vmem:[%s1511_s4 + $0x10] sm:$0xff] %vm129_vm0, %v748_v58  ;;  %757 = vst.msk [vmem:[%s1511_s4 + $0x18] sm:$0xff] %vm129_vm0, %v749_v59 }

// kernel: cdnet_forward.10
= control target key start
LH: loop header
LB: loop body
LE: loop exit
PB: predicated region body
PF: predicated region fallthrough
CT: control target
= control target key end

     0   :  { %vm148_vm0 = vcmask 1040384   ;;  %vm51_vm1 = vcmask 72704   ;;  %vm1553_vm2 = vmmov 1   ;;  %vm540_vm4 = vcmask 523264   ;;  %s2274_s1 = inlined_call_operand.vmem [shape: f32[9,64], index: 1, kind: input, shape index: {}]   ;;  %s2275_s0 = inlined_call_operand.vmem [shape: f32[256,9], index: 0, kind: input, shape index: {}]   ;;  %s2276_s2 = inlined_call_operand.vmem [shape: f32[1,64], index: 2, kind: input, shape index: {}]   ;;  %s2277_s3 = inlined_call_operand.vmem [shape: f32[1,64], index: 3, kind: input, shape index: {}]   ;;  %s2278_s4 = inlined_call_operand.vmem [shape: f32[256,64], index: 4, kind: output, shape index: {}]  }
   0x1   :  { %v49_v0 = vld [vmem:[%s2274_s1] sm:$0xff]  ;;  %v50_v1 = vld [vmem:[%s2274_s1 + $0x8] sm:$0x1]  ;;  %vm1541_vm3 = vmpackc.low %vm148_vm0, %vm1553_vm2 }
   0x2   :  { %v1540_v2 = vpack.c.bf16 %v50_v1, %v49_v0  ;;  %v17_v3 = vld [vmem:[%s2275_s0] sm:$0xff]  ;;  %v18_v4 = vld [vmem:[%s2275_s0 + $0x8] sm:$0xff]  ;;  %v19_v5 = vld [vmem:[%s2275_s0 + $0x10] sm:$0xff] }
   0x3   :  { %1492 = vmatprep.mubr.msk.f32.mxu0 %vm51_vm1, %v17_v3  ;;  %v33_v6 = vld [vmem:[%s2275_s0 + $0x80] sm:$0xff]  ;;  %v34_v7 = vld [vmem:[%s2275_s0 + $0x88] sm:$0xff]  ;;  %v35_v8 = vld [vmem:[%s2275_s0 + $0x90] sm:$0xff] }
   0x4   :  { %1542 = vmatprep.subr.msk.bf16.mxu0 %vm1541_vm3, %v1540_v2  ;;  %1546 = vmatprep.subr.msk.bf16.mxu1 %vm1541_vm3, %v1540_v2  ;;  %v20_v9 = vld [vmem:[%s2275_s0 + $0x18] sm:$0xff]  ;;  %v21_v10 = vld [vmem:[%s2275_s0 + $0x20] sm:$0xff]  ;;  %v22_v13 = vld [vmem:[%s2275_s0 + $0x28] sm:$0xff] }
   0x5   :  { %1545 = vmatpush3.bf16.msk.msra.mxu0 %vm1541_vm3, %v1540_v2  ;;  %1547 = vmatpush3.bf16.msk.msra.mxu1 %vm1541_vm3, %v1540_v2  ;;  %v36_v11 = vld [vmem:[%s2275_s0 + $0x98] sm:$0xff]  ;;  %v37_v12 = vld [vmem:[%s2275_s0 + $0xa0] sm:$0xff]  ;;  %v23_v14 = vld [vmem:[%s2275_s0 + $0x30] sm:$0xff] }
   0x6   :  { %1516 = vmatprep.mubr.msk.f32.mxu1 %vm51_vm1, %v33_v6  ;;  %v38_v15 = vld [vmem:[%s2275_s0 + $0xa8] sm:$0xff]  ;;  %v39_v16 = vld [vmem:[%s2275_s0 + $0xb0] sm:$0xff]  ;;  %v24_v17 = vld [vmem:[%s2275_s0 + $0x38] sm:$0xff] }
   0x7   :  { %v25_v18 = vld [vmem:[%s2275_s0 + $0x40] sm:$0xff]  ;;  %v40_v19 = vld [vmem:[%s2275_s0 + $0xb8] sm:$0xff]  ;;  %v26_v21 = vld [vmem:[%s2275_s0 + $0x48] sm:$0xff] }
   0x8   :  { %1493 = vmatmul.mubr.msk.f32.vlgmr.msra.gmra.mrb[0].mxu0 %vm51_vm1, %v18_v4  ;;  %1517 = vmatmul.mubr.msk.f32.vlgmr.msra.gmra.mrb[0].mxu1 %vm51_vm1, %v34_v7  ;;  %v41_v20 = vld [vmem:[%s2275_s0 + $0xc0] sm:$0xff]  ;;  %v27_v22 = vld [vmem:[%s2275_s0 + $0x50] sm:$0xff]  ;;  %v42_v23 = vld [vmem:[%s2275_s0 + $0xc8] sm:$0xff] }
   0x9   :  { %1495 = vmatprep.mubr.msk.f32.mxu0 %vm51_vm1, %v19_v5  ;;  %1519 = vmatprep.mubr.msk.f32.mxu1 %vm51_vm1, %v35_v8  ;;  %v43_v24 = vld [vmem:[%s2275_s0 + $0xd0] sm:$0xff]  ;;  %v28_v25 = vld [vmem:[%s2275_s0 + $0x58] sm:$0xff]  ;;  %v29_v26 = vld [vmem:[%s2275_s0 + $0x60] sm:$0xff] }
   0xa   :  { %v44_v27 = vld [vmem:[%s2275_s0 + $0xd8] sm:$0xff]  ;;  %v45_v28 = vld [vmem:[%s2275_s0 + $0xe0] sm:$0xff]  ;;  %v30_v29 = vld [vmem:[%s2275_s0 + $0x68] sm:$0xff] }
   0xb   :  { %v31_v30 = vld [vmem:[%s2275_s0 + $0x70] sm:$0xff]  ;;  %v46_v31 = vld [vmem:[%s2275_s0 + $0xe8] sm:$0xff]  ;;  %v32_v33 = vld [vmem:[%s2275_s0 + $0x78] sm:$0xff] }
   0xc   :  { %1496 = vmatmul.mubr.msk.f32.gmra.mrb[2].mxu0 %vm51_vm1, %v20_v9  ;;  %1520 = vmatmul.mubr.msk.f32.gmra.mrb[2].mxu1 %vm51_vm1, %v36_v11  ;;  %v47_v32 = vld [vmem:[%s2275_s0 + $0xf0] sm:$0xff]  ;;  %v48_v34 = vld [vmem:[%s2275_s0 + $0xf8] sm:$0xff] }
   0xd   :  { %1498 = vmatprep.mubr.msk.f32.mxu0 %vm51_vm1, %v21_v10  ;;  %1522 = vmatprep.mubr.msk.f32.mxu1 %vm51_vm1, %v37_v12 }
  0x10   :  { %1499 = vmatmul.mubr.msk.f32.gmra.mrb[4].mxu0 %vm51_vm1, %v22_v13  ;;  %1523 = vmatmul.mubr.msk.f32.gmra.mrb[4].mxu1 %vm51_vm1, %v38_v15 }
  0x11   :  { %1501 = vmatprep.mubr.msk.f32.mxu0 %vm51_vm1, %v23_v14  ;;  %1525 = vmatprep.mubr.msk.f32.mxu1 %vm51_vm1, %v39_v16 }
  0x14   :  { %1502 = vmatmul.mubr.msk.f32.gmra.mrb[6].mxu0 %vm51_vm1, %v24_v17  ;;  %1526 = vmatmul.mubr.msk.f32.gmra.mrb[6].mxu1 %vm51_vm1, %v40_v19 }
  0x15   :  { %1504 = vmatprep.mubr.msk.f32.mxu0 %vm51_vm1, %v25_v18  ;;  %1528 = vmatprep.mubr.msk.f32.mxu1 %vm51_vm1, %v41_v20 }
  0x18   :  { %1505 = vmatmul.mubr.msk.f32.gmra.mrb[8].mxu0 %vm51_vm1, %v26_v21  ;;  %1529 = vmatmul.mubr.msk.f32.gmra.mrb[8].mxu1 %vm51_vm1, %v42_v23 }
  0x19   :  { %1507 = vmatprep.mubr.msk.f32.mxu0 %vm51_vm1, %v27_v22  ;;  %1531 = vmatprep.mubr.msk.f32.mxu1 %vm51_vm1, %v43_v24 }
  0x1c   :  { %1508 = vmatmul.mubr.msk.f32.gmra.mrb[10].mxu0 %vm51_vm1, %v28_v25  ;;  %1532 = vmatmul.mubr.msk.f32.gmra.mrb[10].mxu1 %vm51_vm1, %v44_v27 }
  0x1d   :  { %1510 = vmatprep.mubr.msk.f32.mxu0 %vm51_vm1, %v29_v26  ;;  %1534 = vmatprep.mubr.msk.f32.mxu1 %vm51_vm1, %v45_v28 }
  0x20   :  { %1511 = vmatmul.mubr.msk.f32.gmra.mrb[12].mxu0 %vm51_vm1, %v30_v29  ;;  %1535 = vmatmul.mubr.msk.f32.gmra.mrb[12].mxu1 %vm51_vm1, %v46_v31 }
  0x21   :  { %1513 = vmatprep.mubr.msk.f32.mxu0 %vm51_vm1, %v31_v30  ;;  %1537 = vmatprep.mubr.msk.f32.mxu1 %vm51_vm1, %v47_v32 }
  0x24   :  { %1514 = vmatmul.mubr.msk.f32.gmra.mrb[14].mxu0 %vm51_vm1, %v32_v33  ;;  %1538 = vmatmul.mubr.msk.f32.gmra.mrb[14].mxu1 %vm51_vm1, %v48_v34 }
  0xdb   :  { %v1713_v35 = vpop.f32.mrb[0].mxu0  ;;  %v1721_v39 = vpop.f32.mrb[0].mxu1 }
  0xdc   :  { %v542_v36 = vsel %vm540_vm4, %v1713_v35, 0.0  ;;  %v611_v37 = vmul.f32 %v1713_v35, %v1713_v35  ;;  %v1719_v38 = vpop.f32.mrb[1].mxu0  ;;  %v1727_v42 = vpop.f32.mrb[1].mxu1  ;;  %v525_v45 = vmul.f32 0.0, %v1721_v39  ;;  %v627_v46 = vmul.f32 %v1721_v39, %v1721_v39 }
  0xdd   :  { %v541_v40 = vsel %vm540_vm4, %v1719_v38, 0.0  ;;  %v610_v41 = vmul.f32 %v1719_v38, %v1719_v38  ;;  %v524_v49 = vmul.f32 0.0, %v1727_v42  ;;  %v626_v56 = vmul.f32 %v1727_v42, %v1727_v42 }
  0xde   :  { %v675_v43 = vsel %vm540_vm4, %v611_v37, 0.0  ;;  %v543_v44 = vadd.f32 %v542_v36, %v541_v40  ;;  %v1752_v59 = vsel %vm540_vm4, %v525_v45, 0.0  ;;  %v659_v60 = vmul.f32 0.0, %v627_v46 }
  0xdf   :  { %v674_v47 = vsel %vm540_vm4, %v610_v41, 0.0  ;;  %v1734_v48 = vpop.f32.mrb[2].mxu0  ;;  %v1739_v52 = vpop.f32.mrb[2].mxu1  ;;  %v1756_v61 = vsel %vm540_vm4, %v1721_v39, 0.0  ;;  %v1764_v1 = vsel %vm540_vm4, %v627_v46, 0.0  ;;  %v1767_v2 = vsel %vm540_vm4, %v524_v49, 0.0 }
  0xe0   :  { %v676_v50 = vadd.f32 %v675_v43, %v674_v47  ;;  %v1737_v51 = vpop.f32.mrb[3].mxu0  ;;  %v613_v53 = vmul.f32 %v1734_v48, %v1734_v48  ;;  %v1749_v57 = vpop.f32.mrb[3].mxu1  ;;  %v546_v62 = vsel %vm540_vm4, %v1734_v48, 0.0  ;;  %v658_v6 = vmul.f32 0.0, %v626_v56 }
  0xe1   :  { %v544_v54 = vsel %vm540_vm4, %v1737_v51, 0.0  ;;  %v612_v55 = vmul.f32 %v1737_v51, %v1737_v51  ;;  %v527_v7 = vmul.f32 0.0, %v1739_v52  ;;  %v1784_v16 = vsel %vm540_vm4, %v659_v60, 0.0 }
  0xe2   :  { %v545_v58 = vadd.f32 %v544_v54, %v543_v44  ;;  %v679_v9 = vsel %vm540_vm4, %v613_v53, 0.0  ;;  %v629_v17 = vmul.f32 %v1739_v52, %v1739_v52  ;;  %v1795_v21 = vsel %vm540_vm4, %v1727_v42, 0.0 }
  0xe3   :  { %v677_v63 = vsel %vm540_vm4, %v612_v55, 0.0  ;;  %v1761_v0 = vpop.f32.mrb[4].mxu0  ;;  %v1772_v8 = vpop.f32.mrb[4].mxu1  ;;  %v1798_v22 = vsel %vm540_vm4, %v626_v56, 0.0  ;;  %v1803_v26 = vsel %vm540_vm4, %v658_v6, 0.0  ;;  %v1806_v27 = vsel %vm540_vm4, %v527_v7, 0.0 }
  0xe4   :  { %v678_v3 = vadd.f32 %v677_v63, %v676_v50  ;;  %v1769_v4 = vpop.f32.mrb[5].mxu0  ;;  %v547_v5 = vadd.f32 %v546_v62, %v545_v58  ;;  %2292 = vst [vmem:[#allocation2_spill] sm:$0xff] %v1772_v8  ;;  %v615_v10 = vmul.f32 %v1761_v0, %v1761_v0  ;;  %v1781_v13 = vpop.f32.mrb[5].mxu1  ;;  %v550_v18 = vsel %vm540_vm4, %v1761_v0, 0.0 }
  0xe5   :  { %v548_v11 = vsel %vm540_vm4, %v1769_v4, 0.0  ;;  %v614_v12 = vmul.f32 %v1769_v4, %v1769_v4  ;;  %2293 = vst [vmem:[#allocation3_spill] sm:$0xff] %v1781_v13  ;;  %v661_v37 = vmul.f32 0.0, %v629_v17  ;;  %v1821_v40 = vsel %vm540_vm4, %v1739_v52, 0.0 }
  0xe6   :  { %v549_v14 = vadd.f32 %v548_v11, %v547_v5  ;;  %v680_v15 = vadd.f32 %v679_v9, %v678_v3  ;;  %v683_v29 = vsel %vm540_vm4, %v615_v10, 0.0  ;;  %v526_v45 = vmul.f32 0.0, %v1749_v57 }
  0xe7   :  { %v681_v19 = vsel %vm540_vm4, %v614_v12, 0.0  ;;  %v1791_v20 = vpop.f32.mrb[6].mxu0  ;;  %v1808_v28 = vpop.f32.mrb[6].mxu1  ;;  %v628_v46 = vmul.f32 %v1749_v57, %v1749_v57  ;;  %v1834_v53 = vsel %vm540_vm4, %v629_v17, 0.0  ;;  %v631_v54 = vmul.f32 %v1772_v8, %v1772_v8 }
  0xe8   :  { %2294 = vst [vmem:[#allocation4_spill] sm:$0xff] %v1791_v20  ;;  %v682_v23 = vadd.f32 %v681_v19, %v680_v15  ;;  %v1800_v24 = vpop.f32.mrb[7].mxu0  ;;  %v551_v25 = vadd.f32 %v550_v18, %v549_v14  ;;  %2296 = vst [vmem:[#allocation6_spill] sm:$0xff] %v1808_v28  ;;  %v617_v30 = vmul.f32 %v1791_v20, %v1791_v20  ;;  %v1817_v33 = vpop.f32.mrb[7].mxu1  ;;  %v554_v41 = vsel %vm540_vm4, %v1791_v20, 0.0 }
  0xe9   :  { %2295 = vst [vmem:[#allocation5_spill] sm:$0xff] %v1800_v24  ;;  %v552_v31 = vsel %vm540_vm4, %v1800_v24, 0.0  ;;  %v616_v32 = vmul.f32 %v1800_v24, %v1800_v24  ;;  %2297 = vst [vmem:[#allocation7_spill] sm:$0xff] %v1817_v33  ;;  %v1850_v6 = vsel %vm540_vm4, %v661_v37, 0.0  ;;  %v529_v7 = vmul.f32 0.0, %v1772_v8 }
  0xea   :  { %v553_v34 = vadd.f32 %v552_v31, %v551_v25  ;;  %v684_v36 = vadd.f32 %v683_v29, %v682_v23  ;;  %v687_v56 = vsel %vm540_vm4, %v617_v30, 0.0  ;;  %v1859_v12 = vsel %vm540_vm4, %v526_v45, 0.0 }
  0xeb   :  { %v685_v43 = vsel %vm540_vm4, %v616_v32, 0.0  ;;  %v1826_v44 = vpop.f32.mrb[8].mxu0  ;;  %v1838_v55 = vpop.f32.mrb[8].mxu1  ;;  %v660_v14 = vmul.f32 0.0, %v628_v46  ;;  %v1865_v19 = vsel %vm540_vm4, %v1749_v57, 0.0  ;;  %v663_v23 = vmul.f32 0.0, %v631_v54 }
  0xec   :  { %2298 = vst [vmem:[#allocation8_spill] sm:$0xff] %v1826_v44  ;;  %v686_v47 = vadd.f32 %v685_v43, %v684_v36  ;;  %v1831_v49 = vpop.f32.mrb[9].mxu0  ;;  %v555_v50 = vadd.f32 %v554_v41, %v553_v34  ;;  %v619_v58 = vmul.f32 %v1826_v44, %v1826_v44  ;;  %v1847_v63 = vpop.f32.mrb[9].mxu1  ;;  %v558_v9 = vsel %vm540_vm4, %v1826_v44, 0.0 }
  0xed   :  { %2299 = vst [vmem:[#allocation9_spill] sm:$0xff] %v1831_v49  ;;  %v556_v60 = vsel %vm540_vm4, %v1831_v49, 0.0  ;;  %v618_v62 = vmul.f32 %v1831_v49, %v1831_v49  ;;  %v1879_v41 = vsel %vm540_vm4, %v628_v46, 0.0  ;;  %v1882_v43 = vsel %vm540_vm4, %v529_v7, 0.0 }
  0xee   :  { %v557_v3 = vadd.f32 %v556_v60, %v555_v50  ;;  %v688_v5 = vadd.f32 %v687_v56, %v686_v47  ;;  %v691_v29 = vsel %vm540_vm4, %v619_v58, 0.0  ;;  %v1890_v56 = vsel %vm540_vm4, %v660_v14, 0.0 }
  0xef   :  { %v689_v10 = vsel %vm540_vm4, %v618_v62, 0.0  ;;  %v1856_v11 = vpop.f32.mrb[10].mxu0  ;;  %v1867_v25 = vpop.f32.mrb[10].mxu1  ;;  %v1894_v58 = vsel %vm540_vm4, %v1772_v8, 0.0  ;;  %v632_v49 = vmul.f32 %v1817_v33, %v1817_v33 }
  0xf0   :  { %2300 = vst [vmem:[#allocation10_spill] sm:$0xff] %v1856_v11  ;;  %v690_v15 = vadd.f32 %v689_v10, %v688_v5  ;;  %v1861_v17 = vpop.f32.mrb[11].mxu0  ;;  %v559_v18 = vadd.f32 %v558_v9, %v557_v3  ;;  %v621_v30 = vmul.f32 %v1856_v11, %v1856_v11  ;;  %v1876_v34 = vpop.f32.mrb[11].mxu1  ;;  %v562_v45 = vsel %vm540_vm4, %v1856_v11, 0.0 }
  0xf1   :  { %2301 = vst [vmem:[#allocation11_spill] sm:$0xff] %v1861_v17  ;;  %v560_v31 = vsel %vm540_vm4, %v1861_v17, 0.0  ;;  %v620_v32 = vmul.f32 %v1861_v17, %v1861_v17  ;;  %v1899_v3 = vsel %vm540_vm4, %v663_v23, 0.0  ;;  %v630_v5 = vmul.f32 %v1781_v13, %v1781_v13 }
  0xf2   :  { %v561_v36 = vadd.f32 %v560_v31, %v559_v18  ;;  %v692_v37 = vadd.f32 %v691_v29, %v690_v15  ;;  %v695_v9 = vsel %vm540_vm4, %v621_v30, 0.0  ;;  %v1915_v31 = vsel %vm540_vm4, %v631_v54, 0.0 }
  0xf3   :  { %v693_v47 = vsel %vm540_vm4, %v620_v32, 0.0  ;;  %v1887_v50 = vpop.f32.mrb[12].mxu0  ;;  %v1903_v7 = vpop.f32.mrb[12].mxu1  ;;  %v528_v32 = vmul.f32 0.0, %v1781_v13  ;;  %v851_v11 = vsel %vm540_vm4, %v630_v5, 0.0 }
  0xf4   :  { %2302 = vst [vmem:[#allocation12_spill] sm:$0xff] %v1887_v50  ;;  %v694_v60 = vadd.f32 %v693_v47, %v692_v37  ;;  %v1896_v46 = vpop.f32.mrb[13].mxu0  ;;  %v563_v62 = vadd.f32 %v562_v45, %v561_v36  ;;  %v623_v10 = vmul.f32 %v1887_v50, %v1887_v50  ;;  %v1912_v18 = vpop.f32.mrb[13].mxu1  ;;  %v566_v30 = vsel %vm540_vm4, %v1887_v50, 0.0 }
  0xf5   :  { %2303 = vst [vmem:[#allocation13_spill] sm:$0xff] %v1896_v46  ;;  %v564_v14 = vsel %vm540_vm4, %v1896_v46, 0.0  ;;  %v622_v15 = vmul.f32 %v1896_v46, %v1896_v46  ;;  %v1925_v45 = vsel %vm540_vm4, %v1781_v13, 0.0  ;;  %v633_v47 = vmul.f32 %v1808_v28, %v1808_v28 }
  0xf6   :  { %v565_v23 = vadd.f32 %v564_v14, %v563_v62  ;;  %v696_v29 = vadd.f32 %v695_v9, %v694_v60  ;;  %v662_v9 = vmul.f32 0.0, %v630_v5  ;;  %v531_v14 = vmul.f32 0.0, %v1808_v28 }
  0xf7   :  { %v697_v36 = vsel %vm540_vm4, %v622_v15, 0.0  ;;  %v1921_v37 = vpop.f32.mrb[14].mxu0  ;;  %v1932_v8 = vpop.f32.mrb[14].mxu1  ;;  %v699_v15 = vsel %vm540_vm4, %v623_v10, 0.0  ;;  %v665_v44 = vmul.f32 0.0, %v633_v47  ;;  %v788_v5 = vsel %vm540_vm4, %v1808_v28, 0.0 }
  0xf8   :  { %v698_v60 = vadd.f32 %v697_v36, %v696_v29  ;;  %v1929_v62 = vpop.f32.mrb[15].mxu0  ;;  %v567_v54 = vadd.f32 %v566_v30, %v565_v23  ;;  %v625_v50 = vmul.f32 %v1921_v37, %v1921_v37  ;;  %v1941_v29 = vpop.f32.mrb[15].mxu1  ;;  %v580_v30 = vsel %vm540_vm4, %v528_v32, 0.0 }
  0xf9   :  { %2304 = vst [vmem:[#allocation14_spill] sm:$0xff] %v1929_v62  ;;  %v568_v13 = vsel %vm540_vm4, %v1929_v62, 0.0  ;;  %v624_v46 = vmul.f32 %v1929_v62, %v1929_v62  ;;  %v570_v10 = vsel %vm540_vm4, %v1921_v37, 0.0  ;;  %v713_v62 = vsel %vm540_vm4, %v662_v9, 0.0 }
  0xfa   :  { %v569_v36 = vadd.f32 %v568_v13, %v567_v54  ;;  %v700_v23 = vadd.f32 %v699_v15, %v698_v60  ;;  %v1952_v13 = vsel %vm540_vm4, %v531_v14, 0.0  ;;  %v703_v32 = vsel %vm540_vm4, %v625_v50, 0.0 }
  0xfb   :  { %v701_v17 = vsel %vm540_vm4, %v624_v46, 0.0  ;;  %v530_v60 = vmul.f32 0.0, %v1817_v33  ;;  %v635_v46 = vmul.f32 %v1838_v55, %v1838_v55  ;;  %v1963_v9 = vsel %vm540_vm4, %v633_v47, 0.0 }
  0xfc   :  { %v571_v20 = vadd.f32 %v570_v10, %v569_v36  ;;  %v702_v24 = vadd.f32 %v701_v17, %v700_v23  ;;  %v719_v14 = vsel %vm540_vm4, %v665_v44, 0.0  ;;  %v664_v36 = vmul.f32 0.0, %v632_v49 }
  0xfd   :  { %v786_v50 = vsel %vm540_vm4, %v1817_v33, 0.0  ;;  %v533_v23 = vmul.f32 0.0, %v1838_v55  ;;  %v667_v47 = vmul.f32 0.0, %v635_v46  ;;  %v634_v44 = vmul.f32 %v1847_v63, %v1847_v63 }
  0xfe   :  { %v704_v54 = vadd.f32 %v703_v32, %v702_v24  ;;  %v573_v15 = vadd.f32 %v1767_v2, %v571_v20  ;;  %v775_v17 = vadd.f32 %v1795_v21, %v571_v20  ;;  %v584_v20 = vsel %vm540_vm4, %v530_v60, 0.0 }
  0xff   :  { %v855_v21 = vsel %vm540_vm4, %v632_v49, 0.0  ;;  %v792_v60 = vsel %vm540_vm4, %v1838_v55, 0.0  ;;  %v532_v49 = vmul.f32 0.0, %v1847_v63 }
 0x100   :  { %v706_v10 = vadd.f32 %v1803_v26, %v704_v54  ;;  %v844_v28 = vadd.f32 %v1798_v22, %v704_v54  ;;  %v575_v24 = vadd.f32 %v1752_v59, %v573_v15  ;;  %v777_v2 = vadd.f32 %v1756_v61, %v775_v17 }
 0x101   :  { %v717_v59 = vsel %vm540_vm4, %v664_v36, 0.0  ;;  %v590_v61 = vsel %vm540_vm4, %v533_v23, 0.0  ;;  %v637_v17 = vmul.f32 %v1867_v25, %v1867_v25 }
 0x102   :  { %v577_v32 = vadd.f32 %v1859_v12, %v575_v24  ;;  %v708_v33 = vadd.f32 %v1784_v16, %v706_v10  ;;  %v779_v26 = vadd.f32 %v1865_v19, %v777_v2  ;;  %v846_v22 = vadd.f32 %v1764_v1, %v844_v28 }
 0x103   :  { %v723_v19 = vsel %vm540_vm4, %v667_v47, 0.0  ;;  %v861_v1 = vsel %vm540_vm4, %v635_v46, 0.0  ;;  %v666_v28 = vmul.f32 0.0, %v634_v44  ;;  %v669_v2 = vmul.f32 0.0, %v637_v17 }
 0x104   :  { %v710_v54 = vadd.f32 %v1890_v56, %v708_v33  ;;  %v848_v15 = vadd.f32 %v1879_v41, %v846_v22  ;;  %v579_v12 = vadd.f32 %v1806_v27, %v577_v32  ;;  %v781_v16 = vadd.f32 %v1821_v40, %v779_v26 }
 0x105   :  { %v588_v41 = vsel %vm540_vm4, %v532_v49, 0.0  ;;  %v790_v27 = vsel %vm540_vm4, %v1847_v63, 0.0  ;;  %v535_v40 = vmul.f32 0.0, %v1867_v25  ;;  %v636_v56 = vmul.f32 %v1876_v34, %v1876_v34 }
 0x106   :  { %v581_v36 = vadd.f32 %v580_v30, %v579_v12  ;;  %v712_v23 = vadd.f32 %v1850_v6, %v710_v54  ;;  %v783_v10 = vadd.f32 %v1925_v45, %v781_v16  ;;  %v850_v33 = vadd.f32 %v1834_v53, %v848_v15 }
 0x107   :  { %v721_v45 = vsel %vm540_vm4, %v666_v28, 0.0  ;;  %v859_v53 = vsel %vm540_vm4, %v634_v44, 0.0  ;;  %v534_v47 = vmul.f32 0.0, %v1876_v34 }
 0x108   :  { %v714_v46 = vadd.f32 %v713_v62, %v712_v23  ;;  %v852_v24 = vadd.f32 %v851_v11, %v850_v33  ;;  %v583_v30 = vadd.f32 %v1882_v43, %v581_v36  ;;  %v785_v6 = vadd.f32 %v1894_v58, %v783_v10 }
 0x109   :  { %v594_v62 = vsel %vm540_vm4, %v535_v40, 0.0  ;;  %v796_v11 = vsel %vm540_vm4, %v1867_v25, 0.0  ;;  %v865_v43 = vsel %vm540_vm4, %v637_v17, 0.0  ;;  %v668_v58 = vmul.f32 0.0, %v636_v56 }
 0x10a   :  { %v585_v32 = vadd.f32 %v584_v20, %v583_v30  ;;  %v716_v26 = vadd.f32 %v1899_v3, %v714_v46  ;;  %v787_v22 = vadd.f32 %v786_v50, %v785_v6  ;;  %v854_v49 = vadd.f32 %v1915_v31, %v852_v24 }
 0x10b   :  { %v727_v20 = vsel %vm540_vm4, %v669_v2, 0.0  ;;  %v592_v3 = vsel %vm540_vm4, %v534_v47, 0.0  ;;  %v537_v50 = vmul.f32 0.0, %v1903_v7  ;;  %v639_v31 = vmul.f32 %v1903_v7, %v1903_v7 }
 0x10c   :  { %v718_v54 = vadd.f32 %v717_v59, %v716_v26  ;;  %v856_v15 = vadd.f32 %v855_v21, %v854_v49  ;;  %v587_v44 = vadd.f32 %v1952_v13, %v585_v32  ;;  %v789_v12 = vadd.f32 %v788_v5, %v787_v22 }
 0x10d   :  { %v725_v59 = vsel %vm540_vm4, %v668_v58, 0.0  ;;  %v794_v13 = vsel %vm540_vm4, %v1876_v34, 0.0  ;;  %v536_v5 = vmul.f32 0.0, %v1912_v18  ;;  %v638_v21 = vmul.f32 %v1912_v18, %v1912_v18 }
 0x10e   :  { %v589_v16 = vadd.f32 %v588_v41, %v587_v44  ;;  %v720_v28 = vadd.f32 %v719_v14, %v718_v54  ;;  %v791_v36 = vadd.f32 %v790_v27, %v789_v12  ;;  %v858_v17 = vadd.f32 %v1963_v9, %v856_v15 }
 0x10f   :  { %v863_v41 = vsel %vm540_vm4, %v636_v56, 0.0  ;;  %v598_v14 = vsel %vm540_vm4, %v537_v50, 0.0  ;;  %v671_v27 = vmul.f32 0.0, %v639_v31  ;;  %v670_v9 = vmul.f32 0.0, %v638_v21 }
 0x110   :  { %v722_v23 = vadd.f32 %v721_v45, %v720_v28  ;;  %v860_v10 = vadd.f32 %v859_v53, %v858_v17  ;;  %v591_v33 = vadd.f32 %v590_v61, %v589_v16  ;;  %v793_v40 = vadd.f32 %v792_v60, %v791_v36 }
 0x111   :  { %v800_v2 = vsel %vm540_vm4, %v1903_v7, 0.0  ;;  %v869_v47 = vsel %vm540_vm4, %v639_v31, 0.0  ;;  %v596_v45 = vsel %vm540_vm4, %v536_v5, 0.0  ;;  %v798_v61 = vsel %vm540_vm4, %v1912_v18, 0.0 }
 0x112   :  { %v593_v46 = vadd.f32 %v592_v3, %v591_v33  ;;  %v724_v24 = vadd.f32 %v723_v19, %v722_v23  ;;  %v795_v30 = vadd.f32 %v794_v13, %v793_v40  ;;  %v862_v6 = vadd.f32 %v861_v1, %v860_v10 }
 0x113   :  { %v729_v26 = vsel %vm540_vm4, %v670_v9, 0.0  ;;  %v641_v19 = vmul.f32 %v1932_v8, %v1932_v8  ;;  %v538_v1 = vmul.f32 0.0, %v1941_v29  ;;  %v640_v22 = vmul.f32 %v1941_v29, %v1941_v29 }
 0x114   :  { %v726_v60 = vadd.f32 %v725_v59, %v724_v24  ;;  %v864_v56 = vadd.f32 %v863_v41, %v862_v6  ;;  %v595_v53 = vadd.f32 %v594_v62, %v593_v46  ;;  %v797_v32 = vadd.f32 %v796_v11, %v795_v30 }
 0x115   :  { %v867_v44 = vsel %vm540_vm4, %v638_v21, 0.0  ;;  %v539_v12 = vmul.f32 0.0, %v1932_v8  ;;  %v600_v62 = vsel %vm540_vm4, %v538_v1, 0.0  ;;  %v672_v11 = vmul.f32 0.0, %v640_v22 }
 0x116   :  { %v597_v49 = vadd.f32 %v596_v45, %v595_v53  ;;  %v728_v58 = vadd.f32 %v727_v20, %v726_v60  ;;  %v799_v54 = vadd.f32 %v798_v61, %v797_v32  ;;  %v866_v15 = vadd.f32 %v865_v43, %v864_v56 }
 0x117   :  { %v731_v28 = vsel %vm540_vm4, %v671_v27, 0.0  ;;  %v673_v36 = vmul.f32 0.0, %v641_v19  ;;  %v733_v17 = vsel %vm540_vm4, %v672_v11, 0.0  ;;  %v802_v20 = vsel %vm540_vm4, %v1941_v29, 0.0 }
 0x118   :  { %v730_v3 = vadd.f32 %v729_v26, %v728_v58  ;;  %v868_v50 = vadd.f32 %v867_v44, %v866_v15  ;;  %v599_v31 = vadd.f32 %v598_v14, %v597_v49  ;;  %v801_v16 = vadd.f32 %v800_v2, %v799_v54 }
 0x119   :  { %v602_v21 = vsel %vm540_vm4, %v539_v12, 0.0  ;;  %v804_v23 = vsel %vm540_vm4, %v1932_v8, 0.0  ;;  %v871_v10 = vsel %vm540_vm4, %v640_v22, 0.0  ;;  %v735_v27 = vsel %vm540_vm4, %v673_v36, 0.0 }
 0x11a   :  { %v601_v43 = vadd.f32 %v600_v62, %v599_v31  ;;  %v732_v59 = vadd.f32 %v731_v28, %v730_v3  ;;  %v803_v13 = vadd.f32 %v802_v20, %v801_v16  ;;  %v870_v5 = vadd.f32 %v869_v47, %v868_v50 }
 0x11b   :  { %v873_v9 = vsel %vm540_vm4, %v641_v19, 0.0 }
 0x11c   :  { %v603_v33 = vadd.f32 %v602_v21, %v601_v43  ;;  %v734_v40 = vadd.f32 %v733_v17, %v732_v59  ;;  %v805_v41 = vadd.f32 %v804_v23, %v803_v13  ;;  %v872_v14 = vadd.f32 %v871_v10, %v870_v5 }
 0x11e   :  { %v604_v46 = vrot.slane %v603_v33, 4  ;;  %v736_v24 = vadd.f32 %v735_v27, %v734_v40  ;;  %v806_v30 = vrot.slane %v805_v41, 4  ;;  %v874_v6 = vadd.f32 %v873_v9, %v872_v14 }
 0x120   :  { %v605_v2 = vadd.f32 %v604_v46, %v603_v33  ;;  %v737_v47 = vrot.slane %v736_v24, 4  ;;  %v807_v45 = vadd.f32 %v806_v30, %v805_v41  ;;  %v875_v61 = vrot.slane %v874_v6, 4 }
 0x122   :  { %v606_v60 = vrot.slane %v605_v2, 2  ;;  %v738_v56 = vadd.f32 %v737_v47, %v736_v24  ;;  %v808_v53 = vrot.slane %v807_v45, 2  ;;  %v876_v32 = vadd.f32 %v875_v61, %v874_v6 }
 0x124   :  { %v607_v26 = vadd.f32 %v606_v60, %v605_v2  ;;  %v739_v1 = vrot.slane %v738_v56, 2  ;;  %v809_v22 = vadd.f32 %v808_v53, %v807_v45  ;;  %v877_v49 = vrot.slane %v876_v32, 2  ;;  %v2307_v53 = vld [vmem:[#allocation9_spill] sm:$0xff] }
 0x126   :  { %v608_v58 = vrot.slane %v607_v26, 1  ;;  %v740_v54 = vadd.f32 %v739_v1, %v738_v56  ;;  %v810_v15 = vrot.slane %v809_v22, 1  ;;  %v878_v19 = vadd.f32 %v877_v49, %v876_v32  ;;  %v2306_v56 = vld [vmem:[#allocation4_spill] sm:$0xff]  ;;  %v2309_v1 = vld [vmem:[#allocation11_spill] sm:$0xff] }
 0x128   :  { %v609_v44 = vadd.f32 %v608_v58, %v607_v26  ;;  %v741_v12 = vrot.slane %v740_v54, 1  ;;  %v811_v62 = vadd.f32 %v810_v15, %v809_v22  ;;  %v879_v11 = vrot.slane %v878_v19, 1  ;;  %v2308_v26 = vld [vmem:[#allocation8_spill] sm:$0xff]  ;;  %v2310_v22 = vld [vmem:[#allocation10_spill] sm:$0xff] }
 0x12a   :  { %v742_v3 = vadd.f32 %v741_v12, %v740_v54  ;;  %v880_v50 = vadd.f32 %v879_v11, %v878_v19  ;;  %v881_v31 = vmul.f32 0.0078125, %v609_v44  ;;  %v882_v16 = vsub.f32 %v811_v62, %v609_v44  ;;  %v2314_v44 = vld [vmem:[#allocation3_spill] sm:$0xff]  ;;  %v2315_v62 = vld [vmem:[#allocation2_spill] sm:$0xff] }
 0x12c   :  { %v883_v28 = vmul.f32 0.0078125, %v882_v16  ;;  %v884_v36 = vmul.f32 0.0078125, %v742_v3  ;;  %v885_v17 = vmul.f32 %v881_v31, %v881_v31  ;;  %v887_v20 = vsub.f32 %v880_v50, %v742_v3  ;;  %v2316_v3 = vld [vmem:[#allocation7_spill] sm:$0xff] }
 0x12d   :  { %v907_v43 = vmul.f32 0.0, %v881_v31 }
 0x12e   :  { %v886_v59 = vsub.f32 %v884_v36, %v885_v17  ;;  %v888_v13 = vmul.f32 0.0078125, %v887_v20  ;;  %v889_v5 = vmul.f32 %v883_v28, %v883_v28  ;;  %v955_v21 = vmul.f32 0.0, %v883_v28 }
 0x12f   :  { %v2054_v23 = vadd.f32 %v907_v43, %v883_v28 }
 0x130   :  { %v890_v10 = vsub.f32 %v888_v13, %v889_v5  ;;  %v987_v33 = vadd.f32 %v955_v21, %v881_v31  ;;  %v1035_v40 = vmul.f32 0.0, %v886_v59  ;;  %v2317_v31 = vld [vmem:[#allocation6_spill] sm:$0xff] }
 0x131   :  { %v1163_v41 = vsub.f32 %v1727_v42, %v2054_v23  ;;  %v1164_v14 = vsub.f32 %v1721_v39, %v2054_v23  ;;  %v1165_v27 = vsub.f32 %v1749_v57, %v2054_v23  ;;  %v1166_v9 = vsub.f32 %v1739_v52, %v2054_v23  ;;  %v2305_v57 = vld [vmem:[#allocation5_spill] sm:$0xff] }
 0x132   :  { %v1051_v46 = vmul.f32 0.0, %v890_v10  ;;  %v1099_v24 = vadd.f32 %v1035_v40, %v890_v10  ;;  %v1147_v30 = vsub.f32 %v1719_v38, %v987_v33  ;;  %v1148_v6 = vsub.f32 %v1713_v35, %v987_v33 }
 0x133   :  { %v1149_v2 = vsub.f32 %v1737_v51, %v987_v33  ;;  %v1150_v47 = vsub.f32 %v1734_v48, %v987_v33  ;;  %v1151_v42 = vsub.f32 %v1769_v4, %v987_v33  ;;  %v1152_v39 = vsub.f32 %v1761_v0, %v987_v33  ;;  %v2311_v48 = vld [vmem:[#allocation13_spill] sm:$0xff]  ;;  %v2312_v4 = vld [vmem:[#allocation12_spill] sm:$0xff]  ;;  %v2313_v0 = vld [vmem:[#allocation14_spill] sm:$0xff] }
 0x134   :  { %v1083_v45 = vadd.f32 %v1051_v46, %v886_v59  ;;  %v1131_v61 = vmax.f32 %v1099_v24, 0.0  ;;  %v1153_v60 = vsub.f32 %v2305_v57, %v987_v33  ;;  %v1154_v52 = vsub.f32 %v2306_v56, %v987_v33 }
 0x135   :  { %v1155_v32 = vsub.f32 %v2307_v53, %v987_v33  ;;  %v1156_v38 = vsub.f32 %v2308_v26, %v987_v33  ;;  %v1157_v35 = vsub.f32 %v2309_v1, %v987_v33  ;;  %v1158_v51 = vsub.f32 %v2310_v22, %v987_v33 }
 0x136   :  { %v1115_v49 = vmax.f32 %v1083_v45, 0.0  ;;  %v1159_v58 = vsub.f32 %v2311_v48, %v987_v33  ;;  %v1160_v54 = vsub.f32 %v2312_v4, %v987_v33  ;;  %v1161_v15 = vsub.f32 %v2313_v0, %v987_v33 }
 0x137   :  { %v1162_v19 = vsub.f32 %v1921_v37, %v987_v33  ;;  %v1167_v12 = vsub.f32 %v2314_v44, %v2054_v23  ;;  %v1168_v11 = vsub.f32 %v2315_v62, %v2054_v23  ;;  %v1169_v50 = vsub.f32 %v2316_v3, %v2054_v23 }
 0x138   :  { %v1170_v16 = vsub.f32 %v2317_v31, %v2054_v23  ;;  %v1171_v28 = vsub.f32 %v1847_v63, %v2054_v23  ;;  %v1172_v36 = vsub.f32 %v1838_v55, %v2054_v23  ;;  %v1173_v37 = vsub.f32 %v1876_v34, %v2054_v23 }
 0x139   :  { %v1174_v17 = vsub.f32 %v1867_v25, %v2054_v23  ;;  %v1175_v20 = vsub.f32 %v1912_v18, %v2054_v23  ;;  %v1176_v43 = vsub.f32 %v1903_v7, %v2054_v23  ;;  %v1177_v59 = vsub.f32 %v1941_v29, %v2054_v23 }
 0x13a   :  { %v1178_v63 = vsub.f32 %v1932_v8, %v2054_v23  ;;  %v1179_v13 = vadd.f32 1e-05, %v1115_v49  ;;  %v1195_v55 = vadd.f32 1e-05, %v1131_v61 }
 0x13c   :  { %1549 = vrsqrt.f32 %v1179_v13 }
 0x13d   :  { %1551 = vrsqrt.f32 %v1195_v55  ;;  %v1453_v55 = vld [vmem:[%s2277_s3] ss:$0 sm:$0xff] }
 0x146   :  { %v1550_v34 = vpop.eup %1549 }
 0x147   :  { %v1243_v5 = vmul.f32 %v1550_v34, %v1147_v30  ;;  %v1244_v21 = vmul.f32 %v1550_v34, %v1148_v6  ;;  %v1245_v25 = vmul.f32 %v1550_v34, %v1149_v2  ;;  %v1246_v10 = vmul.f32 %v1550_v34, %v1150_v47  ;;  %v1552_v33 = vpop.eup %1551 }
 0x148   :  { %v1247_v18 = vmul.f32 %v1550_v34, %v1151_v42  ;;  %v1248_v40 = vmul.f32 %v1550_v34, %v1152_v39  ;;  %v1249_v46 = vmul.f32 %v1550_v34, %v1153_v60  ;;  %v1250_v7 = vmul.f32 %v1550_v34, %v1154_v52 }
 0x149   :  { %v1251_v24 = vmul.f32 %v1550_v34, %v1155_v32  ;;  %v1252_v45 = vmul.f32 %v1550_v34, %v1156_v38  ;;  %v1253_v29 = vmul.f32 %v1550_v34, %v1157_v35  ;;  %v1254_v57 = vmul.f32 %v1550_v34, %v1158_v51  ;;  %v1452_v32 = vld [vmem:[%s2276_s2] ss:$0 sm:$0xff] }
 0x14a   :  { %v1255_v56 = vmul.f32 %v1550_v34, %v1159_v58  ;;  %v1256_v8 = vmul.f32 %v1550_v34, %v1160_v54  ;;  %v1257_v23 = vmul.f32 %v1550_v34, %v1161_v15  ;;  %v1258_v61 = vmul.f32 %v1550_v34, %v1162_v19 }
 0x14b   :  { %v1259_v53 = vmul.f32 %v1552_v33, %v1163_v41  ;;  %v1260_v26 = vmul.f32 %v1552_v33, %v1164_v14  ;;  %v1261_v1 = vmul.f32 %v1552_v33, %v1165_v27  ;;  %v1262_v30 = vmul.f32 %v1552_v33, %v1166_v9 }
 0x14c   :  { %v1263_v6 = vmul.f32 %v1552_v33, %v1167_v12  ;;  %v1264_v2 = vmul.f32 %v1552_v33, %v1168_v11  ;;  %v1265_v47 = vmul.f32 %v1552_v33, %v1169_v50  ;;  %v1266_v22 = vmul.f32 %v1552_v33, %v1170_v16 }
 0x14d   :  { %v1267_v42 = vmul.f32 %v1552_v33, %v1171_v28  ;;  %v1268_v39 = vmul.f32 %v1552_v33, %v1172_v36  ;;  %v1269_v60 = vmul.f32 %v1552_v33, %v1173_v37  ;;  %v1270_v52 = vmul.f32 %v1552_v33, %v1174_v17 }
 0x14e   :  { %v1271_v38 = vmul.f32 %v1552_v33, %v1175_v20  ;;  %v1272_v35 = vmul.f32 %v1552_v33, %v1176_v43  ;;  %v1273_v51 = vmul.f32 %v1552_v33, %v1177_v59  ;;  %v1274_v49 = vmul.f32 %v1552_v33, %v1178_v63 }
 0x14f   :  { %v1281_v41 = vmul.f32 %v1452_v32, %v1243_v5  ;;  %v1282_v14 = vmul.f32 %v1452_v32, %v1244_v21  ;;  %v1283_v27 = vmul.f32 %v1452_v32, %v1245_v25  ;;  %v1284_v9 = vmul.f32 %v1452_v32, %v1246_v10 }
 0x150   :  { %v1285_v48 = vmul.f32 %v1452_v32, %v1247_v18  ;;  %v1286_v58 = vmul.f32 %v1452_v32, %v1248_v40  ;;  %v1287_v4 = vmul.f32 %v1452_v32, %v1249_v46  ;;  %v1288_v54 = vmul.f32 %v1452_v32, %v1250_v7 }
 0x151   :  { %v1289_v0 = vmul.f32 %v1452_v32, %v1251_v24  ;;  %v1290_v15 = vmul.f32 %v1452_v32, %v1252_v45  ;;  %v1291_v19 = vmul.f32 %v1452_v32, %v1253_v29  ;;  %v1292_v44 = vmul.f32 %v1452_v32, %v1254_v57 }
 0x152   :  { %v1293_v12 = vmul.f32 %v1452_v32, %v1255_v56  ;;  %v1294_v62 = vmul.f32 %v1452_v32, %v1256_v8  ;;  %v1295_v11 = vmul.f32 %v1452_v32, %v1257_v23  ;;  %v1296_v3 = vmul.f32 %v1452_v32, %v1258_v61 }
 0x153   :  { %v1297_v50 = vmul.f32 %v1452_v32, %v1259_v53  ;;  %v1298_v31 = vmul.f32 %v1452_v32, %v1260_v26  ;;  %v1299_v16 = vmul.f32 %v1452_v32, %v1261_v1  ;;  %v1300_v28 = vmul.f32 %v1452_v32, %v1262_v30 }
 0x154   :  { %v1301_v36 = vmul.f32 %v1452_v32, %v1263_v6  ;;  %v1302_v37 = vmul.f32 %v1452_v32, %v1264_v2  ;;  %v1303_v17 = vmul.f32 %v1452_v32, %v1265_v47  ;;  %v1304_v20 = vmul.f32 %v1452_v32, %v1266_v22 }
 0x155   :  { %v1305_v43 = vmul.f32 %v1452_v32, %v1267_v42  ;;  %v1306_v59 = vmul.f32 %v1452_v32, %v1268_v39  ;;  %v1307_v63 = vmul.f32 %v1452_v32, %v1269_v60  ;;  %v1308_v13 = vmul.f32 %v1452_v32, %v1270_v52 }
 0x156   :  { %v1309_v34 = vmul.f32 %v1452_v32, %v1271_v38  ;;  %v1310_v5 = vmul.f32 %v1452_v32, %v1272_v35  ;;  %v1311_v21 = vmul.f32 %v1452_v32, %v1273_v51  ;;  %v1312_v25 = vmul.f32 %v1452_v32, %v1274_v49 }
 0x157   :  { %v1319_v10 = vadd.f32 %v1453_v55, %v1281_v41  ;;  %v1320_v33 = vadd.f32 %v1453_v55, %v1282_v14  ;;  %v1321_v18 = vadd.f32 %v1453_v55, %v1283_v27  ;;  %v1322_v40 = vadd.f32 %v1453_v55, %v1284_v9 }
 0x158   :  { %v1323_v46 = vadd.f32 %v1453_v55, %v1285_v48  ;;  %v1324_v7 = vadd.f32 %v1453_v55, %v1286_v58  ;;  %v1325_v24 = vadd.f32 %v1453_v55, %v1287_v4  ;;  %v1326_v45 = vadd.f32 %v1453_v55, %v1288_v54 }
 0x159   :  { %v1327_v29 = vadd.f32 %v1453_v55, %v1289_v0  ;;  %v1328_v57 = vadd.f32 %v1453_v55, %v1290_v15  ;;  %v1329_v56 = vadd.f32 %v1453_v55, %v1291_v19  ;;  %v1330_v8 = vadd.f32 %v1453_v55, %v1292_v44 }
 0x15a   :  { %v1331_v23 = vadd.f32 %v1453_v55, %v1293_v12  ;;  %v1332_v61 = vadd.f32 %v1453_v55, %v1294_v62  ;;  %v1333_v53 = vadd.f32 %v1453_v55, %v1295_v11  ;;  %v1334_v26 = vadd.f32 %v1453_v55, %v1296_v3 }
 0x15b   :  { %v1335_v1 = vadd.f32 %v1453_v55, %v1297_v50  ;;  %v1336_v30 = vadd.f32 %v1453_v55, %v1298_v31  ;;  %v1337_v6 = vadd.f32 %v1453_v55, %v1299_v16  ;;  %v1338_v2 = vadd.f32 %v1453_v55, %v1300_v28 }
 0x15c   :  { %v2110_v47 = vadd.f32 %v1453_v55, %v1301_v36  ;;  %v2112_v22 = vadd.f32 %v1453_v55, %v1302_v37  ;;  %v2114_v42 = vadd.f32 %v1453_v55, %v1303_v17  ;;  %v2116_v39 = vadd.f32 %v1453_v55, %v1304_v20 }
 0x15d   :  { %v2118_v60 = vadd.f32 %v1453_v55, %v1305_v43  ;;  %v2120_v52 = vadd.f32 %v1453_v55, %v1306_v59  ;;  %v2122_v32 = vadd.f32 %v1453_v55, %v1307_v63  ;;  %v2124_v38 = vadd.f32 %v1453_v55, %v1308_v13 }
 0x15e   :  { %v2126_v35 = vadd.f32 %v1453_v55, %v1309_v34  ;;  %v2128_v51 = vadd.f32 %v1453_v55, %v1310_v5  ;;  %v2130_v49 = vadd.f32 %v1453_v55, %v1311_v21  ;;  %v2132_v41 = vadd.f32 %v1453_v55, %v1312_v25 }
 0x15f   :  { %v1351_v14 = vmax.f32 %v1319_v10, 0.0  ;;  %v1352_v27 = vmax.f32 %v1320_v33, 0.0  ;;  %v1353_v9 = vmax.f32 %v1321_v18, 0.0  ;;  %v1354_v48 = vmax.f32 %v1322_v40, 0.0 }
 0x160   :  { %v1355_v58 = vmax.f32 %v1323_v46, 0.0  ;;  %v1356_v4 = vmax.f32 %v1324_v7, 0.0  ;;  %v1357_v54 = vmax.f32 %v1325_v24, 0.0  ;;  %v1358_v0 = vmax.f32 %v1326_v45, 0.0 }
 0x161   :  { %v1359_v15 = vmax.f32 %v1327_v29, 0.0  ;;  %v1360_v19 = vmax.f32 %v1328_v57, 0.0  ;;  %v1361_v44 = vmax.f32 %v1329_v56, 0.0  ;;  %v1362_v12 = vmax.f32 %v1330_v8, 0.0  ;;  %1383 = vst.msk [vmem:[%s2278_s4] sm:$0xff] %vm540_vm4, %v1351_v14  ;;  %1384 = vst.msk [vmem:[%s2278_s4 + $0x8] sm:$0xff] %vm540_vm4, %v1352_v27 }
 0x162   :  { %1385 = vst.msk [vmem:[%s2278_s4 + $0x10] sm:$0xff] %vm540_vm4, %v1353_v9  ;;  %1386 = vst.msk [vmem:[%s2278_s4 + $0x18] sm:$0xff] %vm540_vm4, %v1354_v48  ;;  %v1363_v62 = vmax.f32 %v1331_v23, 0.0  ;;  %v1364_v11 = vmax.f32 %v1332_v61, 0.0  ;;  %v1365_v3 = vmax.f32 %v1333_v53, 0.0  ;;  %v1366_v50 = vmax.f32 %v1334_v26, 0.0 }
 0x163   :  { %1387 = vst.msk [vmem:[%s2278_s4 + $0x20] sm:$0xff] %vm540_vm4, %v1355_v58  ;;  %1388 = vst.msk [vmem:[%s2278_s4 + $0x28] sm:$0xff] %vm540_vm4, %v1356_v4  ;;  %v1367_v31 = vmax.f32 %v1335_v1, 0.0  ;;  %v1368_v16 = vmax.f32 %v1336_v30, 0.0  ;;  %v1369_v28 = vmax.f32 %v1337_v6, 0.0  ;;  %v1370_v36 = vmax.f32 %v1338_v2, 0.0 }
 0x164   :  { %1389 = vst.msk [vmem:[%s2278_s4 + $0x30] sm:$0xff] %vm540_vm4, %v1357_v54  ;;  %1390 = vst.msk [vmem:[%s2278_s4 + $0x38] sm:$0xff] %vm540_vm4, %v1358_v0  ;;  %v1371_v37 = vmax.f32 %v2110_v47, 0.0  ;;  %v1372_v17 = vmax.f32 %v2112_v22, 0.0  ;;  %v1373_v20 = vmax.f32 %v2114_v42, 0.0  ;;  %v1374_v43 = vmax.f32 %v2116_v39, 0.0 }
 0x165   :  { %1391 = vst.msk [vmem:[%s2278_s4 + $0x40] sm:$0xff] %vm540_vm4, %v1359_v15  ;;  %1392 = vst.msk [vmem:[%s2278_s4 + $0x48] sm:$0xff] %vm540_vm4, %v1360_v19  ;;  %v1375_v59 = vmax.f32 %v2118_v60, 0.0  ;;  %v1376_v63 = vmax.f32 %v2120_v52, 0.0  ;;  %v1377_v13 = vmax.f32 %v2122_v32, 0.0  ;;  %v1378_v55 = vmax.f32 %v2124_v38, 0.0 }
 0x166   :  { %1393 = vst.msk [vmem:[%s2278_s4 + $0x50] sm:$0xff] %vm540_vm4, %v1361_v44  ;;  %1394 = vst.msk [vmem:[%s2278_s4 + $0x58] sm:$0xff] %vm540_vm4, %v1362_v12  ;;  %v1379_v34 = vmax.f32 %v2126_v35, 0.0  ;;  %v1380_v5 = vmax.f32 %v2128_v51, 0.0  ;;  %v1381_v21 = vmax.f32 %v2130_v49, 0.0  ;;  %v1382_v25 = vmax.f32 %v2132_v41, 0.0 }
 0x167   :  { %1395 = vst.msk [vmem:[%s2278_s4 + $0x60] sm:$0xff] %vm540_vm4, %v1363_v62  ;;  %1396 = vst.msk [vmem:[%s2278_s4 + $0x68] sm:$0xff] %vm540_vm4, %v1364_v11 }
 0x168   :  { %1397 = vst.msk [vmem:[%s2278_s4 + $0x70] sm:$0xff] %vm540_vm4, %v1365_v3  ;;  %1398 = vst.msk [vmem:[%s2278_s4 + $0x78] sm:$0xff] %vm540_vm4, %v1366_v50 }
 0x169   :  { %1399 = vst.msk [vmem:[%s2278_s4 + $0x80] sm:$0xff] %vm540_vm4, %v1367_v31  ;;  %1400 = vst.msk [vmem:[%s2278_s4 + $0x88] sm:$0xff] %vm540_vm4, %v1368_v16 }
 0x16a   :  { %1401 = vst.msk [vmem:[%s2278_s4 + $0x90] sm:$0xff] %vm540_vm4, %v1369_v28  ;;  %1402 = vst.msk [vmem:[%s2278_s4 + $0x98] sm:$0xff] %vm540_vm4, %v1370_v36 }
 0x16b   :  { %1403 = vst.msk [vmem:[%s2278_s4 + $0xa0] sm:$0xff] %vm540_vm4, %v1371_v37  ;;  %1404 = vst.msk [vmem:[%s2278_s4 + $0xa8] sm:$0xff] %vm540_vm4, %v1372_v17 }
 0x16c   :  { %1405 = vst.msk [vmem:[%s2278_s4 + $0xb0] sm:$0xff] %vm540_vm4, %v1373_v20  ;;  %1406 = vst.msk [vmem:[%s2278_s4 + $0xb8] sm:$0xff] %vm540_vm4, %v1374_v43 }
 0x16d   :  { %1407 = vst.msk [vmem:[%s2278_s4 + $0xc0] sm:$0xff] %vm540_vm4, %v1375_v59  ;;  %1408 = vst.msk [vmem:[%s2278_s4 + $0xc8] sm:$0xff] %vm540_vm4, %v1376_v63 }
 0x16e   :  { %1409 = vst.msk [vmem:[%s2278_s4 + $0xd0] sm:$0xff] %vm540_vm4, %v1377_v13  ;;  %1410 = vst.msk [vmem:[%s2278_s4 + $0xd8] sm:$0xff] %vm540_vm4, %v1378_v55 }
 0x16f   :  { %1411 = vst.msk [vmem:[%s2278_s4 + $0xe0] sm:$0xff] %vm540_vm4, %v1379_v34  ;;  %1412 = vst.msk [vmem:[%s2278_s4 + $0xe8] sm:$0xff] %vm540_vm4, %v1380_v5 }
 0x170   :  { %1413 = vst.msk [vmem:[%s2278_s4 + $0xf0] sm:$0xff] %vm540_vm4, %v1381_v21  ;;  %1414 = vst.msk [vmem:[%s2278_s4 + $0xf8] sm:$0xff] %vm540_vm4, %v1382_v25 }

// kernel: cdnet_forward.14
= control target key start
LH: loop header
LB: loop body
LE: loop exit
PB: predicated region body
PF: predicated region fallthrough
CT: control target
= control target key end

     0   :  { %vm132_vm0 = vcmask 523264   ;;  %s1555_s1 = inlined_call_operand.vmem [shape: f32[576,64], index: 1, kind: input, shape index: {}]   ;;  %s1556_s0 = inlined_call_operand.vmem [shape: f32[64,576], index: 0, kind: input, shape index: {}]   ;;  %s1557_s2 = inlined_call_operand.vmem [shape: f32[1,64], index: 2, kind: input, shape index: {}]   ;;  %s1558_s3 = inlined_call_operand.vmem [shape: f32[1,64], index: 3, kind: input, shape index: {}]   ;;  %s1559_s4 = inlined_call_operand.vmem [shape: f32[64,64], index: 4, kind: input, shape index: {}]   ;;  %s1560_s5 = inlined_call_operand.vmem [shape: f32[64,64], index: 5, kind: output, shape index: {}]  }
   0x1   :  { %v76_v0 = vld [vmem:[%s1555_s1 + $0x80] sm:$0xff]  ;;  %v77_v1 = vld [vmem:[%s1555_s1 + $0x88] sm:$0xff]  ;;  %v78_v11 = vld [vmem:[%s1555_s1 + $0x90] sm:$0xff] }
   0x2   :  { %v108_v2 = vld [vmem:[%s1555_s1 + $0x180] sm:$0xff]  ;;  %v951_v3 = vpack.c.bf16 %v77_v1, %v76_v0  ;;  %v109_v4 = vld [vmem:[%s1555_s1 + $0x188] sm:$0xff]  ;;  %v79_v13 = vld [vmem:[%s1555_s1 + $0x98] sm:$0xff] }
   0x3   :  { %v60_v5 = vld [vmem:[%s1555_s1] sm:$0xff]  ;;  %v61_v6 = vld [vmem:[%s1555_s1 + $0x8] sm:$0xff]  ;;  %v983_v7 = vpack.c.bf16 %v109_v4, %v108_v2  ;;  %v110_v14 = vld [vmem:[%s1555_s1 + $0x190] sm:$0xff]  ;;  %v955_v16 = vpack.c.bf16 %v79_v13, %v78_v11 }
   0x4   :  { %v953_v8 = vpack.c.bf16 %v61_v6, %v60_v5  ;;  %v92_v9 = vld [vmem:[%s1555_s1 + $0x100] sm:$0xff]  ;;  %v93_v10 = vld [vmem:[%s1555_s1 + $0x108] sm:$0xff]  ;;  %952 = vmatprep.subr.bf16.mxu0 %v951_v3  ;;  %v111_v15 = vld [vmem:[%s1555_s1 + $0x198] sm:$0xff] }
   0x5   :  { %v985_v12 = vpack.c.bf16 %v93_v10, %v92_v9  ;;  %984 = vmatprep.subr.bf16.mxu1 %v983_v7  ;;  %v987_v17 = vpack.c.bf16 %v111_v15, %v110_v14  ;;  %v62_v18 = vld [vmem:[%s1555_s1 + $0x10] sm:$0xff]  ;;  %v63_v19 = vld [vmem:[%s1555_s1 + $0x18] sm:$0xff]  ;;  %v80_v23 = vld [vmem:[%s1555_s1 + $0xa0] sm:$0xff] }
   0x6   :  { %954 = vmatpush3.bf16.msra.mxu0 %v953_v8  ;;  %v94_v20 = vld [vmem:[%s1555_s1 + $0x110] sm:$0xff]  ;;  %v957_v21 = vpack.c.bf16 %v63_v19, %v62_v18  ;;  %v95_v22 = vld [vmem:[%s1555_s1 + $0x118] sm:$0xff]  ;;  %v81_v24 = vld [vmem:[%s1555_s1 + $0xa8] sm:$0xff] }
   0x7   :  { %986 = vmatpush3.bf16.msra.mxu1 %v985_v12  ;;  %956 = vmatprep.subr.bf16.mxu0 %v955_v16  ;;  %v989_v25 = vpack.c.bf16 %v95_v22, %v94_v20  ;;  %v959_v26 = vpack.c.bf16 %v81_v24, %v80_v23  ;;  %v112_v27 = vld [vmem:[%s1555_s1 + $0x1a0] sm:$0xff]  ;;  %v113_v28 = vld [vmem:[%s1555_s1 + $0x1a8] sm:$0xff]  ;;  %v82_v35 = vld [vmem:[%s1555_s1 + $0xb0] sm:$0xff] }
   0x8   :  { %988 = vmatprep.subr.bf16.mxu1 %v987_v17  ;;  %v64_v29 = vld [vmem:[%s1555_s1 + $0x20] sm:$0xff]  ;;  %v991_v30 = vpack.c.bf16 %v113_v28, %v112_v27  ;;  %v65_v31 = vld [vmem:[%s1555_s1 + $0x28] sm:$0xff]  ;;  %v83_v36 = vld [vmem:[%s1555_s1 + $0xb8] sm:$0xff] }
   0x9   :  { %v96_v32 = vld [vmem:[%s1555_s1 + $0x120] sm:$0xff]  ;;  %v97_v33 = vld [vmem:[%s1555_s1 + $0x128] sm:$0xff]  ;;  %v961_v34 = vpack.c.bf16 %v65_v31, %v64_v29  ;;  %v114_v37 = vld [vmem:[%s1555_s1 + $0x1b0] sm:$0xff]  ;;  %v963_v39 = vpack.c.bf16 %v83_v36, %v82_v35 }
   0xa   :  { %958 = vmatpush3.bf16.msra.mxu0 %v957_v21  ;;  %v993_v38 = vpack.c.bf16 %v97_v33, %v96_v32  ;;  %v115_v40 = vld [vmem:[%s1555_s1 + $0x1b8] sm:$0xff]  ;;  %v66_v41 = vld [vmem:[%s1555_s1 + $0x30] sm:$0xff]  ;;  %v84_v46 = vld [vmem:[%s1555_s1 + $0xc0] sm:$0xff] }
   0xb   :  { %990 = vmatpush3.bf16.msra.mxu1 %v989_v25  ;;  %960 = vmatprep.subr.bf16.mxu0 %v959_v26  ;;  %v67_v42 = vld [vmem:[%s1555_s1 + $0x38] sm:$0xff]  ;;  %v995_v43 = vpack.c.bf16 %v115_v40, %v114_v37  ;;  %v98_v44 = vld [vmem:[%s1555_s1 + $0x130] sm:$0xff]  ;;  %v85_v47 = vld [vmem:[%s1555_s1 + $0xc8] sm:$0xff] }
   0xc   :  { %992 = vmatprep.subr.bf16.mxu1 %v991_v30  ;;  %v99_v45 = vld [vmem:[%s1555_s1 + $0x138] sm:$0xff]  ;;  %v116_v48 = vld [vmem:[%s1555_s1 + $0x1c0] sm:$0xff]  ;;  %v117_v49 = vld [vmem:[%s1555_s1 + $0x1c8] sm:$0xff]  ;;  %v965_v50 = vpack.c.bf16 %v67_v42, %v66_v41  ;;  %v967_v52 = vpack.c.bf16 %v85_v47, %v84_v46 }
   0xd   :  { %v997_v51 = vpack.c.bf16 %v99_v45, %v98_v44  ;;  %v68_v53 = vld [vmem:[%s1555_s1 + $0x40] sm:$0xff]  ;;  %v69_v54 = vld [vmem:[%s1555_s1 + $0x48] sm:$0xff]  ;;  %v999_v56 = vpack.c.bf16 %v117_v49, %v116_v48  ;;  %v86_v58 = vld [vmem:[%s1555_s1 + $0xd0] sm:$0xff] }
   0xe   :  { %962 = vmatpush3.bf16.msra.mxu0 %v961_v34  ;;  %v100_v55 = vld [vmem:[%s1555_s1 + $0x140] sm:$0xff]  ;;  %v101_v57 = vld [vmem:[%s1555_s1 + $0x148] sm:$0xff]  ;;  %v87_v59 = vld [vmem:[%s1555_s1 + $0xd8] sm:$0xff]  ;;  %v969_v62 = vpack.c.bf16 %v69_v54, %v68_v53 }
   0xf   :  { %994 = vmatpush3.bf16.msra.mxu1 %v993_v38  ;;  %964 = vmatprep.subr.bf16.mxu0 %v963_v39  ;;  %v118_v60 = vld [vmem:[%s1555_s1 + $0x1d0] sm:$0xff]  ;;  %v119_v61 = vld [vmem:[%s1555_s1 + $0x1d8] sm:$0xff]  ;;  %v1001_v63 = vpack.c.bf16 %v101_v57, %v100_v55  ;;  %v971_v0 = vpack.c.bf16 %v87_v59, %v86_v58  ;;  %v88_v6 = vld [vmem:[%s1555_s1 + $0xe0] sm:$0xff] }
  0x10   :  { %996 = vmatprep.subr.bf16.mxu1 %v995_v43  ;;  %v70_v1 = vld [vmem:[%s1555_s1 + $0x50] sm:$0xff]  ;;  %v71_v2 = vld [vmem:[%s1555_s1 + $0x58] sm:$0xff]  ;;  %v1003_v4 = vpack.c.bf16 %v119_v61, %v118_v60  ;;  %v89_v7 = vld [vmem:[%s1555_s1 + $0xe8] sm:$0xff] }
  0x11   :  { %v102_v3 = vld [vmem:[%s1555_s1 + $0x150] sm:$0xff]  ;;  %v103_v5 = vld [vmem:[%s1555_s1 + $0x158] sm:$0xff]  ;;  %v120_v8 = vld [vmem:[%s1555_s1 + $0x1e0] sm:$0xff]  ;;  %v973_v10 = vpack.c.bf16 %v71_v2, %v70_v1  ;;  %v975_v14 = vpack.c.bf16 %v89_v7, %v88_v6 }
  0x12   :  { %966 = vmatpush3.bf16.msra.mxu0 %v965_v50  ;;  %v121_v9 = vld [vmem:[%s1555_s1 + $0x1e8] sm:$0xff]  ;;  %v72_v11 = vld [vmem:[%s1555_s1 + $0x60] sm:$0xff]  ;;  %v1005_v13 = vpack.c.bf16 %v103_v5, %v102_v3  ;;  %v23_v17 = vld [vmem:[%s1556_s0 + $0x18] sm:$0xff] }
  0x13   :  { %998 = vmatpush3.bf16.msra.mxu1 %v997_v51  ;;  %968 = vmatprep.subr.bf16.mxu0 %v967_v52  ;;  %v73_v12 = vld [vmem:[%s1555_s1 + $0x68] sm:$0xff]  ;;  %v104_v15 = vld [vmem:[%s1555_s1 + $0x160] sm:$0xff]  ;;  %v1007_v18 = vpack.c.bf16 %v121_v9, %v120_v8  ;;  %v90_v20 = vld [vmem:[%s1555_s1 + $0xf0] sm:$0xff] }
  0x14   :  { %1000 = vmatprep.subr.bf16.mxu1 %v999_v56  ;;  %v21_v16 = vld [vmem:[%s1556_s0 + $0x8] sm:$0xff]  ;;  %v91_v21 = vld [vmem:[%s1555_s1 + $0xf8] sm:$0xff]  ;;  %v122_v22 = vld [vmem:[%s1555_s1 + $0x1f0] sm:$0xff]  ;;  %326 = vmatprep.mubr.f32.mxu1 %v23_v17  ;;  %v977_v24 = vpack.c.bf16 %v73_v12, %v72_v11 }
  0x15   :  { %v105_v19 = vld [vmem:[%s1555_s1 + $0x168] sm:$0xff]  ;;  %221 = vmatprep.mubr.f32.mxu0 %v21_v16  ;;  %v123_v23 = vld [vmem:[%s1555_s1 + $0x1f8] sm:$0xff]  ;;  %v979_v26 = vpack.c.bf16 %v91_v21, %v90_v20  ;;  %v74_v27 = vld [vmem:[%s1555_s1 + $0x70] sm:$0xff] }
  0x16   :  { %970 = vmatpush3.bf16.msra.mxu0 %v969_v62  ;;  %v1009_v25 = vpack.c.bf16 %v105_v19, %v104_v15  ;;  %v75_v28 = vld [vmem:[%s1555_s1 + $0x78] sm:$0xff]  ;;  %v106_v29 = vld [vmem:[%s1555_s1 + $0x170] sm:$0xff]  ;;  %v1011_v30 = vpack.c.bf16 %v123_v23, %v122_v22  ;;  %v124_v32 = vld [vmem:[%s1555_s1 + $0x200] sm:$0xff] }
  0x17   :  { %1002 = vmatpush3.bf16.msra.mxu1 %v1001_v63  ;;  %972 = vmatprep.subr.bf16.mxu0 %v971_v0  ;;  %v107_v31 = vld [vmem:[%s1555_s1 + $0x178] sm:$0xff]  ;;  %v125_v33 = vld [vmem:[%s1555_s1 + $0x208] sm:$0xff]  ;;  %v981_v34 = vpack.c.bf16 %v75_v28, %v74_v27  ;;  %v126_v37 = vld [vmem:[%s1555_s1 + $0x210] sm:$0xff] }
  0x18   :  { %1004 = vmatprep.subr.bf16.mxu1 %v1003_v4  ;;  %v1013_v35 = vpack.c.bf16 %v107_v31, %v106_v29  ;;  %v1015_v36 = vpack.c.bf16 %v125_v33, %v124_v32  ;;  %v127_v38 = vld [vmem:[%s1555_s1 + $0x218] sm:$0xff]  ;;  %v20_v39 = vld [vmem:[%s1556_s0] sm:$0xff]  ;;  %v22_v40 = vld [vmem:[%s1556_s0 + $0x10] sm:$0xff] }
  0x19   :  { %v26_v41 = vld [vmem:[%s1556_s0 + $0x30] sm:$0xff]  ;;  %v28_v42 = vld [vmem:[%s1556_s0 + $0x40] sm:$0xff]  ;;  %v1019_v43 = vpack.c.bf16 %v127_v38, %v126_v37  ;;  %v129_v45 = vld [vmem:[%s1555_s1 + $0x228] sm:$0xff] }
  0x1a   :  { %974 = vmatpush3.bf16.msra.mxu0 %v973_v10  ;;  %v128_v44 = vld [vmem:[%s1555_s1 + $0x220] sm:$0xff]  ;;  %v25_v46 = vld [vmem:[%s1556_s0 + $0x28] sm:$0xff]  ;;  %v27_v47 = vld [vmem:[%s1556_s0 + $0x38] sm:$0xff] }
  0x1b   :  { %1006 = vmatpush3.bf16.msra.mxu1 %v1005_v13  ;;  %976 = vmatprep.subr.bf16.mxu0 %v975_v14  ;;  %v31_v48 = vld [vmem:[%s1556_s0 + $0x58] sm:$0xff]  ;;  %v33_v49 = vld [vmem:[%s1556_s0 + $0x68] sm:$0xff]  ;;  %v1023_v50 = vpack.c.bf16 %v129_v45, %v128_v44  ;;  %v130_v51 = vld [vmem:[%s1555_s1 + $0x230] sm:$0xff] }
  0x1c   :  { %1008 = vmatprep.subr.bf16.mxu1 %v1007_v18  ;;  %v131_v52 = vld [vmem:[%s1555_s1 + $0x238] sm:$0xff]  ;;  %v30_v53 = vld [vmem:[%s1556_s0 + $0x50] sm:$0xff]  ;;  %v32_v54 = vld [vmem:[%s1556_s0 + $0x60] sm:$0xff] }
  0x1d   :  { %v36_v55 = vld [vmem:[%s1556_s0 + $0x80] sm:$0xff]  ;;  %v38_v56 = vld [vmem:[%s1556_s0 + $0x90] sm:$0xff]  ;;  %v1027_v57 = vpack.c.bf16 %v131_v52, %v130_v51  ;;  %v35_v58 = vld [vmem:[%s1556_s0 + $0x78] sm:$0xff] }
  0x1e   :  { %978 = vmatpush3.bf16.msra.mxu0 %v977_v24  ;;  %v37_v59 = vld [vmem:[%s1556_s0 + $0x88] sm:$0xff]  ;;  %v43_v61 = vld [vmem:[%s1556_s0 + $0xb8] sm:$0xff]  ;;  %v40_v62 = vld [vmem:[%s1556_s0 + $0xa0] sm:$0xff] }
  0x1f   :  { %1010 = vmatpush3.bf16.msra.mxu1 %v1009_v25  ;;  %980 = vmatprep.subr.bf16.mxu0 %v979_v26  ;;  %v41_v60 = vld [vmem:[%s1556_s0 + $0xa8] sm:$0xff]  ;;  %v42_v63 = vld [vmem:[%s1556_s0 + $0xb0] sm:$0xff]  ;;  %v48_v1 = vld [vmem:[%s1556_s0 + $0xe0] sm:$0xff] }
  0x20   :  { %1012 = vmatprep.subr.bf16.mxu1 %v1011_v30  ;;  %v46_v0 = vld [vmem:[%s1556_s0 + $0xd0] sm:$0xff]  ;;  %v45_v2 = vld [vmem:[%s1556_s0 + $0xc8] sm:$0xff]  ;;  %v47_v3 = vld [vmem:[%s1556_s0 + $0xd8] sm:$0xff] }
  0x21   :  { %v51_v4 = vld [vmem:[%s1556_s0 + $0xf8] sm:$0xff]  ;;  %v53_v5 = vld [vmem:[%s1556_s0 + $0x108] sm:$0xff]  ;;  %v50_v6 = vld [vmem:[%s1556_s0 + $0xf0] sm:$0xff] }
  0x22   :  { %982 = vmatpush3.bf16.msra.mxu0 %v981_v34  ;;  %v52_v7 = vld [vmem:[%s1556_s0 + $0x100] sm:$0xff]  ;;  %v58_v9 = vld [vmem:[%s1556_s0 + $0x130] sm:$0xff]  ;;  %v55_v10 = vld [vmem:[%s1556_s0 + $0x118] sm:$0xff] }
  0x23   :  { %1014 = vmatpush3.bf16.msra.mxu1 %v1013_v35  ;;  %1016 = vmatprep.subr.bf16.mxu0 %v1015_v36  ;;  %v56_v8 = vld [vmem:[%s1556_s0 + $0x120] sm:$0xff]  ;;  %v57_v11 = vld [vmem:[%s1556_s0 + $0x128] sm:$0xff]  ;;  %v34_v16 = vld [vmem:[%s1556_s0 + $0x70] sm:$0xff] }
  0x24   :  { %1031 = vmatprep.subr.bf16.mxu1 %v1015_v36  ;;  %v24_v12 = vld [vmem:[%s1556_s0 + $0x20] sm:$0xff]  ;;  %v29_v14 = vld [vmem:[%s1556_s0 + $0x48] sm:$0xff]  ;;  %v54_v17 = vld [vmem:[%s1556_s0 + $0x110] sm:$0xff] }
  0x25   :  { %222 = vmatmul.mubr.f32.vlgmr.msra.gmra.mrb[0].mxu0 %v20_v39  ;;  %v44_v13 = vld [vmem:[%s1556_s0 + $0xc0] sm:$0xff]  ;;  %v49_v15 = vld [vmem:[%s1556_s0 + $0xe8] sm:$0xff]  ;;  %v39_v18 = vld [vmem:[%s1556_s0 + $0x98] sm:$0xff] }
  0x26   :  { %327 = vmatmul.mubr.f32.vlgmr.msra.gmra.mrb[0].mxu1 %v22_v40  ;;  %1018 = vmatpush3.bf16.msra.mxu0 %v1015_v36  ;;  %v59_v19 = vld [vmem:[%s1556_s0 + $0x138] sm:$0xff] }
  0x27   :  { %226 = vmatprep.mubr.f32.mxu0 %v26_v41  ;;  %331 = vmatprep.mubr.f32.mxu1 %v28_v42 }
  0x28   :  { %1035 = vmatpush3.bf16.msra.mxu1 %v1015_v36  ;;  %1020 = vmatprep.subr.bf16.mxu0 %v1019_v43 }
  0x29   :  { %227 = vmatmul.mubr.f32.gmra.mrb[2].mxu0 %v25_v46  ;;  %1032 = vmatprep.subr.bf16.mxu1 %v1019_v43 }
  0x2a   :  { %332 = vmatmul.mubr.f32.gmra.mrb[2].mxu1 %v27_v47  ;;  %231 = vmatprep.mubr.f32.mxu0 %v31_v48 }
  0x2b   :  { %336 = vmatprep.mubr.f32.mxu1 %v33_v49  ;;  %1022 = vmatpush3.bf16.msra.mxu0 %v1019_v43 }
  0x2c   :  { %1036 = vmatpush3.bf16.msra.mxu1 %v1019_v43  ;;  %1024 = vmatprep.subr.bf16.mxu0 %v1023_v50 }
  0x2d   :  { %232 = vmatmul.mubr.f32.gmra.mrb[4].mxu0 %v30_v53  ;;  %1033 = vmatprep.subr.bf16.mxu1 %v1023_v50 }
  0x2e   :  { %337 = vmatmul.mubr.f32.gmra.mrb[4].mxu1 %v32_v54  ;;  %236 = vmatprep.mubr.f32.mxu0 %v36_v55 }
  0x2f   :  { %341 = vmatprep.mubr.f32.mxu1 %v38_v56  ;;  %1026 = vmatpush3.bf16.msra.mxu0 %v1023_v50 }
  0x30   :  { %1037 = vmatpush3.bf16.msra.mxu1 %v1023_v50  ;;  %1028 = vmatprep.subr.bf16.mxu0 %v1027_v57 }
  0x31   :  { %237 = vmatmul.mubr.f32.gmra.mrb[6].mxu0 %v35_v58  ;;  %1034 = vmatprep.subr.bf16.mxu1 %v1027_v57 }
  0x32   :  { %342 = vmatmul.mubr.f32.gmra.mrb[6].mxu1 %v37_v59  ;;  %241 = vmatprep.mubr.f32.mxu0 %v41_v60 }
  0x33   :  { %346 = vmatprep.mubr.f32.mxu1 %v43_v61  ;;  %1030 = vmatpush3.bf16.msra.mxu0 %v1027_v57 }
  0x34   :  { %1038 = vmatpush3.bf16.msra.mxu1 %v1027_v57 }
  0x35   :  { %242 = vmatmul.mubr.f32.gmra.mrb[8].mxu0 %v40_v62 }
  0x36   :  { %347 = vmatmul.mubr.f32.gmra.mrb[8].mxu1 %v42_v63  ;;  %246 = vmatprep.mubr.f32.mxu0 %v46_v0 }
  0x37   :  { %351 = vmatprep.mubr.f32.mxu1 %v48_v1 }
  0x39   :  { %247 = vmatmul.mubr.f32.gmra.mrb[10].mxu0 %v45_v2 }
  0x3a   :  { %352 = vmatmul.mubr.f32.gmra.mrb[10].mxu1 %v47_v3  ;;  %251 = vmatprep.mubr.f32.mxu0 %v51_v4 }
  0x3b   :  { %356 = vmatprep.mubr.f32.mxu1 %v53_v5 }
  0x3d   :  { %252 = vmatmul.mubr.f32.gmra.mrb[12].mxu0 %v50_v6 }
  0x3e   :  { %357 = vmatmul.mubr.f32.gmra.mrb[12].mxu1 %v52_v7  ;;  %256 = vmatprep.mubr.f32.mxu0 %v56_v8 }
  0x3f   :  { %361 = vmatprep.mubr.f32.mxu1 %v58_v9 }
  0x41   :  { %257 = vmatmul.mubr.f32.gmra.mrb[14].mxu0 %v55_v10 }
  0x42   :  { %362 = vmatmul.mubr.f32.gmra.mrb[14].mxu1 %v57_v11  ;;  %939 = vmatprep.mubr.msk.f32.mxu0 %vm132_vm0, %v24_v12 }
  0x43   :  { %945 = vmatprep.mubr.msk.f32.mxu1 %vm132_vm0, %v44_v13 }
  0x45   :  { %940 = vmatmul.mubr.msk.f32.vlgmr.msra.gmra.mrb[16].mxu0 %vm132_vm0, %v29_v14 }
  0x46   :  { %946 = vmatmul.mubr.msk.f32.vlgmr.msra.gmra.mrb[16].mxu1 %vm132_vm0, %v49_v15  ;;  %942 = vmatprep.mubr.msk.f32.mxu0 %vm132_vm0, %v34_v16 }
  0x47   :  { %948 = vmatprep.mubr.msk.f32.mxu1 %vm132_vm0, %v54_v17 }
  0x49   :  { %943 = vmatmul.mubr.msk.f32.gmra.mrb[18].mxu0 %vm132_vm0, %v39_v18 }
  0x4a   :  { %949 = vmatmul.mubr.msk.f32.gmra.mrb[18].mxu1 %vm132_vm0, %v59_v19 }
  0xf8   :  { %v827_v20 = vpop.f32.mrb[0].mxu0 }
  0xf9   :  { %v883_v21 = vpop.f32.mrb[0].mxu1  ;;  %v828_v22 = vpop.f32.mrb[1].mxu0 }
  0xfa   :  { %v829_v23 = vadd.f32 %v828_v22, %v827_v20  ;;  %v884_v24 = vpop.f32.mrb[1].mxu1 }
  0xfb   :  { %v885_v25 = vadd.f32 %v884_v24, %v883_v21 }
  0xfc   :  { %v830_v26 = vpop.f32.mrb[2].mxu0 }
  0xfd   :  { %v886_v27 = vpop.f32.mrb[2].mxu1  ;;  %v831_v28 = vpop.f32.mrb[3].mxu0  ;;  %v329_v29 = vadd.f32 %v885_v25, %v829_v23 }
  0xfe   :  { %v832_v30 = vadd.f32 %v831_v28, %v830_v26  ;;  %v887_v31 = vpop.f32.mrb[3].mxu1 }
  0xff   :  { %v888_v32 = vadd.f32 %v887_v31, %v886_v27 }
 0x100   :  { %v833_v33 = vpop.f32.mrb[4].mxu0 }
 0x101   :  { %v889_v34 = vpop.f32.mrb[4].mxu1  ;;  %v834_v35 = vpop.f32.mrb[5].mxu0  ;;  %v334_v36 = vadd.f32 %v888_v32, %v832_v30 }
 0x102   :  { %v835_v37 = vadd.f32 %v834_v35, %v833_v33  ;;  %v890_v38 = vpop.f32.mrb[5].mxu1 }
 0x103   :  { %v891_v39 = vadd.f32 %v890_v38, %v889_v34 }
 0x104   :  { %v836_v40 = vpop.f32.mrb[6].mxu0 }
 0x105   :  { %v892_v41 = vpop.f32.mrb[6].mxu1  ;;  %v837_v42 = vpop.f32.mrb[7].mxu0  ;;  %v339_v43 = vadd.f32 %v891_v39, %v835_v37 }
 0x106   :  { %v838_v44 = vadd.f32 %v837_v42, %v836_v40  ;;  %v893_v45 = vpop.f32.mrb[7].mxu1 }
 0x107   :  { %v894_v46 = vadd.f32 %v893_v45, %v892_v41 }
 0x108   :  { %v839_v47 = vpop.f32.mrb[8].mxu0 }
 0x109   :  { %v895_v48 = vpop.f32.mrb[8].mxu1  ;;  %v840_v49 = vpop.f32.mrb[9].mxu0  ;;  %v344_v50 = vadd.f32 %v894_v46, %v838_v44 }
 0x10a   :  { %v841_v51 = vadd.f32 %v840_v49, %v839_v47  ;;  %v896_v52 = vpop.f32.mrb[9].mxu1 }
 0x10b   :  { %v897_v53 = vadd.f32 %v896_v52, %v895_v48 }
 0x10c   :  { %v842_v54 = vpop.f32.mrb[10].mxu0 }
 0x10d   :  { %v898_v55 = vpop.f32.mrb[10].mxu1  ;;  %v843_v56 = vpop.f32.mrb[11].mxu0  ;;  %v349_v57 = vadd.f32 %v897_v53, %v841_v51 }
 0x10e   :  { %v844_v58 = vadd.f32 %v843_v56, %v842_v54  ;;  %v899_v59 = vpop.f32.mrb[11].mxu1 }
 0x10f   :  { %v900_v60 = vadd.f32 %v899_v59, %v898_v55 }
 0x110   :  { %v845_v61 = vpop.f32.mrb[12].mxu0 }
 0x111   :  { %v901_v62 = vpop.f32.mrb[12].mxu1  ;;  %v846_v63 = vpop.f32.mrb[13].mxu0  ;;  %v354_v0 = vadd.f32 %v900_v60, %v844_v58 }
 0x112   :  { %v847_v1 = vadd.f32 %v846_v63, %v845_v61  ;;  %v902_v2 = vpop.f32.mrb[13].mxu1 }
 0x113   :  { %v903_v3 = vadd.f32 %v902_v2, %v901_v62 }
 0x114   :  { %v848_v4 = vpop.f32.mrb[14].mxu0 }
 0x115   :  { %v904_v5 = vpop.f32.mrb[14].mxu1  ;;  %v849_v6 = vpop.f32.mrb[15].mxu0  ;;  %v359_v7 = vadd.f32 %v903_v3, %v847_v1 }
 0x116   :  { %v850_v8 = vadd.f32 %v849_v6, %v848_v4  ;;  %v905_v9 = vpop.f32.mrb[15].mxu1 }
 0x117   :  { %v906_v10 = vadd.f32 %v905_v9, %v904_v5 }
 0x118   :  { %v941_v11 = vpop.f32.mrb[16].mxu0 }
 0x119   :  { %v1417_v12 = vadd.f32 %v941_v11, %v334_v36  ;;  %v947_v13 = vpop.f32.mrb[16].mxu1  ;;  %v433_v14 = vpop.f32.mrb[17].mxu0  ;;  %v364_v15 = vadd.f32 %v906_v10, %v850_v8 }
 0x11a   :  { %v1419_v16 = vadd.f32 %v947_v13, %v354_v0  ;;  %v1421_v17 = vadd.f32 %v433_v14, %v329_v29  ;;  %v453_v18 = vpop.f32.mrb[17].mxu1 }
 0x11b   :  { %v516_v19 = vsel %vm132_vm0, %v1417_v12, 0.0  ;;  %v537_v20 = vmul.f32 %v1417_v12, %v1417_v12  ;;  %v1427_v21 = vadd.f32 %v453_v18, %v349_v57 }
 0x11c   :  { %v515_v22 = vsel %vm132_vm0, %v1421_v17, 0.0  ;;  %v944_v23 = vpop.f32.mrb[18].mxu0  ;;  %v536_v26 = vmul.f32 %v1421_v17, %v1421_v17  ;;  %v512_v33 = vmul.f32 0.0, %v1419_v16  ;;  %v541_v38 = vmul.f32 %v1419_v16, %v1419_v16 }
 0x11d   :  { %v553_v24 = vsel %vm132_vm0, %v537_v20, 0.0  ;;  %v517_v25 = vadd.f32 %v516_v19, %v515_v22  ;;  %v950_v27 = vpop.f32.mrb[18].mxu1  ;;  %v443_v28 = vpop.f32.mrb[19].mxu0  ;;  %v1435_v31 = vadd.f32 %v944_v23, %v344_v50  ;;  %v540_v36 = vmul.f32 %v1427_v21, %v1427_v21 }
 0x11e   :  { %v463_v29 = vpop.f32.mrb[19].mxu1  ;;  %v552_v30 = vsel %vm132_vm0, %v536_v26, 0.0  ;;  %v1438_v34 = vadd.f32 %v950_v27, %v364_v15  ;;  %v1440_v35 = vadd.f32 %v443_v28, %v339_v43  ;;  %v511_v39 = vmul.f32 0.0, %v1427_v21 }
 0x11f   :  { %v554_v32 = vadd.f32 %v553_v24, %v552_v30  ;;  %v1444_v37 = vadd.f32 %v463_v29, %v359_v7  ;;  %v539_v40 = vmul.f32 %v1435_v31, %v1435_v31  ;;  %v524_v43 = vsel %vm132_vm0, %v512_v33, 0.0 }
 0x120   :  { %v518_v41 = vsel %vm132_vm0, %v1440_v35, 0.0  ;;  %v538_v42 = vmul.f32 %v1440_v35, %v1440_v35  ;;  %v582_v44 = vsel %vm132_vm0, %v1419_v16, 0.0  ;;  %v548_v46 = vmul.f32 0.0, %v540_v36 }
 0x121   :  { %v519_v45 = vadd.f32 %v518_v41, %v517_v25  ;;  %v520_v47 = vsel %vm132_vm0, %v1435_v31, 0.0  ;;  %v542_v49 = vmul.f32 %v1444_v37, %v1444_v37  ;;  %v549_v50 = vmul.f32 0.0, %v541_v38 }
 0x122   :  { %v555_v48 = vsel %vm132_vm0, %v538_v42, 0.0  ;;  %v522_v51 = vsel %vm132_vm0, %v511_v39, 0.0  ;;  %v580_v54 = vsel %vm132_vm0, %v1427_v21, 0.0  ;;  %v557_v55 = vsel %vm132_vm0, %v539_v40, 0.0 }
 0x123   :  { %v521_v52 = vadd.f32 %v520_v47, %v519_v45  ;;  %v556_v53 = vadd.f32 %v555_v48, %v554_v32  ;;  %v543_v56 = vmul.f32 %v1438_v34, %v1438_v34  ;;  %v513_v57 = vmul.f32 0.0, %v1444_v37 }
 0x124   :  { %v603_v58 = vsel %vm132_vm0, %v541_v38, 0.0  ;;  %v559_v62 = vsel %vm132_vm0, %v548_v46, 0.0  ;;  %v601_v63 = vsel %vm132_vm0, %v540_v36, 0.0  ;;  %v514_v0 = vmul.f32 0.0, %v1438_v34 }
 0x125   :  { %v523_v59 = vadd.f32 %v522_v51, %v521_v52  ;;  %v558_v60 = vadd.f32 %v557_v55, %v556_v53  ;;  %v581_v61 = vadd.f32 %v580_v54, %v521_v52  ;;  %v550_v1 = vmul.f32 0.0, %v542_v49 }
 0x126   :  { %v561_v6 = vsel %vm132_vm0, %v549_v50, 0.0  ;;  %v551_v7 = vmul.f32 0.0, %v543_v56  ;;  %v526_v8 = vsel %vm132_vm0, %v513_v57, 0.0  ;;  %v584_v9 = vsel %vm132_vm0, %v1444_v37, 0.0 }
 0x127   :  { %v525_v2 = vadd.f32 %v524_v43, %v523_v59  ;;  %v560_v3 = vadd.f32 %v559_v62, %v558_v60  ;;  %v602_v4 = vadd.f32 %v601_v63, %v558_v60  ;;  %v583_v5 = vadd.f32 %v582_v44, %v581_v61 }
 0x128   :  { %v528_v15 = vsel %vm132_vm0, %v514_v0, 0.0  ;;  %v586_v18 = vsel %vm132_vm0, %v1438_v34, 0.0  ;;  %v563_v19 = vsel %vm132_vm0, %v550_v1, 0.0  ;;  %v605_v20 = vsel %vm132_vm0, %v542_v49, 0.0 }
 0x129   :  { %v562_v10 = vadd.f32 %v561_v6, %v560_v3  ;;  %v527_v11 = vadd.f32 %v526_v8, %v525_v2  ;;  %v585_v13 = vadd.f32 %v584_v9, %v583_v5  ;;  %v604_v14 = vadd.f32 %v603_v58, %v602_v4 }
 0x12a   :  { %v565_v26 = vsel %vm132_vm0, %v551_v7, 0.0  ;;  %v607_v27 = vsel %vm132_vm0, %v543_v56, 0.0 }
 0x12b   :  { %v529_v22 = vadd.f32 %v528_v15, %v527_v11  ;;  %v564_v23 = vadd.f32 %v563_v19, %v562_v10  ;;  %v587_v24 = vadd.f32 %v586_v18, %v585_v13  ;;  %v606_v25 = vadd.f32 %v605_v20, %v604_v14 }
 0x12d   :  { %v530_v28 = vrot.slane %v529_v22, 4  ;;  %v566_v29 = vadd.f32 %v565_v26, %v564_v23  ;;  %v588_v30 = vrot.slane %v587_v24, 4  ;;  %v608_v32 = vadd.f32 %v607_v27, %v606_v25 }
 0x12f   :  { %v531_v33 = vadd.f32 %v530_v28, %v529_v22  ;;  %v567_v36 = vrot.slane %v566_v29, 4  ;;  %v589_v38 = vadd.f32 %v588_v30, %v587_v24  ;;  %v609_v39 = vrot.slane %v608_v32, 4 }
 0x131   :  { %v532_v40 = vrot.slane %v531_v33, 2  ;;  %v568_v41 = vadd.f32 %v567_v36, %v566_v29  ;;  %v590_v42 = vrot.slane %v589_v38, 2  ;;  %v610_v43 = vadd.f32 %v609_v39, %v608_v32 }
 0x133   :  { %v533_v44 = vadd.f32 %v532_v40, %v531_v33  ;;  %v569_v45 = vrot.slane %v568_v41, 2  ;;  %v591_v46 = vadd.f32 %v590_v42, %v589_v38  ;;  %v611_v47 = vrot.slane %v610_v43, 2  ;;  %v749_v40 = vld [vmem:[%s1559_s4] sm:$0xff] }
 0x135   :  { %v534_v48 = vrot.slane %v533_v44, 1  ;;  %v570_v49 = vadd.f32 %v569_v45, %v568_v41  ;;  %v592_v50 = vrot.slane %v591_v46, 1  ;;  %v612_v51 = vadd.f32 %v611_v47, %v610_v43  ;;  %v753_v41 = vld [vmem:[%s1559_s4 + $0x20] sm:$0xff]  ;;  %v755_v47 = vld [vmem:[%s1559_s4 + $0x30] sm:$0xff] }
 0x137   :  { %v535_v52 = vadd.f32 %v534_v48, %v533_v44  ;;  %v571_v53 = vrot.slane %v570_v49, 1  ;;  %v593_v54 = vadd.f32 %v592_v50, %v591_v46  ;;  %v613_v55 = vrot.slane %v612_v51, 1  ;;  %v754_v46 = vld [vmem:[%s1559_s4 + $0x28] sm:$0xff]  ;;  %v756_v48 = vld [vmem:[%s1559_s4 + $0x38] sm:$0xff] }
 0x139   :  { %v572_v56 = vadd.f32 %v571_v53, %v570_v49  ;;  %v614_v57 = vadd.f32 %v613_v55, %v612_v51  ;;  %v615_v58 = vmul.f32 0.03125, %v535_v52  ;;  %v616_v59 = vsub.f32 %v593_v54, %v535_v52  ;;  %v750_v53 = vld [vmem:[%s1559_s4 + $0x8] sm:$0xff]  ;;  %v751_v54 = vld [vmem:[%s1559_s4 + $0x10] sm:$0xff]  ;;  %v752_v55 = vld [vmem:[%s1559_s4 + $0x18] sm:$0xff] }
 0x13b   :  { %v617_v60 = vmul.f32 0.03125, %v616_v59  ;;  %v618_v61 = vmul.f32 0.03125, %v572_v56  ;;  %v619_v62 = vmul.f32 %v615_v58, %v615_v58  ;;  %v621_v63 = vsub.f32 %v614_v57, %v572_v56 }
 0x13c   :  { %v629_v0 = vmul.f32 0.0, %v615_v58 }
 0x13d   :  { %v620_v1 = vsub.f32 %v618_v61, %v619_v62  ;;  %v622_v2 = vmul.f32 0.03125, %v621_v63  ;;  %v623_v3 = vmul.f32 %v617_v60, %v617_v60  ;;  %v641_v4 = vmul.f32 0.0, %v617_v60 }
 0x13e   :  { %v653_v5 = vadd.f32 %v629_v0, %v617_v60 }
 0x13f   :  { %v624_v6 = vsub.f32 %v622_v2, %v623_v3  ;;  %v649_v7 = vadd.f32 %v641_v4, %v615_v58  ;;  %v661_v8 = vmul.f32 0.0, %v620_v1 }
 0x140   :  { %v693_v9 = vsub.f32 %v1427_v21, %v653_v5  ;;  %v694_v10 = vsub.f32 %v1419_v16, %v653_v5  ;;  %v695_v11 = vsub.f32 %v1444_v37, %v653_v5  ;;  %v696_v13 = vsub.f32 %v1438_v34, %v653_v5  ;;  %v793_v34 = vld [vmem:[%s1557_s2] ss:$0 sm:$0xff] }
 0x141   :  { %v665_v14 = vmul.f32 0.0, %v624_v6  ;;  %v677_v15 = vadd.f32 %v661_v8, %v624_v6  ;;  %v689_v18 = vsub.f32 %v1421_v17, %v649_v7  ;;  %v690_v19 = vsub.f32 %v1417_v12, %v649_v7 }
 0x142   :  { %v691_v20 = vsub.f32 %v1440_v35, %v649_v7  ;;  %v692_v22 = vsub.f32 %v1435_v31, %v649_v7  ;;  %v794_v31 = vld [vmem:[%s1558_s3] ss:$0 sm:$0xff] }
 0x143   :  { %v673_v23 = vadd.f32 %v665_v14, %v620_v1  ;;  %v685_v24 = vmax.f32 %v677_v15, 0.0 }
 0x145   :  { %v681_v25 = vmax.f32 %v673_v23, 0.0  ;;  %v701_v21 = vadd.f32 1e-05, %v685_v24 }
 0x147   :  { %v697_v26 = vadd.f32 1e-05, %v681_v25  ;;  %1039 = vrsqrt.f32 %v701_v21 }
 0x149   :  { %1041 = vrsqrt.f32 %v697_v26 }
 0x151   :  { %v1040_v16 = vpop.eup %1039 }
 0x152   :  { %v717_v37 = vmul.f32 %v1040_v16, %v693_v9  ;;  %v718_v17 = vmul.f32 %v1040_v16, %v694_v10  ;;  %v719_v27 = vmul.f32 %v1040_v16, %v695_v11  ;;  %v720_v12 = vmul.f32 %v1040_v16, %v696_v13 }
 0x153   :  { %v1042_v28 = vpop.eup %1041 }
 0x154   :  { %v713_v35 = vmul.f32 %v1042_v28, %v689_v18  ;;  %v714_v29 = vmul.f32 %v1042_v28, %v690_v19  ;;  %v715_v30 = vmul.f32 %v1042_v28, %v691_v20  ;;  %v716_v32 = vmul.f32 %v1042_v28, %v692_v22 }
 0x155   :  { %v731_v33 = vmul.f32 %v793_v34, %v717_v37  ;;  %v732_v36 = vmul.f32 %v793_v34, %v718_v17  ;;  %v733_v38 = vmul.f32 %v793_v34, %v719_v27  ;;  %v734_v39 = vmul.f32 %v793_v34, %v720_v12 }
 0x156   :  { %v727_v42 = vmul.f32 %v793_v34, %v713_v35  ;;  %v728_v43 = vmul.f32 %v793_v34, %v714_v29  ;;  %v729_v44 = vmul.f32 %v793_v34, %v715_v30  ;;  %v730_v45 = vmul.f32 %v793_v34, %v716_v32 }
 0x157   :  { %v745_v49 = vadd.f32 %v794_v31, %v731_v33  ;;  %v746_v50 = vadd.f32 %v794_v31, %v732_v36  ;;  %v747_v51 = vadd.f32 %v794_v31, %v733_v38  ;;  %v748_v52 = vadd.f32 %v794_v31, %v734_v39 }
 0x158   :  { %v741_v56 = vadd.f32 %v794_v31, %v727_v42  ;;  %v742_v57 = vadd.f32 %v794_v31, %v728_v43  ;;  %v743_v58 = vadd.f32 %v794_v31, %v729_v44  ;;  %v744_v59 = vadd.f32 %v794_v31, %v730_v45 }
 0x159   :  { %v761_v60 = vadd.f32 %v753_v41, %v745_v49  ;;  %v762_v61 = vadd.f32 %v754_v46, %v746_v50  ;;  %v763_v62 = vadd.f32 %v755_v47, %v747_v51  ;;  %v764_v63 = vadd.f32 %v756_v48, %v748_v52 }
 0x15a   :  { %v757_v0 = vadd.f32 %v749_v40, %v741_v56  ;;  %v758_v1 = vadd.f32 %v750_v53, %v742_v57  ;;  %v759_v2 = vadd.f32 %v751_v54, %v743_v58  ;;  %v760_v3 = vadd.f32 %v752_v55, %v744_v59 }
 0x15b   :  { %v769_v4 = vmax.f32 %v761_v60, 0.0  ;;  %v770_v5 = vmax.f32 %v762_v61, 0.0  ;;  %v771_v6 = vmax.f32 %v763_v62, 0.0  ;;  %v772_v7 = vmax.f32 %v764_v63, 0.0 }
 0x15c   :  { %v765_v8 = vmax.f32 %v757_v0, 0.0  ;;  %v766_v9 = vmax.f32 %v758_v1, 0.0  ;;  %v767_v10 = vmax.f32 %v759_v2, 0.0  ;;  %v768_v11 = vmax.f32 %v760_v3, 0.0 }
 0x15d   :  { %777 = vst.msk [vmem:[%s1560_s5 + $0x20] sm:$0xff] %vm132_vm0, %v769_v4  ;;  %778 = vst.msk [vmem:[%s1560_s5 + $0x28] sm:$0xff] %vm132_vm0, %v770_v5 }
 0x15e   :  { %779 = vst.msk [vmem:[%s1560_s5 + $0x30] sm:$0xff] %vm132_vm0, %v771_v6  ;;  %780 = vst.msk [vmem:[%s1560_s5 + $0x38] sm:$0xff] %vm132_vm0, %v772_v7 }
 0x15f   :  { %773 = vst.msk [vmem:[%s1560_s5] sm:$0xff] %vm132_vm0, %v765_v8  ;;  %774 = vst.msk [vmem:[%s1560_s5 + $0x8] sm:$0xff] %vm132_vm0, %v766_v9 }
 0x160   :  { %775 = vst.msk [vmem:[%s1560_s5 + $0x10] sm:$0xff] %vm132_vm0, %v767_v10  ;;  %776 = vst.msk [vmem:[%s1560_s5 + $0x18] sm:$0xff] %vm132_vm0, %v768_v11 }

// kernel: cdnet_forward.12
= control target key start
LH: loop header
LB: loop body
LE: loop exit
PB: predicated region body
PF: predicated region fallthrough
CT: control target
= control target key end

     0   :  { %vm141_vm0 = vcmask 523264   ;;  %s2165_s1 = inlined_call_operand.vmem [shape: f32[576,64], index: 1, kind: input, shape index: {}]   ;;  %s2166_s0 = inlined_call_operand.vmem [shape: f32[64,576], index: 0, kind: input, shape index: {}]   ;;  %s2167_s5 = inlined_call_operand.vmem [shape: f32[64,64], index: 5, kind: input, shape index: {}]   ;;  %s2168_s4 = inlined_call_operand.vmem [shape: f32[64,64], index: 4, kind: input, shape index: {}]   ;;  %s2169_s2 = inlined_call_operand.vmem [shape: f32[1,64], index: 2, kind: input, shape index: {}, may-alias: {2,6}]   ;;  %s2170_s3 = inlined_call_operand.vmem [shape: f32[1,64], index: 3, kind: input, shape index: {}, may-alias: {3,7}]   ;;  %s2171_s6 = inlined_call_operand.vmem [shape: f32[1,64], index: 6, kind: input, shape index: {}, may-alias: {2,6}]   ;;  %s2172_s7 = inlined_call_operand.vmem [shape: f32[1,64], index: 7, kind: input, shape index: {}, may-alias: {3,7}]   ;;  %s2173_s8 = inlined_call_operand.vmem [shape: f32[64,64], index: 8, kind: output, shape index: {}]  }
   0x1   :  { %v85_v0 = vld [vmem:[%s2165_s1 + $0x80] sm:$0xff]  ;;  %v86_v1 = vld [vmem:[%s2165_s1 + $0x88] sm:$0xff]  ;;  %v87_v11 = vld [vmem:[%s2165_s1 + $0x90] sm:$0xff] }
   0x2   :  { %v117_v2 = vld [vmem:[%s2165_s1 + $0x180] sm:$0xff]  ;;  %v1387_v3 = vpack.c.bf16 %v86_v1, %v85_v0  ;;  %v118_v4 = vld [vmem:[%s2165_s1 + $0x188] sm:$0xff]  ;;  %v88_v13 = vld [vmem:[%s2165_s1 + $0x98] sm:$0xff] }
   0x3   :  { %v69_v5 = vld [vmem:[%s2165_s1] sm:$0xff]  ;;  %v70_v6 = vld [vmem:[%s2165_s1 + $0x8] sm:$0xff]  ;;  %v1419_v7 = vpack.c.bf16 %v118_v4, %v117_v2  ;;  %v119_v14 = vld [vmem:[%s2165_s1 + $0x190] sm:$0xff]  ;;  %v1391_v16 = vpack.c.bf16 %v88_v13, %v87_v11 }
   0x4   :  { %v1389_v8 = vpack.c.bf16 %v70_v6, %v69_v5  ;;  %v101_v9 = vld [vmem:[%s2165_s1 + $0x100] sm:$0xff]  ;;  %v102_v10 = vld [vmem:[%s2165_s1 + $0x108] sm:$0xff]  ;;  %1388 = vmatprep.subr.bf16.mxu0 %v1387_v3  ;;  %v120_v15 = vld [vmem:[%s2165_s1 + $0x198] sm:$0xff] }
   0x5   :  { %v1421_v12 = vpack.c.bf16 %v102_v10, %v101_v9  ;;  %1420 = vmatprep.subr.bf16.mxu1 %v1419_v7  ;;  %v1423_v17 = vpack.c.bf16 %v120_v15, %v119_v14  ;;  %v71_v18 = vld [vmem:[%s2165_s1 + $0x10] sm:$0xff]  ;;  %v72_v19 = vld [vmem:[%s2165_s1 + $0x18] sm:$0xff]  ;;  %v89_v23 = vld [vmem:[%s2165_s1 + $0xa0] sm:$0xff] }
   0x6   :  { %1390 = vmatpush3.bf16.msra.mxu0 %v1389_v8  ;;  %v103_v20 = vld [vmem:[%s2165_s1 + $0x110] sm:$0xff]  ;;  %v1393_v21 = vpack.c.bf16 %v72_v19, %v71_v18  ;;  %v104_v22 = vld [vmem:[%s2165_s1 + $0x118] sm:$0xff]  ;;  %v90_v24 = vld [vmem:[%s2165_s1 + $0xa8] sm:$0xff] }
   0x7   :  { %1422 = vmatpush3.bf16.msra.mxu1 %v1421_v12  ;;  %1392 = vmatprep.subr.bf16.mxu0 %v1391_v16  ;;  %v1425_v25 = vpack.c.bf16 %v104_v22, %v103_v20  ;;  %v1395_v26 = vpack.c.bf16 %v90_v24, %v89_v23  ;;  %v121_v27 = vld [vmem:[%s2165_s1 + $0x1a0] sm:$0xff]  ;;  %v122_v28 = vld [vmem:[%s2165_s1 + $0x1a8] sm:$0xff]  ;;  %v91_v35 = vld [vmem:[%s2165_s1 + $0xb0] sm:$0xff] }
   0x8   :  { %1424 = vmatprep.subr.bf16.mxu1 %v1423_v17  ;;  %v73_v29 = vld [vmem:[%s2165_s1 + $0x20] sm:$0xff]  ;;  %v1427_v30 = vpack.c.bf16 %v122_v28, %v121_v27  ;;  %v74_v31 = vld [vmem:[%s2165_s1 + $0x28] sm:$0xff]  ;;  %v92_v36 = vld [vmem:[%s2165_s1 + $0xb8] sm:$0xff] }
   0x9   :  { %v105_v32 = vld [vmem:[%s2165_s1 + $0x120] sm:$0xff]  ;;  %v106_v33 = vld [vmem:[%s2165_s1 + $0x128] sm:$0xff]  ;;  %v1397_v34 = vpack.c.bf16 %v74_v31, %v73_v29  ;;  %v123_v37 = vld [vmem:[%s2165_s1 + $0x1b0] sm:$0xff]  ;;  %v1399_v39 = vpack.c.bf16 %v92_v36, %v91_v35 }
   0xa   :  { %1394 = vmatpush3.bf16.msra.mxu0 %v1393_v21  ;;  %v1429_v38 = vpack.c.bf16 %v106_v33, %v105_v32  ;;  %v124_v40 = vld [vmem:[%s2165_s1 + $0x1b8] sm:$0xff]  ;;  %v75_v41 = vld [vmem:[%s2165_s1 + $0x30] sm:$0xff]  ;;  %v93_v46 = vld [vmem:[%s2165_s1 + $0xc0] sm:$0xff] }
   0xb   :  { %1426 = vmatpush3.bf16.msra.mxu1 %v1425_v25  ;;  %1396 = vmatprep.subr.bf16.mxu0 %v1395_v26  ;;  %v76_v42 = vld [vmem:[%s2165_s1 + $0x38] sm:$0xff]  ;;  %v1431_v43 = vpack.c.bf16 %v124_v40, %v123_v37  ;;  %v107_v44 = vld [vmem:[%s2165_s1 + $0x130] sm:$0xff]  ;;  %v94_v47 = vld [vmem:[%s2165_s1 + $0xc8] sm:$0xff] }
   0xc   :  { %1428 = vmatprep.subr.bf16.mxu1 %v1427_v30  ;;  %v108_v45 = vld [vmem:[%s2165_s1 + $0x138] sm:$0xff]  ;;  %v125_v48 = vld [vmem:[%s2165_s1 + $0x1c0] sm:$0xff]  ;;  %v126_v49 = vld [vmem:[%s2165_s1 + $0x1c8] sm:$0xff]  ;;  %v1401_v50 = vpack.c.bf16 %v76_v42, %v75_v41  ;;  %v1403_v52 = vpack.c.bf16 %v94_v47, %v93_v46 }
   0xd   :  { %v1433_v51 = vpack.c.bf16 %v108_v45, %v107_v44  ;;  %v77_v53 = vld [vmem:[%s2165_s1 + $0x40] sm:$0xff]  ;;  %v78_v54 = vld [vmem:[%s2165_s1 + $0x48] sm:$0xff]  ;;  %v1435_v56 = vpack.c.bf16 %v126_v49, %v125_v48  ;;  %v95_v58 = vld [vmem:[%s2165_s1 + $0xd0] sm:$0xff] }
   0xe   :  { %1398 = vmatpush3.bf16.msra.mxu0 %v1397_v34  ;;  %v109_v55 = vld [vmem:[%s2165_s1 + $0x140] sm:$0xff]  ;;  %v110_v57 = vld [vmem:[%s2165_s1 + $0x148] sm:$0xff]  ;;  %v96_v59 = vld [vmem:[%s2165_s1 + $0xd8] sm:$0xff]  ;;  %v1405_v62 = vpack.c.bf16 %v78_v54, %v77_v53 }
   0xf   :  { %1430 = vmatpush3.bf16.msra.mxu1 %v1429_v38  ;;  %1400 = vmatprep.subr.bf16.mxu0 %v1399_v39  ;;  %v127_v60 = vld [vmem:[%s2165_s1 + $0x1d0] sm:$0xff]  ;;  %v128_v61 = vld [vmem:[%s2165_s1 + $0x1d8] sm:$0xff]  ;;  %v1437_v63 = vpack.c.bf16 %v110_v57, %v109_v55  ;;  %v1407_v0 = vpack.c.bf16 %v96_v59, %v95_v58  ;;  %v97_v6 = vld [vmem:[%s2165_s1 + $0xe0] sm:$0xff] }
  0x10   :  { %1432 = vmatprep.subr.bf16.mxu1 %v1431_v43  ;;  %v79_v1 = vld [vmem:[%s2165_s1 + $0x50] sm:$0xff]  ;;  %v80_v2 = vld [vmem:[%s2165_s1 + $0x58] sm:$0xff]  ;;  %v1439_v4 = vpack.c.bf16 %v128_v61, %v127_v60  ;;  %v98_v7 = vld [vmem:[%s2165_s1 + $0xe8] sm:$0xff] }
  0x11   :  { %v111_v3 = vld [vmem:[%s2165_s1 + $0x150] sm:$0xff]  ;;  %v112_v5 = vld [vmem:[%s2165_s1 + $0x158] sm:$0xff]  ;;  %v129_v8 = vld [vmem:[%s2165_s1 + $0x1e0] sm:$0xff]  ;;  %v1409_v10 = vpack.c.bf16 %v80_v2, %v79_v1  ;;  %v1411_v14 = vpack.c.bf16 %v98_v7, %v97_v6 }
  0x12   :  { %1402 = vmatpush3.bf16.msra.mxu0 %v1401_v50  ;;  %v130_v9 = vld [vmem:[%s2165_s1 + $0x1e8] sm:$0xff]  ;;  %v81_v11 = vld [vmem:[%s2165_s1 + $0x60] sm:$0xff]  ;;  %v1441_v13 = vpack.c.bf16 %v112_v5, %v111_v3  ;;  %v32_v17 = vld [vmem:[%s2166_s0 + $0x18] sm:$0xff] }
  0x13   :  { %1434 = vmatpush3.bf16.msra.mxu1 %v1433_v51  ;;  %1404 = vmatprep.subr.bf16.mxu0 %v1403_v52  ;;  %v82_v12 = vld [vmem:[%s2165_s1 + $0x68] sm:$0xff]  ;;  %v113_v15 = vld [vmem:[%s2165_s1 + $0x160] sm:$0xff]  ;;  %v1443_v18 = vpack.c.bf16 %v130_v9, %v129_v8  ;;  %v99_v20 = vld [vmem:[%s2165_s1 + $0xf0] sm:$0xff] }
  0x14   :  { %1436 = vmatprep.subr.bf16.mxu1 %v1435_v56  ;;  %v30_v16 = vld [vmem:[%s2166_s0 + $0x8] sm:$0xff]  ;;  %v100_v21 = vld [vmem:[%s2165_s1 + $0xf8] sm:$0xff]  ;;  %v131_v22 = vld [vmem:[%s2165_s1 + $0x1f0] sm:$0xff]  ;;  %335 = vmatprep.mubr.f32.mxu1 %v32_v17  ;;  %v1413_v24 = vpack.c.bf16 %v82_v12, %v81_v11 }
  0x15   :  { %v114_v19 = vld [vmem:[%s2165_s1 + $0x168] sm:$0xff]  ;;  %230 = vmatprep.mubr.f32.mxu0 %v30_v16  ;;  %v132_v23 = vld [vmem:[%s2165_s1 + $0x1f8] sm:$0xff]  ;;  %v1415_v26 = vpack.c.bf16 %v100_v21, %v99_v20  ;;  %v83_v27 = vld [vmem:[%s2165_s1 + $0x70] sm:$0xff] }
  0x16   :  { %1406 = vmatpush3.bf16.msra.mxu0 %v1405_v62  ;;  %v1445_v25 = vpack.c.bf16 %v114_v19, %v113_v15  ;;  %v84_v28 = vld [vmem:[%s2165_s1 + $0x78] sm:$0xff]  ;;  %v115_v29 = vld [vmem:[%s2165_s1 + $0x170] sm:$0xff]  ;;  %v1447_v30 = vpack.c.bf16 %v132_v23, %v131_v22  ;;  %v133_v32 = vld [vmem:[%s2165_s1 + $0x200] sm:$0xff] }
  0x17   :  { %1438 = vmatpush3.bf16.msra.mxu1 %v1437_v63  ;;  %1408 = vmatprep.subr.bf16.mxu0 %v1407_v0  ;;  %v116_v31 = vld [vmem:[%s2165_s1 + $0x178] sm:$0xff]  ;;  %v134_v33 = vld [vmem:[%s2165_s1 + $0x208] sm:$0xff]  ;;  %v766_v34 = vld [vmem:[%s2167_s5] sm:$0xff]  ;;  %v1417_v36 = vpack.c.bf16 %v84_v28, %v83_v27 }
  0x18   :  { %1440 = vmatprep.subr.bf16.mxu1 %v1439_v4  ;;  %v767_v35 = vld [vmem:[%s2167_s5 + $0x8] sm:$0xff]  ;;  %v1449_v37 = vpack.c.bf16 %v116_v31, %v115_v29  ;;  %v1451_v38 = vpack.c.bf16 %v134_v33, %v133_v32  ;;  %v135_v40 = vld [vmem:[%s2165_s1 + $0x210] sm:$0xff]  ;;  %v136_v41 = vld [vmem:[%s2165_s1 + $0x218] sm:$0xff] }
  0x19   :  { %v1467_v39 = vpack.c.bf16 %v767_v35, %v766_v34  ;;  %v29_v42 = vld [vmem:[%s2166_s0] sm:$0xff]  ;;  %v768_v43 = vld [vmem:[%s2167_s5 + $0x10] sm:$0xff]  ;;  %v769_v44 = vld [vmem:[%s2167_s5 + $0x18] sm:$0xff]  ;;  %v1455_v48 = vpack.c.bf16 %v136_v41, %v135_v40 }
  0x1a   :  { %1410 = vmatpush3.bf16.msra.mxu0 %v1409_v10  ;;  %v31_v45 = vld [vmem:[%s2166_s0 + $0x10] sm:$0xff]  ;;  %v37_v47 = vld [vmem:[%s2166_s0 + $0x40] sm:$0xff]  ;;  %v1471_v49 = vpack.c.bf16 %v769_v44, %v768_v43  ;;  %v138_v51 = vld [vmem:[%s2165_s1 + $0x228] sm:$0xff] }
  0x1b   :  { %1442 = vmatpush3.bf16.msra.mxu1 %v1441_v13  ;;  %1412 = vmatprep.subr.bf16.mxu0 %v1411_v14  ;;  %v35_v46 = vld [vmem:[%s2166_s0 + $0x30] sm:$0xff]  ;;  %v137_v50 = vld [vmem:[%s2165_s1 + $0x220] sm:$0xff]  ;;  %v34_v52 = vld [vmem:[%s2166_s0 + $0x28] sm:$0xff] }
  0x1c   :  { %1444 = vmatprep.subr.bf16.mxu1 %v1443_v18  ;;  %v770_v53 = vld [vmem:[%s2167_s5 + $0x20] sm:$0xff]  ;;  %v771_v54 = vld [vmem:[%s2167_s5 + $0x28] sm:$0xff]  ;;  %v36_v55 = vld [vmem:[%s2166_s0 + $0x38] sm:$0xff]  ;;  %v1459_v58 = vpack.c.bf16 %v138_v51, %v137_v50 }
  0x1d   :  { %v40_v56 = vld [vmem:[%s2166_s0 + $0x58] sm:$0xff]  ;;  %v42_v57 = vld [vmem:[%s2166_s0 + $0x68] sm:$0xff]  ;;  %v1475_v59 = vpack.c.bf16 %v771_v54, %v770_v53  ;;  %v139_v60 = vld [vmem:[%s2165_s1 + $0x230] sm:$0xff] }
  0x1e   :  { %1414 = vmatpush3.bf16.msra.mxu0 %v1413_v24  ;;  %v140_v61 = vld [vmem:[%s2165_s1 + $0x238] sm:$0xff]  ;;  %v39_v62 = vld [vmem:[%s2166_s0 + $0x50] sm:$0xff]  ;;  %v41_v1 = vld [vmem:[%s2166_s0 + $0x60] sm:$0xff] }
  0x1f   :  { %1446 = vmatpush3.bf16.msra.mxu1 %v1445_v25  ;;  %1416 = vmatprep.subr.bf16.mxu0 %v1415_v26  ;;  %v772_v63 = vld [vmem:[%s2167_s5 + $0x30] sm:$0xff]  ;;  %v773_v0 = vld [vmem:[%s2167_s5 + $0x38] sm:$0xff]  ;;  %v45_v2 = vld [vmem:[%s2166_s0 + $0x80] sm:$0xff]  ;;  %v1463_v4 = vpack.c.bf16 %v140_v61, %v139_v60 }
  0x20   :  { %1448 = vmatprep.subr.bf16.mxu1 %v1447_v30  ;;  %v47_v3 = vld [vmem:[%s2166_s0 + $0x90] sm:$0xff]  ;;  %v1479_v5 = vpack.c.bf16 %v773_v0, %v772_v63  ;;  %v44_v6 = vld [vmem:[%s2166_s0 + $0x78] sm:$0xff]  ;;  %v46_v7 = vld [vmem:[%s2166_s0 + $0x88] sm:$0xff] }
  0x21   :  { %v50_v8 = vld [vmem:[%s2166_s0 + $0xa8] sm:$0xff]  ;;  %v52_v9 = vld [vmem:[%s2166_s0 + $0xb8] sm:$0xff]  ;;  %v49_v10 = vld [vmem:[%s2166_s0 + $0xa0] sm:$0xff] }
  0x22   :  { %1418 = vmatpush3.bf16.msra.mxu0 %v1417_v36  ;;  %v51_v11 = vld [vmem:[%s2166_s0 + $0xb0] sm:$0xff]  ;;  %v57_v13 = vld [vmem:[%s2166_s0 + $0xe0] sm:$0xff]  ;;  %v54_v14 = vld [vmem:[%s2166_s0 + $0xc8] sm:$0xff] }
  0x23   :  { %1450 = vmatpush3.bf16.msra.mxu1 %v1449_v37  ;;  %1452 = vmatprep.subr.bf16.mxu0 %v1451_v38  ;;  %v55_v12 = vld [vmem:[%s2166_s0 + $0xd0] sm:$0xff]  ;;  %v56_v15 = vld [vmem:[%s2166_s0 + $0xd8] sm:$0xff]  ;;  %v62_v17 = vld [vmem:[%s2166_s0 + $0x108] sm:$0xff] }
  0x24   :  { %1468 = vmatprep.subr.bf16.mxu1 %v1467_v39  ;;  %v60_v16 = vld [vmem:[%s2166_s0 + $0xf8] sm:$0xff]  ;;  %v59_v18 = vld [vmem:[%s2166_s0 + $0xf0] sm:$0xff]  ;;  %v61_v19 = vld [vmem:[%s2166_s0 + $0x100] sm:$0xff] }
  0x25   :  { %231 = vmatmul.mubr.f32.vlgmr.msra.gmra.mrb[0].mxu0 %v29_v42  ;;  %v65_v20 = vld [vmem:[%s2166_s0 + $0x120] sm:$0xff]  ;;  %v67_v21 = vld [vmem:[%s2166_s0 + $0x130] sm:$0xff]  ;;  %v64_v22 = vld [vmem:[%s2166_s0 + $0x118] sm:$0xff] }
  0x26   :  { %336 = vmatmul.mubr.f32.vlgmr.msra.gmra.mrb[0].mxu1 %v31_v45  ;;  %1454 = vmatpush3.bf16.msra.mxu0 %v1451_v38  ;;  %v66_v23 = vld [vmem:[%s2166_s0 + $0x128] sm:$0xff]  ;;  %v33_v24 = vld [vmem:[%s2166_s0 + $0x20] sm:$0xff]  ;;  %v43_v28 = vld [vmem:[%s2166_s0 + $0x70] sm:$0xff] }
  0x27   :  { %235 = vmatprep.mubr.f32.mxu0 %v35_v46  ;;  %340 = vmatprep.mubr.f32.mxu1 %v37_v47  ;;  %v758_v25 = vld [vmem:[%s2168_s4] sm:$0xff]  ;;  %v38_v26 = vld [vmem:[%s2166_s0 + $0x48] sm:$0xff]  ;;  %v760_v29 = vld [vmem:[%s2168_s4 + $0x10] sm:$0xff] }
  0x28   :  { %1470 = vmatpush3.bf16.msra.mxu1 %v1467_v39  ;;  %1456 = vmatprep.subr.bf16.mxu0 %v1455_v48  ;;  %v759_v27 = vld [vmem:[%s2168_s4 + $0x8] sm:$0xff]  ;;  %v48_v30 = vld [vmem:[%s2166_s0 + $0x98] sm:$0xff]  ;;  %v53_v32 = vld [vmem:[%s2166_s0 + $0xc0] sm:$0xff] }
  0x29   :  { %236 = vmatmul.mubr.f32.gmra.mrb[2].mxu0 %v34_v52  ;;  %1472 = vmatprep.subr.bf16.mxu1 %v1471_v49  ;;  %v761_v31 = vld [vmem:[%s2168_s4 + $0x18] sm:$0xff]  ;;  %v762_v33 = vld [vmem:[%s2168_s4 + $0x20] sm:$0xff]  ;;  %v58_v34 = vld [vmem:[%s2166_s0 + $0xe8] sm:$0xff] }
  0x2a   :  { %341 = vmatmul.mubr.f32.gmra.mrb[2].mxu1 %v36_v55  ;;  %240 = vmatprep.mubr.f32.mxu0 %v40_v56  ;;  %v763_v35 = vld [vmem:[%s2168_s4 + $0x28] sm:$0xff]  ;;  %v63_v36 = vld [vmem:[%s2166_s0 + $0x110] sm:$0xff]  ;;  %v68_v38 = vld [vmem:[%s2166_s0 + $0x138] sm:$0xff] }
  0x2b   :  { %345 = vmatprep.mubr.f32.mxu1 %v42_v57  ;;  %1458 = vmatpush3.bf16.msra.mxu0 %v1455_v48  ;;  %v764_v37 = vld [vmem:[%s2168_s4 + $0x30] sm:$0xff]  ;;  %v765_v39 = vld [vmem:[%s2168_s4 + $0x38] sm:$0xff] }
  0x2c   :  { %1474 = vmatpush3.bf16.msra.mxu1 %v1471_v49  ;;  %1460 = vmatprep.subr.bf16.mxu0 %v1459_v58 }
  0x2d   :  { %241 = vmatmul.mubr.f32.gmra.mrb[4].mxu0 %v39_v62  ;;  %1476 = vmatprep.subr.bf16.mxu1 %v1475_v59 }
  0x2e   :  { %346 = vmatmul.mubr.f32.gmra.mrb[4].mxu1 %v41_v1  ;;  %245 = vmatprep.mubr.f32.mxu0 %v45_v2 }
  0x2f   :  { %350 = vmatprep.mubr.f32.mxu1 %v47_v3  ;;  %1462 = vmatpush3.bf16.msra.mxu0 %v1459_v58 }
  0x30   :  { %1478 = vmatpush3.bf16.msra.mxu1 %v1475_v59  ;;  %1464 = vmatprep.subr.bf16.mxu0 %v1463_v4 }
  0x31   :  { %246 = vmatmul.mubr.f32.gmra.mrb[6].mxu0 %v44_v6  ;;  %1480 = vmatprep.subr.bf16.mxu1 %v1479_v5 }
  0x32   :  { %351 = vmatmul.mubr.f32.gmra.mrb[6].mxu1 %v46_v7  ;;  %250 = vmatprep.mubr.f32.mxu0 %v50_v8 }
  0x33   :  { %355 = vmatprep.mubr.f32.mxu1 %v52_v9  ;;  %1466 = vmatpush3.bf16.msra.mxu0 %v1463_v4 }
  0x34   :  { %1482 = vmatpush3.bf16.msra.mxu1 %v1479_v5 }
  0x35   :  { %251 = vmatmul.mubr.f32.gmra.mrb[8].mxu0 %v49_v10 }
  0x36   :  { %356 = vmatmul.mubr.f32.gmra.mrb[8].mxu1 %v51_v11  ;;  %255 = vmatprep.mubr.f32.mxu0 %v55_v12 }
  0x37   :  { %360 = vmatprep.mubr.f32.mxu1 %v57_v13 }
  0x39   :  { %256 = vmatmul.mubr.f32.gmra.mrb[10].mxu0 %v54_v14 }
  0x3a   :  { %361 = vmatmul.mubr.f32.gmra.mrb[10].mxu1 %v56_v15  ;;  %260 = vmatprep.mubr.f32.mxu0 %v60_v16 }
  0x3b   :  { %365 = vmatprep.mubr.f32.mxu1 %v62_v17 }
  0x3d   :  { %261 = vmatmul.mubr.f32.gmra.mrb[12].mxu0 %v59_v18 }
  0x3e   :  { %366 = vmatmul.mubr.f32.gmra.mrb[12].mxu1 %v61_v19  ;;  %265 = vmatprep.mubr.f32.mxu0 %v65_v20 }
  0x3f   :  { %370 = vmatprep.mubr.f32.mxu1 %v67_v21 }
  0x41   :  { %266 = vmatmul.mubr.f32.gmra.mrb[14].mxu0 %v64_v22 }
  0x42   :  { %371 = vmatmul.mubr.f32.gmra.mrb[14].mxu1 %v66_v23  ;;  %1347 = vmatprep.mubr.msk.f32.mxu0 %vm141_vm0, %v33_v24 }
  0x43   :  { %1375 = vmatprep.mubr.msk.f32.mxu1 %vm141_vm0, %v758_v25 }
  0x45   :  { %1348 = vmatmul.mubr.msk.f32.vlgmr.msra.gmra.mrb[16].mxu0 %vm141_vm0, %v38_v26 }
  0x46   :  { %1376 = vmatmul.mubr.msk.f32.vlgmr.msra.gmra.mrb[16].mxu1 %vm141_vm0, %v759_v27  ;;  %1350 = vmatprep.mubr.msk.f32.mxu0 %vm141_vm0, %v43_v28 }
  0x47   :  { %1378 = vmatprep.mubr.msk.f32.mxu1 %vm141_vm0, %v760_v29 }
  0x49   :  { %1351 = vmatmul.mubr.msk.f32.gmra.mrb[18].mxu0 %vm141_vm0, %v48_v30 }
  0x4a   :  { %1379 = vmatmul.mubr.msk.f32.gmra.mrb[18].mxu1 %vm141_vm0, %v761_v31  ;;  %1353 = vmatprep.mubr.msk.f32.mxu0 %vm141_vm0, %v53_v32 }
  0x4b   :  { %1381 = vmatprep.mubr.msk.f32.mxu1 %vm141_vm0, %v762_v33 }
  0x4d   :  { %1354 = vmatmul.mubr.msk.f32.gmra.mrb[20].mxu0 %vm141_vm0, %v58_v34 }
  0x4e   :  { %1382 = vmatmul.mubr.msk.f32.gmra.mrb[20].mxu1 %vm141_vm0, %v763_v35  ;;  %1356 = vmatprep.mubr.msk.f32.mxu0 %vm141_vm0, %v63_v36 }
  0x4f   :  { %1384 = vmatprep.mubr.msk.f32.mxu1 %vm141_vm0, %v764_v37 }
  0x51   :  { %1357 = vmatmul.mubr.msk.f32.gmra.mrb[22].mxu0 %vm141_vm0, %v68_v38 }
  0x52   :  { %1385 = vmatmul.mubr.msk.f32.gmra.mrb[22].mxu1 %vm141_vm0, %v765_v39 }
  0xf8   :  { %v1219_v40 = vpop.f32.mrb[0].mxu0 }
  0xf9   :  { %v1275_v41 = vpop.f32.mrb[0].mxu1  ;;  %v1220_v42 = vpop.f32.mrb[1].mxu0 }
  0xfa   :  { %v1221_v43 = vadd.f32 %v1220_v42, %v1219_v40  ;;  %v1276_v44 = vpop.f32.mrb[1].mxu1 }
  0xfb   :  { %v1277_v45 = vadd.f32 %v1276_v44, %v1275_v41 }
  0xfc   :  { %v1222_v46 = vpop.f32.mrb[2].mxu0 }
  0xfd   :  { %v1278_v47 = vpop.f32.mrb[2].mxu1  ;;  %v1223_v48 = vpop.f32.mrb[3].mxu0  ;;  %v338_v49 = vadd.f32 %v1277_v45, %v1221_v43 }
  0xfe   :  { %v1224_v50 = vadd.f32 %v1223_v48, %v1222_v46  ;;  %v1279_v51 = vpop.f32.mrb[3].mxu1 }
  0xff   :  { %v1280_v52 = vadd.f32 %v1279_v51, %v1278_v47 }
 0x100   :  { %v1225_v53 = vpop.f32.mrb[4].mxu0 }
 0x101   :  { %v1281_v54 = vpop.f32.mrb[4].mxu1  ;;  %v1226_v55 = vpop.f32.mrb[5].mxu0  ;;  %v343_v56 = vadd.f32 %v1280_v52, %v1224_v50 }
 0x102   :  { %v1227_v57 = vadd.f32 %v1226_v55, %v1225_v53  ;;  %v1282_v58 = vpop.f32.mrb[5].mxu1 }
 0x103   :  { %v1283_v59 = vadd.f32 %v1282_v58, %v1281_v54 }
 0x104   :  { %v1228_v60 = vpop.f32.mrb[6].mxu0 }
 0x105   :  { %v1284_v61 = vpop.f32.mrb[6].mxu1  ;;  %v1229_v62 = vpop.f32.mrb[7].mxu0  ;;  %v1936_v63 = vadd.f32 %v1283_v59, %v1227_v57 }
 0x106   :  { %v1230_v0 = vadd.f32 %v1229_v62, %v1228_v60  ;;  %v1285_v1 = vpop.f32.mrb[7].mxu1 }
 0x107   :  { %v1286_v2 = vadd.f32 %v1285_v1, %v1284_v61 }
 0x108   :  { %v1231_v3 = vpop.f32.mrb[8].mxu0 }
 0x109   :  { %v1287_v4 = vpop.f32.mrb[8].mxu1  ;;  %v1232_v5 = vpop.f32.mrb[9].mxu0  ;;  %v353_v6 = vadd.f32 %v1286_v2, %v1230_v0 }
 0x10a   :  { %v1233_v7 = vadd.f32 %v1232_v5, %v1231_v3  ;;  %v1288_v8 = vpop.f32.mrb[9].mxu1 }
 0x10b   :  { %v1289_v9 = vadd.f32 %v1288_v8, %v1287_v4 }
 0x10c   :  { %v1234_v10 = vpop.f32.mrb[10].mxu0 }
 0x10d   :  { %v1290_v11 = vpop.f32.mrb[10].mxu1  ;;  %v1235_v12 = vpop.f32.mrb[11].mxu0  ;;  %v1938_v13 = vadd.f32 %v1289_v9, %v1233_v7 }
 0x10e   :  { %v1236_v14 = vadd.f32 %v1235_v12, %v1234_v10  ;;  %v1291_v15 = vpop.f32.mrb[11].mxu1 }
 0x10f   :  { %v1292_v16 = vadd.f32 %v1291_v15, %v1290_v11 }
 0x110   :  { %v1237_v17 = vpop.f32.mrb[12].mxu0 }
 0x111   :  { %v1293_v18 = vpop.f32.mrb[12].mxu1  ;;  %v1238_v19 = vpop.f32.mrb[13].mxu0  ;;  %v363_v20 = vadd.f32 %v1292_v16, %v1236_v14 }
 0x112   :  { %v1239_v21 = vadd.f32 %v1238_v19, %v1237_v17  ;;  %v1294_v22 = vpop.f32.mrb[13].mxu1 }
 0x113   :  { %v1295_v23 = vadd.f32 %v1294_v22, %v1293_v18 }
 0x114   :  { %v1240_v24 = vpop.f32.mrb[14].mxu0 }
 0x115   :  { %v1296_v25 = vpop.f32.mrb[14].mxu1  ;;  %v1241_v26 = vpop.f32.mrb[15].mxu0  ;;  %v1940_v27 = vadd.f32 %v1295_v23, %v1239_v21 }
 0x116   :  { %v1242_v28 = vadd.f32 %v1241_v26, %v1240_v24  ;;  %v1297_v29 = vpop.f32.mrb[15].mxu1 }
 0x117   :  { %v1298_v30 = vadd.f32 %v1297_v29, %v1296_v25 }
 0x118   :  { %v1349_v31 = vpop.f32.mrb[16].mxu0 }
 0x119   :  { %v1942_v32 = vadd.f32 %v1349_v31, %v343_v56  ;;  %v442_v33 = vpop.f32.mrb[17].mxu0  ;;  %v1944_v34 = vpop.f32.mrb[16].mxu1  ;;  %v1946_v35 = vadd.f32 %v1298_v30, %v1242_v28 }
 0x11a   :  { %v1948_v36 = vadd.f32 %v442_v33, %v338_v49  ;;  %v914_v37 = vsel %vm141_vm0, %v1944_v34, 0.0  ;;  %v935_v38 = vmul.f32 %v1944_v34, %v1944_v34  ;;  %v1954_v39 = vpop.f32.mrb[17].mxu1 }
 0x11b   :  { %v525_v40 = vsel %vm141_vm0, %v1942_v32, 0.0  ;;  %v546_v41 = vmul.f32 %v1942_v32, %v1942_v32  ;;  %v913_v42 = vsel %vm141_vm0, %v1954_v39, 0.0  ;;  %v934_v43 = vmul.f32 %v1954_v39, %v1954_v39 }
 0x11c   :  { %v524_v44 = vsel %vm141_vm0, %v1948_v36, 0.0  ;;  %v545_v45 = vmul.f32 %v1948_v36, %v1948_v36  ;;  %v951_v46 = vsel %vm141_vm0, %v935_v38, 0.0  ;;  %v915_v47 = vadd.f32 %v914_v37, %v913_v42  ;;  %v1352_v48 = vpop.f32.mrb[18].mxu0 }
 0x11d   :  { %v562_v49 = vsel %vm141_vm0, %v546_v41, 0.0  ;;  %v526_v50 = vadd.f32 %v525_v40, %v524_v44  ;;  %v950_v51 = vsel %vm141_vm0, %v934_v43, 0.0  ;;  %v1971_v52 = vadd.f32 %v1352_v48, %v353_v6  ;;  %v1973_v53 = vpop.f32.mrb[18].mxu1  ;;  %v452_v54 = vpop.f32.mrb[19].mxu0 }
 0x11e   :  { %v561_v55 = vsel %vm141_vm0, %v545_v45, 0.0  ;;  %v952_v56 = vadd.f32 %v951_v46, %v950_v51  ;;  %v937_v57 = vmul.f32 %v1973_v53, %v1973_v53  ;;  %v1978_v58 = vpop.f32.mrb[19].mxu1  ;;  %v918_v61 = vsel %vm141_vm0, %v1973_v53, 0.0 }
 0x11f   :  { %v563_v59 = vadd.f32 %v562_v49, %v561_v55  ;;  %v548_v60 = vmul.f32 %v1971_v52, %v1971_v52  ;;  %v1985_v62 = vadd.f32 %v452_v54, %v1936_v63  ;;  %v529_v0 = vsel %vm141_vm0, %v1971_v52, 0.0 }
 0x120   :  { %v955_v1 = vsel %vm141_vm0, %v937_v57, 0.0  ;;  %v916_v2 = vsel %vm141_vm0, %v1978_v58, 0.0  ;;  %v936_v3 = vmul.f32 %v1978_v58, %v1978_v58  ;;  %v1355_v4 = vpop.f32.mrb[20].mxu0 }
 0x121   :  { %v566_v5 = vsel %vm141_vm0, %v548_v60, 0.0  ;;  %v527_v6 = vsel %vm141_vm0, %v1985_v62, 0.0  ;;  %v547_v63 = vmul.f32 %v1985_v62, %v1985_v62  ;;  %v917_v7 = vadd.f32 %v916_v2, %v915_v47  ;;  %v1999_v8 = vpop.f32.mrb[20].mxu1  ;;  %v462_v9 = vpop.f32.mrb[21].mxu0 }
 0x122   :  { %v528_v10 = vadd.f32 %v527_v6, %v526_v50  ;;  %v953_v11 = vsel %vm141_vm0, %v936_v3, 0.0  ;;  %v2002_v12 = vadd.f32 %v1355_v4, %v363_v20  ;;  %v910_v14 = vmul.f32 0.0, %v1999_v8  ;;  %v2005_v15 = vpop.f32.mrb[21].mxu1 }
 0x123   :  { %v564_v16 = vsel %vm141_vm0, %v547_v63, 0.0  ;;  %v919_v17 = vadd.f32 %v918_v61, %v917_v7  ;;  %v954_v18 = vadd.f32 %v953_v11, %v952_v56  ;;  %v939_v19 = vmul.f32 %v1999_v8, %v1999_v8 }
 0x124   :  { %v530_v21 = vadd.f32 %v529_v0, %v528_v10  ;;  %v565_v22 = vadd.f32 %v564_v16, %v563_v59  ;;  %v521_v23 = vmul.f32 0.0, %v2002_v12  ;;  %v550_v24 = vmul.f32 %v2002_v12, %v2002_v12  ;;  %v1358_v20 = vpop.f32.mrb[22].mxu0 }
 0x125   :  { %v956_v25 = vadd.f32 %v955_v1, %v954_v18  ;;  %v591_v26 = vsel %vm141_vm0, %v2002_v12, 0.0  ;;  %v2016_v28 = vsel %vm141_vm0, %v910_v14, 0.0  ;;  %v947_v29 = vmul.f32 0.0, %v939_v19  ;;  %v2018_v30 = vpop.f32.mrb[22].mxu1  ;;  %v472_v31 = vpop.f32.mrb[23].mxu0 }
 0x126   :  { %v567_v33 = vadd.f32 %v566_v5, %v565_v22  ;;  %v533_v37 = vsel %vm141_vm0, %v521_v23, 0.0  ;;  %v558_v38 = vmul.f32 0.0, %v550_v24  ;;  %v612_v40 = vsel %vm141_vm0, %v550_v24, 0.0  ;;  %v2022_v41 = vpop.f32.mrb[23].mxu1 }
 0x127   :  { %v2025_v42 = vsel %vm141_vm0, %v947_v29, 0.0  ;;  %v2029_v43 = vsel %vm141_vm0, %v1999_v8, 0.0  ;;  %v2032_v44 = vsel %vm141_vm0, %v939_v19, 0.0  ;;  %v2035_v45 = vadd.f32 %v462_v9, %v1938_v13 }
 0x128   :  { %v570_v46 = vsel %vm141_vm0, %v558_v38, 0.0  ;;  %v909_v47 = vmul.f32 0.0, %v2005_v15  ;;  %v938_v48 = vmul.f32 %v2005_v15, %v2005_v15  ;;  %v978_v49 = vsel %vm141_vm0, %v2005_v15, 0.0 }
 0x129   :  { %v520_v50 = vmul.f32 0.0, %v2035_v45  ;;  %v549_v51 = vmul.f32 %v2035_v45, %v2035_v45  ;;  %v589_v54 = vsel %vm141_vm0, %v2035_v45, 0.0  ;;  %v979_v13 = vadd.f32 %v978_v49, %v919_v17 }
 0x12a   :  { %v590_v55 = vadd.f32 %v589_v54, %v530_v21  ;;  %v920_v56 = vsel %vm141_vm0, %v909_v47, 0.0  ;;  %v946_v57 = vmul.f32 0.0, %v938_v48  ;;  %v999_v59 = vsel %vm141_vm0, %v938_v48, 0.0 }
 0x12b   :  { %v531_v60 = vsel %vm141_vm0, %v520_v50, 0.0  ;;  %v557_v61 = vmul.f32 0.0, %v549_v51  ;;  %v610_v0 = vsel %vm141_vm0, %v549_v51, 0.0  ;;  %v921_v1 = vadd.f32 %v920_v56, %v919_v17 }
 0x12c   :  { %v532_v2 = vadd.f32 %v531_v60, %v530_v21  ;;  %v611_v3 = vadd.f32 %v610_v0, %v567_v33  ;;  %v957_v4 = vsel %vm141_vm0, %v946_v57, 0.0  ;;  %v1000_v5 = vadd.f32 %v999_v59, %v956_v25 }
 0x12d   :  { %v568_v6 = vsel %vm141_vm0, %v557_v61, 0.0  ;;  %v958_v63 = vadd.f32 %v957_v4, %v956_v25  ;;  %v2055_v7 = vadd.f32 %v1358_v20, %v1946_v35  ;;  %v912_v9 = vmul.f32 0.0, %v2018_v30 }
 0x12e   :  { %v569_v10 = vadd.f32 %v568_v6, %v567_v33  ;;  %v941_v11 = vmul.f32 %v2018_v30, %v2018_v30  ;;  %v984_v14 = vsel %vm141_vm0, %v2018_v30, 0.0  ;;  %v2063_v16 = vadd.f32 %v472_v31, %v1940_v27 }
 0x12f   :  { %v523_v17 = vmul.f32 0.0, %v2055_v7  ;;  %v552_v18 = vmul.f32 %v2055_v7, %v2055_v7  ;;  %v595_v35 = vsel %vm141_vm0, %v2055_v7, 0.0  ;;  %v926_v19 = vsel %vm141_vm0, %v912_v9, 0.0 }
 0x130   :  { %v949_v21 = vmul.f32 0.0, %v941_v11  ;;  %v2072_v22 = vsel %vm141_vm0, %v941_v11, 0.0  ;;  %v522_v23 = vmul.f32 0.0, %v2063_v16  ;;  %v534_v24 = vadd.f32 %v533_v37, %v532_v2 }
 0x131   :  { %v537_v27 = vsel %vm141_vm0, %v523_v17, 0.0  ;;  %v560_v20 = vmul.f32 0.0, %v552_v18  ;;  %v616_v25 = vsel %vm141_vm0, %v552_v18, 0.0  ;;  %v551_v29 = vmul.f32 %v2063_v16, %v2063_v16 }
 0x132   :  { %v963_v31 = vsel %vm141_vm0, %v949_v21, 0.0  ;;  %v535_v33 = vsel %vm141_vm0, %v522_v23, 0.0  ;;  %v571_v38 = vadd.f32 %v570_v46, %v569_v10  ;;  %v592_v47 = vadd.f32 %v591_v26, %v590_v55 }
 0x133   :  { %v574_v48 = vsel %vm141_vm0, %v560_v20, 0.0  ;;  %v536_v49 = vadd.f32 %v535_v33, %v534_v24  ;;  %v559_v50 = vmul.f32 0.0, %v551_v29  ;;  %v593_v37 = vsel %vm141_vm0, %v2063_v16, 0.0 }
 0x134   :  { %v594_v51 = vadd.f32 %v593_v37, %v592_v47  ;;  %v613_v54 = vadd.f32 %v612_v40, %v611_v3  ;;  %v614_v56 = vsel %vm141_vm0, %v551_v29, 0.0  ;;  %v911_v57 = vmul.f32 0.0, %v2022_v41 }
 0x135   :  { %v538_v59 = vadd.f32 %v537_v27, %v536_v49  ;;  %v572_v60 = vsel %vm141_vm0, %v559_v50, 0.0  ;;  %v923_v61 = vadd.f32 %v2016_v28, %v921_v1  ;;  %v940_v26 = vmul.f32 %v2022_v41, %v2022_v41 }
 0x136   :  { %v573_v46 = vadd.f32 %v572_v60, %v571_v38  ;;  %v596_v55 = vadd.f32 %v595_v35, %v594_v51  ;;  %v615_v0 = vadd.f32 %v614_v56, %v613_v54  ;;  %v924_v2 = vsel %vm141_vm0, %v911_v57, 0.0 }
 0x137   :  { %v539_v4 = vrot.slane %v538_v59, 4  ;;  %v925_v6 = vadd.f32 %v924_v2, %v923_v61  ;;  %v948_v40 = vmul.f32 0.0, %v940_v26  ;;  %v960_v3 = vadd.f32 %v2025_v42, %v958_v63 }
 0x138   :  { %v575_v9 = vadd.f32 %v574_v48, %v573_v46  ;;  %v597_v10 = vrot.slane %v596_v55, 4  ;;  %v617_v11 = vadd.f32 %v616_v25, %v615_v0  ;;  %v981_v17 = vadd.f32 %v2029_v43, %v979_v13 }
 0x139   :  { %v540_v18 = vadd.f32 %v539_v4, %v538_v59  ;;  %v927_v28 = vadd.f32 %v926_v19, %v925_v6  ;;  %v961_v1 = vsel %vm141_vm0, %v948_v40, 0.0  ;;  %v982_v35 = vsel %vm141_vm0, %v2022_v41, 0.0 }
 0x13a   :  { %v576_v21 = vrot.slane %v575_v9, 4  ;;  %v598_v23 = vadd.f32 %v597_v10, %v596_v55  ;;  %v618_v24 = vrot.slane %v617_v11, 4  ;;  %v962_v27 = vadd.f32 %v961_v1, %v960_v3 }
 0x13b   :  { %v541_v20 = vrot.slane %v540_v18, 2  ;;  %v928_v29 = vrot.slane %v927_v28, 4  ;;  %v983_v33 = vadd.f32 %v982_v35, %v981_v17  ;;  %v1002_v42 = vadd.f32 %v2032_v44, %v1000_v5 }
 0x13c   :  { %v577_v63 = vadd.f32 %v576_v21, %v575_v9  ;;  %v599_v25 = vrot.slane %v598_v23, 2  ;;  %v619_v38 = vadd.f32 %v618_v24, %v617_v11  ;;  %v964_v43 = vadd.f32 %v963_v31, %v962_v27 }
 0x13d   :  { %v542_v13 = vadd.f32 %v541_v20, %v540_v18  ;;  %v929_v19 = vadd.f32 %v928_v29, %v927_v28  ;;  %v985_v47 = vadd.f32 %v984_v14, %v983_v33  ;;  %v1003_v48 = vsel %vm141_vm0, %v940_v26, 0.0 }
 0x13e   :  { %v578_v49 = vrot.slane %v577_v63, 2  ;;  %v600_v50 = vadd.f32 %v599_v25, %v598_v23  ;;  %v620_v37 = vrot.slane %v619_v38, 2  ;;  %v965_v51 = vrot.slane %v964_v43, 4 }
 0x13f   :  { %v543_v54 = vrot.slane %v542_v13, 1  ;;  %v930_v56 = vrot.slane %v929_v19, 2  ;;  %v986_v57 = vrot.slane %v985_v47, 4  ;;  %v1004_v59 = vadd.f32 %v1003_v48, %v1002_v42 }
 0x140   :  { %v579_v60 = vadd.f32 %v578_v49, %v577_v63  ;;  %v601_v61 = vrot.slane %v600_v50, 1  ;;  %v621_v44 = vadd.f32 %v620_v37, %v619_v38  ;;  %v966_v5 = vadd.f32 %v965_v51, %v964_v43 }
 0x141   :  { %v544_v46 = vadd.f32 %v543_v54, %v542_v13  ;;  %v931_v55 = vadd.f32 %v930_v56, %v929_v19  ;;  %v987_v31 = vadd.f32 %v986_v57, %v985_v47  ;;  %v1006_v0 = vadd.f32 %v2072_v22, %v1004_v59 }
 0x142   :  { %v580_v14 = vrot.slane %v579_v60, 1  ;;  %v602_v2 = vadd.f32 %v601_v61, %v600_v50  ;;  %v622_v26 = vrot.slane %v621_v44, 1  ;;  %v967_v4 = vrot.slane %v966_v5, 2 }
 0x143   :  { %v624_v6 = vmul.f32 0.03125, %v544_v46  ;;  %v932_v40 = vrot.slane %v931_v55, 1  ;;  %v988_v3 = vrot.slane %v987_v31, 2  ;;  %v1007_v9 = vrot.slane %v1006_v0, 4 }
 0x144   :  { %v581_v10 = vadd.f32 %v580_v14, %v579_v60  ;;  %v623_v11 = vadd.f32 %v622_v26, %v621_v44  ;;  %v625_v17 = vsub.f32 %v602_v2, %v544_v46  ;;  %v968_v18 = vadd.f32 %v967_v4, %v966_v5 }
 0x145   :  { %v628_v28 = vmul.f32 %v624_v6, %v624_v6  ;;  %v638_v1 = vmul.f32 0.0, %v624_v6  ;;  %v933_v35 = vadd.f32 %v932_v40, %v931_v55  ;;  %v989_v21 = vadd.f32 %v988_v3, %v987_v31 }
 0x146   :  { %v626_v23 = vmul.f32 0.03125, %v625_v17  ;;  %v627_v24 = vmul.f32 0.03125, %v581_v10  ;;  %v630_v27 = vsub.f32 %v623_v11, %v581_v10  ;;  %v969_v22 = vrot.slane %v968_v18, 1 }
 0x147   :  { %v990_v20 = vrot.slane %v989_v21, 1  ;;  %v1008_v29 = vadd.f32 %v1007_v9, %v1006_v0  ;;  %v1013_v33 = vmul.f32 0.03125, %v933_v35 }
 0x148   :  { %v629_v42 = vsub.f32 %v627_v24, %v628_v28  ;;  %v631_v63 = vmul.f32 0.03125, %v630_v27  ;;  %v632_v25 = vmul.f32 %v626_v23, %v626_v23  ;;  %v650_v38 = vmul.f32 0.0, %v626_v23 }
 0x149   :  { %v662_v43 = vadd.f32 %v638_v1, %v626_v23  ;;  %v970_v13 = vadd.f32 %v969_v22, %v968_v18  ;;  %v991_v19 = vadd.f32 %v990_v20, %v989_v21  ;;  %v1009_v47 = vrot.slane %v1008_v29, 2 }
 0x14a   :  { %v633_v48 = vsub.f32 %v631_v63, %v632_v25  ;;  %v658_v49 = vadd.f32 %v650_v38, %v624_v6  ;;  %v670_v50 = vmul.f32 0.0, %v629_v42  ;;  %v1017_v37 = vmul.f32 %v1013_v33, %v1013_v33 }
 0x14b   :  { %v702_v51 = vsub.f32 %v2035_v45, %v662_v43  ;;  %v703_v54 = vsub.f32 %v2002_v12, %v662_v43  ;;  %v704_v56 = vsub.f32 %v2063_v16, %v662_v43  ;;  %v705_v57 = vsub.f32 %v2055_v7, %v662_v43 }
 0x14c   :  { %v674_v59 = vmul.f32 0.0, %v633_v48  ;;  %v686_v60 = vadd.f32 %v670_v50, %v633_v48  ;;  %v698_v61 = vsub.f32 %v1948_v36, %v658_v49  ;;  %v699_v44 = vsub.f32 %v1942_v32, %v658_v49 }
 0x14d   :  { %v700_v5 = vsub.f32 %v1985_v62, %v658_v49  ;;  %v701_v46 = vsub.f32 %v1971_v52, %v658_v49  ;;  %v1010_v55 = vadd.f32 %v1009_v47, %v1008_v29  ;;  %v1014_v31 = vsub.f32 %v991_v19, %v933_v35  ;;  %v1176_v49 = vld [vmem:[%s2170_s3] ss:$0 sm:$0xff] }
 0x14e   :  { %v682_v0 = vadd.f32 %v674_v59, %v629_v42  ;;  %v694_v45 = vmax.f32 %v686_v60, 0.0  ;;  %v1016_v14 = vmul.f32 0.03125, %v970_v13  ;;  %v1027_v12 = vmul.f32 0.0, %v1013_v33 }
 0x14f   :  { %v1011_v2 = vrot.slane %v1010_v55, 1  ;;  %v1015_v16 = vmul.f32 0.03125, %v1014_v31 }
 0x150   :  { %v690_v26 = vmax.f32 %v682_v0, 0.0  ;;  %v710_v7 = vadd.f32 1e-05, %v694_v45  ;;  %v1018_v4 = vsub.f32 %v1016_v14, %v1017_v37 }
 0x151   :  { %v1012_v6 = vadd.f32 %v1011_v2, %v1010_v55  ;;  %v1031_v40 = vmul.f32 0.0, %v1015_v16  ;;  %v1043_v36 = vadd.f32 %v1027_v12, %v1015_v16  ;;  %v1021_v32 = vmul.f32 %v1015_v16, %v1015_v16  ;;  %v1186_v16 = vld [vmem:[%s2172_s7] ss:$0 sm:$0xff] }
 0x152   :  { %v706_v3 = vadd.f32 1e-05, %v690_v26  ;;  %1483 = vrsqrt.f32 %v710_v7  ;;  %v1051_v11 = vmul.f32 0.0, %v1018_v4 }
 0x153   :  { %v1019_v62 = vsub.f32 %v1012_v6, %v970_v13  ;;  %v2107_v9 = vadd.f32 %v1031_v40, %v1013_v33  ;;  %v1083_v52 = vsub.f32 %v2005_v15, %v1043_v36  ;;  %v1084_v10 = vsub.f32 %v1999_v8, %v1043_v36 }
 0x154   :  { %1485 = vrsqrt.f32 %v706_v3  ;;  %v1085_v17 = vsub.f32 %v2022_v41, %v1043_v36  ;;  %v1086_v18 = vsub.f32 %v2018_v30, %v1043_v36 }
 0x155   :  { %v1020_v28 = vmul.f32 0.03125, %v1019_v62  ;;  %v1079_v1 = vsub.f32 %v1954_v39, %v2107_v9  ;;  %v1080_v35 = vsub.f32 %v1944_v34, %v2107_v9  ;;  %v1081_v21 = vsub.f32 %v1978_v58, %v2107_v9 }
 0x156   :  { %v1082_v15 = vsub.f32 %v1973_v53, %v2107_v9  ;;  %v1175_v53 = vld [vmem:[%s2169_s2] ss:$0 sm:$0xff] }
 0x157   :  { %v1022_v8 = vsub.f32 %v1020_v28, %v1021_v32 }
 0x159   :  { %v1055_v23 = vmul.f32 0.0, %v1022_v8  ;;  %v1067_v24 = vadd.f32 %v1051_v11, %v1022_v8 }
 0x15b   :  { %v1063_v27 = vadd.f32 %v1055_v23, %v1018_v4  ;;  %v1075_v22 = vmax.f32 %v1067_v24, 0.0 }
 0x15c   :  { %v1484_v41 = vpop.eup %1483 }
 0x15d   :  { %v726_v30 = vmul.f32 %v1484_v41, %v702_v51  ;;  %v727_v20 = vmul.f32 %v1484_v41, %v703_v54  ;;  %v728_v29 = vmul.f32 %v1484_v41, %v704_v56  ;;  %v729_v33 = vmul.f32 %v1484_v41, %v705_v57 }
 0x15e   :  { %v1486_v39 = vpop.eup %1485  ;;  %v1071_v38 = vmax.f32 %v1063_v27, 0.0  ;;  %v1091_v58 = vadd.f32 1e-05, %v1075_v22 }
 0x15f   :  { %v722_v42 = vmul.f32 %v1486_v39, %v698_v61  ;;  %v723_v63 = vmul.f32 %v1486_v39, %v699_v44  ;;  %v724_v34 = vmul.f32 %v1486_v39, %v700_v5  ;;  %v725_v25 = vmul.f32 %v1486_v39, %v701_v46  ;;  %v1185_v44 = vld [vmem:[%s2171_s6] ss:$0 sm:$0xff] }
 0x160   :  { %v1087_v43 = vadd.f32 1e-05, %v1071_v38  ;;  %1487 = vrsqrt.f32 %v1091_v58  ;;  %v740_v13 = vmul.f32 %v1175_v53, %v726_v30  ;;  %v741_v19 = vmul.f32 %v1175_v53, %v727_v20 }
 0x161   :  { %v742_v47 = vmul.f32 %v1175_v53, %v728_v29  ;;  %v743_v48 = vmul.f32 %v1175_v53, %v729_v33  ;;  %v736_v50 = vmul.f32 %v1175_v53, %v722_v42  ;;  %v737_v37 = vmul.f32 %v1175_v53, %v723_v63 }
 0x162   :  { %1489 = vrsqrt.f32 %v1087_v43  ;;  %v738_v51 = vmul.f32 %v1175_v53, %v724_v34  ;;  %v739_v54 = vmul.f32 %v1175_v53, %v725_v25  ;;  %v754_v57 = vadd.f32 %v1176_v49, %v740_v13 }
 0x163   :  { %v755_v59 = vadd.f32 %v1176_v49, %v741_v19  ;;  %v756_v60 = vadd.f32 %v1176_v49, %v742_v47  ;;  %v757_v61 = vadd.f32 %v1176_v49, %v743_v48  ;;  %v750_v45 = vadd.f32 %v1176_v49, %v736_v50 }
 0x164   :  { %v751_v14 = vadd.f32 %v1176_v49, %v737_v37  ;;  %v752_v12 = vadd.f32 %v1176_v49, %v738_v51  ;;  %v753_v2 = vadd.f32 %v1176_v49, %v739_v54 }
 0x16a   :  { %v1488_v56 = vpop.eup %1487 }
 0x16b   :  { %v1107_v5 = vmul.f32 %v1488_v56, %v1083_v52  ;;  %v1108_v46 = vmul.f32 %v1488_v56, %v1084_v10  ;;  %v1109_v55 = vmul.f32 %v1488_v56, %v1085_v17  ;;  %v1110_v31 = vmul.f32 %v1488_v56, %v1086_v18 }
 0x16c   :  { %v1490_v0 = vpop.eup %1489 }
 0x16d   :  { %v1103_v26 = vmul.f32 %v1490_v0, %v1079_v1  ;;  %v1104_v7 = vmul.f32 %v1490_v0, %v1080_v35  ;;  %v1105_v4 = vmul.f32 %v1490_v0, %v1081_v21  ;;  %v1106_v6 = vmul.f32 %v1490_v0, %v1082_v15 }
 0x16e   :  { %v1121_v40 = vmul.f32 %v1185_v44, %v1107_v5  ;;  %v1122_v36 = vmul.f32 %v1185_v44, %v1108_v46  ;;  %v1123_v3 = vmul.f32 %v1185_v44, %v1109_v55  ;;  %v1124_v32 = vmul.f32 %v1185_v44, %v1110_v31 }
 0x16f   :  { %v1117_v62 = vmul.f32 %v1185_v44, %v1103_v26  ;;  %v1118_v9 = vmul.f32 %v1185_v44, %v1104_v7  ;;  %v1119_v52 = vmul.f32 %v1185_v44, %v1105_v4  ;;  %v1120_v10 = vmul.f32 %v1185_v44, %v1106_v6 }
 0x170   :  { %v1135_v11 = vadd.f32 %v1186_v16, %v1121_v40  ;;  %v1136_v17 = vadd.f32 %v1186_v16, %v1122_v36  ;;  %v1137_v18 = vadd.f32 %v1186_v16, %v1123_v3  ;;  %v1138_v28 = vadd.f32 %v1186_v16, %v1124_v32 }
 0x171   :  { %v1131_v8 = vadd.f32 %v1186_v16, %v1117_v62  ;;  %v1132_v23 = vadd.f32 %v1186_v16, %v1118_v9  ;;  %v1133_v24 = vadd.f32 %v1186_v16, %v1119_v52  ;;  %v1134_v27 = vadd.f32 %v1186_v16, %v1120_v10 }
 0x172   :  { %v1143_v1 = vadd.f32 %v1135_v11, %v754_v57  ;;  %v1144_v35 = vadd.f32 %v1136_v17, %v755_v59  ;;  %v1145_v21 = vadd.f32 %v1137_v18, %v756_v60  ;;  %v1146_v15 = vadd.f32 %v1138_v28, %v757_v61 }
 0x173   :  { %v1139_v41 = vadd.f32 %v1131_v8, %v750_v45  ;;  %v1140_v22 = vadd.f32 %v1132_v23, %v751_v14  ;;  %v1141_v30 = vadd.f32 %v1133_v24, %v752_v12  ;;  %v1142_v20 = vadd.f32 %v1134_v27, %v753_v2 }
 0x174   :  { %v1151_v29 = vmax.f32 %v1143_v1, 0.0  ;;  %v1152_v33 = vmax.f32 %v1144_v35, 0.0  ;;  %v1153_v39 = vmax.f32 %v1145_v21, 0.0  ;;  %v1154_v42 = vmax.f32 %v1146_v15, 0.0 }
 0x175   :  { %v1147_v63 = vmax.f32 %v1139_v41, 0.0  ;;  %v1148_v34 = vmax.f32 %v1140_v22, 0.0  ;;  %v1149_v25 = vmax.f32 %v1141_v30, 0.0  ;;  %v1150_v38 = vmax.f32 %v1142_v20, 0.0 }
 0x176   :  { %1159 = vst.msk [vmem:[%s2173_s8 + $0x20] sm:$0xff] %vm141_vm0, %v1151_v29  ;;  %1160 = vst.msk [vmem:[%s2173_s8 + $0x28] sm:$0xff] %vm141_vm0, %v1152_v33 }
 0x177   :  { %1161 = vst.msk [vmem:[%s2173_s8 + $0x30] sm:$0xff] %vm141_vm0, %v1153_v39  ;;  %1162 = vst.msk [vmem:[%s2173_s8 + $0x38] sm:$0xff] %vm141_vm0, %v1154_v42 }
 0x178   :  { %1155 = vst.msk [vmem:[%s2173_s8] sm:$0xff] %vm141_vm0, %v1147_v63  ;;  %1156 = vst.msk [vmem:[%s2173_s8 + $0x8] sm:$0xff] %vm141_vm0, %v1148_v34 }
 0x179   :  { %1157 = vst.msk [vmem:[%s2173_s8 + $0x10] sm:$0xff] %vm141_vm0, %v1149_v25  ;;  %1158 = vst.msk [vmem:[%s2173_s8 + $0x18] sm:$0xff] %vm141_vm0, %v1150_v38 }

// kernel: cdnet_forward.15
= control target key start
LH: loop header
LB: loop body
LE: loop exit
PB: predicated region body
PF: predicated region fallthrough
CT: control target
= control target key end

     0   :  { %vm99_vm0 = vcmask 523264   ;;  %s924_s1 = inlined_call_operand.vmem [shape: f32[576,128], index: 1, kind: input, shape index: {}]   ;;  %s925_s0 = inlined_call_operand.vmem [shape: f32[16,576], index: 0, kind: input, shape index: {}]   ;;  %s926_s2 = inlined_call_operand.vmem [shape: f32[1,128], index: 2, kind: input, shape index: {}]   ;;  %s927_s3 = inlined_call_operand.vmem [shape: f32[1,128], index: 3, kind: input, shape index: {}]   ;;  %s928_s4 = inlined_call_operand.vmem [shape: f32[16,128], index: 4, kind: output, shape index: {}]  }
   0x1   :  { %v43_v0 = vld [vmem:[%s924_s1 + $0x80] sm:$0xff]  ;;  %v44_v1 = vld [vmem:[%s924_s1 + $0x88] sm:$0xff]  ;;  %v45_v11 = vld [vmem:[%s924_s1 + $0x90] sm:$0xff] }
   0x2   :  { %v75_v2 = vld [vmem:[%s924_s1 + $0x180] sm:$0xff]  ;;  %v543_v3 = vpack.c.bf16 %v44_v1, %v43_v0  ;;  %v76_v4 = vld [vmem:[%s924_s1 + $0x188] sm:$0xff]  ;;  %v46_v13 = vld [vmem:[%s924_s1 + $0x98] sm:$0xff] }
   0x3   :  { %v27_v5 = vld [vmem:[%s924_s1] sm:$0xff]  ;;  %v28_v6 = vld [vmem:[%s924_s1 + $0x8] sm:$0xff]  ;;  %v575_v7 = vpack.c.bf16 %v76_v4, %v75_v2  ;;  %v77_v14 = vld [vmem:[%s924_s1 + $0x190] sm:$0xff]  ;;  %v547_v16 = vpack.c.bf16 %v46_v13, %v45_v11 }
   0x4   :  { %v545_v8 = vpack.c.bf16 %v28_v6, %v27_v5  ;;  %v59_v9 = vld [vmem:[%s924_s1 + $0x100] sm:$0xff]  ;;  %v60_v10 = vld [vmem:[%s924_s1 + $0x108] sm:$0xff]  ;;  %544 = vmatprep.subr.bf16.mxu0 %v543_v3  ;;  %v78_v15 = vld [vmem:[%s924_s1 + $0x198] sm:$0xff] }
   0x5   :  { %v577_v12 = vpack.c.bf16 %v60_v10, %v59_v9  ;;  %576 = vmatprep.subr.bf16.mxu1 %v575_v7  ;;  %v579_v17 = vpack.c.bf16 %v78_v15, %v77_v14  ;;  %v29_v18 = vld [vmem:[%s924_s1 + $0x10] sm:$0xff]  ;;  %v30_v19 = vld [vmem:[%s924_s1 + $0x18] sm:$0xff]  ;;  %v47_v23 = vld [vmem:[%s924_s1 + $0xa0] sm:$0xff] }
   0x6   :  { %546 = vmatpush3.bf16.msra.mxu0 %v545_v8  ;;  %v61_v20 = vld [vmem:[%s924_s1 + $0x110] sm:$0xff]  ;;  %v549_v21 = vpack.c.bf16 %v30_v19, %v29_v18  ;;  %v62_v22 = vld [vmem:[%s924_s1 + $0x118] sm:$0xff]  ;;  %v48_v24 = vld [vmem:[%s924_s1 + $0xa8] sm:$0xff] }
   0x7   :  { %578 = vmatpush3.bf16.msra.mxu1 %v577_v12  ;;  %548 = vmatprep.subr.bf16.mxu0 %v547_v16  ;;  %v581_v25 = vpack.c.bf16 %v62_v22, %v61_v20  ;;  %v551_v26 = vpack.c.bf16 %v48_v24, %v47_v23  ;;  %v79_v27 = vld [vmem:[%s924_s1 + $0x1a0] sm:$0xff]  ;;  %v80_v28 = vld [vmem:[%s924_s1 + $0x1a8] sm:$0xff]  ;;  %v49_v35 = vld [vmem:[%s924_s1 + $0xb0] sm:$0xff] }
   0x8   :  { %580 = vmatprep.subr.bf16.mxu1 %v579_v17  ;;  %v31_v29 = vld [vmem:[%s924_s1 + $0x20] sm:$0xff]  ;;  %v583_v30 = vpack.c.bf16 %v80_v28, %v79_v27  ;;  %v32_v31 = vld [vmem:[%s924_s1 + $0x28] sm:$0xff]  ;;  %v50_v36 = vld [vmem:[%s924_s1 + $0xb8] sm:$0xff] }
   0x9   :  { %v63_v32 = vld [vmem:[%s924_s1 + $0x120] sm:$0xff]  ;;  %v64_v33 = vld [vmem:[%s924_s1 + $0x128] sm:$0xff]  ;;  %v553_v34 = vpack.c.bf16 %v32_v31, %v31_v29  ;;  %v81_v37 = vld [vmem:[%s924_s1 + $0x1b0] sm:$0xff]  ;;  %v555_v39 = vpack.c.bf16 %v50_v36, %v49_v35 }
   0xa   :  { %550 = vmatpush3.bf16.msra.mxu0 %v549_v21  ;;  %v585_v38 = vpack.c.bf16 %v64_v33, %v63_v32  ;;  %v82_v40 = vld [vmem:[%s924_s1 + $0x1b8] sm:$0xff]  ;;  %v33_v41 = vld [vmem:[%s924_s1 + $0x30] sm:$0xff]  ;;  %v51_v46 = vld [vmem:[%s924_s1 + $0xc0] sm:$0xff] }
   0xb   :  { %582 = vmatpush3.bf16.msra.mxu1 %v581_v25  ;;  %552 = vmatprep.subr.bf16.mxu0 %v551_v26  ;;  %v34_v42 = vld [vmem:[%s924_s1 + $0x38] sm:$0xff]  ;;  %v587_v43 = vpack.c.bf16 %v82_v40, %v81_v37  ;;  %v65_v44 = vld [vmem:[%s924_s1 + $0x130] sm:$0xff]  ;;  %v52_v47 = vld [vmem:[%s924_s1 + $0xc8] sm:$0xff] }
   0xc   :  { %584 = vmatprep.subr.bf16.mxu1 %v583_v30  ;;  %v66_v45 = vld [vmem:[%s924_s1 + $0x138] sm:$0xff]  ;;  %v83_v48 = vld [vmem:[%s924_s1 + $0x1c0] sm:$0xff]  ;;  %v84_v49 = vld [vmem:[%s924_s1 + $0x1c8] sm:$0xff]  ;;  %v557_v50 = vpack.c.bf16 %v34_v42, %v33_v41  ;;  %v559_v52 = vpack.c.bf16 %v52_v47, %v51_v46 }
   0xd   :  { %v589_v51 = vpack.c.bf16 %v66_v45, %v65_v44  ;;  %v35_v53 = vld [vmem:[%s924_s1 + $0x40] sm:$0xff]  ;;  %v36_v54 = vld [vmem:[%s924_s1 + $0x48] sm:$0xff]  ;;  %v591_v56 = vpack.c.bf16 %v84_v49, %v83_v48  ;;  %v53_v58 = vld [vmem:[%s924_s1 + $0xd0] sm:$0xff] }
   0xe   :  { %554 = vmatpush3.bf16.msra.mxu0 %v553_v34  ;;  %v67_v55 = vld [vmem:[%s924_s1 + $0x140] sm:$0xff]  ;;  %v68_v57 = vld [vmem:[%s924_s1 + $0x148] sm:$0xff]  ;;  %v54_v59 = vld [vmem:[%s924_s1 + $0xd8] sm:$0xff]  ;;  %v561_v62 = vpack.c.bf16 %v36_v54, %v35_v53 }
   0xf   :  { %586 = vmatpush3.bf16.msra.mxu1 %v585_v38  ;;  %556 = vmatprep.subr.bf16.mxu0 %v555_v39  ;;  %v85_v60 = vld [vmem:[%s924_s1 + $0x1d0] sm:$0xff]  ;;  %v86_v61 = vld [vmem:[%s924_s1 + $0x1d8] sm:$0xff]  ;;  %v593_v63 = vpack.c.bf16 %v68_v57, %v67_v55  ;;  %v563_v0 = vpack.c.bf16 %v54_v59, %v53_v58  ;;  %v55_v6 = vld [vmem:[%s924_s1 + $0xe0] sm:$0xff] }
  0x10   :  { %588 = vmatprep.subr.bf16.mxu1 %v587_v43  ;;  %v37_v1 = vld [vmem:[%s924_s1 + $0x50] sm:$0xff]  ;;  %v38_v2 = vld [vmem:[%s924_s1 + $0x58] sm:$0xff]  ;;  %v595_v4 = vpack.c.bf16 %v86_v61, %v85_v60  ;;  %v56_v7 = vld [vmem:[%s924_s1 + $0xe8] sm:$0xff] }
  0x11   :  { %v69_v3 = vld [vmem:[%s924_s1 + $0x150] sm:$0xff]  ;;  %v70_v5 = vld [vmem:[%s924_s1 + $0x158] sm:$0xff]  ;;  %v87_v8 = vld [vmem:[%s924_s1 + $0x1e0] sm:$0xff]  ;;  %v565_v10 = vpack.c.bf16 %v38_v2, %v37_v1  ;;  %v567_v14 = vpack.c.bf16 %v56_v7, %v55_v6 }
  0x12   :  { %558 = vmatpush3.bf16.msra.mxu0 %v557_v50  ;;  %v88_v9 = vld [vmem:[%s924_s1 + $0x1e8] sm:$0xff]  ;;  %v39_v11 = vld [vmem:[%s924_s1 + $0x60] sm:$0xff]  ;;  %v597_v13 = vpack.c.bf16 %v70_v5, %v69_v3  ;;  %v20_v17 = vld [vmem:[%s925_s0 + $0x18] sm:$0xff] }
  0x13   :  { %590 = vmatpush3.bf16.msra.mxu1 %v589_v51  ;;  %560 = vmatprep.subr.bf16.mxu0 %v559_v52  ;;  %v40_v12 = vld [vmem:[%s924_s1 + $0x68] sm:$0xff]  ;;  %v71_v15 = vld [vmem:[%s924_s1 + $0x160] sm:$0xff]  ;;  %v599_v18 = vpack.c.bf16 %v88_v9, %v87_v8  ;;  %v57_v20 = vld [vmem:[%s924_s1 + $0xf0] sm:$0xff] }
  0x14   :  { %592 = vmatprep.subr.bf16.mxu1 %v591_v56  ;;  %v18_v16 = vld [vmem:[%s925_s0 + $0x8] sm:$0xff]  ;;  %v58_v21 = vld [vmem:[%s924_s1 + $0xf8] sm:$0xff]  ;;  %v89_v22 = vld [vmem:[%s924_s1 + $0x1f0] sm:$0xff]  ;;  %245 = vmatprep.mubr.f32.mxu1 %v20_v17  ;;  %v569_v24 = vpack.c.bf16 %v40_v12, %v39_v11 }
  0x15   :  { %v72_v19 = vld [vmem:[%s924_s1 + $0x168] sm:$0xff]  ;;  %170 = vmatprep.mubr.f32.mxu0 %v18_v16  ;;  %v90_v23 = vld [vmem:[%s924_s1 + $0x1f8] sm:$0xff]  ;;  %v571_v26 = vpack.c.bf16 %v58_v21, %v57_v20  ;;  %v41_v27 = vld [vmem:[%s924_s1 + $0x70] sm:$0xff] }
  0x16   :  { %562 = vmatpush3.bf16.msra.mxu0 %v561_v62  ;;  %v601_v25 = vpack.c.bf16 %v72_v19, %v71_v15  ;;  %v42_v28 = vld [vmem:[%s924_s1 + $0x78] sm:$0xff]  ;;  %v73_v29 = vld [vmem:[%s924_s1 + $0x170] sm:$0xff]  ;;  %v603_v30 = vpack.c.bf16 %v90_v23, %v89_v22  ;;  %v91_v32 = vld [vmem:[%s924_s1 + $0x200] sm:$0xff] }
  0x17   :  { %594 = vmatpush3.bf16.msra.mxu1 %v593_v63  ;;  %564 = vmatprep.subr.bf16.mxu0 %v563_v0  ;;  %v74_v31 = vld [vmem:[%s924_s1 + $0x178] sm:$0xff]  ;;  %v92_v33 = vld [vmem:[%s924_s1 + $0x208] sm:$0xff]  ;;  %v573_v34 = vpack.c.bf16 %v42_v28, %v41_v27  ;;  %v93_v37 = vld [vmem:[%s924_s1 + $0x210] sm:$0xff] }
  0x18   :  { %596 = vmatprep.subr.bf16.mxu1 %v595_v4  ;;  %v605_v35 = vpack.c.bf16 %v74_v31, %v73_v29  ;;  %v607_v36 = vpack.c.bf16 %v92_v33, %v91_v32  ;;  %v94_v38 = vld [vmem:[%s924_s1 + $0x218] sm:$0xff]  ;;  %v17_v39 = vld [vmem:[%s925_s0] sm:$0xff]  ;;  %v19_v40 = vld [vmem:[%s925_s0 + $0x10] sm:$0xff] }
  0x19   :  { %v611_v41 = vpack.c.bf16 %v94_v38, %v93_v37  ;;  %v95_v42 = vld [vmem:[%s924_s1 + $0x220] sm:$0xff]  ;;  %v96_v43 = vld [vmem:[%s924_s1 + $0x228] sm:$0xff]  ;;  %v23_v44 = vld [vmem:[%s925_s0 + $0x30] sm:$0xff] }
  0x1a   :  { %566 = vmatpush3.bf16.msra.mxu0 %v565_v10  ;;  %v25_v45 = vld [vmem:[%s925_s0 + $0x40] sm:$0xff]  ;;  %v22_v46 = vld [vmem:[%s925_s0 + $0x28] sm:$0xff]  ;;  %v615_v47 = vpack.c.bf16 %v96_v43, %v95_v42  ;;  %v24_v48 = vld [vmem:[%s925_s0 + $0x38] sm:$0xff] }
  0x1b   :  { %598 = vmatpush3.bf16.msra.mxu1 %v597_v13  ;;  %568 = vmatprep.subr.bf16.mxu0 %v567_v14  ;;  %v97_v49 = vld [vmem:[%s924_s1 + $0x230] sm:$0xff]  ;;  %v98_v50 = vld [vmem:[%s924_s1 + $0x238] sm:$0xff]  ;;  %v21_v51 = vld [vmem:[%s925_s0 + $0x20] sm:$0xff] }
  0x1c   :  { %600 = vmatprep.subr.bf16.mxu1 %v599_v18  ;;  %v619_v52 = vpack.c.bf16 %v98_v50, %v97_v49  ;;  %v26_v53 = vld [vmem:[%s925_s0 + $0x48] sm:$0xff] }
  0x1e   :  { %570 = vmatpush3.bf16.msra.mxu0 %v569_v24 }
  0x1f   :  { %602 = vmatpush3.bf16.msra.mxu1 %v601_v25  ;;  %572 = vmatprep.subr.bf16.mxu0 %v571_v26 }
  0x20   :  { %604 = vmatprep.subr.bf16.mxu1 %v603_v30 }
  0x22   :  { %574 = vmatpush3.bf16.msra.mxu0 %v573_v34 }
  0x23   :  { %606 = vmatpush3.bf16.msra.mxu1 %v605_v35  ;;  %608 = vmatprep.subr.bf16.mxu0 %v607_v36 }
  0x25   :  { %171 = vmatmul.mubr.f32.vlgmr.msra.gmra.mrb[0].mxu0 %v17_v39 }
  0x26   :  { %246 = vmatmul.mubr.f32.vlgmr.msra.gmra.mrb[0].mxu1 %v19_v40  ;;  %610 = vmatpush3.bf16.msra.mxu0 %v607_v36 }
  0x27   :  { %612 = vmatprep.subr.bf16.mxu0 %v611_v41  ;;  %175 = vmatprep.mubr.f32.mxu0 %v23_v44 }
  0x28   :  { %250 = vmatprep.mubr.f32.mxu1 %v25_v45 }
  0x29   :  { %176 = vmatmul.mubr.f32.gmra.mrb[2].mxu0 %v22_v46 }
  0x2a   :  { %614 = vmatpush3.bf16.msra.mxu0 %v611_v41  ;;  %251 = vmatmul.mubr.f32.gmra.mrb[2].mxu1 %v24_v48 }
  0x2b   :  { %616 = vmatprep.subr.bf16.mxu0 %v615_v47  ;;  %540 = vmatprep.mubr.msk.f32.mxu0 %vm99_vm0, %v21_v51 }
  0x2e   :  { %618 = vmatpush3.bf16.msra.mxu0 %v615_v47 }
  0x2f   :  { %620 = vmatprep.subr.bf16.mxu0 %v619_v52 }
  0x32   :  { %622 = vmatpush3.bf16.msra.mxu0 %v619_v52 }
  0x35   :  { %541 = vmatmul.mubr.msk.f32.vlgmr.msra.gmra.mrb[4].mxu0 %vm99_vm0, %v26_v53 }
  0xf8   :  { %v470_v54 = vpop.f32.mrb[0].mxu0 }
  0xf9   :  { %v508_v55 = vpop.f32.mrb[0].mxu1  ;;  %v471_v56 = vpop.f32.mrb[1].mxu0 }
  0xfa   :  { %v472_v57 = vadd.f32 %v471_v56, %v470_v54  ;;  %v509_v58 = vpop.f32.mrb[1].mxu1 }
  0xfb   :  { %v510_v59 = vadd.f32 %v509_v58, %v508_v55 }
  0xfc   :  { %v473_v60 = vpop.f32.mrb[2].mxu0 }
  0xfd   :  { %v511_v61 = vpop.f32.mrb[2].mxu1  ;;  %v474_v62 = vpop.f32.mrb[3].mxu0  ;;  %v248_v63 = vadd.f32 %v510_v59, %v472_v57 }
  0xfe   :  { %v475_v0 = vadd.f32 %v474_v62, %v473_v60  ;;  %v512_v1 = vpop.f32.mrb[3].mxu1 }
  0xff   :  { %v513_v2 = vadd.f32 %v512_v1, %v511_v61  ;;  %v436_v1 = vld [vmem:[%s926_s2] ss:$0 sm:$0xff] }
 0x101   :  { %v253_v3 = vadd.f32 %v513_v2, %v475_v0 }
 0x108   :  { %v542_v4 = vpop.f32.mrb[4].mxu0 }
 0x109   :  { %v898_v5 = vadd.f32 %v542_v4, %v253_v3  ;;  %v322_v6 = vpop.f32.mrb[5].mxu0  ;;  %v437_v4 = vld [vmem:[%s927_s3] ss:$0 sm:$0xff] }
 0x10a   :  { %v900_v7 = vadd.f32 %v322_v6, %v248_v63 }
 0x10b   :  { %v343_v8 = vmul.f32 0.0, %v898_v5  ;;  %v352_v9 = vmul.f32 %v898_v5, %v898_v5 }
 0x10c   :  { %v351_v10 = vmul.f32 %v900_v7, %v900_v7  ;;  %v362_v11 = vadd.f32 %v898_v5, %v900_v7 }
 0x10d   :  { %v354_v12 = vmul.f32 0.0, %v352_v9  ;;  %v344_v13 = vadd.f32 %v343_v8, %v900_v7 }
 0x10e   :  { %v363_v14 = vrot.slane %v362_v11, 4  ;;  %v369_v15 = vadd.f32 %v352_v9, %v351_v10 }
 0x10f   :  { %v345_v16 = vrot.slane %v344_v13, 4  ;;  %v355_v17 = vadd.f32 %v354_v12, %v351_v10 }
 0x110   :  { %v364_v18 = vadd.f32 %v363_v14, %v362_v11  ;;  %v370_v19 = vrot.slane %v369_v15, 4 }
 0x111   :  { %v346_v20 = vadd.f32 %v345_v16, %v344_v13  ;;  %v356_v21 = vrot.slane %v355_v17, 4 }
 0x112   :  { %v365_v22 = vrot.slane %v364_v18, 2  ;;  %v371_v23 = vadd.f32 %v370_v19, %v369_v15 }
 0x113   :  { %v347_v24 = vrot.slane %v346_v20, 2  ;;  %v357_v25 = vadd.f32 %v356_v21, %v355_v17 }
 0x114   :  { %v366_v26 = vadd.f32 %v365_v22, %v364_v18  ;;  %v372_v27 = vrot.slane %v371_v23, 2 }
 0x115   :  { %v348_v28 = vadd.f32 %v347_v24, %v346_v20  ;;  %v358_v29 = vrot.slane %v357_v25, 2 }
 0x116   :  { %v367_v30 = vrot.slane %v366_v26, 1  ;;  %v373_v31 = vadd.f32 %v372_v27, %v371_v23 }
 0x117   :  { %v349_v32 = vrot.slane %v348_v28, 1  ;;  %v359_v33 = vadd.f32 %v358_v29, %v357_v25 }
 0x118   :  { %v368_v34 = vadd.f32 %v367_v30, %v366_v26  ;;  %v374_v35 = vrot.slane %v373_v31, 1 }
 0x119   :  { %v350_v36 = vadd.f32 %v349_v32, %v348_v28  ;;  %v360_v37 = vrot.slane %v359_v33, 1 }
 0x11a   :  { %v375_v38 = vadd.f32 %v374_v35, %v373_v31 }
 0x11b   :  { %v361_v39 = vadd.f32 %v360_v37, %v359_v33  ;;  %v376_v40 = vmul.f32 0.125, %v350_v36  ;;  %v377_v41 = vsub.f32 %v368_v34, %v350_v36 }
 0x11d   :  { %v378_v42 = vmul.f32 0.125, %v377_v41  ;;  %v379_v43 = vmul.f32 0.125, %v361_v39  ;;  %v380_v44 = vmul.f32 %v376_v40, %v376_v40  ;;  %v382_v45 = vsub.f32 %v375_v38, %v361_v39 }
 0x11e   :  { %v387_v46 = vmul.f32 0.0, %v376_v40 }
 0x11f   :  { %v381_v47 = vsub.f32 %v379_v43, %v380_v44  ;;  %v383_v48 = vmul.f32 0.125, %v382_v45  ;;  %v384_v49 = vmul.f32 %v378_v42, %v378_v42  ;;  %v390_v50 = vmul.f32 0.0, %v378_v42 }
 0x120   :  { %v393_v51 = vadd.f32 %v387_v46, %v378_v42 }
 0x121   :  { %v385_v52 = vsub.f32 %v383_v48, %v384_v49  ;;  %v392_v53 = vadd.f32 %v390_v50, %v376_v40  ;;  %v395_v54 = vmul.f32 0.0, %v381_v47 }
 0x122   :  { %v403_v55 = vsub.f32 %v898_v5, %v393_v51 }
 0x123   :  { %v396_v56 = vmul.f32 0.0, %v385_v52  ;;  %v399_v57 = vadd.f32 %v395_v54, %v385_v52  ;;  %v402_v58 = vsub.f32 %v900_v7, %v392_v53 }
 0x125   :  { %v398_v59 = vadd.f32 %v396_v56, %v381_v47  ;;  %v401_v60 = vmax.f32 %v399_v57, 0.0 }
 0x127   :  { %v400_v61 = vmax.f32 %v398_v59, 0.0  ;;  %v405_v62 = vadd.f32 1e-05, %v401_v60 }
 0x129   :  { %v404_v63 = vadd.f32 1e-05, %v400_v61  ;;  %623 = vrsqrt.f32 %v405_v62 }
 0x12b   :  { %625 = vrsqrt.f32 %v404_v63 }
 0x133   :  { %v624_v0 = vpop.eup %623 }
 0x134   :  { %v409_v2 = vmul.f32 %v624_v0, %v403_v55 }
 0x135   :  { %v626_v3 = vpop.eup %625 }
 0x136   :  { %v408_v5 = vmul.f32 %v626_v3, %v402_v58  ;;  %v417_v6 = vmul.f32 %v436_v1, %v409_v2 }
 0x138   :  { %v416_v7 = vmul.f32 %v436_v1, %v408_v5  ;;  %v425_v8 = vadd.f32 %v437_v4, %v417_v6 }
 0x13a   :  { %v424_v9 = vadd.f32 %v437_v4, %v416_v7  ;;  %v427_v10 = vmax.f32 %v425_v8, 0.0 }
 0x13c   :  { %v426_v11 = vmax.f32 %v424_v9, 0.0  ;;  %429 = vst [vmem:[%s928_s4 + $0x8] sm:$0xff] %v427_v10 }
 0x13e   :  { %428 = vst [vmem:[%s928_s4] sm:$0xff] %v426_v11 }

// kernel: cdnet_forward.16
= control target key start
LH: loop header
LB: loop body
LE: loop exit
PB: predicated region body
PF: predicated region fallthrough
CT: control target
= control target key end

     0   :  { %vm671_vm0 = vcmask 523264   ;;  %s1880_s1 = inlined_call_operand.vmem [shape: f32[1152,128], index: 1, kind: input, shape index: {}]   ;;  %s1881_s0 = inlined_call_operand.vmem [shape: f32[16,1152], index: 0, kind: input, shape index: {}]   ;;  %s1882_s5 = inlined_call_operand.vmem [shape: f32[64,128], index: 5, kind: input, shape index: {}]   ;;  %s1883_s4 = inlined_call_operand.vmem [shape: f32[16,64], index: 4, kind: input, shape index: {}]   ;;  %s1884_s6 = inlined_call_operand.vmem [shape: f32[1,128], index: 6, kind: input, shape index: {}, may-alias: {2,6}]   ;;  %s1885_s2 = inlined_call_operand.vmem [shape: f32[1,128], index: 2, kind: input, shape index: {}, may-alias: {2,6}]   ;;  %s1886_s7 = inlined_call_operand.vmem [shape: f32[1,128], index: 7, kind: input, shape index: {}, may-alias: {3,7}]   ;;  %s1887_s3 = inlined_call_operand.vmem [shape: f32[1,128], index: 3, kind: input, shape index: {}, may-alias: {3,7}]   ;;  %s1888_s8 = inlined_call_operand.vmem [shape: f32[16,128], index: 8, kind: output, shape index: {}]  }
   0x1   :  { %v63_v0 = vld [vmem:[%s1880_s1 + $0x80] sm:$0xff]  ;;  %v64_v1 = vld [vmem:[%s1880_s1 + $0x88] sm:$0xff]  ;;  %v65_v11 = vld [vmem:[%s1880_s1 + $0x90] sm:$0xff] }
   0x2   :  { %v95_v2 = vld [vmem:[%s1880_s1 + $0x180] sm:$0xff]  ;;  %v1087_v3 = vpack.c.bf16 %v64_v1, %v63_v0  ;;  %v96_v4 = vld [vmem:[%s1880_s1 + $0x188] sm:$0xff]  ;;  %v66_v13 = vld [vmem:[%s1880_s1 + $0x98] sm:$0xff] }
   0x3   :  { %v47_v5 = vld [vmem:[%s1880_s1] sm:$0xff]  ;;  %v48_v6 = vld [vmem:[%s1880_s1 + $0x8] sm:$0xff]  ;;  %v1119_v7 = vpack.c.bf16 %v96_v4, %v95_v2  ;;  %v97_v14 = vld [vmem:[%s1880_s1 + $0x190] sm:$0xff]  ;;  %v1091_v16 = vpack.c.bf16 %v66_v13, %v65_v11 }
   0x4   :  { %v1089_v8 = vpack.c.bf16 %v48_v6, %v47_v5  ;;  %v79_v9 = vld [vmem:[%s1880_s1 + $0x100] sm:$0xff]  ;;  %v80_v10 = vld [vmem:[%s1880_s1 + $0x108] sm:$0xff]  ;;  %1088 = vmatprep.subr.bf16.mxu0 %v1087_v3  ;;  %v98_v15 = vld [vmem:[%s1880_s1 + $0x198] sm:$0xff] }
   0x5   :  { %v1121_v12 = vpack.c.bf16 %v80_v10, %v79_v9  ;;  %1120 = vmatprep.subr.bf16.mxu1 %v1119_v7  ;;  %v1123_v17 = vpack.c.bf16 %v98_v15, %v97_v14  ;;  %v49_v18 = vld [vmem:[%s1880_s1 + $0x10] sm:$0xff]  ;;  %v50_v19 = vld [vmem:[%s1880_s1 + $0x18] sm:$0xff]  ;;  %v67_v23 = vld [vmem:[%s1880_s1 + $0xa0] sm:$0xff] }
   0x6   :  { %1090 = vmatpush3.bf16.msra.mxu0 %v1089_v8  ;;  %v81_v20 = vld [vmem:[%s1880_s1 + $0x110] sm:$0xff]  ;;  %v1093_v21 = vpack.c.bf16 %v50_v19, %v49_v18  ;;  %v82_v22 = vld [vmem:[%s1880_s1 + $0x118] sm:$0xff]  ;;  %v68_v24 = vld [vmem:[%s1880_s1 + $0xa8] sm:$0xff] }
   0x7   :  { %1122 = vmatpush3.bf16.msra.mxu1 %v1121_v12  ;;  %1092 = vmatprep.subr.bf16.mxu0 %v1091_v16  ;;  %v1125_v25 = vpack.c.bf16 %v82_v22, %v81_v20  ;;  %v1095_v26 = vpack.c.bf16 %v68_v24, %v67_v23  ;;  %v99_v27 = vld [vmem:[%s1880_s1 + $0x1a0] sm:$0xff]  ;;  %v100_v28 = vld [vmem:[%s1880_s1 + $0x1a8] sm:$0xff]  ;;  %v69_v35 = vld [vmem:[%s1880_s1 + $0xb0] sm:$0xff] }
   0x8   :  { %1124 = vmatprep.subr.bf16.mxu1 %v1123_v17  ;;  %v51_v29 = vld [vmem:[%s1880_s1 + $0x20] sm:$0xff]  ;;  %v1127_v30 = vpack.c.bf16 %v100_v28, %v99_v27  ;;  %v52_v31 = vld [vmem:[%s1880_s1 + $0x28] sm:$0xff]  ;;  %v70_v36 = vld [vmem:[%s1880_s1 + $0xb8] sm:$0xff] }
   0x9   :  { %v83_v32 = vld [vmem:[%s1880_s1 + $0x120] sm:$0xff]  ;;  %v84_v33 = vld [vmem:[%s1880_s1 + $0x128] sm:$0xff]  ;;  %v1097_v34 = vpack.c.bf16 %v52_v31, %v51_v29  ;;  %v101_v37 = vld [vmem:[%s1880_s1 + $0x1b0] sm:$0xff]  ;;  %v1099_v39 = vpack.c.bf16 %v70_v36, %v69_v35 }
   0xa   :  { %1094 = vmatpush3.bf16.msra.mxu0 %v1093_v21  ;;  %v1129_v38 = vpack.c.bf16 %v84_v33, %v83_v32  ;;  %v102_v40 = vld [vmem:[%s1880_s1 + $0x1b8] sm:$0xff]  ;;  %v53_v41 = vld [vmem:[%s1880_s1 + $0x30] sm:$0xff]  ;;  %v71_v46 = vld [vmem:[%s1880_s1 + $0xc0] sm:$0xff] }
   0xb   :  { %1126 = vmatpush3.bf16.msra.mxu1 %v1125_v25  ;;  %1096 = vmatprep.subr.bf16.mxu0 %v1095_v26  ;;  %v54_v42 = vld [vmem:[%s1880_s1 + $0x38] sm:$0xff]  ;;  %v1131_v43 = vpack.c.bf16 %v102_v40, %v101_v37  ;;  %v85_v44 = vld [vmem:[%s1880_s1 + $0x130] sm:$0xff]  ;;  %v72_v47 = vld [vmem:[%s1880_s1 + $0xc8] sm:$0xff] }
   0xc   :  { %1128 = vmatprep.subr.bf16.mxu1 %v1127_v30  ;;  %v86_v45 = vld [vmem:[%s1880_s1 + $0x138] sm:$0xff]  ;;  %v103_v48 = vld [vmem:[%s1880_s1 + $0x1c0] sm:$0xff]  ;;  %v104_v49 = vld [vmem:[%s1880_s1 + $0x1c8] sm:$0xff]  ;;  %v1101_v50 = vpack.c.bf16 %v54_v42, %v53_v41  ;;  %v1103_v52 = vpack.c.bf16 %v72_v47, %v71_v46 }
   0xd   :  { %v1133_v51 = vpack.c.bf16 %v86_v45, %v85_v44  ;;  %v55_v53 = vld [vmem:[%s1880_s1 + $0x40] sm:$0xff]  ;;  %v56_v54 = vld [vmem:[%s1880_s1 + $0x48] sm:$0xff]  ;;  %v1135_v56 = vpack.c.bf16 %v104_v49, %v103_v48  ;;  %v73_v58 = vld [vmem:[%s1880_s1 + $0xd0] sm:$0xff] }
   0xe   :  { %1098 = vmatpush3.bf16.msra.mxu0 %v1097_v34  ;;  %v87_v55 = vld [vmem:[%s1880_s1 + $0x140] sm:$0xff]  ;;  %v88_v57 = vld [vmem:[%s1880_s1 + $0x148] sm:$0xff]  ;;  %v74_v59 = vld [vmem:[%s1880_s1 + $0xd8] sm:$0xff]  ;;  %v1105_v62 = vpack.c.bf16 %v56_v54, %v55_v53 }
   0xf   :  { %1130 = vmatpush3.bf16.msra.mxu1 %v1129_v38  ;;  %1100 = vmatprep.subr.bf16.mxu0 %v1099_v39  ;;  %v105_v60 = vld [vmem:[%s1880_s1 + $0x1d0] sm:$0xff]  ;;  %v106_v61 = vld [vmem:[%s1880_s1 + $0x1d8] sm:$0xff]  ;;  %v1137_v63 = vpack.c.bf16 %v88_v57, %v87_v55  ;;  %v1107_v0 = vpack.c.bf16 %v74_v59, %v73_v58  ;;  %v75_v6 = vld [vmem:[%s1880_s1 + $0xe0] sm:$0xff] }
  0x10   :  { %1132 = vmatprep.subr.bf16.mxu1 %v1131_v43  ;;  %v57_v1 = vld [vmem:[%s1880_s1 + $0x50] sm:$0xff]  ;;  %v58_v2 = vld [vmem:[%s1880_s1 + $0x58] sm:$0xff]  ;;  %v1139_v4 = vpack.c.bf16 %v106_v61, %v105_v60  ;;  %v76_v7 = vld [vmem:[%s1880_s1 + $0xe8] sm:$0xff] }
  0x11   :  { %v89_v3 = vld [vmem:[%s1880_s1 + $0x150] sm:$0xff]  ;;  %v90_v5 = vld [vmem:[%s1880_s1 + $0x158] sm:$0xff]  ;;  %v107_v8 = vld [vmem:[%s1880_s1 + $0x1e0] sm:$0xff]  ;;  %v1109_v10 = vpack.c.bf16 %v58_v2, %v57_v1  ;;  %v1111_v14 = vpack.c.bf16 %v76_v7, %v75_v6 }
  0x12   :  { %1102 = vmatpush3.bf16.msra.mxu0 %v1101_v50  ;;  %v108_v9 = vld [vmem:[%s1880_s1 + $0x1e8] sm:$0xff]  ;;  %v59_v11 = vld [vmem:[%s1880_s1 + $0x60] sm:$0xff]  ;;  %v1141_v13 = vpack.c.bf16 %v90_v5, %v89_v3  ;;  %v32_v17 = vld [vmem:[%s1881_s0 + $0x18] sm:$0xff] }
  0x13   :  { %1134 = vmatpush3.bf16.msra.mxu1 %v1133_v51  ;;  %1104 = vmatprep.subr.bf16.mxu0 %v1103_v52  ;;  %v60_v12 = vld [vmem:[%s1880_s1 + $0x68] sm:$0xff]  ;;  %v91_v15 = vld [vmem:[%s1880_s1 + $0x160] sm:$0xff]  ;;  %v1143_v18 = vpack.c.bf16 %v108_v9, %v107_v8  ;;  %v77_v20 = vld [vmem:[%s1880_s1 + $0xf0] sm:$0xff] }
  0x14   :  { %1136 = vmatprep.subr.bf16.mxu1 %v1135_v56  ;;  %v30_v16 = vld [vmem:[%s1881_s0 + $0x8] sm:$0xff]  ;;  %v78_v21 = vld [vmem:[%s1880_s1 + $0xf8] sm:$0xff]  ;;  %v109_v22 = vld [vmem:[%s1880_s1 + $0x1f0] sm:$0xff]  ;;  %330 = vmatprep.mubr.f32.mxu1 %v32_v17  ;;  %v1113_v24 = vpack.c.bf16 %v60_v12, %v59_v11 }
  0x15   :  { %v92_v19 = vld [vmem:[%s1880_s1 + $0x168] sm:$0xff]  ;;  %255 = vmatprep.mubr.f32.mxu0 %v30_v16  ;;  %v110_v23 = vld [vmem:[%s1880_s1 + $0x1f8] sm:$0xff]  ;;  %v1115_v26 = vpack.c.bf16 %v78_v21, %v77_v20  ;;  %v61_v27 = vld [vmem:[%s1880_s1 + $0x70] sm:$0xff] }
  0x16   :  { %1106 = vmatpush3.bf16.msra.mxu0 %v1105_v62  ;;  %v1145_v25 = vpack.c.bf16 %v92_v19, %v91_v15  ;;  %v62_v28 = vld [vmem:[%s1880_s1 + $0x78] sm:$0xff]  ;;  %v93_v29 = vld [vmem:[%s1880_s1 + $0x170] sm:$0xff]  ;;  %v1147_v30 = vpack.c.bf16 %v110_v23, %v109_v22  ;;  %v127_v32 = vld [vmem:[%s1880_s1 + $0x280] sm:$0xff] }
  0x17   :  { %1138 = vmatpush3.bf16.msra.mxu1 %v1137_v63  ;;  %1108 = vmatprep.subr.bf16.mxu0 %v1107_v0  ;;  %v94_v31 = vld [vmem:[%s1880_s1 + $0x178] sm:$0xff]  ;;  %v128_v33 = vld [vmem:[%s1880_s1 + $0x288] sm:$0xff]  ;;  %v159_v34 = vld [vmem:[%s1880_s1 + $0x380] sm:$0xff]  ;;  %v1117_v36 = vpack.c.bf16 %v62_v28, %v61_v27 }
  0x18   :  { %1140 = vmatprep.subr.bf16.mxu1 %v1139_v4  ;;  %v160_v35 = vld [vmem:[%s1880_s1 + $0x388] sm:$0xff]  ;;  %v1149_v37 = vpack.c.bf16 %v94_v31, %v93_v29  ;;  %v1151_v38 = vpack.c.bf16 %v128_v33, %v127_v32  ;;  %v111_v39 = vld [vmem:[%s1880_s1 + $0x200] sm:$0xff]  ;;  %v129_v44 = vld [vmem:[%s1880_s1 + $0x290] sm:$0xff] }
  0x19   :  { %v112_v40 = vld [vmem:[%s1880_s1 + $0x208] sm:$0xff]  ;;  %v143_v41 = vld [vmem:[%s1880_s1 + $0x300] sm:$0xff]  ;;  %v1183_v42 = vpack.c.bf16 %v160_v35, %v159_v34  ;;  %v130_v45 = vld [vmem:[%s1880_s1 + $0x298] sm:$0xff] }
  0x1a   :  { %1110 = vmatpush3.bf16.msra.mxu0 %v1109_v10  ;;  %v144_v43 = vld [vmem:[%s1880_s1 + $0x308] sm:$0xff]  ;;  %v161_v46 = vld [vmem:[%s1880_s1 + $0x390] sm:$0xff]  ;;  %v162_v47 = vld [vmem:[%s1880_s1 + $0x398] sm:$0xff]  ;;  %v1153_v50 = vpack.c.bf16 %v112_v40, %v111_v39  ;;  %v1155_v52 = vpack.c.bf16 %v130_v45, %v129_v44 }
  0x1b   :  { %1142 = vmatpush3.bf16.msra.mxu1 %v1141_v13  ;;  %1112 = vmatprep.subr.bf16.mxu0 %v1111_v14  ;;  %v29_v48 = vld [vmem:[%s1881_s0] sm:$0xff]  ;;  %v31_v49 = vld [vmem:[%s1881_s0 + $0x10] sm:$0xff]  ;;  %v1185_v51 = vpack.c.bf16 %v144_v43, %v143_v41  ;;  %v114_v54 = vld [vmem:[%s1880_s1 + $0x218] sm:$0xff]  ;;  %v1187_v56 = vpack.c.bf16 %v162_v47, %v161_v46 }
  0x1c   :  { %1144 = vmatprep.subr.bf16.mxu1 %v1143_v18  ;;  %v113_v53 = vld [vmem:[%s1880_s1 + $0x210] sm:$0xff]  ;;  %v146_v57 = vld [vmem:[%s1880_s1 + $0x318] sm:$0xff]  ;;  %v131_v58 = vld [vmem:[%s1880_s1 + $0x2a0] sm:$0xff] }
  0x1d   :  { %v145_v55 = vld [vmem:[%s1880_s1 + $0x310] sm:$0xff]  ;;  %v132_v59 = vld [vmem:[%s1880_s1 + $0x2a8] sm:$0xff]  ;;  %v163_v60 = vld [vmem:[%s1880_s1 + $0x3a0] sm:$0xff]  ;;  %v1157_v62 = vpack.c.bf16 %v114_v54, %v113_v53 }
  0x1e   :  { %1114 = vmatpush3.bf16.msra.mxu0 %v1113_v24  ;;  %v164_v61 = vld [vmem:[%s1880_s1 + $0x3a8] sm:$0xff]  ;;  %v1189_v63 = vpack.c.bf16 %v146_v57, %v145_v55  ;;  %v1159_v0 = vpack.c.bf16 %v132_v59, %v131_v58  ;;  %v115_v1 = vld [vmem:[%s1880_s1 + $0x220] sm:$0xff]  ;;  %v133_v6 = vld [vmem:[%s1880_s1 + $0x2b0] sm:$0xff] }
  0x1f   :  { %1146 = vmatpush3.bf16.msra.mxu1 %v1145_v25  ;;  %1116 = vmatprep.subr.bf16.mxu0 %v1115_v26  ;;  %v116_v2 = vld [vmem:[%s1880_s1 + $0x228] sm:$0xff]  ;;  %v147_v3 = vld [vmem:[%s1880_s1 + $0x320] sm:$0xff]  ;;  %v1191_v4 = vpack.c.bf16 %v164_v61, %v163_v60  ;;  %v134_v7 = vld [vmem:[%s1880_s1 + $0x2b8] sm:$0xff] }
  0x20   :  { %1148 = vmatprep.subr.bf16.mxu1 %v1147_v30  ;;  %v148_v5 = vld [vmem:[%s1880_s1 + $0x328] sm:$0xff]  ;;  %v165_v8 = vld [vmem:[%s1880_s1 + $0x3b0] sm:$0xff]  ;;  %v166_v9 = vld [vmem:[%s1880_s1 + $0x3b8] sm:$0xff]  ;;  %v1161_v11 = vpack.c.bf16 %v116_v2, %v115_v1  ;;  %v1163_v16 = vpack.c.bf16 %v134_v7, %v133_v6 }
  0x21   :  { %v117_v10 = vld [vmem:[%s1880_s1 + $0x230] sm:$0xff]  ;;  %v118_v12 = vld [vmem:[%s1880_s1 + $0x238] sm:$0xff]  ;;  %v1193_v15 = vpack.c.bf16 %v148_v5, %v147_v3  ;;  %v135_v17 = vld [vmem:[%s1880_s1 + $0x2c0] sm:$0xff]  ;;  %v1195_v20 = vpack.c.bf16 %v166_v9, %v165_v8 }
  0x22   :  { %1118 = vmatpush3.bf16.msra.mxu0 %v1117_v36  ;;  %v149_v13 = vld [vmem:[%s1880_s1 + $0x330] sm:$0xff]  ;;  %v150_v14 = vld [vmem:[%s1880_s1 + $0x338] sm:$0xff]  ;;  %v41_v19 = vld [vmem:[%s1881_s0 + $0x60] sm:$0xff]  ;;  %v1165_v26 = vpack.c.bf16 %v118_v12, %v117_v10 }
  0x23   :  { %1150 = vmatpush3.bf16.msra.mxu1 %v1149_v37  ;;  %1152 = vmatprep.subr.bf16.mxu0 %v1151_v38  ;;  %v39_v18 = vld [vmem:[%s1881_s0 + $0x50] sm:$0xff]  ;;  %v136_v21 = vld [vmem:[%s1880_s1 + $0x2c8] sm:$0xff]  ;;  %v40_v23 = vld [vmem:[%s1881_s0 + $0x58] sm:$0xff]  ;;  %v1197_v29 = vpack.c.bf16 %v150_v14, %v149_v13 }
  0x24   :  { %1184 = vmatprep.subr.bf16.mxu1 %v1183_v42  ;;  %v38_v22 = vld [vmem:[%s1881_s0 + $0x48] sm:$0xff]  ;;  %v167_v24 = vld [vmem:[%s1880_s1 + $0x3c0] sm:$0xff]  ;;  %v1167_v30 = vpack.c.bf16 %v136_v21, %v135_v17  ;;  %v137_v35 = vld [vmem:[%s1880_s1 + $0x2d0] sm:$0xff] }
  0x25   :  { %256 = vmatmul.mubr.f32.vlgmr.msra.gmra.mrb[0].mxu0 %v29_v48  ;;  %v168_v25 = vld [vmem:[%s1880_s1 + $0x3c8] sm:$0xff]  ;;  %v119_v27 = vld [vmem:[%s1880_s1 + $0x240] sm:$0xff]  ;;  %v138_v36 = vld [vmem:[%s1880_s1 + $0x2d8] sm:$0xff] }
  0x26   :  { %331 = vmatmul.mubr.f32.vlgmr.msra.gmra.mrb[0].mxu1 %v31_v49  ;;  %1154 = vmatpush3.bf16.msra.mxu0 %v1153_v50  ;;  %v120_v28 = vld [vmem:[%s1880_s1 + $0x248] sm:$0xff]  ;;  %v151_v31 = vld [vmem:[%s1880_s1 + $0x340] sm:$0xff]  ;;  %v1199_v34 = vpack.c.bf16 %v168_v25, %v167_v24  ;;  %v36_v37 = vld [vmem:[%s1881_s0 + $0x38] sm:$0xff]  ;;  %v1171_v42 = vpack.c.bf16 %v138_v36, %v137_v35 }
  0x27   :  { %1186 = vmatpush3.bf16.msra.mxu1 %v1185_v51  ;;  %1156 = vmatprep.subr.bf16.mxu0 %v1155_v52  ;;  %v152_v32 = vld [vmem:[%s1880_s1 + $0x348] sm:$0xff]  ;;  %v169_v38 = vld [vmem:[%s1880_s1 + $0x3d0] sm:$0xff]  ;;  %v170_v39 = vld [vmem:[%s1880_s1 + $0x3d8] sm:$0xff]  ;;  %v1169_v40 = vpack.c.bf16 %v120_v28, %v119_v27 }
  0x28   :  { %1188 = vmatprep.subr.bf16.mxu1 %v1187_v56  ;;  %260 = vmatprep.mubr.f32.mxu0 %v39_v18  ;;  %v34_v33 = vld [vmem:[%s1881_s0 + $0x28] sm:$0xff]  ;;  %v1201_v41 = vpack.c.bf16 %v152_v32, %v151_v31  ;;  %v121_v43 = vld [vmem:[%s1880_s1 + $0x250] sm:$0xff]  ;;  %v122_v44 = vld [vmem:[%s1880_s1 + $0x258] sm:$0xff]  ;;  %v1203_v46 = vpack.c.bf16 %v170_v39, %v169_v38 }
  0x29   :  { %335 = vmatprep.mubr.f32.mxu1 %v41_v19  ;;  %261 = vmatmul.mubr.f32.gmra.mrb[2].mxu0 %v38_v22  ;;  %v153_v45 = vld [vmem:[%s1880_s1 + $0x350] sm:$0xff]  ;;  %v154_v47 = vld [vmem:[%s1880_s1 + $0x358] sm:$0xff]  ;;  %v139_v48 = vld [vmem:[%s1880_s1 + $0x2e0] sm:$0xff]  ;;  %v1173_v52 = vpack.c.bf16 %v122_v44, %v121_v43 }
  0x2a   :  { %1158 = vmatpush3.bf16.msra.mxu0 %v1157_v62  ;;  %336 = vmatmul.mubr.f32.gmra.mrb[2].mxu1 %v40_v23  ;;  %v140_v49 = vld [vmem:[%s1880_s1 + $0x2e8] sm:$0xff]  ;;  %v171_v50 = vld [vmem:[%s1880_s1 + $0x3e0] sm:$0xff]  ;;  %v1205_v53 = vpack.c.bf16 %v154_v47, %v153_v45  ;;  %v141_v60 = vld [vmem:[%s1880_s1 + $0x2f0] sm:$0xff] }
  0x2b   :  { %1190 = vmatpush3.bf16.msra.mxu1 %v1189_v63  ;;  %1160 = vmatprep.subr.bf16.mxu0 %v1159_v0  ;;  %v172_v51 = vld [vmem:[%s1880_s1 + $0x3e8] sm:$0xff]  ;;  %v1175_v54 = vpack.c.bf16 %v140_v49, %v139_v48  ;;  %v123_v55 = vld [vmem:[%s1880_s1 + $0x260] sm:$0xff]  ;;  %v142_v61 = vld [vmem:[%s1880_s1 + $0x2f8] sm:$0xff] }
  0x2c   :  { %1192 = vmatprep.subr.bf16.mxu1 %v1191_v4  ;;  %405 = vmatprep.mubr.f32.mxu0 %v34_v33  ;;  %v124_v56 = vld [vmem:[%s1880_s1 + $0x268] sm:$0xff]  ;;  %v155_v57 = vld [vmem:[%s1880_s1 + $0x360] sm:$0xff]  ;;  %v1207_v58 = vpack.c.bf16 %v172_v51, %v171_v50  ;;  %v173_v62 = vld [vmem:[%s1880_s1 + $0x3f0] sm:$0xff]  ;;  %v1179_v2 = vpack.c.bf16 %v142_v61, %v141_v60 }
  0x2d   :  { %480 = vmatprep.mubr.f32.mxu1 %v36_v37  ;;  %v156_v59 = vld [vmem:[%s1880_s1 + $0x368] sm:$0xff]  ;;  %v174_v63 = vld [vmem:[%s1880_s1 + $0x3f8] sm:$0xff]  ;;  %v1177_v0 = vpack.c.bf16 %v124_v56, %v123_v55  ;;  %v125_v3 = vld [vmem:[%s1880_s1 + $0x270] sm:$0xff] }
  0x2e   :  { %1162 = vmatpush3.bf16.msra.mxu0 %v1161_v11  ;;  %v1209_v1 = vpack.c.bf16 %v156_v59, %v155_v57  ;;  %v126_v4 = vld [vmem:[%s1880_s1 + $0x278] sm:$0xff]  ;;  %v157_v5 = vld [vmem:[%s1880_s1 + $0x370] sm:$0xff]  ;;  %v1211_v6 = vpack.c.bf16 %v174_v63, %v173_v62  ;;  %v175_v8 = vld [vmem:[%s1880_s1 + $0x400] sm:$0xff] }
  0x2f   :  { %1194 = vmatpush3.bf16.msra.mxu1 %v1193_v15  ;;  %1164 = vmatprep.subr.bf16.mxu0 %v1163_v16  ;;  %v158_v7 = vld [vmem:[%s1880_s1 + $0x378] sm:$0xff]  ;;  %v176_v9 = vld [vmem:[%s1880_s1 + $0x408] sm:$0xff]  ;;  %v663_v10 = vld [vmem:[%s1882_s5] sm:$0xff]  ;;  %v1181_v12 = vpack.c.bf16 %v126_v4, %v125_v3 }
  0x30   :  { %1196 = vmatprep.subr.bf16.mxu1 %v1195_v20  ;;  %v664_v11 = vld [vmem:[%s1882_s5 + $0x8] sm:$0xff]  ;;  %v1213_v13 = vpack.c.bf16 %v158_v7, %v157_v5  ;;  %v1215_v14 = vpack.c.bf16 %v176_v9, %v175_v8  ;;  %v177_v16 = vld [vmem:[%s1880_s1 + $0x410] sm:$0xff]  ;;  %v178_v17 = vld [vmem:[%s1880_s1 + $0x418] sm:$0xff] }
  0x31   :  { %v1247_v15 = vpack.c.bf16 %v664_v11, %v663_v10  ;;  %v665_v18 = vld [vmem:[%s1882_s5 + $0x10] sm:$0xff]  ;;  %v666_v19 = vld [vmem:[%s1882_s5 + $0x18] sm:$0xff]  ;;  %v33_v20 = vld [vmem:[%s1881_s0 + $0x20] sm:$0xff]  ;;  %v1219_v23 = vpack.c.bf16 %v178_v17, %v177_v16 }
  0x32   :  { %1166 = vmatpush3.bf16.msra.mxu0 %v1165_v26  ;;  %v35_v21 = vld [vmem:[%s1881_s0 + $0x30] sm:$0xff]  ;;  %v1251_v24 = vpack.c.bf16 %v666_v19, %v665_v18  ;;  %v179_v25 = vld [vmem:[%s1880_s1 + $0x420] sm:$0xff]  ;;  %v180_v26 = vld [vmem:[%s1880_s1 + $0x428] sm:$0xff] }
  0x33   :  { %1198 = vmatpush3.bf16.msra.mxu1 %v1197_v29  ;;  %1168 = vmatprep.subr.bf16.mxu0 %v1167_v30  ;;  %v43_v22 = vld [vmem:[%s1881_s0 + $0x70] sm:$0xff]  ;;  %v667_v27 = vld [vmem:[%s1882_s5 + $0x20] sm:$0xff]  ;;  %v668_v28 = vld [vmem:[%s1882_s5 + $0x28] sm:$0xff]  ;;  %v1223_v32 = vpack.c.bf16 %v180_v26, %v179_v25 }
  0x34   :  { %1200 = vmatprep.subr.bf16.mxu1 %v1199_v34  ;;  %v42_v29 = vld [vmem:[%s1881_s0 + $0x68] sm:$0xff]  ;;  %v45_v30 = vld [vmem:[%s1881_s0 + $0x80] sm:$0xff]  ;;  %v44_v31 = vld [vmem:[%s1881_s0 + $0x78] sm:$0xff]  ;;  %v1255_v33 = vpack.c.bf16 %v668_v28, %v667_v27 }
  0x35   :  { %v181_v34 = vld [vmem:[%s1880_s1 + $0x430] sm:$0xff]  ;;  %v182_v35 = vld [vmem:[%s1880_s1 + $0x438] sm:$0xff]  ;;  %v661_v38 = vld [vmem:[%s1883_s4] sm:$0xff] }
  0x36   :  { %1170 = vmatpush3.bf16.msra.mxu0 %v1169_v40  ;;  %v669_v36 = vld [vmem:[%s1882_s5 + $0x30] sm:$0xff]  ;;  %v670_v37 = vld [vmem:[%s1882_s5 + $0x38] sm:$0xff]  ;;  %v37_v39 = vld [vmem:[%s1881_s0 + $0x40] sm:$0xff]  ;;  %v1227_v40 = vpack.c.bf16 %v182_v35, %v181_v34 }
  0x37   :  { %1202 = vmatpush3.bf16.msra.mxu1 %v1201_v41  ;;  %1172 = vmatprep.subr.bf16.mxu0 %v1171_v42  ;;  %v1259_v41 = vpack.c.bf16 %v670_v37, %v669_v36  ;;  %v183_v42 = vld [vmem:[%s1880_s1 + $0x440] sm:$0xff]  ;;  %v184_v43 = vld [vmem:[%s1880_s1 + $0x448] sm:$0xff]  ;;  %v185_v45 = vld [vmem:[%s1880_s1 + $0x450] sm:$0xff] }
  0x38   :  { %1204 = vmatprep.subr.bf16.mxu1 %v1203_v46  ;;  %v1231_v44 = vpack.c.bf16 %v184_v43, %v183_v42  ;;  %v186_v46 = vld [vmem:[%s1880_s1 + $0x458] sm:$0xff]  ;;  %v662_v47 = vld [vmem:[%s1883_s4 + $0x8] sm:$0xff]  ;;  %v187_v49 = vld [vmem:[%s1880_s1 + $0x460] sm:$0xff] }
  0x39   :  { %v1235_v48 = vpack.c.bf16 %v186_v46, %v185_v45  ;;  %v188_v50 = vld [vmem:[%s1880_s1 + $0x468] sm:$0xff] }
  0x3a   :  { %1174 = vmatpush3.bf16.msra.mxu0 %v1173_v52  ;;  %v1239_v51 = vpack.c.bf16 %v188_v50, %v187_v49  ;;  %v189_v52 = vld [vmem:[%s1880_s1 + $0x470] sm:$0xff]  ;;  %v46_v55 = vld [vmem:[%s1881_s0 + $0x88] sm:$0xff] }
  0x3b   :  { %1206 = vmatpush3.bf16.msra.mxu1 %v1205_v53  ;;  %1176 = vmatprep.subr.bf16.mxu0 %v1175_v54  ;;  %v190_v53 = vld [vmem:[%s1880_s1 + $0x478] sm:$0xff] }
  0x3c   :  { %1208 = vmatprep.subr.bf16.mxu1 %v1207_v58  ;;  %v1243_v54 = vpack.c.bf16 %v190_v53, %v189_v52 }
  0x3e   :  { %1178 = vmatpush3.bf16.msra.mxu0 %v1177_v0 }
  0x3f   :  { %1210 = vmatpush3.bf16.msra.mxu1 %v1209_v1  ;;  %1180 = vmatprep.subr.bf16.mxu0 %v1179_v2 }
  0x40   :  { %1212 = vmatprep.subr.bf16.mxu1 %v1211_v6 }
  0x42   :  { %1182 = vmatpush3.bf16.msra.mxu0 %v1181_v12 }
  0x43   :  { %1214 = vmatpush3.bf16.msra.mxu1 %v1213_v13  ;;  %1216 = vmatprep.subr.bf16.mxu0 %v1215_v14 }
  0x44   :  { %1248 = vmatprep.subr.bf16.mxu1 %v1247_v15 }
  0x45   :  { %406 = vmatmul.mubr.f32.vlgmr.msra.gmra.mrb[4].mxu0 %v33_v20 }
  0x46   :  { %481 = vmatmul.mubr.f32.vlgmr.msra.gmra.mrb[4].mxu1 %v35_v21  ;;  %1218 = vmatpush3.bf16.msra.mxu0 %v1215_v14 }
  0x47   :  { %1250 = vmatpush3.bf16.msra.mxu1 %v1247_v15  ;;  %410 = vmatprep.mubr.f32.mxu0 %v43_v22 }
  0x48   :  { %1220 = vmatprep.subr.bf16.mxu0 %v1219_v23  ;;  %1252 = vmatprep.subr.bf16.mxu1 %v1251_v24 }
  0x49   :  { %411 = vmatmul.mubr.f32.gmra.mrb[6].mxu0 %v42_v29  ;;  %485 = vmatprep.mubr.f32.mxu1 %v45_v30 }
  0x4a   :  { %1222 = vmatpush3.bf16.msra.mxu0 %v1219_v23  ;;  %486 = vmatmul.mubr.f32.gmra.mrb[6].mxu1 %v44_v31 }
  0x4b   :  { %1254 = vmatpush3.bf16.msra.mxu1 %v1251_v24  ;;  %1224 = vmatprep.subr.bf16.mxu0 %v1223_v32 }
  0x4c   :  { %1256 = vmatprep.subr.bf16.mxu1 %v1255_v33  ;;  %1084 = vmatprep.mubr.msk.f32.mxu1 %vm671_vm0, %v661_v38 }
  0x4d   :  { %1065 = vmatprep.mubr.f32.mxu0 %v37_v39 }
  0x4e   :  { %1226 = vmatpush3.bf16.msra.mxu0 %v1223_v32 }
  0x4f   :  { %1258 = vmatpush3.bf16.msra.mxu1 %v1255_v33  ;;  %1228 = vmatprep.subr.bf16.mxu0 %v1227_v40 }
  0x50   :  { %1260 = vmatprep.subr.bf16.mxu1 %v1259_v41 }
  0x52   :  { %1230 = vmatpush3.bf16.msra.mxu0 %v1227_v40 }
  0x53   :  { %1262 = vmatpush3.bf16.msra.mxu1 %v1259_v41  ;;  %1232 = vmatprep.subr.bf16.mxu0 %v1231_v44 }
  0x56   :  { %1085 = vmatmul.mubr.msk.f32.vlgmr.msra.gmra.mrb[8].mxu1 %vm671_vm0, %v662_v47  ;;  %1234 = vmatpush3.bf16.msra.mxu0 %v1231_v44 }
  0x57   :  { %1236 = vmatprep.subr.bf16.mxu0 %v1235_v48 }
  0x5a   :  { %1238 = vmatpush3.bf16.msra.mxu0 %v1235_v48 }
  0x5b   :  { %1240 = vmatprep.subr.bf16.mxu0 %v1239_v51 }
  0x5e   :  { %1242 = vmatpush3.bf16.msra.mxu0 %v1239_v51 }
  0x5f   :  { %1244 = vmatprep.subr.bf16.mxu0 %v1243_v54 }
  0x62   :  { %1246 = vmatpush3.bf16.msra.mxu0 %v1243_v54 }
  0x65   :  { %1066 = vmatmul.mubr.f32.vlgmr.msra.gmra.mrb[8].mxu0 %v46_v55 }
  0xf8   :  { %v885_v56 = vpop.f32.mrb[0].mxu0 }
  0xf9   :  { %v923_v57 = vpop.f32.mrb[0].mxu1  ;;  %v886_v58 = vpop.f32.mrb[1].mxu0 }
  0xfa   :  { %v887_v59 = vadd.f32 %v886_v58, %v885_v56  ;;  %v924_v60 = vpop.f32.mrb[1].mxu1 }
  0xfb   :  { %v925_v61 = vadd.f32 %v924_v60, %v923_v57 }
  0xfc   :  { %v888_v63 = vpop.f32.mrb[2].mxu0 }
  0xfd   :  { %v333_v62 = vadd.f32 %v925_v61, %v887_v59  ;;  %v926_v0 = vpop.f32.mrb[2].mxu1  ;;  %v889_v1 = vpop.f32.mrb[3].mxu0 }
  0xfe   :  { %v890_v2 = vadd.f32 %v889_v1, %v888_v63  ;;  %v927_v3 = vpop.f32.mrb[3].mxu1 }
  0xff   :  { %v928_v4 = vadd.f32 %v927_v3, %v926_v0 }
 0x101   :  { %v338_v5 = vadd.f32 %v928_v4, %v890_v2 }
 0x118   :  { %v961_v6 = vpop.f32.mrb[4].mxu0 }
 0x119   :  { %v962_v7 = vpop.f32.mrb[5].mxu0  ;;  %v999_v8 = vpop.f32.mrb[4].mxu1 }
 0x11a   :  { %v963_v9 = vadd.f32 %v962_v7, %v961_v6  ;;  %v1000_v10 = vpop.f32.mrb[5].mxu1 }
 0x11b   :  { %v1001_v11 = vadd.f32 %v1000_v10, %v999_v8 }
 0x11c   :  { %v408_v12 = vadd.f32 %v963_v9, %v333_v62  ;;  %v964_v13 = vpop.f32.mrb[6].mxu0 }
 0x11d   :  { %v965_v14 = vpop.f32.mrb[7].mxu0  ;;  %v1002_v15 = vpop.f32.mrb[6].mxu1 }
 0x11e   :  { %v966_v16 = vadd.f32 %v965_v14, %v964_v13  ;;  %v1003_v17 = vpop.f32.mrb[7].mxu1  ;;  %v483_v18 = vadd.f32 %v1001_v11, %v408_v12 }
 0x11f   :  { %v1004_v19 = vadd.f32 %v1003_v17, %v1002_v15 }
 0x120   :  { %v413_v20 = vadd.f32 %v966_v16, %v338_v5 }
 0x122   :  { %v488_v21 = vadd.f32 %v1004_v19, %v413_v20 }
 0x129   :  { %v1834_v22 = vpop.f32.mrb[8].mxu1 }
 0x12a   :  { %v765_v23 = vmul.f32 %v1834_v22, %v1834_v22  ;;  %v1838_v24 = vpop.f32.mrb[9].mxu1  ;;  %v756_v25 = vmul.f32 0.0, %v1834_v22 }
 0x12b   :  { %v764_v26 = vmul.f32 %v1838_v24, %v1838_v24  ;;  %v775_v27 = vadd.f32 %v1834_v22, %v1838_v24 }
 0x12c   :  { %v757_v28 = vadd.f32 %v756_v25, %v1838_v24  ;;  %v767_v29 = vmul.f32 0.0, %v765_v23 }
 0x12d   :  { %v776_v30 = vrot.slane %v775_v27, 4  ;;  %v782_v31 = vadd.f32 %v765_v23, %v764_v26 }
 0x12e   :  { %v758_v32 = vrot.slane %v757_v28, 4  ;;  %v768_v33 = vadd.f32 %v767_v29, %v764_v26 }
 0x12f   :  { %v777_v34 = vadd.f32 %v776_v30, %v775_v27  ;;  %v783_v35 = vrot.slane %v782_v31, 4 }
 0x130   :  { %v759_v36 = vadd.f32 %v758_v32, %v757_v28  ;;  %v769_v37 = vrot.slane %v768_v33, 4 }
 0x131   :  { %v778_v38 = vrot.slane %v777_v34, 2  ;;  %v784_v39 = vadd.f32 %v783_v35, %v782_v31 }
 0x132   :  { %v760_v40 = vrot.slane %v759_v36, 2  ;;  %v770_v41 = vadd.f32 %v769_v37, %v768_v33 }
 0x133   :  { %v779_v42 = vadd.f32 %v778_v38, %v777_v34  ;;  %v785_v43 = vrot.slane %v784_v39, 2 }
 0x134   :  { %v761_v44 = vadd.f32 %v760_v40, %v759_v36  ;;  %v771_v45 = vrot.slane %v770_v41, 2 }
 0x135   :  { %v780_v46 = vrot.slane %v779_v42, 1  ;;  %v786_v47 = vadd.f32 %v785_v43, %v784_v39 }
 0x136   :  { %v762_v48 = vrot.slane %v761_v44, 1  ;;  %v772_v49 = vadd.f32 %v771_v45, %v770_v41 }
 0x137   :  { %v781_v50 = vadd.f32 %v780_v46, %v779_v42  ;;  %v787_v51 = vrot.slane %v786_v47, 1 }
 0x138   :  { %v763_v52 = vadd.f32 %v762_v48, %v761_v44  ;;  %v773_v53 = vrot.slane %v772_v49, 1  ;;  %v1067_v54 = vpop.f32.mrb[8].mxu0 }
 0x139   :  { %v788_v55 = vadd.f32 %v787_v51, %v786_v47  ;;  %v1846_v56 = vadd.f32 %v1067_v54, %v488_v21  ;;  %v557_v57 = vpop.f32.mrb[9].mxu0 }
 0x13a   :  { %v774_v58 = vadd.f32 %v773_v53, %v772_v49  ;;  %v789_v59 = vmul.f32 0.125, %v763_v52  ;;  %v790_v60 = vsub.f32 %v781_v50, %v763_v52  ;;  %v1848_v61 = vadd.f32 %v557_v57, %v483_v18 }
 0x13b   :  { %v578_v62 = vmul.f32 0.0, %v1846_v56  ;;  %v587_v63 = vmul.f32 %v1846_v56, %v1846_v56 }
 0x13c   :  { %v791_v0 = vmul.f32 0.125, %v790_v60  ;;  %v792_v1 = vmul.f32 0.125, %v774_v58  ;;  %v793_v2 = vmul.f32 %v789_v59, %v789_v59  ;;  %v795_v3 = vsub.f32 %v788_v55, %v774_v58 }
 0x13d   :  { %v800_v4 = vmul.f32 0.0, %v789_v59  ;;  %v589_v5 = vmul.f32 0.0, %v587_v63  ;;  %v579_v6 = vadd.f32 %v578_v62, %v1848_v61  ;;  %v586_v7 = vmul.f32 %v1848_v61, %v1848_v61 }
 0x13e   :  { %v794_v8 = vsub.f32 %v792_v1, %v793_v2  ;;  %v796_v9 = vmul.f32 0.125, %v795_v3  ;;  %v797_v10 = vmul.f32 %v791_v0, %v791_v0  ;;  %v801_v11 = vmul.f32 0.0, %v791_v0 }
 0x13f   :  { %v804_v12 = vadd.f32 %v800_v4, %v791_v0  ;;  %v580_v13 = vrot.slane %v579_v6, 4  ;;  %v590_v14 = vadd.f32 %v589_v5, %v586_v7  ;;  %v597_v15 = vadd.f32 %v1846_v56, %v1848_v61 }
 0x140   :  { %v798_v16 = vsub.f32 %v796_v9, %v797_v10  ;;  %v803_v17 = vadd.f32 %v801_v11, %v789_v59  ;;  %v806_v18 = vmul.f32 0.0, %v794_v8  ;;  %v604_v19 = vadd.f32 %v587_v63, %v586_v7 }
 0x141   :  { %v814_v20 = vsub.f32 %v1834_v22, %v804_v12  ;;  %v581_v21 = vadd.f32 %v580_v13, %v579_v6  ;;  %v591_v23 = vrot.slane %v590_v14, 4  ;;  %v598_v25 = vrot.slane %v597_v15, 4 }
 0x142   :  { %v807_v26 = vmul.f32 0.0, %v798_v16  ;;  %v810_v27 = vadd.f32 %v806_v18, %v798_v16  ;;  %v813_v28 = vsub.f32 %v1838_v24, %v803_v17  ;;  %v605_v29 = vrot.slane %v604_v19, 4  ;;  %v851_v18 = vld [vmem:[%s1884_s6] ss:$0 sm:$0xff] }
 0x143   :  { %v582_v30 = vrot.slane %v581_v21, 2  ;;  %v592_v31 = vadd.f32 %v591_v23, %v590_v14  ;;  %v599_v32 = vadd.f32 %v598_v25, %v597_v15  ;;  %v848_v25 = vld [vmem:[%s1887_s3] ss:$0 sm:$0xff] }
 0x144   :  { %v809_v33 = vadd.f32 %v807_v26, %v794_v8  ;;  %v812_v34 = vmax.f32 %v810_v27, 0.0  ;;  %v606_v35 = vadd.f32 %v605_v29, %v604_v19 }
 0x145   :  { %v583_v36 = vadd.f32 %v582_v30, %v581_v21  ;;  %v593_v37 = vrot.slane %v592_v31, 2  ;;  %v600_v38 = vrot.slane %v599_v32, 2 }
 0x146   :  { %v811_v39 = vmax.f32 %v809_v33, 0.0  ;;  %v816_v40 = vadd.f32 1e-05, %v812_v34  ;;  %v607_v22 = vrot.slane %v606_v35, 2 }
 0x147   :  { %v584_v41 = vrot.slane %v583_v36, 1  ;;  %v594_v42 = vadd.f32 %v593_v37, %v592_v31  ;;  %v601_v43 = vadd.f32 %v600_v38, %v599_v32 }
 0x148   :  { %v815_v44 = vadd.f32 1e-05, %v811_v39  ;;  %1263 = vrsqrt.f32 %v816_v40  ;;  %v608_v45 = vadd.f32 %v607_v22, %v606_v35 }
 0x149   :  { %v585_v24 = vadd.f32 %v584_v41, %v583_v36  ;;  %v595_v46 = vrot.slane %v594_v42, 1  ;;  %v602_v47 = vrot.slane %v601_v43, 1 }
 0x14a   :  { %1265 = vrsqrt.f32 %v815_v44  ;;  %v609_v48 = vrot.slane %v608_v45, 1 }
 0x14b   :  { %v596_v49 = vadd.f32 %v595_v46, %v594_v42  ;;  %v603_v50 = vadd.f32 %v602_v47, %v601_v43  ;;  %v611_v51 = vmul.f32 0.125, %v585_v24 }
 0x14c   :  { %v610_v52 = vadd.f32 %v609_v48, %v608_v45 }
 0x14d   :  { %v612_v53 = vsub.f32 %v603_v50, %v585_v24  ;;  %v614_v54 = vmul.f32 0.125, %v596_v49  ;;  %v615_v55 = vmul.f32 %v611_v51, %v611_v51  ;;  %v622_v57 = vmul.f32 0.0, %v611_v51 }
 0x14e   :  { %v617_v58 = vsub.f32 %v610_v52, %v596_v49 }
 0x14f   :  { %v613_v59 = vmul.f32 0.125, %v612_v53  ;;  %v616_v60 = vsub.f32 %v614_v54, %v615_v55 }
 0x150   :  { %v618_v62 = vmul.f32 0.125, %v617_v58 }
 0x151   :  { %v619_v63 = vmul.f32 %v613_v59, %v613_v59  ;;  %v625_v0 = vmul.f32 0.0, %v613_v59  ;;  %v628_v1 = vadd.f32 %v622_v57, %v613_v59  ;;  %v630_v2 = vmul.f32 0.0, %v616_v60 }
 0x152   :  { %v1264_v3 = vpop.eup %1263 }
 0x153   :  { %v820_v4 = vmul.f32 %v1264_v3, %v814_v20  ;;  %v620_v5 = vsub.f32 %v618_v62, %v619_v63  ;;  %v627_v6 = vadd.f32 %v625_v0, %v611_v51  ;;  %v638_v7 = vsub.f32 %v1846_v56, %v628_v1  ;;  %v847_v56 = vld [vmem:[%s1885_s2] ss:$0 sm:$0xff] }
 0x154   :  { %v1266_v8 = vpop.eup %1265 }
 0x155   :  { %v819_v9 = vmul.f32 %v1266_v8, %v813_v28  ;;  %v631_v10 = vmul.f32 0.0, %v620_v5  ;;  %v634_v11 = vadd.f32 %v630_v2, %v620_v5  ;;  %v637_v12 = vsub.f32 %v1848_v61, %v627_v6  ;;  %v852_v61 = vld [vmem:[%s1886_s7] ss:$0 sm:$0xff] }
 0x156   :  { %v828_v20 = vmul.f32 %v851_v18, %v820_v4 }
 0x157   :  { %v633_v13 = vadd.f32 %v631_v10, %v616_v60  ;;  %v636_v14 = vmax.f32 %v634_v11, 0.0  ;;  %v827_v26 = vmul.f32 %v851_v18, %v819_v9 }
 0x158   :  { %v836_v29 = vadd.f32 %v852_v61, %v828_v20 }
 0x159   :  { %v635_v15 = vmax.f32 %v633_v13, 0.0  ;;  %v640_v16 = vadd.f32 1e-05, %v636_v14  ;;  %v835_v32 = vadd.f32 %v852_v61, %v827_v26 }
 0x15b   :  { %v639_v17 = vadd.f32 1e-05, %v635_v15  ;;  %1267 = vrsqrt.f32 %v640_v16 }
 0x15d   :  { %1269 = vrsqrt.f32 %v639_v17 }
 0x165   :  { %v1268_v19 = vpop.eup %1267 }
 0x166   :  { %v644_v21 = vmul.f32 %v1268_v19, %v638_v7 }
 0x167   :  { %v1270_v23 = vpop.eup %1269 }
 0x168   :  { %v643_v27 = vmul.f32 %v1270_v23, %v637_v12  ;;  %v652_v28 = vmul.f32 %v847_v56, %v644_v21 }
 0x16a   :  { %v651_v30 = vmul.f32 %v847_v56, %v643_v27  ;;  %v660_v31 = vadd.f32 %v848_v25, %v652_v28 }
 0x16c   :  { %v659_v33 = vadd.f32 %v848_v25, %v651_v30  ;;  %v838_v34 = vadd.f32 %v836_v29, %v660_v31 }
 0x16e   :  { %v837_v35 = vadd.f32 %v835_v32, %v659_v33  ;;  %v840_v36 = vmax.f32 %v838_v34, 0.0 }
 0x170   :  { %v839_v37 = vmax.f32 %v837_v35, 0.0  ;;  %842 = vst [vmem:[%s1888_s8 + $0x8] sm:$0xff] %v840_v36 }
 0x172   :  { %841 = vst [vmem:[%s1888_s8] sm:$0xff] %v839_v37 }

// kernel: cdnet_forward.17
= control target key start
LH: loop header
LB: loop body
LE: loop exit
PB: predicated region body
PF: predicated region fallthrough
CT: control target
= control target key end

     0   :  { %s1565_s1 = inlined_call_operand.vmem [shape: f32[1152,128], index: 1, kind: input, shape index: {}]   ;;  %s1566_s0 = inlined_call_operand.vmem [shape: f32[16,1152], index: 0, kind: input, shape index: {}]   ;;  %s1567_s2 = inlined_call_operand.vmem [shape: f32[1,128], index: 2, kind: input, shape index: {}]   ;;  %s1568_s3 = inlined_call_operand.vmem [shape: f32[1,128], index: 3, kind: input, shape index: {}]   ;;  %s1569_s4 = inlined_call_operand.vmem [shape: f32[16,128], index: 4, kind: output, shape index: {}]  }
   0x1   :  { %v51_v0 = vld [vmem:[%s1565_s1 + $0x80] sm:$0xff]  ;;  %v52_v1 = vld [vmem:[%s1565_s1 + $0x88] sm:$0xff]  ;;  %v53_v11 = vld [vmem:[%s1565_s1 + $0x90] sm:$0xff] }
   0x2   :  { %v83_v2 = vld [vmem:[%s1565_s1 + $0x180] sm:$0xff]  ;;  %v864_v3 = vpack.c.bf16 %v52_v1, %v51_v0  ;;  %v84_v4 = vld [vmem:[%s1565_s1 + $0x188] sm:$0xff]  ;;  %v54_v13 = vld [vmem:[%s1565_s1 + $0x98] sm:$0xff] }
   0x3   :  { %v35_v5 = vld [vmem:[%s1565_s1] sm:$0xff]  ;;  %v36_v6 = vld [vmem:[%s1565_s1 + $0x8] sm:$0xff]  ;;  %v896_v7 = vpack.c.bf16 %v84_v4, %v83_v2  ;;  %v85_v14 = vld [vmem:[%s1565_s1 + $0x190] sm:$0xff]  ;;  %v868_v16 = vpack.c.bf16 %v54_v13, %v53_v11 }
   0x4   :  { %v866_v8 = vpack.c.bf16 %v36_v6, %v35_v5  ;;  %v67_v9 = vld [vmem:[%s1565_s1 + $0x100] sm:$0xff]  ;;  %v68_v10 = vld [vmem:[%s1565_s1 + $0x108] sm:$0xff]  ;;  %865 = vmatprep.subr.bf16.mxu0 %v864_v3  ;;  %v86_v15 = vld [vmem:[%s1565_s1 + $0x198] sm:$0xff] }
   0x5   :  { %v898_v12 = vpack.c.bf16 %v68_v10, %v67_v9  ;;  %897 = vmatprep.subr.bf16.mxu1 %v896_v7  ;;  %v900_v17 = vpack.c.bf16 %v86_v15, %v85_v14  ;;  %v37_v18 = vld [vmem:[%s1565_s1 + $0x10] sm:$0xff]  ;;  %v38_v19 = vld [vmem:[%s1565_s1 + $0x18] sm:$0xff]  ;;  %v55_v23 = vld [vmem:[%s1565_s1 + $0xa0] sm:$0xff] }
   0x6   :  { %867 = vmatpush3.bf16.msra.mxu0 %v866_v8  ;;  %v69_v20 = vld [vmem:[%s1565_s1 + $0x110] sm:$0xff]  ;;  %v870_v21 = vpack.c.bf16 %v38_v19, %v37_v18  ;;  %v70_v22 = vld [vmem:[%s1565_s1 + $0x118] sm:$0xff]  ;;  %v56_v24 = vld [vmem:[%s1565_s1 + $0xa8] sm:$0xff] }
   0x7   :  { %899 = vmatpush3.bf16.msra.mxu1 %v898_v12  ;;  %869 = vmatprep.subr.bf16.mxu0 %v868_v16  ;;  %v902_v25 = vpack.c.bf16 %v70_v22, %v69_v20  ;;  %v872_v26 = vpack.c.bf16 %v56_v24, %v55_v23  ;;  %v87_v27 = vld [vmem:[%s1565_s1 + $0x1a0] sm:$0xff]  ;;  %v88_v28 = vld [vmem:[%s1565_s1 + $0x1a8] sm:$0xff]  ;;  %v57_v35 = vld [vmem:[%s1565_s1 + $0xb0] sm:$0xff] }
   0x8   :  { %901 = vmatprep.subr.bf16.mxu1 %v900_v17  ;;  %v39_v29 = vld [vmem:[%s1565_s1 + $0x20] sm:$0xff]  ;;  %v904_v30 = vpack.c.bf16 %v88_v28, %v87_v27  ;;  %v40_v31 = vld [vmem:[%s1565_s1 + $0x28] sm:$0xff]  ;;  %v58_v36 = vld [vmem:[%s1565_s1 + $0xb8] sm:$0xff] }
   0x9   :  { %v71_v32 = vld [vmem:[%s1565_s1 + $0x120] sm:$0xff]  ;;  %v72_v33 = vld [vmem:[%s1565_s1 + $0x128] sm:$0xff]  ;;  %v874_v34 = vpack.c.bf16 %v40_v31, %v39_v29  ;;  %v89_v37 = vld [vmem:[%s1565_s1 + $0x1b0] sm:$0xff]  ;;  %v876_v39 = vpack.c.bf16 %v58_v36, %v57_v35 }
   0xa   :  { %871 = vmatpush3.bf16.msra.mxu0 %v870_v21  ;;  %v906_v38 = vpack.c.bf16 %v72_v33, %v71_v32  ;;  %v90_v40 = vld [vmem:[%s1565_s1 + $0x1b8] sm:$0xff]  ;;  %v41_v41 = vld [vmem:[%s1565_s1 + $0x30] sm:$0xff]  ;;  %v59_v46 = vld [vmem:[%s1565_s1 + $0xc0] sm:$0xff] }
   0xb   :  { %903 = vmatpush3.bf16.msra.mxu1 %v902_v25  ;;  %873 = vmatprep.subr.bf16.mxu0 %v872_v26  ;;  %v42_v42 = vld [vmem:[%s1565_s1 + $0x38] sm:$0xff]  ;;  %v908_v43 = vpack.c.bf16 %v90_v40, %v89_v37  ;;  %v73_v44 = vld [vmem:[%s1565_s1 + $0x130] sm:$0xff]  ;;  %v60_v47 = vld [vmem:[%s1565_s1 + $0xc8] sm:$0xff] }
   0xc   :  { %905 = vmatprep.subr.bf16.mxu1 %v904_v30  ;;  %v74_v45 = vld [vmem:[%s1565_s1 + $0x138] sm:$0xff]  ;;  %v91_v48 = vld [vmem:[%s1565_s1 + $0x1c0] sm:$0xff]  ;;  %v92_v49 = vld [vmem:[%s1565_s1 + $0x1c8] sm:$0xff]  ;;  %v878_v50 = vpack.c.bf16 %v42_v42, %v41_v41  ;;  %v880_v52 = vpack.c.bf16 %v60_v47, %v59_v46 }
   0xd   :  { %v910_v51 = vpack.c.bf16 %v74_v45, %v73_v44  ;;  %v43_v53 = vld [vmem:[%s1565_s1 + $0x40] sm:$0xff]  ;;  %v44_v54 = vld [vmem:[%s1565_s1 + $0x48] sm:$0xff]  ;;  %v912_v56 = vpack.c.bf16 %v92_v49, %v91_v48  ;;  %v61_v58 = vld [vmem:[%s1565_s1 + $0xd0] sm:$0xff] }
   0xe   :  { %875 = vmatpush3.bf16.msra.mxu0 %v874_v34  ;;  %v75_v55 = vld [vmem:[%s1565_s1 + $0x140] sm:$0xff]  ;;  %v76_v57 = vld [vmem:[%s1565_s1 + $0x148] sm:$0xff]  ;;  %v62_v59 = vld [vmem:[%s1565_s1 + $0xd8] sm:$0xff]  ;;  %v882_v62 = vpack.c.bf16 %v44_v54, %v43_v53 }
   0xf   :  { %907 = vmatpush3.bf16.msra.mxu1 %v906_v38  ;;  %877 = vmatprep.subr.bf16.mxu0 %v876_v39  ;;  %v93_v60 = vld [vmem:[%s1565_s1 + $0x1d0] sm:$0xff]  ;;  %v94_v61 = vld [vmem:[%s1565_s1 + $0x1d8] sm:$0xff]  ;;  %v914_v63 = vpack.c.bf16 %v76_v57, %v75_v55  ;;  %v884_v0 = vpack.c.bf16 %v62_v59, %v61_v58  ;;  %v63_v6 = vld [vmem:[%s1565_s1 + $0xe0] sm:$0xff] }
  0x10   :  { %909 = vmatprep.subr.bf16.mxu1 %v908_v43  ;;  %v45_v1 = vld [vmem:[%s1565_s1 + $0x50] sm:$0xff]  ;;  %v46_v2 = vld [vmem:[%s1565_s1 + $0x58] sm:$0xff]  ;;  %v916_v4 = vpack.c.bf16 %v94_v61, %v93_v60  ;;  %v64_v7 = vld [vmem:[%s1565_s1 + $0xe8] sm:$0xff] }
  0x11   :  { %v77_v3 = vld [vmem:[%s1565_s1 + $0x150] sm:$0xff]  ;;  %v78_v5 = vld [vmem:[%s1565_s1 + $0x158] sm:$0xff]  ;;  %v95_v8 = vld [vmem:[%s1565_s1 + $0x1e0] sm:$0xff]  ;;  %v886_v10 = vpack.c.bf16 %v46_v2, %v45_v1  ;;  %v888_v14 = vpack.c.bf16 %v64_v7, %v63_v6 }
  0x12   :  { %879 = vmatpush3.bf16.msra.mxu0 %v878_v50  ;;  %v96_v9 = vld [vmem:[%s1565_s1 + $0x1e8] sm:$0xff]  ;;  %v47_v11 = vld [vmem:[%s1565_s1 + $0x60] sm:$0xff]  ;;  %v918_v13 = vpack.c.bf16 %v78_v5, %v77_v3  ;;  %v20_v17 = vld [vmem:[%s1566_s0 + $0x18] sm:$0xff] }
  0x13   :  { %911 = vmatpush3.bf16.msra.mxu1 %v910_v51  ;;  %881 = vmatprep.subr.bf16.mxu0 %v880_v52  ;;  %v48_v12 = vld [vmem:[%s1565_s1 + $0x68] sm:$0xff]  ;;  %v79_v15 = vld [vmem:[%s1565_s1 + $0x160] sm:$0xff]  ;;  %v920_v18 = vpack.c.bf16 %v96_v9, %v95_v8  ;;  %v65_v20 = vld [vmem:[%s1565_s1 + $0xf0] sm:$0xff] }
  0x14   :  { %913 = vmatprep.subr.bf16.mxu1 %v912_v56  ;;  %v18_v16 = vld [vmem:[%s1566_s0 + $0x8] sm:$0xff]  ;;  %v66_v21 = vld [vmem:[%s1565_s1 + $0xf8] sm:$0xff]  ;;  %v97_v22 = vld [vmem:[%s1565_s1 + $0x1f0] sm:$0xff]  ;;  %318 = vmatprep.mubr.f32.mxu1 %v20_v17  ;;  %v890_v24 = vpack.c.bf16 %v48_v12, %v47_v11 }
  0x15   :  { %v80_v19 = vld [vmem:[%s1565_s1 + $0x168] sm:$0xff]  ;;  %243 = vmatprep.mubr.f32.mxu0 %v18_v16  ;;  %v98_v23 = vld [vmem:[%s1565_s1 + $0x1f8] sm:$0xff]  ;;  %v892_v26 = vpack.c.bf16 %v66_v21, %v65_v20  ;;  %v49_v27 = vld [vmem:[%s1565_s1 + $0x70] sm:$0xff] }
  0x16   :  { %883 = vmatpush3.bf16.msra.mxu0 %v882_v62  ;;  %v922_v25 = vpack.c.bf16 %v80_v19, %v79_v15  ;;  %v50_v28 = vld [vmem:[%s1565_s1 + $0x78] sm:$0xff]  ;;  %v81_v29 = vld [vmem:[%s1565_s1 + $0x170] sm:$0xff]  ;;  %v924_v30 = vpack.c.bf16 %v98_v23, %v97_v22  ;;  %v115_v32 = vld [vmem:[%s1565_s1 + $0x280] sm:$0xff] }
  0x17   :  { %915 = vmatpush3.bf16.msra.mxu1 %v914_v63  ;;  %885 = vmatprep.subr.bf16.mxu0 %v884_v0  ;;  %v82_v31 = vld [vmem:[%s1565_s1 + $0x178] sm:$0xff]  ;;  %v116_v33 = vld [vmem:[%s1565_s1 + $0x288] sm:$0xff]  ;;  %v147_v34 = vld [vmem:[%s1565_s1 + $0x380] sm:$0xff]  ;;  %v894_v36 = vpack.c.bf16 %v50_v28, %v49_v27 }
  0x18   :  { %917 = vmatprep.subr.bf16.mxu1 %v916_v4  ;;  %v148_v35 = vld [vmem:[%s1565_s1 + $0x388] sm:$0xff]  ;;  %v926_v37 = vpack.c.bf16 %v82_v31, %v81_v29  ;;  %v928_v38 = vpack.c.bf16 %v116_v33, %v115_v32  ;;  %v99_v39 = vld [vmem:[%s1565_s1 + $0x200] sm:$0xff]  ;;  %v117_v44 = vld [vmem:[%s1565_s1 + $0x290] sm:$0xff] }
  0x19   :  { %v100_v40 = vld [vmem:[%s1565_s1 + $0x208] sm:$0xff]  ;;  %v131_v41 = vld [vmem:[%s1565_s1 + $0x300] sm:$0xff]  ;;  %v960_v42 = vpack.c.bf16 %v148_v35, %v147_v34  ;;  %v118_v45 = vld [vmem:[%s1565_s1 + $0x298] sm:$0xff] }
  0x1a   :  { %887 = vmatpush3.bf16.msra.mxu0 %v886_v10  ;;  %v132_v43 = vld [vmem:[%s1565_s1 + $0x308] sm:$0xff]  ;;  %v149_v46 = vld [vmem:[%s1565_s1 + $0x390] sm:$0xff]  ;;  %v150_v47 = vld [vmem:[%s1565_s1 + $0x398] sm:$0xff]  ;;  %v930_v50 = vpack.c.bf16 %v100_v40, %v99_v39  ;;  %v932_v52 = vpack.c.bf16 %v118_v45, %v117_v44 }
  0x1b   :  { %919 = vmatpush3.bf16.msra.mxu1 %v918_v13  ;;  %889 = vmatprep.subr.bf16.mxu0 %v888_v14  ;;  %v17_v48 = vld [vmem:[%s1566_s0] sm:$0xff]  ;;  %v19_v49 = vld [vmem:[%s1566_s0 + $0x10] sm:$0xff]  ;;  %v962_v51 = vpack.c.bf16 %v132_v43, %v131_v41  ;;  %v102_v54 = vld [vmem:[%s1565_s1 + $0x218] sm:$0xff]  ;;  %v964_v56 = vpack.c.bf16 %v150_v47, %v149_v46 }
  0x1c   :  { %921 = vmatprep.subr.bf16.mxu1 %v920_v18  ;;  %v101_v53 = vld [vmem:[%s1565_s1 + $0x210] sm:$0xff]  ;;  %v134_v57 = vld [vmem:[%s1565_s1 + $0x318] sm:$0xff]  ;;  %v119_v58 = vld [vmem:[%s1565_s1 + $0x2a0] sm:$0xff] }
  0x1d   :  { %v133_v55 = vld [vmem:[%s1565_s1 + $0x310] sm:$0xff]  ;;  %v120_v59 = vld [vmem:[%s1565_s1 + $0x2a8] sm:$0xff]  ;;  %v151_v60 = vld [vmem:[%s1565_s1 + $0x3a0] sm:$0xff]  ;;  %v934_v62 = vpack.c.bf16 %v102_v54, %v101_v53 }
  0x1e   :  { %891 = vmatpush3.bf16.msra.mxu0 %v890_v24  ;;  %v152_v61 = vld [vmem:[%s1565_s1 + $0x3a8] sm:$0xff]  ;;  %v966_v63 = vpack.c.bf16 %v134_v57, %v133_v55  ;;  %v936_v0 = vpack.c.bf16 %v120_v59, %v119_v58  ;;  %v103_v1 = vld [vmem:[%s1565_s1 + $0x220] sm:$0xff]  ;;  %v121_v6 = vld [vmem:[%s1565_s1 + $0x2b0] sm:$0xff] }
  0x1f   :  { %923 = vmatpush3.bf16.msra.mxu1 %v922_v25  ;;  %893 = vmatprep.subr.bf16.mxu0 %v892_v26  ;;  %v104_v2 = vld [vmem:[%s1565_s1 + $0x228] sm:$0xff]  ;;  %v135_v3 = vld [vmem:[%s1565_s1 + $0x320] sm:$0xff]  ;;  %v968_v4 = vpack.c.bf16 %v152_v61, %v151_v60  ;;  %v122_v7 = vld [vmem:[%s1565_s1 + $0x2b8] sm:$0xff] }
  0x20   :  { %925 = vmatprep.subr.bf16.mxu1 %v924_v30  ;;  %v136_v5 = vld [vmem:[%s1565_s1 + $0x328] sm:$0xff]  ;;  %v105_v8 = vld [vmem:[%s1565_s1 + $0x230] sm:$0xff]  ;;  %v154_v10 = vld [vmem:[%s1565_s1 + $0x3b8] sm:$0xff]  ;;  %v938_v11 = vpack.c.bf16 %v104_v2, %v103_v1  ;;  %v940_v16 = vpack.c.bf16 %v122_v7, %v121_v6 }
  0x21   :  { %v153_v9 = vld [vmem:[%s1565_s1 + $0x3b0] sm:$0xff]  ;;  %v106_v12 = vld [vmem:[%s1565_s1 + $0x238] sm:$0xff]  ;;  %v970_v15 = vpack.c.bf16 %v136_v5, %v135_v3  ;;  %v123_v18 = vld [vmem:[%s1565_s1 + $0x2c0] sm:$0xff] }
  0x22   :  { %895 = vmatpush3.bf16.msra.mxu0 %v894_v36  ;;  %v137_v13 = vld [vmem:[%s1565_s1 + $0x330] sm:$0xff]  ;;  %v138_v17 = vld [vmem:[%s1565_s1 + $0x338] sm:$0xff]  ;;  %v29_v19 = vld [vmem:[%s1566_s0 + $0x60] sm:$0xff]  ;;  %v972_v20 = vpack.c.bf16 %v154_v10, %v153_v9  ;;  %v942_v26 = vpack.c.bf16 %v106_v12, %v105_v8 }
  0x23   :  { %927 = vmatpush3.bf16.msra.mxu1 %v926_v37  ;;  %929 = vmatprep.subr.bf16.mxu0 %v928_v38  ;;  %v27_v14 = vld [vmem:[%s1566_s0 + $0x50] sm:$0xff]  ;;  %v124_v21 = vld [vmem:[%s1565_s1 + $0x2c8] sm:$0xff]  ;;  %v28_v23 = vld [vmem:[%s1566_s0 + $0x58] sm:$0xff]  ;;  %v974_v29 = vpack.c.bf16 %v138_v17, %v137_v13 }
  0x24   :  { %961 = vmatprep.subr.bf16.mxu1 %v960_v42  ;;  %v26_v22 = vld [vmem:[%s1566_s0 + $0x48] sm:$0xff]  ;;  %v155_v24 = vld [vmem:[%s1565_s1 + $0x3c0] sm:$0xff]  ;;  %v944_v30 = vpack.c.bf16 %v124_v21, %v123_v18  ;;  %v125_v35 = vld [vmem:[%s1565_s1 + $0x2d0] sm:$0xff] }
  0x25   :  { %244 = vmatmul.mubr.f32.vlgmr.msra.gmra.mrb[0].mxu0 %v17_v48  ;;  %v156_v25 = vld [vmem:[%s1565_s1 + $0x3c8] sm:$0xff]  ;;  %v107_v27 = vld [vmem:[%s1565_s1 + $0x240] sm:$0xff]  ;;  %v126_v36 = vld [vmem:[%s1565_s1 + $0x2d8] sm:$0xff] }
  0x26   :  { %319 = vmatmul.mubr.f32.vlgmr.msra.gmra.mrb[0].mxu1 %v19_v49  ;;  %931 = vmatpush3.bf16.msra.mxu0 %v930_v50  ;;  %v22_v28 = vld [vmem:[%s1566_s0 + $0x28] sm:$0xff]  ;;  %v139_v32 = vld [vmem:[%s1565_s1 + $0x340] sm:$0xff]  ;;  %v976_v34 = vpack.c.bf16 %v156_v25, %v155_v24  ;;  %v24_v37 = vld [vmem:[%s1566_s0 + $0x38] sm:$0xff]  ;;  %v948_v42 = vpack.c.bf16 %v126_v36, %v125_v35 }
  0x27   :  { %963 = vmatpush3.bf16.msra.mxu1 %v962_v51  ;;  %933 = vmatprep.subr.bf16.mxu0 %v932_v52  ;;  %v108_v31 = vld [vmem:[%s1565_s1 + $0x248] sm:$0xff]  ;;  %v157_v38 = vld [vmem:[%s1565_s1 + $0x3d0] sm:$0xff]  ;;  %v158_v39 = vld [vmem:[%s1565_s1 + $0x3d8] sm:$0xff] }
  0x28   :  { %965 = vmatprep.subr.bf16.mxu1 %v964_v56  ;;  %248 = vmatprep.mubr.f32.mxu0 %v27_v14  ;;  %v140_v33 = vld [vmem:[%s1565_s1 + $0x348] sm:$0xff]  ;;  %v946_v40 = vpack.c.bf16 %v108_v31, %v107_v27  ;;  %v109_v43 = vld [vmem:[%s1565_s1 + $0x250] sm:$0xff]  ;;  %v110_v44 = vld [vmem:[%s1565_s1 + $0x258] sm:$0xff]  ;;  %v980_v46 = vpack.c.bf16 %v158_v39, %v157_v38 }
  0x29   :  { %323 = vmatprep.mubr.f32.mxu1 %v29_v19  ;;  %249 = vmatmul.mubr.f32.gmra.mrb[2].mxu0 %v26_v22  ;;  %v978_v41 = vpack.c.bf16 %v140_v33, %v139_v32  ;;  %v141_v45 = vld [vmem:[%s1565_s1 + $0x350] sm:$0xff]  ;;  %v142_v47 = vld [vmem:[%s1565_s1 + $0x358] sm:$0xff]  ;;  %v127_v48 = vld [vmem:[%s1565_s1 + $0x2e0] sm:$0xff]  ;;  %v950_v52 = vpack.c.bf16 %v110_v44, %v109_v43 }
  0x2a   :  { %935 = vmatpush3.bf16.msra.mxu0 %v934_v62  ;;  %324 = vmatmul.mubr.f32.gmra.mrb[2].mxu1 %v28_v23  ;;  %v128_v49 = vld [vmem:[%s1565_s1 + $0x2e8] sm:$0xff]  ;;  %v159_v50 = vld [vmem:[%s1565_s1 + $0x3e0] sm:$0xff]  ;;  %v982_v53 = vpack.c.bf16 %v142_v47, %v141_v45  ;;  %v129_v60 = vld [vmem:[%s1565_s1 + $0x2f0] sm:$0xff] }
  0x2b   :  { %967 = vmatpush3.bf16.msra.mxu1 %v966_v63  ;;  %937 = vmatprep.subr.bf16.mxu0 %v936_v0  ;;  %v160_v51 = vld [vmem:[%s1565_s1 + $0x3e8] sm:$0xff]  ;;  %v952_v54 = vpack.c.bf16 %v128_v49, %v127_v48  ;;  %v111_v55 = vld [vmem:[%s1565_s1 + $0x260] sm:$0xff]  ;;  %v130_v61 = vld [vmem:[%s1565_s1 + $0x2f8] sm:$0xff] }
  0x2c   :  { %969 = vmatprep.subr.bf16.mxu1 %v968_v4  ;;  %393 = vmatprep.mubr.f32.mxu0 %v22_v28  ;;  %v112_v56 = vld [vmem:[%s1565_s1 + $0x268] sm:$0xff]  ;;  %v143_v57 = vld [vmem:[%s1565_s1 + $0x360] sm:$0xff]  ;;  %v984_v58 = vpack.c.bf16 %v160_v51, %v159_v50  ;;  %v161_v62 = vld [vmem:[%s1565_s1 + $0x3f0] sm:$0xff]  ;;  %v956_v2 = vpack.c.bf16 %v130_v61, %v129_v60 }
  0x2d   :  { %468 = vmatprep.mubr.f32.mxu1 %v24_v37  ;;  %v144_v59 = vld [vmem:[%s1565_s1 + $0x368] sm:$0xff]  ;;  %v162_v63 = vld [vmem:[%s1565_s1 + $0x3f8] sm:$0xff]  ;;  %v954_v0 = vpack.c.bf16 %v112_v56, %v111_v55  ;;  %v113_v3 = vld [vmem:[%s1565_s1 + $0x270] sm:$0xff] }
  0x2e   :  { %939 = vmatpush3.bf16.msra.mxu0 %v938_v11  ;;  %v986_v1 = vpack.c.bf16 %v144_v59, %v143_v57  ;;  %v114_v4 = vld [vmem:[%s1565_s1 + $0x278] sm:$0xff]  ;;  %v145_v5 = vld [vmem:[%s1565_s1 + $0x370] sm:$0xff]  ;;  %v988_v6 = vpack.c.bf16 %v162_v63, %v161_v62  ;;  %v163_v8 = vld [vmem:[%s1565_s1 + $0x400] sm:$0xff] }
  0x2f   :  { %971 = vmatpush3.bf16.msra.mxu1 %v970_v15  ;;  %941 = vmatprep.subr.bf16.mxu0 %v940_v16  ;;  %v146_v7 = vld [vmem:[%s1565_s1 + $0x378] sm:$0xff]  ;;  %v164_v9 = vld [vmem:[%s1565_s1 + $0x408] sm:$0xff]  ;;  %v958_v10 = vpack.c.bf16 %v114_v4, %v113_v3  ;;  %v165_v13 = vld [vmem:[%s1565_s1 + $0x410] sm:$0xff] }
  0x30   :  { %973 = vmatprep.subr.bf16.mxu1 %v972_v20  ;;  %v990_v11 = vpack.c.bf16 %v146_v7, %v145_v5  ;;  %v992_v12 = vpack.c.bf16 %v164_v9, %v163_v8  ;;  %v166_v14 = vld [vmem:[%s1565_s1 + $0x418] sm:$0xff]  ;;  %v21_v15 = vld [vmem:[%s1566_s0 + $0x20] sm:$0xff]  ;;  %v23_v16 = vld [vmem:[%s1566_s0 + $0x30] sm:$0xff] }
  0x31   :  { %v996_v17 = vpack.c.bf16 %v166_v14, %v165_v13  ;;  %v31_v18 = vld [vmem:[%s1566_s0 + $0x70] sm:$0xff]  ;;  %v167_v19 = vld [vmem:[%s1565_s1 + $0x420] sm:$0xff]  ;;  %v168_v20 = vld [vmem:[%s1565_s1 + $0x428] sm:$0xff] }
  0x32   :  { %943 = vmatpush3.bf16.msra.mxu0 %v942_v26  ;;  %v33_v21 = vld [vmem:[%s1566_s0 + $0x80] sm:$0xff]  ;;  %v30_v22 = vld [vmem:[%s1566_s0 + $0x68] sm:$0xff]  ;;  %v32_v23 = vld [vmem:[%s1566_s0 + $0x78] sm:$0xff]  ;;  %v1000_v24 = vpack.c.bf16 %v168_v20, %v167_v19 }
  0x33   :  { %975 = vmatpush3.bf16.msra.mxu1 %v974_v29  ;;  %945 = vmatprep.subr.bf16.mxu0 %v944_v30  ;;  %v169_v25 = vld [vmem:[%s1565_s1 + $0x430] sm:$0xff]  ;;  %v170_v26 = vld [vmem:[%s1565_s1 + $0x438] sm:$0xff]  ;;  %v25_v27 = vld [vmem:[%s1566_s0 + $0x40] sm:$0xff] }
  0x34   :  { %977 = vmatprep.subr.bf16.mxu1 %v976_v34  ;;  %v1004_v28 = vpack.c.bf16 %v170_v26, %v169_v25  ;;  %v171_v29 = vld [vmem:[%s1565_s1 + $0x440] sm:$0xff]  ;;  %v172_v30 = vld [vmem:[%s1565_s1 + $0x448] sm:$0xff]  ;;  %v173_v32 = vld [vmem:[%s1565_s1 + $0x450] sm:$0xff] }
  0x35   :  { %v1008_v31 = vpack.c.bf16 %v172_v30, %v171_v29  ;;  %v174_v33 = vld [vmem:[%s1565_s1 + $0x458] sm:$0xff]  ;;  %v175_v35 = vld [vmem:[%s1565_s1 + $0x460] sm:$0xff]  ;;  %v176_v36 = vld [vmem:[%s1565_s1 + $0x468] sm:$0xff] }
  0x36   :  { %947 = vmatpush3.bf16.msra.mxu0 %v946_v40  ;;  %v1012_v34 = vpack.c.bf16 %v174_v33, %v173_v32  ;;  %v1016_v37 = vpack.c.bf16 %v176_v36, %v175_v35  ;;  %v177_v38 = vld [vmem:[%s1565_s1 + $0x470] sm:$0xff]  ;;  %v178_v39 = vld [vmem:[%s1565_s1 + $0x478] sm:$0xff] }
  0x37   :  { %979 = vmatpush3.bf16.msra.mxu1 %v978_v41  ;;  %949 = vmatprep.subr.bf16.mxu0 %v948_v42  ;;  %v1020_v40 = vpack.c.bf16 %v178_v39, %v177_v38  ;;  %v34_v41 = vld [vmem:[%s1566_s0 + $0x88] sm:$0xff] }
  0x38   :  { %981 = vmatprep.subr.bf16.mxu1 %v980_v46 }
  0x3a   :  { %951 = vmatpush3.bf16.msra.mxu0 %v950_v52 }
  0x3b   :  { %983 = vmatpush3.bf16.msra.mxu1 %v982_v53  ;;  %953 = vmatprep.subr.bf16.mxu0 %v952_v54 }
  0x3c   :  { %985 = vmatprep.subr.bf16.mxu1 %v984_v58 }
  0x3e   :  { %955 = vmatpush3.bf16.msra.mxu0 %v954_v0 }
  0x3f   :  { %987 = vmatpush3.bf16.msra.mxu1 %v986_v1  ;;  %957 = vmatprep.subr.bf16.mxu0 %v956_v2 }
  0x40   :  { %989 = vmatprep.subr.bf16.mxu1 %v988_v6 }
  0x42   :  { %959 = vmatpush3.bf16.msra.mxu0 %v958_v10 }
  0x43   :  { %991 = vmatpush3.bf16.msra.mxu1 %v990_v11  ;;  %993 = vmatprep.subr.bf16.mxu0 %v992_v12 }
  0x45   :  { %394 = vmatmul.mubr.f32.vlgmr.msra.gmra.mrb[4].mxu0 %v21_v15 }
  0x46   :  { %995 = vmatpush3.bf16.msra.mxu0 %v992_v12  ;;  %469 = vmatmul.mubr.f32.vlgmr.msra.gmra.mrb[4].mxu1 %v23_v16 }
  0x47   :  { %398 = vmatprep.mubr.f32.mxu0 %v31_v18  ;;  %997 = vmatprep.subr.bf16.mxu0 %v996_v17 }
  0x48   :  { %473 = vmatprep.mubr.f32.mxu1 %v33_v21 }
  0x49   :  { %399 = vmatmul.mubr.f32.gmra.mrb[6].mxu0 %v30_v22 }
  0x4a   :  { %999 = vmatpush3.bf16.msra.mxu0 %v996_v17  ;;  %474 = vmatmul.mubr.f32.gmra.mrb[6].mxu1 %v32_v23 }
  0x4b   :  { %1001 = vmatprep.subr.bf16.mxu0 %v1000_v24  ;;  %861 = vmatprep.mubr.f32.mxu0 %v25_v27 }
  0x4e   :  { %1003 = vmatpush3.bf16.msra.mxu0 %v1000_v24 }
  0x4f   :  { %1005 = vmatprep.subr.bf16.mxu0 %v1004_v28 }
  0x52   :  { %1007 = vmatpush3.bf16.msra.mxu0 %v1004_v28 }
  0x53   :  { %1009 = vmatprep.subr.bf16.mxu0 %v1008_v31 }
  0x56   :  { %1011 = vmatpush3.bf16.msra.mxu0 %v1008_v31 }
  0x57   :  { %1013 = vmatprep.subr.bf16.mxu0 %v1012_v34 }
  0x5a   :  { %1015 = vmatpush3.bf16.msra.mxu0 %v1012_v34 }
  0x5b   :  { %1017 = vmatprep.subr.bf16.mxu0 %v1016_v37 }
  0x5e   :  { %1019 = vmatpush3.bf16.msra.mxu0 %v1016_v37 }
  0x5f   :  { %1021 = vmatprep.subr.bf16.mxu0 %v1020_v40 }
  0x62   :  { %1023 = vmatpush3.bf16.msra.mxu0 %v1020_v40 }
  0x65   :  { %862 = vmatmul.mubr.f32.vlgmr.msra.gmra.mrb[8].mxu0 %v34_v41 }
  0xf8   :  { %v691_v42 = vpop.f32.mrb[0].mxu0 }
  0xf9   :  { %v729_v43 = vpop.f32.mrb[0].mxu1  ;;  %v692_v44 = vpop.f32.mrb[1].mxu0 }
  0xfa   :  { %v693_v45 = vadd.f32 %v692_v44, %v691_v42  ;;  %v730_v46 = vpop.f32.mrb[1].mxu1 }
  0xfb   :  { %v731_v47 = vadd.f32 %v730_v46, %v729_v43 }
  0xfc   :  { %v694_v49 = vpop.f32.mrb[2].mxu0 }
  0xfd   :  { %v321_v48 = vadd.f32 %v731_v47, %v693_v45  ;;  %v732_v50 = vpop.f32.mrb[2].mxu1  ;;  %v695_v51 = vpop.f32.mrb[3].mxu0 }
  0xfe   :  { %v696_v52 = vadd.f32 %v695_v51, %v694_v49  ;;  %v733_v53 = vpop.f32.mrb[3].mxu1 }
  0xff   :  { %v734_v54 = vadd.f32 %v733_v53, %v732_v50 }
 0x101   :  { %v326_v55 = vadd.f32 %v734_v54, %v696_v52 }
 0x118   :  { %v767_v56 = vpop.f32.mrb[4].mxu0 }
 0x119   :  { %v768_v57 = vpop.f32.mrb[5].mxu0  ;;  %v805_v58 = vpop.f32.mrb[4].mxu1 }
 0x11a   :  { %v769_v59 = vadd.f32 %v768_v57, %v767_v56  ;;  %v806_v60 = vpop.f32.mrb[5].mxu1 }
 0x11b   :  { %v807_v61 = vadd.f32 %v806_v60, %v805_v58 }
 0x11c   :  { %v396_v62 = vadd.f32 %v769_v59, %v321_v48  ;;  %v770_v63 = vpop.f32.mrb[6].mxu0 }
 0x11d   :  { %v771_v0 = vpop.f32.mrb[7].mxu0  ;;  %v808_v1 = vpop.f32.mrb[6].mxu1 }
 0x11e   :  { %v772_v2 = vadd.f32 %v771_v0, %v770_v63  ;;  %v809_v3 = vpop.f32.mrb[7].mxu1  ;;  %v471_v4 = vadd.f32 %v807_v61, %v396_v62 }
 0x11f   :  { %v810_v5 = vadd.f32 %v809_v3, %v808_v1 }
 0x120   :  { %v401_v6 = vadd.f32 %v772_v2, %v326_v55 }
 0x122   :  { %v476_v7 = vadd.f32 %v810_v5, %v401_v6  ;;  %v657_v5 = vld [vmem:[%s1567_s2] ss:$0 sm:$0xff] }
 0x138   :  { %v863_v8 = vpop.f32.mrb[8].mxu0 }
 0x139   :  { %v1539_v9 = vadd.f32 %v863_v8, %v476_v7  ;;  %v545_v10 = vpop.f32.mrb[9].mxu0  ;;  %v658_v8 = vld [vmem:[%s1568_s3] ss:$0 sm:$0xff] }
 0x13a   :  { %v1541_v11 = vadd.f32 %v545_v10, %v471_v4 }
 0x13b   :  { %v566_v12 = vmul.f32 0.0, %v1539_v9  ;;  %v575_v13 = vmul.f32 %v1539_v9, %v1539_v9 }
 0x13c   :  { %v574_v14 = vmul.f32 %v1541_v11, %v1541_v11  ;;  %v585_v15 = vadd.f32 %v1539_v9, %v1541_v11 }
 0x13d   :  { %v577_v16 = vmul.f32 0.0, %v575_v13  ;;  %v567_v17 = vadd.f32 %v566_v12, %v1541_v11 }
 0x13e   :  { %v586_v18 = vrot.slane %v585_v15, 4  ;;  %v592_v19 = vadd.f32 %v575_v13, %v574_v14 }
 0x13f   :  { %v568_v20 = vrot.slane %v567_v17, 4  ;;  %v578_v21 = vadd.f32 %v577_v16, %v574_v14 }
 0x140   :  { %v587_v22 = vadd.f32 %v586_v18, %v585_v15  ;;  %v593_v23 = vrot.slane %v592_v19, 4 }
 0x141   :  { %v569_v24 = vadd.f32 %v568_v20, %v567_v17  ;;  %v579_v25 = vrot.slane %v578_v21, 4 }
 0x142   :  { %v588_v26 = vrot.slane %v587_v22, 2  ;;  %v594_v27 = vadd.f32 %v593_v23, %v592_v19 }
 0x143   :  { %v570_v28 = vrot.slane %v569_v24, 2  ;;  %v580_v29 = vadd.f32 %v579_v25, %v578_v21 }
 0x144   :  { %v589_v30 = vadd.f32 %v588_v26, %v587_v22  ;;  %v595_v31 = vrot.slane %v594_v27, 2 }
 0x145   :  { %v571_v32 = vadd.f32 %v570_v28, %v569_v24  ;;  %v581_v33 = vrot.slane %v580_v29, 2 }
 0x146   :  { %v590_v34 = vrot.slane %v589_v30, 1  ;;  %v596_v35 = vadd.f32 %v595_v31, %v594_v27 }
 0x147   :  { %v572_v36 = vrot.slane %v571_v32, 1  ;;  %v582_v37 = vadd.f32 %v581_v33, %v580_v29 }
 0x148   :  { %v591_v38 = vadd.f32 %v590_v34, %v589_v30  ;;  %v597_v39 = vrot.slane %v596_v35, 1 }
 0x149   :  { %v573_v40 = vadd.f32 %v572_v36, %v571_v32  ;;  %v583_v41 = vrot.slane %v582_v37, 1 }
 0x14a   :  { %v598_v42 = vadd.f32 %v597_v39, %v596_v35 }
 0x14b   :  { %v584_v43 = vadd.f32 %v583_v41, %v582_v37  ;;  %v599_v44 = vmul.f32 0.125, %v573_v40  ;;  %v600_v45 = vsub.f32 %v591_v38, %v573_v40 }
 0x14d   :  { %v601_v46 = vmul.f32 0.125, %v600_v45  ;;  %v602_v47 = vmul.f32 0.125, %v584_v43  ;;  %v603_v48 = vmul.f32 %v599_v44, %v599_v44  ;;  %v605_v49 = vsub.f32 %v598_v42, %v584_v43 }
 0x14e   :  { %v610_v50 = vmul.f32 0.0, %v599_v44 }
 0x14f   :  { %v604_v51 = vsub.f32 %v602_v47, %v603_v48  ;;  %v606_v52 = vmul.f32 0.125, %v605_v49  ;;  %v607_v53 = vmul.f32 %v601_v46, %v601_v46  ;;  %v613_v54 = vmul.f32 0.0, %v601_v46 }
 0x150   :  { %v616_v55 = vadd.f32 %v610_v50, %v601_v46 }
 0x151   :  { %v608_v56 = vsub.f32 %v606_v52, %v607_v53  ;;  %v615_v57 = vadd.f32 %v613_v54, %v599_v44  ;;  %v618_v58 = vmul.f32 0.0, %v604_v51 }
 0x152   :  { %v626_v59 = vsub.f32 %v1539_v9, %v616_v55 }
 0x153   :  { %v619_v60 = vmul.f32 0.0, %v608_v56  ;;  %v622_v61 = vadd.f32 %v618_v58, %v608_v56  ;;  %v625_v62 = vsub.f32 %v1541_v11, %v615_v57 }
 0x155   :  { %v621_v63 = vadd.f32 %v619_v60, %v604_v51  ;;  %v624_v0 = vmax.f32 %v622_v61, 0.0 }
 0x157   :  { %v623_v1 = vmax.f32 %v621_v63, 0.0  ;;  %v628_v2 = vadd.f32 1e-05, %v624_v0 }
 0x159   :  { %v627_v3 = vadd.f32 1e-05, %v623_v1  ;;  %1024 = vrsqrt.f32 %v628_v2 }
 0x15b   :  { %1026 = vrsqrt.f32 %v627_v3 }
 0x163   :  { %v1025_v4 = vpop.eup %1024 }
 0x164   :  { %v632_v6 = vmul.f32 %v1025_v4, %v626_v59 }
 0x165   :  { %v1027_v7 = vpop.eup %1026 }
 0x166   :  { %v631_v9 = vmul.f32 %v1027_v7, %v625_v62  ;;  %v640_v10 = vmul.f32 %v657_v5, %v632_v6 }
 0x168   :  { %v639_v11 = vmul.f32 %v657_v5, %v631_v9  ;;  %v648_v12 = vadd.f32 %v658_v8, %v640_v10 }
 0x16a   :  { %v647_v13 = vadd.f32 %v658_v8, %v639_v11  ;;  %v650_v14 = vmax.f32 %v648_v12, 0.0 }
 0x16c   :  { %v649_v15 = vmax.f32 %v647_v13, 0.0  ;;  %652 = vst [vmem:[%s1569_s4 + $0x8] sm:$0xff] %v650_v14 }
 0x16e   :  { %651 = vst [vmem:[%s1569_s4] sm:$0xff] %v649_v15 }

// kernel: cdnet_forward.18
= control target key start
LH: loop header
LB: loop body
LE: loop exit
PB: predicated region body
PF: predicated region fallthrough
CT: control target
= control target key end

     0   :  { %s1583_s1 = inlined_call_operand.vmem [shape: f32[1152,128], index: 1, kind: input, shape index: {}]   ;;  %s1584_s0 = inlined_call_operand.vmem [shape: f32[16,1152], index: 0, kind: input, shape index: {}]   ;;  %s1585_s2 = inlined_call_operand.vmem [shape: f32[1,128], index: 2, kind: input, shape index: {}]   ;;  %s1586_s3 = inlined_call_operand.vmem [shape: f32[1,128], index: 3, kind: input, shape index: {}]   ;;  %s1587_s4 = inlined_call_operand.vmem [shape: f32[16,128], index: 4, kind: input, shape index: {}]   ;;  %s1588_s5 = inlined_call_operand.vmem [shape: f32[16,128], index: 5, kind: output, shape index: {}]  }
   0x1   :  { %v54_v0 = vld [vmem:[%s1583_s1 + $0x80] sm:$0xff]  ;;  %v55_v1 = vld [vmem:[%s1583_s1 + $0x88] sm:$0xff]  ;;  %v56_v11 = vld [vmem:[%s1583_s1 + $0x90] sm:$0xff] }
   0x2   :  { %v86_v2 = vld [vmem:[%s1583_s1 + $0x180] sm:$0xff]  ;;  %v871_v3 = vpack.c.bf16 %v55_v1, %v54_v0  ;;  %v87_v4 = vld [vmem:[%s1583_s1 + $0x188] sm:$0xff]  ;;  %v57_v13 = vld [vmem:[%s1583_s1 + $0x98] sm:$0xff] }
   0x3   :  { %v38_v5 = vld [vmem:[%s1583_s1] sm:$0xff]  ;;  %v39_v6 = vld [vmem:[%s1583_s1 + $0x8] sm:$0xff]  ;;  %v903_v7 = vpack.c.bf16 %v87_v4, %v86_v2  ;;  %v88_v14 = vld [vmem:[%s1583_s1 + $0x190] sm:$0xff]  ;;  %v875_v16 = vpack.c.bf16 %v57_v13, %v56_v11 }
   0x4   :  { %v873_v8 = vpack.c.bf16 %v39_v6, %v38_v5  ;;  %v70_v9 = vld [vmem:[%s1583_s1 + $0x100] sm:$0xff]  ;;  %v71_v10 = vld [vmem:[%s1583_s1 + $0x108] sm:$0xff]  ;;  %872 = vmatprep.subr.bf16.mxu0 %v871_v3  ;;  %v89_v15 = vld [vmem:[%s1583_s1 + $0x198] sm:$0xff] }
   0x5   :  { %v905_v12 = vpack.c.bf16 %v71_v10, %v70_v9  ;;  %904 = vmatprep.subr.bf16.mxu1 %v903_v7  ;;  %v907_v17 = vpack.c.bf16 %v89_v15, %v88_v14  ;;  %v40_v18 = vld [vmem:[%s1583_s1 + $0x10] sm:$0xff]  ;;  %v41_v19 = vld [vmem:[%s1583_s1 + $0x18] sm:$0xff]  ;;  %v58_v23 = vld [vmem:[%s1583_s1 + $0xa0] sm:$0xff] }
   0x6   :  { %874 = vmatpush3.bf16.msra.mxu0 %v873_v8  ;;  %v72_v20 = vld [vmem:[%s1583_s1 + $0x110] sm:$0xff]  ;;  %v877_v21 = vpack.c.bf16 %v41_v19, %v40_v18  ;;  %v73_v22 = vld [vmem:[%s1583_s1 + $0x118] sm:$0xff]  ;;  %v59_v24 = vld [vmem:[%s1583_s1 + $0xa8] sm:$0xff] }
   0x7   :  { %906 = vmatpush3.bf16.msra.mxu1 %v905_v12  ;;  %876 = vmatprep.subr.bf16.mxu0 %v875_v16  ;;  %v909_v25 = vpack.c.bf16 %v73_v22, %v72_v20  ;;  %v879_v26 = vpack.c.bf16 %v59_v24, %v58_v23  ;;  %v90_v27 = vld [vmem:[%s1583_s1 + $0x1a0] sm:$0xff]  ;;  %v91_v28 = vld [vmem:[%s1583_s1 + $0x1a8] sm:$0xff]  ;;  %v60_v35 = vld [vmem:[%s1583_s1 + $0xb0] sm:$0xff] }
   0x8   :  { %908 = vmatprep.subr.bf16.mxu1 %v907_v17  ;;  %v42_v29 = vld [vmem:[%s1583_s1 + $0x20] sm:$0xff]  ;;  %v911_v30 = vpack.c.bf16 %v91_v28, %v90_v27  ;;  %v43_v31 = vld [vmem:[%s1583_s1 + $0x28] sm:$0xff]  ;;  %v61_v36 = vld [vmem:[%s1583_s1 + $0xb8] sm:$0xff] }
   0x9   :  { %v74_v32 = vld [vmem:[%s1583_s1 + $0x120] sm:$0xff]  ;;  %v75_v33 = vld [vmem:[%s1583_s1 + $0x128] sm:$0xff]  ;;  %v881_v34 = vpack.c.bf16 %v43_v31, %v42_v29  ;;  %v92_v37 = vld [vmem:[%s1583_s1 + $0x1b0] sm:$0xff]  ;;  %v883_v39 = vpack.c.bf16 %v61_v36, %v60_v35 }
   0xa   :  { %878 = vmatpush3.bf16.msra.mxu0 %v877_v21  ;;  %v913_v38 = vpack.c.bf16 %v75_v33, %v74_v32  ;;  %v93_v40 = vld [vmem:[%s1583_s1 + $0x1b8] sm:$0xff]  ;;  %v44_v41 = vld [vmem:[%s1583_s1 + $0x30] sm:$0xff]  ;;  %v62_v46 = vld [vmem:[%s1583_s1 + $0xc0] sm:$0xff] }
   0xb   :  { %910 = vmatpush3.bf16.msra.mxu1 %v909_v25  ;;  %880 = vmatprep.subr.bf16.mxu0 %v879_v26  ;;  %v45_v42 = vld [vmem:[%s1583_s1 + $0x38] sm:$0xff]  ;;  %v915_v43 = vpack.c.bf16 %v93_v40, %v92_v37  ;;  %v76_v44 = vld [vmem:[%s1583_s1 + $0x130] sm:$0xff]  ;;  %v63_v47 = vld [vmem:[%s1583_s1 + $0xc8] sm:$0xff] }
   0xc   :  { %912 = vmatprep.subr.bf16.mxu1 %v911_v30  ;;  %v77_v45 = vld [vmem:[%s1583_s1 + $0x138] sm:$0xff]  ;;  %v94_v48 = vld [vmem:[%s1583_s1 + $0x1c0] sm:$0xff]  ;;  %v95_v49 = vld [vmem:[%s1583_s1 + $0x1c8] sm:$0xff]  ;;  %v885_v50 = vpack.c.bf16 %v45_v42, %v44_v41  ;;  %v887_v52 = vpack.c.bf16 %v63_v47, %v62_v46 }
   0xd   :  { %v917_v51 = vpack.c.bf16 %v77_v45, %v76_v44  ;;  %v46_v53 = vld [vmem:[%s1583_s1 + $0x40] sm:$0xff]  ;;  %v47_v54 = vld [vmem:[%s1583_s1 + $0x48] sm:$0xff]  ;;  %v919_v56 = vpack.c.bf16 %v95_v49, %v94_v48  ;;  %v64_v58 = vld [vmem:[%s1583_s1 + $0xd0] sm:$0xff] }
   0xe   :  { %882 = vmatpush3.bf16.msra.mxu0 %v881_v34  ;;  %v78_v55 = vld [vmem:[%s1583_s1 + $0x140] sm:$0xff]  ;;  %v79_v57 = vld [vmem:[%s1583_s1 + $0x148] sm:$0xff]  ;;  %v65_v59 = vld [vmem:[%s1583_s1 + $0xd8] sm:$0xff]  ;;  %v889_v62 = vpack.c.bf16 %v47_v54, %v46_v53 }
   0xf   :  { %914 = vmatpush3.bf16.msra.mxu1 %v913_v38  ;;  %884 = vmatprep.subr.bf16.mxu0 %v883_v39  ;;  %v96_v60 = vld [vmem:[%s1583_s1 + $0x1d0] sm:$0xff]  ;;  %v97_v61 = vld [vmem:[%s1583_s1 + $0x1d8] sm:$0xff]  ;;  %v921_v63 = vpack.c.bf16 %v79_v57, %v78_v55  ;;  %v891_v0 = vpack.c.bf16 %v65_v59, %v64_v58  ;;  %v66_v6 = vld [vmem:[%s1583_s1 + $0xe0] sm:$0xff] }
  0x10   :  { %916 = vmatprep.subr.bf16.mxu1 %v915_v43  ;;  %v48_v1 = vld [vmem:[%s1583_s1 + $0x50] sm:$0xff]  ;;  %v49_v2 = vld [vmem:[%s1583_s1 + $0x58] sm:$0xff]  ;;  %v923_v4 = vpack.c.bf16 %v97_v61, %v96_v60  ;;  %v67_v7 = vld [vmem:[%s1583_s1 + $0xe8] sm:$0xff] }
  0x11   :  { %v80_v3 = vld [vmem:[%s1583_s1 + $0x150] sm:$0xff]  ;;  %v81_v5 = vld [vmem:[%s1583_s1 + $0x158] sm:$0xff]  ;;  %v98_v8 = vld [vmem:[%s1583_s1 + $0x1e0] sm:$0xff]  ;;  %v893_v10 = vpack.c.bf16 %v49_v2, %v48_v1  ;;  %v895_v14 = vpack.c.bf16 %v67_v7, %v66_v6 }
  0x12   :  { %886 = vmatpush3.bf16.msra.mxu0 %v885_v50  ;;  %v99_v9 = vld [vmem:[%s1583_s1 + $0x1e8] sm:$0xff]  ;;  %v50_v11 = vld [vmem:[%s1583_s1 + $0x60] sm:$0xff]  ;;  %v925_v13 = vpack.c.bf16 %v81_v5, %v80_v3  ;;  %v23_v17 = vld [vmem:[%s1584_s0 + $0x18] sm:$0xff] }
  0x13   :  { %918 = vmatpush3.bf16.msra.mxu1 %v917_v51  ;;  %888 = vmatprep.subr.bf16.mxu0 %v887_v52  ;;  %v51_v12 = vld [vmem:[%s1583_s1 + $0x68] sm:$0xff]  ;;  %v82_v15 = vld [vmem:[%s1583_s1 + $0x160] sm:$0xff]  ;;  %v927_v18 = vpack.c.bf16 %v99_v9, %v98_v8  ;;  %v68_v20 = vld [vmem:[%s1583_s1 + $0xf0] sm:$0xff] }
  0x14   :  { %920 = vmatprep.subr.bf16.mxu1 %v919_v56  ;;  %v21_v16 = vld [vmem:[%s1584_s0 + $0x8] sm:$0xff]  ;;  %v69_v21 = vld [vmem:[%s1583_s1 + $0xf8] sm:$0xff]  ;;  %v100_v22 = vld [vmem:[%s1583_s1 + $0x1f0] sm:$0xff]  ;;  %321 = vmatprep.mubr.f32.mxu1 %v23_v17  ;;  %v897_v24 = vpack.c.bf16 %v51_v12, %v50_v11 }
  0x15   :  { %v83_v19 = vld [vmem:[%s1583_s1 + $0x168] sm:$0xff]  ;;  %246 = vmatprep.mubr.f32.mxu0 %v21_v16  ;;  %v101_v23 = vld [vmem:[%s1583_s1 + $0x1f8] sm:$0xff]  ;;  %v899_v26 = vpack.c.bf16 %v69_v21, %v68_v20  ;;  %v52_v27 = vld [vmem:[%s1583_s1 + $0x70] sm:$0xff] }
  0x16   :  { %890 = vmatpush3.bf16.msra.mxu0 %v889_v62  ;;  %v929_v25 = vpack.c.bf16 %v83_v19, %v82_v15  ;;  %v53_v28 = vld [vmem:[%s1583_s1 + $0x78] sm:$0xff]  ;;  %v84_v29 = vld [vmem:[%s1583_s1 + $0x170] sm:$0xff]  ;;  %v931_v30 = vpack.c.bf16 %v101_v23, %v100_v22  ;;  %v118_v32 = vld [vmem:[%s1583_s1 + $0x280] sm:$0xff] }
  0x17   :  { %922 = vmatpush3.bf16.msra.mxu1 %v921_v63  ;;  %892 = vmatprep.subr.bf16.mxu0 %v891_v0  ;;  %v85_v31 = vld [vmem:[%s1583_s1 + $0x178] sm:$0xff]  ;;  %v119_v33 = vld [vmem:[%s1583_s1 + $0x288] sm:$0xff]  ;;  %v150_v34 = vld [vmem:[%s1583_s1 + $0x380] sm:$0xff]  ;;  %v901_v36 = vpack.c.bf16 %v53_v28, %v52_v27 }
  0x18   :  { %924 = vmatprep.subr.bf16.mxu1 %v923_v4  ;;  %v151_v35 = vld [vmem:[%s1583_s1 + $0x388] sm:$0xff]  ;;  %v933_v37 = vpack.c.bf16 %v85_v31, %v84_v29  ;;  %v935_v38 = vpack.c.bf16 %v119_v33, %v118_v32  ;;  %v102_v39 = vld [vmem:[%s1583_s1 + $0x200] sm:$0xff]  ;;  %v120_v44 = vld [vmem:[%s1583_s1 + $0x290] sm:$0xff] }
  0x19   :  { %v103_v40 = vld [vmem:[%s1583_s1 + $0x208] sm:$0xff]  ;;  %v134_v41 = vld [vmem:[%s1583_s1 + $0x300] sm:$0xff]  ;;  %v967_v42 = vpack.c.bf16 %v151_v35, %v150_v34  ;;  %v121_v45 = vld [vmem:[%s1583_s1 + $0x298] sm:$0xff] }
  0x1a   :  { %894 = vmatpush3.bf16.msra.mxu0 %v893_v10  ;;  %v135_v43 = vld [vmem:[%s1583_s1 + $0x308] sm:$0xff]  ;;  %v152_v46 = vld [vmem:[%s1583_s1 + $0x390] sm:$0xff]  ;;  %v153_v47 = vld [vmem:[%s1583_s1 + $0x398] sm:$0xff]  ;;  %v937_v50 = vpack.c.bf16 %v103_v40, %v102_v39  ;;  %v939_v52 = vpack.c.bf16 %v121_v45, %v120_v44 }
  0x1b   :  { %926 = vmatpush3.bf16.msra.mxu1 %v925_v13  ;;  %896 = vmatprep.subr.bf16.mxu0 %v895_v14  ;;  %v20_v48 = vld [vmem:[%s1584_s0] sm:$0xff]  ;;  %v22_v49 = vld [vmem:[%s1584_s0 + $0x10] sm:$0xff]  ;;  %v969_v51 = vpack.c.bf16 %v135_v43, %v134_v41  ;;  %v105_v54 = vld [vmem:[%s1583_s1 + $0x218] sm:$0xff]  ;;  %v971_v56 = vpack.c.bf16 %v153_v47, %v152_v46 }
  0x1c   :  { %928 = vmatprep.subr.bf16.mxu1 %v927_v18  ;;  %v104_v53 = vld [vmem:[%s1583_s1 + $0x210] sm:$0xff]  ;;  %v137_v57 = vld [vmem:[%s1583_s1 + $0x318] sm:$0xff]  ;;  %v122_v58 = vld [vmem:[%s1583_s1 + $0x2a0] sm:$0xff] }
  0x1d   :  { %v136_v55 = vld [vmem:[%s1583_s1 + $0x310] sm:$0xff]  ;;  %v123_v59 = vld [vmem:[%s1583_s1 + $0x2a8] sm:$0xff]  ;;  %v154_v60 = vld [vmem:[%s1583_s1 + $0x3a0] sm:$0xff]  ;;  %v941_v62 = vpack.c.bf16 %v105_v54, %v104_v53 }
  0x1e   :  { %898 = vmatpush3.bf16.msra.mxu0 %v897_v24  ;;  %v155_v61 = vld [vmem:[%s1583_s1 + $0x3a8] sm:$0xff]  ;;  %v973_v63 = vpack.c.bf16 %v137_v57, %v136_v55  ;;  %v943_v0 = vpack.c.bf16 %v123_v59, %v122_v58  ;;  %v106_v1 = vld [vmem:[%s1583_s1 + $0x220] sm:$0xff]  ;;  %v124_v6 = vld [vmem:[%s1583_s1 + $0x2b0] sm:$0xff] }
  0x1f   :  { %930 = vmatpush3.bf16.msra.mxu1 %v929_v25  ;;  %900 = vmatprep.subr.bf16.mxu0 %v899_v26  ;;  %v107_v2 = vld [vmem:[%s1583_s1 + $0x228] sm:$0xff]  ;;  %v138_v3 = vld [vmem:[%s1583_s1 + $0x320] sm:$0xff]  ;;  %v975_v4 = vpack.c.bf16 %v155_v61, %v154_v60  ;;  %v125_v7 = vld [vmem:[%s1583_s1 + $0x2b8] sm:$0xff] }
  0x20   :  { %932 = vmatprep.subr.bf16.mxu1 %v931_v30  ;;  %v139_v5 = vld [vmem:[%s1583_s1 + $0x328] sm:$0xff]  ;;  %v108_v8 = vld [vmem:[%s1583_s1 + $0x230] sm:$0xff]  ;;  %v157_v10 = vld [vmem:[%s1583_s1 + $0x3b8] sm:$0xff]  ;;  %v945_v11 = vpack.c.bf16 %v107_v2, %v106_v1  ;;  %v947_v16 = vpack.c.bf16 %v125_v7, %v124_v6 }
  0x21   :  { %v156_v9 = vld [vmem:[%s1583_s1 + $0x3b0] sm:$0xff]  ;;  %v109_v12 = vld [vmem:[%s1583_s1 + $0x238] sm:$0xff]  ;;  %v977_v15 = vpack.c.bf16 %v139_v5, %v138_v3  ;;  %v126_v18 = vld [vmem:[%s1583_s1 + $0x2c0] sm:$0xff] }
  0x22   :  { %902 = vmatpush3.bf16.msra.mxu0 %v901_v36  ;;  %v140_v13 = vld [vmem:[%s1583_s1 + $0x330] sm:$0xff]  ;;  %v141_v17 = vld [vmem:[%s1583_s1 + $0x338] sm:$0xff]  ;;  %v32_v19 = vld [vmem:[%s1584_s0 + $0x60] sm:$0xff]  ;;  %v979_v20 = vpack.c.bf16 %v157_v10, %v156_v9  ;;  %v949_v26 = vpack.c.bf16 %v109_v12, %v108_v8 }
  0x23   :  { %934 = vmatpush3.bf16.msra.mxu1 %v933_v37  ;;  %936 = vmatprep.subr.bf16.mxu0 %v935_v38  ;;  %v30_v14 = vld [vmem:[%s1584_s0 + $0x50] sm:$0xff]  ;;  %v127_v21 = vld [vmem:[%s1583_s1 + $0x2c8] sm:$0xff]  ;;  %v31_v23 = vld [vmem:[%s1584_s0 + $0x58] sm:$0xff]  ;;  %v981_v29 = vpack.c.bf16 %v141_v17, %v140_v13 }
  0x24   :  { %968 = vmatprep.subr.bf16.mxu1 %v967_v42  ;;  %v29_v22 = vld [vmem:[%s1584_s0 + $0x48] sm:$0xff]  ;;  %v158_v24 = vld [vmem:[%s1583_s1 + $0x3c0] sm:$0xff]  ;;  %v951_v30 = vpack.c.bf16 %v127_v21, %v126_v18  ;;  %v128_v35 = vld [vmem:[%s1583_s1 + $0x2d0] sm:$0xff] }
  0x25   :  { %247 = vmatmul.mubr.f32.vlgmr.msra.gmra.mrb[0].mxu0 %v20_v48  ;;  %v159_v25 = vld [vmem:[%s1583_s1 + $0x3c8] sm:$0xff]  ;;  %v110_v27 = vld [vmem:[%s1583_s1 + $0x240] sm:$0xff]  ;;  %v129_v36 = vld [vmem:[%s1583_s1 + $0x2d8] sm:$0xff] }
  0x26   :  { %322 = vmatmul.mubr.f32.vlgmr.msra.gmra.mrb[0].mxu1 %v22_v49  ;;  %938 = vmatpush3.bf16.msra.mxu0 %v937_v50  ;;  %v25_v28 = vld [vmem:[%s1584_s0 + $0x28] sm:$0xff]  ;;  %v142_v32 = vld [vmem:[%s1583_s1 + $0x340] sm:$0xff]  ;;  %v983_v34 = vpack.c.bf16 %v159_v25, %v158_v24  ;;  %v27_v37 = vld [vmem:[%s1584_s0 + $0x38] sm:$0xff]  ;;  %v955_v42 = vpack.c.bf16 %v129_v36, %v128_v35 }
  0x27   :  { %970 = vmatpush3.bf16.msra.mxu1 %v969_v51  ;;  %940 = vmatprep.subr.bf16.mxu0 %v939_v52  ;;  %v111_v31 = vld [vmem:[%s1583_s1 + $0x248] sm:$0xff]  ;;  %v160_v38 = vld [vmem:[%s1583_s1 + $0x3d0] sm:$0xff]  ;;  %v161_v39 = vld [vmem:[%s1583_s1 + $0x3d8] sm:$0xff] }
  0x28   :  { %972 = vmatprep.subr.bf16.mxu1 %v971_v56  ;;  %251 = vmatprep.mubr.f32.mxu0 %v30_v14  ;;  %v143_v33 = vld [vmem:[%s1583_s1 + $0x348] sm:$0xff]  ;;  %v953_v40 = vpack.c.bf16 %v111_v31, %v110_v27  ;;  %v112_v43 = vld [vmem:[%s1583_s1 + $0x250] sm:$0xff]  ;;  %v113_v44 = vld [vmem:[%s1583_s1 + $0x258] sm:$0xff]  ;;  %v987_v46 = vpack.c.bf16 %v161_v39, %v160_v38 }
  0x29   :  { %326 = vmatprep.mubr.f32.mxu1 %v32_v19  ;;  %252 = vmatmul.mubr.f32.gmra.mrb[2].mxu0 %v29_v22  ;;  %v985_v41 = vpack.c.bf16 %v143_v33, %v142_v32  ;;  %v144_v45 = vld [vmem:[%s1583_s1 + $0x350] sm:$0xff]  ;;  %v145_v47 = vld [vmem:[%s1583_s1 + $0x358] sm:$0xff]  ;;  %v130_v48 = vld [vmem:[%s1583_s1 + $0x2e0] sm:$0xff]  ;;  %v957_v52 = vpack.c.bf16 %v113_v44, %v112_v43 }
  0x2a   :  { %942 = vmatpush3.bf16.msra.mxu0 %v941_v62  ;;  %327 = vmatmul.mubr.f32.gmra.mrb[2].mxu1 %v31_v23  ;;  %v131_v49 = vld [vmem:[%s1583_s1 + $0x2e8] sm:$0xff]  ;;  %v162_v50 = vld [vmem:[%s1583_s1 + $0x3e0] sm:$0xff]  ;;  %v989_v53 = vpack.c.bf16 %v145_v47, %v144_v45  ;;  %v132_v60 = vld [vmem:[%s1583_s1 + $0x2f0] sm:$0xff] }
  0x2b   :  { %974 = vmatpush3.bf16.msra.mxu1 %v973_v63  ;;  %944 = vmatprep.subr.bf16.mxu0 %v943_v0  ;;  %v163_v51 = vld [vmem:[%s1583_s1 + $0x3e8] sm:$0xff]  ;;  %v959_v54 = vpack.c.bf16 %v131_v49, %v130_v48  ;;  %v114_v55 = vld [vmem:[%s1583_s1 + $0x260] sm:$0xff]  ;;  %v133_v61 = vld [vmem:[%s1583_s1 + $0x2f8] sm:$0xff] }
  0x2c   :  { %976 = vmatprep.subr.bf16.mxu1 %v975_v4  ;;  %396 = vmatprep.mubr.f32.mxu0 %v25_v28  ;;  %v115_v56 = vld [vmem:[%s1583_s1 + $0x268] sm:$0xff]  ;;  %v146_v57 = vld [vmem:[%s1583_s1 + $0x360] sm:$0xff]  ;;  %v991_v58 = vpack.c.bf16 %v163_v51, %v162_v50  ;;  %v164_v62 = vld [vmem:[%s1583_s1 + $0x3f0] sm:$0xff]  ;;  %v963_v2 = vpack.c.bf16 %v133_v61, %v132_v60 }
  0x2d   :  { %471 = vmatprep.mubr.f32.mxu1 %v27_v37  ;;  %v147_v59 = vld [vmem:[%s1583_s1 + $0x368] sm:$0xff]  ;;  %v165_v63 = vld [vmem:[%s1583_s1 + $0x3f8] sm:$0xff]  ;;  %v961_v0 = vpack.c.bf16 %v115_v56, %v114_v55  ;;  %v116_v3 = vld [vmem:[%s1583_s1 + $0x270] sm:$0xff] }
  0x2e   :  { %946 = vmatpush3.bf16.msra.mxu0 %v945_v11  ;;  %v993_v1 = vpack.c.bf16 %v147_v59, %v146_v57  ;;  %v117_v4 = vld [vmem:[%s1583_s1 + $0x278] sm:$0xff]  ;;  %v148_v5 = vld [vmem:[%s1583_s1 + $0x370] sm:$0xff]  ;;  %v995_v6 = vpack.c.bf16 %v165_v63, %v164_v62  ;;  %v166_v8 = vld [vmem:[%s1583_s1 + $0x400] sm:$0xff] }
  0x2f   :  { %978 = vmatpush3.bf16.msra.mxu1 %v977_v15  ;;  %948 = vmatprep.subr.bf16.mxu0 %v947_v16  ;;  %v149_v7 = vld [vmem:[%s1583_s1 + $0x378] sm:$0xff]  ;;  %v167_v9 = vld [vmem:[%s1583_s1 + $0x408] sm:$0xff]  ;;  %v965_v10 = vpack.c.bf16 %v117_v4, %v116_v3  ;;  %v168_v13 = vld [vmem:[%s1583_s1 + $0x410] sm:$0xff] }
  0x30   :  { %980 = vmatprep.subr.bf16.mxu1 %v979_v20  ;;  %v997_v11 = vpack.c.bf16 %v149_v7, %v148_v5  ;;  %v999_v12 = vpack.c.bf16 %v167_v9, %v166_v8  ;;  %v169_v14 = vld [vmem:[%s1583_s1 + $0x418] sm:$0xff]  ;;  %v24_v15 = vld [vmem:[%s1584_s0 + $0x20] sm:$0xff]  ;;  %v26_v16 = vld [vmem:[%s1584_s0 + $0x30] sm:$0xff] }
  0x31   :  { %v1003_v17 = vpack.c.bf16 %v169_v14, %v168_v13  ;;  %v34_v18 = vld [vmem:[%s1584_s0 + $0x70] sm:$0xff]  ;;  %v170_v19 = vld [vmem:[%s1583_s1 + $0x420] sm:$0xff]  ;;  %v171_v20 = vld [vmem:[%s1583_s1 + $0x428] sm:$0xff] }
  0x32   :  { %950 = vmatpush3.bf16.msra.mxu0 %v949_v26  ;;  %v36_v21 = vld [vmem:[%s1584_s0 + $0x80] sm:$0xff]  ;;  %v33_v22 = vld [vmem:[%s1584_s0 + $0x68] sm:$0xff]  ;;  %v35_v23 = vld [vmem:[%s1584_s0 + $0x78] sm:$0xff]  ;;  %v1007_v24 = vpack.c.bf16 %v171_v20, %v170_v19 }
  0x33   :  { %982 = vmatpush3.bf16.msra.mxu1 %v981_v29  ;;  %952 = vmatprep.subr.bf16.mxu0 %v951_v30  ;;  %v172_v25 = vld [vmem:[%s1583_s1 + $0x430] sm:$0xff]  ;;  %v173_v26 = vld [vmem:[%s1583_s1 + $0x438] sm:$0xff]  ;;  %v28_v27 = vld [vmem:[%s1584_s0 + $0x40] sm:$0xff] }
  0x34   :  { %984 = vmatprep.subr.bf16.mxu1 %v983_v34  ;;  %v1011_v28 = vpack.c.bf16 %v173_v26, %v172_v25  ;;  %v174_v29 = vld [vmem:[%s1583_s1 + $0x440] sm:$0xff]  ;;  %v175_v30 = vld [vmem:[%s1583_s1 + $0x448] sm:$0xff]  ;;  %v176_v32 = vld [vmem:[%s1583_s1 + $0x450] sm:$0xff] }
  0x35   :  { %v1015_v31 = vpack.c.bf16 %v175_v30, %v174_v29  ;;  %v177_v33 = vld [vmem:[%s1583_s1 + $0x458] sm:$0xff]  ;;  %v178_v35 = vld [vmem:[%s1583_s1 + $0x460] sm:$0xff]  ;;  %v179_v36 = vld [vmem:[%s1583_s1 + $0x468] sm:$0xff] }
  0x36   :  { %954 = vmatpush3.bf16.msra.mxu0 %v953_v40  ;;  %v1019_v34 = vpack.c.bf16 %v177_v33, %v176_v32  ;;  %v1023_v37 = vpack.c.bf16 %v179_v36, %v178_v35  ;;  %v180_v38 = vld [vmem:[%s1583_s1 + $0x470] sm:$0xff]  ;;  %v181_v39 = vld [vmem:[%s1583_s1 + $0x478] sm:$0xff] }
  0x37   :  { %986 = vmatpush3.bf16.msra.mxu1 %v985_v41  ;;  %956 = vmatprep.subr.bf16.mxu0 %v955_v42  ;;  %v1027_v40 = vpack.c.bf16 %v181_v39, %v180_v38  ;;  %v37_v41 = vld [vmem:[%s1584_s0 + $0x88] sm:$0xff] }
  0x38   :  { %988 = vmatprep.subr.bf16.mxu1 %v987_v46 }
  0x3a   :  { %958 = vmatpush3.bf16.msra.mxu0 %v957_v52 }
  0x3b   :  { %990 = vmatpush3.bf16.msra.mxu1 %v989_v53  ;;  %960 = vmatprep.subr.bf16.mxu0 %v959_v54 }
  0x3c   :  { %992 = vmatprep.subr.bf16.mxu1 %v991_v58 }
  0x3e   :  { %962 = vmatpush3.bf16.msra.mxu0 %v961_v0 }
  0x3f   :  { %994 = vmatpush3.bf16.msra.mxu1 %v993_v1  ;;  %964 = vmatprep.subr.bf16.mxu0 %v963_v2 }
  0x40   :  { %996 = vmatprep.subr.bf16.mxu1 %v995_v6 }
  0x42   :  { %966 = vmatpush3.bf16.msra.mxu0 %v965_v10 }
  0x43   :  { %998 = vmatpush3.bf16.msra.mxu1 %v997_v11  ;;  %1000 = vmatprep.subr.bf16.mxu0 %v999_v12 }
  0x45   :  { %397 = vmatmul.mubr.f32.vlgmr.msra.gmra.mrb[4].mxu0 %v24_v15 }
  0x46   :  { %1002 = vmatpush3.bf16.msra.mxu0 %v999_v12  ;;  %472 = vmatmul.mubr.f32.vlgmr.msra.gmra.mrb[4].mxu1 %v26_v16 }
  0x47   :  { %401 = vmatprep.mubr.f32.mxu0 %v34_v18  ;;  %1004 = vmatprep.subr.bf16.mxu0 %v1003_v17 }
  0x48   :  { %476 = vmatprep.mubr.f32.mxu1 %v36_v21 }
  0x49   :  { %402 = vmatmul.mubr.f32.gmra.mrb[6].mxu0 %v33_v22 }
  0x4a   :  { %1006 = vmatpush3.bf16.msra.mxu0 %v1003_v17  ;;  %477 = vmatmul.mubr.f32.gmra.mrb[6].mxu1 %v35_v23 }
  0x4b   :  { %1008 = vmatprep.subr.bf16.mxu0 %v1007_v24  ;;  %868 = vmatprep.mubr.f32.mxu0 %v28_v27 }
  0x4e   :  { %1010 = vmatpush3.bf16.msra.mxu0 %v1007_v24 }
  0x4f   :  { %1012 = vmatprep.subr.bf16.mxu0 %v1011_v28 }
  0x52   :  { %1014 = vmatpush3.bf16.msra.mxu0 %v1011_v28 }
  0x53   :  { %1016 = vmatprep.subr.bf16.mxu0 %v1015_v31 }
  0x56   :  { %1018 = vmatpush3.bf16.msra.mxu0 %v1015_v31 }
  0x57   :  { %1020 = vmatprep.subr.bf16.mxu0 %v1019_v34 }
  0x5a   :  { %1022 = vmatpush3.bf16.msra.mxu0 %v1019_v34 }
  0x5b   :  { %1024 = vmatprep.subr.bf16.mxu0 %v1023_v37 }
  0x5e   :  { %1026 = vmatpush3.bf16.msra.mxu0 %v1023_v37 }
  0x5f   :  { %1028 = vmatprep.subr.bf16.mxu0 %v1027_v40 }
  0x62   :  { %1030 = vmatpush3.bf16.msra.mxu0 %v1027_v40 }
  0x65   :  { %869 = vmatmul.mubr.f32.vlgmr.msra.gmra.mrb[8].mxu0 %v37_v41 }
  0xf8   :  { %v698_v42 = vpop.f32.mrb[0].mxu0 }
  0xf9   :  { %v736_v43 = vpop.f32.mrb[0].mxu1  ;;  %v699_v44 = vpop.f32.mrb[1].mxu0 }
  0xfa   :  { %v700_v45 = vadd.f32 %v699_v44, %v698_v42  ;;  %v737_v46 = vpop.f32.mrb[1].mxu1 }
  0xfb   :  { %v738_v47 = vadd.f32 %v737_v46, %v736_v43 }
  0xfc   :  { %v701_v49 = vpop.f32.mrb[2].mxu0 }
  0xfd   :  { %v324_v48 = vadd.f32 %v738_v47, %v700_v45  ;;  %v739_v50 = vpop.f32.mrb[2].mxu1  ;;  %v702_v51 = vpop.f32.mrb[3].mxu0 }
  0xfe   :  { %v703_v52 = vadd.f32 %v702_v51, %v701_v49  ;;  %v740_v53 = vpop.f32.mrb[3].mxu1 }
  0xff   :  { %v741_v54 = vadd.f32 %v740_v53, %v739_v50 }
 0x101   :  { %v329_v55 = vadd.f32 %v741_v54, %v703_v52 }
 0x118   :  { %v774_v56 = vpop.f32.mrb[4].mxu0 }
 0x119   :  { %v775_v57 = vpop.f32.mrb[5].mxu0  ;;  %v812_v58 = vpop.f32.mrb[4].mxu1 }
 0x11a   :  { %v776_v59 = vadd.f32 %v775_v57, %v774_v56  ;;  %v813_v60 = vpop.f32.mrb[5].mxu1 }
 0x11b   :  { %v814_v61 = vadd.f32 %v813_v60, %v812_v58 }
 0x11c   :  { %v399_v62 = vadd.f32 %v776_v59, %v324_v48  ;;  %v777_v63 = vpop.f32.mrb[6].mxu0 }
 0x11d   :  { %v778_v0 = vpop.f32.mrb[7].mxu0  ;;  %v815_v1 = vpop.f32.mrb[6].mxu1 }
 0x11e   :  { %v779_v2 = vadd.f32 %v778_v0, %v777_v63  ;;  %v816_v3 = vpop.f32.mrb[7].mxu1  ;;  %v474_v4 = vadd.f32 %v814_v61, %v399_v62 }
 0x11f   :  { %v817_v5 = vadd.f32 %v816_v3, %v815_v1 }
 0x120   :  { %v404_v6 = vadd.f32 %v779_v2, %v329_v55 }
 0x122   :  { %v479_v7 = vadd.f32 %v817_v5, %v404_v6  ;;  %v664_v5 = vld [vmem:[%s1585_s2] ss:$0 sm:$0xff] }
 0x138   :  { %v870_v8 = vpop.f32.mrb[8].mxu0 }
 0x139   :  { %v1551_v9 = vadd.f32 %v870_v8, %v479_v7  ;;  %v548_v10 = vpop.f32.mrb[9].mxu0  ;;  %v665_v8 = vld [vmem:[%s1586_s3] ss:$0 sm:$0xff] }
 0x13a   :  { %v1553_v11 = vadd.f32 %v548_v10, %v474_v4 }
 0x13b   :  { %v569_v12 = vmul.f32 0.0, %v1551_v9  ;;  %v578_v13 = vmul.f32 %v1551_v9, %v1551_v9 }
 0x13c   :  { %v577_v14 = vmul.f32 %v1553_v11, %v1553_v11  ;;  %v588_v15 = vadd.f32 %v1551_v9, %v1553_v11 }
 0x13d   :  { %v580_v16 = vmul.f32 0.0, %v578_v13  ;;  %v570_v17 = vadd.f32 %v569_v12, %v1553_v11 }
 0x13e   :  { %v589_v18 = vrot.slane %v588_v15, 4  ;;  %v595_v19 = vadd.f32 %v578_v13, %v577_v14 }
 0x13f   :  { %v571_v20 = vrot.slane %v570_v17, 4  ;;  %v581_v21 = vadd.f32 %v580_v16, %v577_v14  ;;  %v652_v14 = vld [vmem:[%s1587_s4] sm:$0xff] }
 0x140   :  { %v590_v22 = vadd.f32 %v589_v18, %v588_v15  ;;  %v596_v23 = vrot.slane %v595_v19, 4 }
 0x141   :  { %v572_v24 = vadd.f32 %v571_v20, %v570_v17  ;;  %v582_v25 = vrot.slane %v581_v21, 4 }
 0x142   :  { %v591_v26 = vrot.slane %v590_v22, 2  ;;  %v597_v27 = vadd.f32 %v596_v23, %v595_v19 }
 0x143   :  { %v573_v28 = vrot.slane %v572_v24, 2  ;;  %v583_v29 = vadd.f32 %v582_v25, %v581_v21 }
 0x144   :  { %v592_v30 = vadd.f32 %v591_v26, %v590_v22  ;;  %v598_v31 = vrot.slane %v597_v27, 2 }
 0x145   :  { %v574_v32 = vadd.f32 %v573_v28, %v572_v24  ;;  %v584_v33 = vrot.slane %v583_v29, 2 }
 0x146   :  { %v593_v34 = vrot.slane %v592_v30, 1  ;;  %v599_v35 = vadd.f32 %v598_v31, %v597_v27 }
 0x147   :  { %v575_v36 = vrot.slane %v574_v32, 1  ;;  %v585_v37 = vadd.f32 %v584_v33, %v583_v29 }
 0x148   :  { %v594_v38 = vadd.f32 %v593_v34, %v592_v30  ;;  %v600_v39 = vrot.slane %v599_v35, 1 }
 0x149   :  { %v576_v40 = vadd.f32 %v575_v36, %v574_v32  ;;  %v586_v41 = vrot.slane %v585_v37, 1 }
 0x14a   :  { %v601_v42 = vadd.f32 %v600_v39, %v599_v35 }
 0x14b   :  { %v587_v43 = vadd.f32 %v586_v41, %v585_v37  ;;  %v602_v44 = vmul.f32 0.125, %v576_v40  ;;  %v603_v45 = vsub.f32 %v594_v38, %v576_v40 }
 0x14d   :  { %v604_v46 = vmul.f32 0.125, %v603_v45  ;;  %v605_v47 = vmul.f32 0.125, %v587_v43  ;;  %v606_v48 = vmul.f32 %v602_v44, %v602_v44  ;;  %v608_v49 = vsub.f32 %v601_v42, %v587_v43 }
 0x14e   :  { %v613_v50 = vmul.f32 0.0, %v602_v44 }
 0x14f   :  { %v607_v51 = vsub.f32 %v605_v47, %v606_v48  ;;  %v609_v52 = vmul.f32 0.125, %v608_v49  ;;  %v610_v53 = vmul.f32 %v604_v46, %v604_v46  ;;  %v616_v54 = vmul.f32 0.0, %v604_v46 }
 0x150   :  { %v619_v55 = vadd.f32 %v613_v50, %v604_v46 }
 0x151   :  { %v611_v56 = vsub.f32 %v609_v52, %v610_v53  ;;  %v618_v57 = vadd.f32 %v616_v54, %v602_v44  ;;  %v621_v58 = vmul.f32 0.0, %v607_v51 }
 0x152   :  { %v629_v59 = vsub.f32 %v1551_v9, %v619_v55 }
 0x153   :  { %v622_v60 = vmul.f32 0.0, %v611_v56  ;;  %v625_v61 = vadd.f32 %v621_v58, %v611_v56  ;;  %v628_v62 = vsub.f32 %v1553_v11, %v618_v57  ;;  %v653_v11 = vld [vmem:[%s1587_s4 + $0x8] sm:$0xff] }
 0x155   :  { %v624_v63 = vadd.f32 %v622_v60, %v607_v51  ;;  %v627_v0 = vmax.f32 %v625_v61, 0.0 }
 0x157   :  { %v626_v1 = vmax.f32 %v624_v63, 0.0  ;;  %v631_v2 = vadd.f32 1e-05, %v627_v0 }
 0x159   :  { %v630_v3 = vadd.f32 1e-05, %v626_v1  ;;  %1031 = vrsqrt.f32 %v631_v2 }
 0x15b   :  { %1033 = vrsqrt.f32 %v630_v3 }
 0x163   :  { %v1032_v4 = vpop.eup %1031 }
 0x164   :  { %v635_v6 = vmul.f32 %v1032_v4, %v629_v59 }
 0x165   :  { %v1034_v7 = vpop.eup %1033 }
 0x166   :  { %v634_v9 = vmul.f32 %v1034_v7, %v628_v62  ;;  %v643_v10 = vmul.f32 %v664_v5, %v635_v6 }
 0x168   :  { %v642_v12 = vmul.f32 %v664_v5, %v634_v9  ;;  %v651_v13 = vadd.f32 %v665_v8, %v643_v10 }
 0x16a   :  { %v650_v15 = vadd.f32 %v665_v8, %v642_v12  ;;  %v655_v16 = vadd.f32 %v653_v11, %v651_v13 }
 0x16c   :  { %v654_v17 = vadd.f32 %v652_v14, %v650_v15  ;;  %v657_v18 = vmax.f32 %v655_v16, 0.0 }
 0x16e   :  { %v656_v19 = vmax.f32 %v654_v17, 0.0  ;;  %659 = vst [vmem:[%s1588_s5 + $0x8] sm:$0xff] %v657_v18 }
 0x170   :  { %658 = vst [vmem:[%s1588_s5] sm:$0xff] %v656_v19 }

// kernel: cdnet_forward.19
= control target key start
LH: loop header
LB: loop body
LE: loop exit
PB: predicated region body
PF: predicated region fallthrough
CT: control target
= control target key end

     0   :  { %v2835_v7 = vmov 0.0   ;;  %vm52_vm0 = vcmask 1043456   ;;  %vm176_vm1 = vcmask 1041409   ;;  %vm178_vm2 = vcmask 1042434   ;;  %s4666_s0 = inlined_call_operand.vmem [shape: f32[4,4,128], index: 0, kind: input, shape index: {}]   ;;  %s4667_s1 = inlined_call_operand.vmem [shape: f32[128,512], index: 1, kind: input, shape index: {}]   ;;  %s4668_s2 = inlined_call_operand.vmem [shape: f32[1,512], index: 2, kind: input, shape index: {}]   ;;  %s4669_s3 = inlined_call_operand.vmem [shape: f32[1,512], index: 3, kind: input, shape index: {}, may-alias: {3,7}]   ;;  %s4670_s4 = inlined_call_operand.vmem [shape: f32[1,512], index: 4, kind: input, shape index: {}, may-alias: {4,8}]   ;;  %s4671_s5 = inlined_call_operand.vmem [shape: f32[512,512], index: 5, kind: input, shape index: {}]   ;;  %s4672_s6 = inlined_call_operand.vmem [shape: f32[1,512], index: 6, kind: input, shape index: {}]   ;;  %s4673_s7 = inlined_call_operand.vmem [shape: f32[1,512], index: 7, kind: input, shape index: {}, may-alias: {3,7}]   ;;  %s4674_s8 = inlined_call_operand.vmem [shape: f32[1,512], index: 8, kind: input, shape index: {}, may-alias: {4,8}]   ;;  %s4675_s9 = inlined_call_operand.vmem [shape: f32[512,128], index: 9, kind: input, shape index: {}]   ;;  %s4676_s10 = inlined_call_operand.vmem [shape: f32[512,128], index: 10, kind: input, shape index: {}]   ;;  %s4677_s11 = inlined_call_operand.vmem [shape: f32[1,128], index: 11, kind: input, shape index: {}]   ;;  %s4678_s12 = inlined_call_operand.vmem [shape: f32[128,2], index: 12, kind: input, shape index: {}]   ;;  %s4679_s13 = inlined_call_operand.vmem [shape: f32[1,2], index: 13, kind: input, shape index: {}]   ;;  %s4680_s14 = inlined_call_operand.hbm [shape: f32[2,2], index: 14, kind: output, shape index: {}]  }
   0x1   :  { %v87_v0 = vld [vmem:[%s4667_s1 + $0x8] sm:$0xff]  ;;  %v86_v2 = vld [vmem:[%s4667_s1] sm:$0xff]  ;;  %247 = vmatprep.mubr.f32.mxu0 %v2835_v7  ;;  %318 = vmatprep.mubr.f32.mxu1 %v2835_v7  ;;  %v89_v22 = vld [vmem:[%s4667_s1 + $0x18] sm:$0xff]  ;;  %vm180_vm3 = vcmask 1043459  }
   0x2   :  { %v91_v1 = vld [vmem:[%s4667_s1 + $0x28] sm:$0xff]  ;;  %v90_v4 = vld [vmem:[%s4667_s1 + $0x20] sm:$0xff]  ;;  %v93_v23 = vld [vmem:[%s4667_s1 + $0x38] sm:$0xff] }
   0x3   :  { %v2311_v3 = vpack.c.bf16 %v91_v1, %v87_v0  ;;  %v95_v5 = vld [vmem:[%s4667_s1 + $0x48] sm:$0xff]  ;;  %v2313_v8 = vpack.c.bf16 %v90_v4, %v86_v2  ;;  %v94_v10 = vld [vmem:[%s4667_s1 + $0x40] sm:$0xff]  ;;  %v88_v24 = vld [vmem:[%s4667_s1 + $0x10] sm:$0xff]  ;;  %v2343_v28 = vpack.c.bf16 %v93_v23, %v89_v22 }
   0x4   :  { %v99_v6 = vld [vmem:[%s4667_s1 + $0x68] sm:$0xff]  ;;  %v98_v11 = vld [vmem:[%s4667_s1 + $0x60] sm:$0xff]  ;;  %v92_v29 = vld [vmem:[%s4667_s1 + $0x30] sm:$0xff] }
   0x5   :  { %v2315_v9 = vpack.c.bf16 %v99_v6, %v95_v5  ;;  %v103_v12 = vld [vmem:[%s4667_s1 + $0x88] sm:$0xff]  ;;  %2312 = vmatprep.subr.bf16.mxu0 %v2311_v3  ;;  %v2317_v14 = vpack.c.bf16 %v98_v11, %v94_v10  ;;  %v102_v16 = vld [vmem:[%s4667_s1 + $0x80] sm:$0xff]  ;;  %v2345_v32 = vpack.c.bf16 %v92_v29, %v88_v24  ;;  %v97_v33 = vld [vmem:[%s4667_s1 + $0x58] sm:$0xff]  ;;  %2344 = vmatprep.subr.bf16.mxu1 %v2343_v28 }
   0x6   :  { %v107_v13 = vld [vmem:[%s4667_s1 + $0xa8] sm:$0xff]  ;;  %2314 = vmatpush1.bf16.msra.mxu0 %v2313_v8  ;;  %v106_v17 = vld [vmem:[%s4667_s1 + $0xa0] sm:$0xff]  ;;  %v101_v34 = vld [vmem:[%s4667_s1 + $0x78] sm:$0xff] }
   0x7   :  { %2316 = vmatprep.subr.bf16.mxu0 %v2315_v9  ;;  %v2319_v15 = vpack.c.bf16 %v107_v13, %v103_v12  ;;  %v111_v18 = vld [vmem:[%s4667_s1 + $0xc8] sm:$0xff]  ;;  %v110_v20 = vld [vmem:[%s4667_s1 + $0xc0] sm:$0xff]  ;;  %v2321_v21 = vpack.c.bf16 %v106_v17, %v102_v16  ;;  %v96_v35 = vld [vmem:[%s4667_s1 + $0x50] sm:$0xff]  ;;  %2346 = vmatpush1.bf16.msra.mxu1 %v2345_v32  ;;  %v2347_v41 = vpack.c.bf16 %v101_v34, %v97_v33 }
   0x8   :  { %v115_v19 = vld [vmem:[%s4667_s1 + $0xe8] sm:$0xff]  ;;  %v114_v26 = vld [vmem:[%s4667_s1 + $0xe0] sm:$0xff]  ;;  %v100_v36 = vld [vmem:[%s4667_s1 + $0x70] sm:$0xff] }
   0x9   :  { %v2323_v25 = vpack.c.bf16 %v115_v19, %v111_v18  ;;  %v119_v27 = vld [vmem:[%s4667_s1 + $0x108] sm:$0xff]  ;;  %v118_v31 = vld [vmem:[%s4667_s1 + $0x100] sm:$0xff]  ;;  %v2325_v37 = vpack.c.bf16 %v114_v26, %v110_v20  ;;  %v2349_v42 = vpack.c.bf16 %v100_v36, %v96_v35  ;;  %v105_v46 = vld [vmem:[%s4667_s1 + $0x98] sm:$0xff]  ;;  %2348 = vmatprep.subr.bf16.mxu1 %v2347_v41 }
   0xa   :  { %2318 = vmatpush1.bf16.msra.mxu0 %v2317_v14  ;;  %v123_v30 = vld [vmem:[%s4667_s1 + $0x128] sm:$0xff]  ;;  %v122_v38 = vld [vmem:[%s4667_s1 + $0x120] sm:$0xff]  ;;  %v109_v47 = vld [vmem:[%s4667_s1 + $0xb8] sm:$0xff] }
   0xb   :  { %2320 = vmatprep.subr.bf16.mxu0 %v2319_v15  ;;  %v127_v39 = vld [vmem:[%s4667_s1 + $0x148] sm:$0xff]  ;;  %v2327_v43 = vpack.c.bf16 %v123_v30, %v119_v27  ;;  %v3009_v44 = vld [vmem:[%s4667_s1 + $0x140] sm:$0xff]  ;;  %v2351_v48 = vpack.c.bf16 %v109_v47, %v105_v46  ;;  %v104_v49 = vld [vmem:[%s4667_s1 + $0x90] sm:$0xff]  ;;  %v2329_v52 = vpack.c.bf16 %v122_v38, %v118_v31  ;;  %2350 = vmatpush1.bf16.msra.mxu1 %v2349_v42 }
   0xc   :  { %v131_v40 = vld [vmem:[%s4667_s1 + $0x168] sm:$0xff]  ;;  %v3014_v45 = vld [vmem:[%s4667_s1 + $0x160] sm:$0xff]  ;;  %v108_v50 = vld [vmem:[%s4667_s1 + $0xb0] sm:$0xff] }
   0xd   :  { %v48_v51 = vld [vmem:[%s4666_s0] sm:$0xf]  ;;  %v2331_v53 = vpack.c.bf16 %v131_v40, %v127_v39  ;;  %v3034_v54 = vld [vmem:[%s4667_s1 + $0x188] sm:$0xff]  ;;  %v2353_v56 = vpack.c.bf16 %v108_v50, %v104_v49  ;;  %v49_v57 = vld [vmem:[%s4666_s0 + $0x4] sm:$0xf]  ;;  %2352 = vmatprep.subr.bf16.mxu1 %v2351_v48  ;;  %v2333_v9 = vpack.c.bf16 %v3014_v45, %v3009_v44 }
   0xe   :  { %2322 = vmatpush1.bf16.msra.mxu0 %v2321_v21  ;;  %v3039_v55 = vld [vmem:[%s4667_s1 + $0x1a8] sm:$0xff]  ;;  %v53_v60 = vsel %vm52_vm0, %v48_v51, 0.0  ;;  %v60_v61 = vsel %vm52_vm0, %v49_v57, 0.0  ;;  %v113_v0 = vld [vmem:[%s4667_s1 + $0xd8] sm:$0xff]  ;;  %v112_v6 = vld [vmem:[%s4667_s1 + $0xd0] sm:$0xff] }
   0xf   :  { %2324 = vmatprep.subr.bf16.mxu0 %v2323_v25  ;;  %v50_v58 = vld [vmem:[%s4666_s0 + $0x8] sm:$0xf]  ;;  %v51_v59 = vld [vmem:[%s4666_s0 + $0xc] sm:$0xf]  ;;  %v117_v1 = vld [vmem:[%s4667_s1 + $0xf8] sm:$0xff]  ;;  %v54_v2 = vrot.slane %v53_v60, 4  ;;  %v2335_v20 = vpack.c.bf16 %v3039_v55, %v3034_v54  ;;  %2354 = vmatpush1.bf16.msra.mxu1 %v2353_v56 }
  0x10   :  { %v67_v62 = vsel %vm52_vm0, %v50_v58, 0.0  ;;  %v74_v63 = vsel %vm52_vm0, %v51_v59, 0.0  ;;  %v61_v3 = vrot.slane %v60_v61, 4  ;;  %v116_v8 = vld [vmem:[%s4667_s1 + $0xf0] sm:$0xff]  ;;  %v2355_v10 = vpack.c.bf16 %v117_v1, %v113_v0  ;;  %v121_v11 = vld [vmem:[%s4667_s1 + $0x118] sm:$0xff]  ;;  %v134_v13 = vld [vmem:[%s4667_s1 + $0x180] sm:$0xff] }
  0x11   :  { %v68_v4 = vrot.slane %v67_v62, 4  ;;  %v75_v5 = vrot.slane %v74_v63, 4  ;;  %v125_v12 = vld [vmem:[%s4667_s1 + $0x138] sm:$0xff]  ;;  %v138_v14 = vld [vmem:[%s4667_s1 + $0x1a0] sm:$0xff]  ;;  %v143_v15 = vld [vmem:[%s4667_s1 + $0x1c8] sm:$0xff]  ;;  %v55_v16 = vadd.f32 %v54_v2, %v53_v60  ;;  %v2357_v22 = vpack.c.bf16 %v116_v8, %v112_v6 }
  0x12   :  { %2326 = vmatpush1.bf16.msra.mxu0 %v2325_v37  ;;  %v62_v17 = vadd.f32 %v61_v3, %v60_v61  ;;  %v147_v21 = vld [vmem:[%s4667_s1 + $0x1e8] sm:$0xff]  ;;  %v2359_v23 = vpack.c.bf16 %v125_v12, %v121_v11  ;;  %v120_v24 = vld [vmem:[%s4667_s1 + $0x110] sm:$0xff]  ;;  %2356 = vmatprep.subr.bf16.mxu1 %v2355_v10  ;;  %v129_v30 = vld [vmem:[%s4667_s1 + $0x158] sm:$0xff]  ;;  %v2337_v32 = vpack.c.bf16 %v138_v14, %v134_v13 }
  0x13   :  { %2328 = vmatprep.subr.bf16.mxu0 %v2327_v43  ;;  %v69_v18 = vadd.f32 %v68_v4, %v67_v62  ;;  %v76_v19 = vadd.f32 %v75_v5, %v74_v63  ;;  %v124_v25 = vld [vmem:[%s4667_s1 + $0x130] sm:$0xff]  ;;  %v56_v26 = vrot.slane %v55_v16, 2  ;;  %v133_v31 = vld [vmem:[%s4667_s1 + $0x178] sm:$0xff]  ;;  %v142_v33 = vld [vmem:[%s4667_s1 + $0x1c0] sm:$0xff]  ;;  %v2339_v40 = vpack.c.bf16 %v147_v21, %v143_v15  ;;  %2358 = vmatpush1.bf16.msra.mxu1 %v2357_v22 }
  0x14   :  { %v63_v27 = vrot.slane %v62_v17, 2  ;;  %v146_v34 = vld [vmem:[%s4667_s1 + $0x1e0] sm:$0xff]  ;;  %v128_v39 = vld [vmem:[%s4667_s1 + $0x150] sm:$0xff]  ;;  %v2361_v41 = vpack.c.bf16 %v124_v25, %v120_v24  ;;  %v2363_v42 = vpack.c.bf16 %v133_v31, %v129_v30  ;;  %v137_v44 = vld [vmem:[%s4667_s1 + $0x198] sm:$0xff]  ;;  %2360 = vmatprep.subr.bf16.mxu1 %v2359_v23 }
  0x15   :  { %v70_v28 = vrot.slane %v69_v18, 2  ;;  %v77_v29 = vrot.slane %v76_v19, 2  ;;  %v57_v35 = vadd.f32 %v56_v26, %v55_v16  ;;  %v132_v43 = vld [vmem:[%s4667_s1 + $0x170] sm:$0xff]  ;;  %v141_v45 = vld [vmem:[%s4667_s1 + $0x1b8] sm:$0xff]  ;;  %v596_v50 = vld [vmem:[%s4671_s5 + $0x8] sm:$0xff] }
  0x16   :  { %2330 = vmatpush1.bf16.msra.mxu0 %v2329_v52  ;;  %v64_v36 = vadd.f32 %v63_v27, %v62_v17  ;;  %v600_v51 = vld [vmem:[%s4671_s5 + $0x28] sm:$0xff]  ;;  %v2341_v52 = vpack.c.bf16 %v146_v34, %v142_v33  ;;  %v2365_v57 = vpack.c.bf16 %v132_v43, %v128_v39  ;;  %v2367_v58 = vpack.c.bf16 %v141_v45, %v137_v44  ;;  %v136_v59 = vld [vmem:[%s4667_s1 + $0x190] sm:$0xff]  ;;  %v145_v61 = vld [vmem:[%s4667_s1 + $0x1d8] sm:$0xff] }
  0x17   :  { %2332 = vmatprep.subr.bf16.mxu0 %v2331_v53  ;;  %v71_v37 = vadd.f32 %v70_v28, %v69_v18  ;;  %v78_v38 = vadd.f32 %v77_v29, %v76_v19  ;;  %v58_v46 = vrot.slane %v57_v35, 1  ;;  %2362 = vmatpush1.bf16.msra.mxu1 %v2361_v41  ;;  %v140_v60 = vld [vmem:[%s4667_s1 + $0x1b0] sm:$0xff]  ;;  %v2375_v62 = vpack.c.bf16 %v600_v51, %v596_v50  ;;  %v595_v3 = vld [vmem:[%s4671_s5] sm:$0xff]  ;;  %v149_v5 = vld [vmem:[%s4667_s1 + $0x1f8] sm:$0xff] }
  0x18   :  { %v65_v47 = vrot.slane %v64_v36, 1  ;;  %2364 = vmatprep.subr.bf16.mxu1 %v2363_v42  ;;  %v599_v4 = vld [vmem:[%s4671_s5 + $0x20] sm:$0xff]  ;;  %v604_v6 = vld [vmem:[%s4671_s5 + $0x48] sm:$0xff]  ;;  %v2369_v11 = vpack.c.bf16 %v140_v60, %v136_v59  ;;  %v144_v12 = vld [vmem:[%s4667_s1 + $0x1d0] sm:$0xff] }
  0x19   :  { %v72_v48 = vrot.slane %v71_v37, 1  ;;  %v79_v49 = vrot.slane %v78_v38, 1  ;;  %v59_v53 = vadd.f32 %v58_v46, %v57_v35  ;;  %v608_v8 = vld [vmem:[%s4671_s5 + $0x68] sm:$0xff]  ;;  %v148_v13 = vld [vmem:[%s4667_s1 + $0x1f0] sm:$0xff]  ;;  %v2377_v14 = vpack.c.bf16 %v599_v4, %v595_v3 }
  0x1a   :  { %2334 = vmatpush1.bf16.msra.mxu0 %v2333_v9  ;;  %v66_v54 = vadd.f32 %v65_v47, %v64_v36 }
  0x1b   :  { %2336 = vmatprep.subr.bf16.mxu0 %v2335_v20  ;;  %v73_v55 = vadd.f32 %v72_v48, %v71_v37  ;;  %v80_v56 = vadd.f32 %v79_v49, %v78_v38  ;;  %v82_v63 = vmul.f32 0.25, %v59_v53  ;;  %2366 = vmatpush1.bf16.msra.mxu1 %v2365_v57 }
  0x1c   :  { %v83_v0 = vmul.f32 0.25, %v66_v54 }
  0x1d   :  { %v84_v1 = vmul.f32 0.25, %v73_v55  ;;  %v85_v2 = vmul.f32 0.25, %v80_v56 }
  0x1e   :  { %2338 = vmatpush1.bf16.msra.mxu0 %v2337_v32  ;;  %v177_v9 = vsel %vm176_vm1, %v83_v0, %v82_v63 }
  0x1f   :  { %2340 = vmatprep.subr.bf16.mxu0 %v2339_v40  ;;  %v179_v10 = vsel %vm178_vm2, %v84_v1, %v177_v9 }
  0x22   :  { %2342 = vmatpush1.bf16.msra.mxu0 %v2341_v52 }
  0x23   :  { %19 = vsyncpa [#allocation3], 0  ;;  %v181_v15 = vsel %vm180_vm3, %v85_v2, %v179_v10  ;;  %2368 = vmatprep.subr.bf16.mxu1 %v2367_v58  ;;  %v2371_v16 = vpack.c.bf16 %v149_v5, %v145_v61  ;;  %2376 = vmatprep.subr.bf16.mxu0 %v2375_v62  ;;  %v598_v17 = vld [vmem:[%s4671_s5 + $0x18] sm:$0xff]  ;;  %v2379_v18 = vpack.c.bf16 %v608_v8, %v604_v6  ;;  %v603_v19 = vld [vmem:[%s4671_s5 + $0x40] sm:$0xff]  ;;  %vm1426_vm8 = vcmask 31744   ;;  %s2838_s29 = smov [#allocation2]  }
  0x24   :  { %v607_v20 = vld [vmem:[%s4671_s5 + $0x60] sm:$0xff]  ;;  %v602_v21 = vld [vmem:[%s4671_s5 + $0x38] sm:$0xff]  ;;  %v612_v22 = vld [vmem:[%s4671_s5 + $0x88] sm:$0xff]  ;;  %2370 = vmatpush1.bf16.msra.mxu1 %v2369_v11  ;;  %v2373_v24 = vpack.c.bf16 %v148_v13, %v144_v12  ;;  %vm2837_vm9 = vmmov 0   ;;  %s2101_s30 = sshll.u32 %s2838_s29, 4  ;;  %vm2093_vm10 = vcmask 9216   ;;  %s2102_s30 = int_to_ptr.vmem [resolvable:$true] %s2101_s30 }
  0x25   :  { %v616_v23 = vld [vmem:[%s4671_s5 + $0xa8] sm:$0xff]  ;;  %248 = vmatmul.mubr.f32.vlgmr.msra.gmra.mrb[0].mxu0 %v181_v15  ;;  %v597_v25 = vld [vmem:[%s4671_s5 + $0x10] sm:$0xff]  ;;  %v2381_v26 = vpack.c.bf16 %v607_v20, %v603_v19  ;;  %2372 = vmatprep.subr.bf16.mxu1 %v2371_v16  ;;  %v2503_v27 = vpack.c.bf16 %v602_v21, %v598_v17  ;;  %v611_v30 = vld [vmem:[%s4671_s5 + $0x80] sm:$0xff]  ;;  %p2816_p1 = scmp.lt.s32.totalorder %s2102_s30, %s2102_s30 }
  0x26   :  { %2378 = vmatpush1.bf16.msra.mxu0 %v2377_v14  ;;  %v601_v28 = vld [vmem:[%s4671_s5 + $0x30] sm:$0xff]  ;;  %v2383_v29 = vpack.c.bf16 %v616_v23, %v612_v22  ;;  %v615_v31 = vld [vmem:[%s4671_s5 + $0xa0] sm:$0xff]  ;;  %v606_v32 = vld [vmem:[%s4671_s5 + $0x58] sm:$0xff] }
  0x27   :  { %2380 = vmatprep.subr.bf16.mxu0 %v2379_v18  ;;  %v610_v33 = vld [vmem:[%s4671_s5 + $0x78] sm:$0xff]  ;;  %v2505_v34 = vpack.c.bf16 %v601_v28, %v597_v25  ;;  %v2385_v35 = vpack.c.bf16 %v615_v31, %v611_v30  ;;  %v605_v37 = vld [vmem:[%s4671_s5 + $0x50] sm:$0xff]  ;;  %v620_v46 = vld [vmem:[%s4671_s5 + $0xc8] sm:$0xff] }
  0x28   :  { %2374 = vmatpush1.bf16.msra.mxu1 %v2373_v24  ;;  %v2507_v36 = vpack.c.bf16 %v610_v33, %v606_v32  ;;  %v609_v38 = vld [vmem:[%s4671_s5 + $0x70] sm:$0xff]  ;;  %v614_v39 = vld [vmem:[%s4671_s5 + $0x98] sm:$0xff]  ;;  %v624_v47 = vld [vmem:[%s4671_s5 + $0xe8] sm:$0xff] }
  0x29   :  { %2504 = vmatprep.subr.bf16.mxu1 %v2503_v27  ;;  %v618_v40 = vld [vmem:[%s4671_s5 + $0xb8] sm:$0xff]  ;;  %v2509_v41 = vpack.c.bf16 %v609_v38, %v605_v37  ;;  %v613_v43 = vld [vmem:[%s4671_s5 + $0x90] sm:$0xff]  ;;  %v2387_v49 = vpack.c.bf16 %v624_v47, %v620_v46  ;;  %v619_v51 = vld [vmem:[%s4671_s5 + $0xc0] sm:$0xff] }
  0x2a   :  { %2382 = vmatpush1.bf16.msra.mxu0 %v2381_v26  ;;  %v2511_v42 = vpack.c.bf16 %v618_v40, %v614_v39  ;;  %v617_v44 = vld [vmem:[%s4671_s5 + $0xb0] sm:$0xff]  ;;  %v622_v48 = vld [vmem:[%s4671_s5 + $0xd8] sm:$0xff]  ;;  %v623_v52 = vld [vmem:[%s4671_s5 + $0xe0] sm:$0xff] }
  0x2b   :  { %2384 = vmatprep.subr.bf16.mxu0 %v2383_v29  ;;  %319 = vmatmul.mubr.f32.vlgmr.msra.gmra.mrb[0].mxu1 %v181_v15  ;;  %v2513_v45 = vpack.c.bf16 %v617_v44, %v613_v43  ;;  %v626_v50 = vld [vmem:[%s4671_s5 + $0xf8] sm:$0xff]  ;;  %v2389_v54 = vpack.c.bf16 %v623_v52, %v619_v51  ;;  %v621_v55 = vld [vmem:[%s4671_s5 + $0xd0] sm:$0xff]  ;;  %v628_v58 = vld [vmem:[%s4671_s5 + $0x108] sm:$0xff] }
  0x2c   :  { %2506 = vmatpush1.bf16.msra.mxu1 %v2505_v34  ;;  %v2515_v53 = vpack.c.bf16 %v626_v50, %v622_v48  ;;  %v625_v56 = vld [vmem:[%s4671_s5 + $0xf0] sm:$0xff]  ;;  %v632_v59 = vld [vmem:[%s4671_s5 + $0x128] sm:$0xff]  ;;  %v630_v60 = vld [vmem:[%s4671_s5 + $0x118] sm:$0xff] }
  0x2d   :  { %2508 = vmatprep.subr.bf16.mxu1 %v2507_v36  ;;  %v2517_v57 = vpack.c.bf16 %v625_v56, %v621_v55  ;;  %v2391_v61 = vpack.c.bf16 %v632_v59, %v628_v58  ;;  %v634_v62 = vld [vmem:[%s4671_s5 + $0x138] sm:$0xff]  ;;  %v627_v63 = vld [vmem:[%s4671_s5 + $0x100] sm:$0xff]  ;;  %v629_v3 = vld [vmem:[%s4671_s5 + $0x110] sm:$0xff] }
  0x2e   :  { %2386 = vmatpush1.bf16.msra.mxu0 %v2385_v35  ;;  %v631_v0 = vld [vmem:[%s4671_s5 + $0x120] sm:$0xff]  ;;  %v2519_v1 = vpack.c.bf16 %v634_v62, %v630_v60  ;;  %v633_v4 = vld [vmem:[%s4671_s5 + $0x130] sm:$0xff]  ;;  %v636_v6 = vld [vmem:[%s4671_s5 + $0x148] sm:$0xff] }
  0x2f   :  { %2388 = vmatprep.subr.bf16.mxu0 %v2387_v49  ;;  %v2393_v2 = vpack.c.bf16 %v631_v0, %v627_v63  ;;  %v2521_v5 = vpack.c.bf16 %v633_v4, %v629_v3  ;;  %v640_v8 = vld [vmem:[%s4671_s5 + $0x168] sm:$0xff]  ;;  %v638_v9 = vld [vmem:[%s4671_s5 + $0x158] sm:$0xff]  ;;  %v635_v12 = vld [vmem:[%s4671_s5 + $0x140] sm:$0xff] }
  0x30   :  { %2510 = vmatpush1.bf16.msra.mxu1 %v2509_v41  ;;  %v2395_v10 = vpack.c.bf16 %v640_v8, %v636_v6  ;;  %v642_v11 = vld [vmem:[%s4671_s5 + $0x178] sm:$0xff]  ;;  %v639_v13 = vld [vmem:[%s4671_s5 + $0x160] sm:$0xff]  ;;  %v637_v16 = vld [vmem:[%s4671_s5 + $0x150] sm:$0xff] }
  0x31   :  { %2512 = vmatprep.subr.bf16.mxu1 %v2511_v42  ;;  %v2523_v14 = vpack.c.bf16 %v642_v11, %v638_v9  ;;  %v2397_v15 = vpack.c.bf16 %v639_v13, %v635_v12  ;;  %v641_v17 = vld [vmem:[%s4671_s5 + $0x170] sm:$0xff]  ;;  %v644_v19 = vld [vmem:[%s4671_s5 + $0x188] sm:$0xff]  ;;  %v646_v21 = vld [vmem:[%s4671_s5 + $0x198] sm:$0xff] }
  0x32   :  { %2390 = vmatpush1.bf16.msra.mxu0 %v2389_v54  ;;  %v2525_v18 = vpack.c.bf16 %v641_v17, %v637_v16  ;;  %v648_v20 = vld [vmem:[%s4671_s5 + $0x1a8] sm:$0xff]  ;;  %v650_v23 = vld [vmem:[%s4671_s5 + $0x1b8] sm:$0xff]  ;;  %v643_v24 = vld [vmem:[%s4671_s5 + $0x180] sm:$0xff] }
  0x33   :  { %2392 = vmatprep.subr.bf16.mxu0 %v2391_v61  ;;  %v2399_v22 = vpack.c.bf16 %v648_v20, %v644_v19  ;;  %v647_v25 = vld [vmem:[%s4671_s5 + $0x1a0] sm:$0xff]  ;;  %v2527_v26 = vpack.c.bf16 %v650_v23, %v646_v21  ;;  %v645_v28 = vld [vmem:[%s4671_s5 + $0x190] sm:$0xff]  ;;  %v652_v31 = vld [vmem:[%s4671_s5 + $0x1c8] sm:$0xff] }
  0x34   :  { %2514 = vmatpush1.bf16.msra.mxu1 %v2513_v45  ;;  %v2401_v27 = vpack.c.bf16 %v647_v25, %v643_v24  ;;  %v649_v29 = vld [vmem:[%s4671_s5 + $0x1b0] sm:$0xff]  ;;  %v656_v32 = vld [vmem:[%s4671_s5 + $0x1e8] sm:$0xff]  ;;  %v654_v33 = vld [vmem:[%s4671_s5 + $0x1d8] sm:$0xff] }
  0x35   :  { %2516 = vmatprep.subr.bf16.mxu1 %v2515_v53  ;;  %v2529_v30 = vpack.c.bf16 %v649_v29, %v645_v28  ;;  %v2403_v34 = vpack.c.bf16 %v656_v32, %v652_v31  ;;  %v658_v35 = vld [vmem:[%s4671_s5 + $0x1f8] sm:$0xff]  ;;  %v651_v36 = vld [vmem:[%s4671_s5 + $0x1c0] sm:$0xff]  ;;  %v653_v40 = vld [vmem:[%s4671_s5 + $0x1d0] sm:$0xff] }
  0x36   :  { %2394 = vmatpush1.bf16.msra.mxu0 %v2393_v2  ;;  %v655_v37 = vld [vmem:[%s4671_s5 + $0x1e0] sm:$0xff]  ;;  %v2531_v38 = vpack.c.bf16 %v658_v35, %v654_v33  ;;  %v657_v41 = vld [vmem:[%s4671_s5 + $0x1f0] sm:$0xff]  ;;  %v660_v43 = vld [vmem:[%s4671_s5 + $0x208] sm:$0xff] }
  0x37   :  { %2396 = vmatprep.subr.bf16.mxu0 %v2395_v10  ;;  %v2405_v39 = vpack.c.bf16 %v655_v37, %v651_v36  ;;  %v2533_v42 = vpack.c.bf16 %v657_v41, %v653_v40  ;;  %v664_v44 = vld [vmem:[%s4671_s5 + $0x228] sm:$0xff]  ;;  %v662_v45 = vld [vmem:[%s4671_s5 + $0x218] sm:$0xff]  ;;  %v659_v49 = vld [vmem:[%s4671_s5 + $0x200] sm:$0xff] }
  0x38   :  { %2518 = vmatpush1.bf16.msra.mxu1 %v2517_v57  ;;  %v2407_v46 = vpack.c.bf16 %v664_v44, %v660_v43  ;;  %v666_v47 = vld [vmem:[%s4671_s5 + $0x238] sm:$0xff]  ;;  %v663_v50 = vld [vmem:[%s4671_s5 + $0x220] sm:$0xff]  ;;  %v661_v51 = vld [vmem:[%s4671_s5 + $0x210] sm:$0xff] }
  0x39   :  { %2520 = vmatprep.subr.bf16.mxu1 %v2519_v1  ;;  %v2535_v48 = vpack.c.bf16 %v666_v47, %v662_v45  ;;  %v2409_v52 = vpack.c.bf16 %v663_v50, %v659_v49  ;;  %v665_v53 = vld [vmem:[%s4671_s5 + $0x230] sm:$0xff]  ;;  %v668_v55 = vld [vmem:[%s4671_s5 + $0x248] sm:$0xff]  ;;  %v670_v57 = vld [vmem:[%s4671_s5 + $0x258] sm:$0xff] }
  0x3a   :  { %2398 = vmatpush1.bf16.msra.mxu0 %v2397_v15  ;;  %v2537_v54 = vpack.c.bf16 %v665_v53, %v661_v51  ;;  %v672_v56 = vld [vmem:[%s4671_s5 + $0x268] sm:$0xff]  ;;  %v674_v59 = vld [vmem:[%s4671_s5 + $0x278] sm:$0xff]  ;;  %v667_v60 = vld [vmem:[%s4671_s5 + $0x240] sm:$0xff] }
  0x3b   :  { %2400 = vmatprep.subr.bf16.mxu0 %v2399_v22  ;;  %v2411_v58 = vpack.c.bf16 %v672_v56, %v668_v55  ;;  %v671_v61 = vld [vmem:[%s4671_s5 + $0x260] sm:$0xff]  ;;  %v2539_v62 = vpack.c.bf16 %v674_v59, %v670_v57  ;;  %v669_v0 = vld [vmem:[%s4671_s5 + $0x250] sm:$0xff]  ;;  %v676_v3 = vld [vmem:[%s4671_s5 + $0x288] sm:$0xff] }
  0x3c   :  { %2522 = vmatpush1.bf16.msra.mxu1 %v2521_v5  ;;  %v2413_v63 = vpack.c.bf16 %v671_v61, %v667_v60  ;;  %v673_v1 = vld [vmem:[%s4671_s5 + $0x270] sm:$0xff]  ;;  %v680_v4 = vld [vmem:[%s4671_s5 + $0x2a8] sm:$0xff]  ;;  %v678_v5 = vld [vmem:[%s4671_s5 + $0x298] sm:$0xff] }
  0x3d   :  { %2524 = vmatprep.subr.bf16.mxu1 %v2523_v14  ;;  %v2541_v2 = vpack.c.bf16 %v673_v1, %v669_v0  ;;  %v2415_v6 = vpack.c.bf16 %v680_v4, %v676_v3  ;;  %v682_v8 = vld [vmem:[%s4671_s5 + $0x2b8] sm:$0xff]  ;;  %v675_v9 = vld [vmem:[%s4671_s5 + $0x280] sm:$0xff]  ;;  %v677_v13 = vld [vmem:[%s4671_s5 + $0x290] sm:$0xff] }
  0x3e   :  { %2402 = vmatpush1.bf16.msra.mxu0 %v2401_v27  ;;  %v679_v10 = vld [vmem:[%s4671_s5 + $0x2a0] sm:$0xff]  ;;  %v2543_v11 = vpack.c.bf16 %v682_v8, %v678_v5  ;;  %v681_v14 = vld [vmem:[%s4671_s5 + $0x2b0] sm:$0xff]  ;;  %v684_v16 = vld [vmem:[%s4671_s5 + $0x2c8] sm:$0xff] }
  0x3f   :  { %2404 = vmatprep.subr.bf16.mxu0 %v2403_v34  ;;  %v2417_v12 = vpack.c.bf16 %v679_v10, %v675_v9  ;;  %v2545_v15 = vpack.c.bf16 %v681_v14, %v677_v13  ;;  %v688_v17 = vld [vmem:[%s4671_s5 + $0x2e8] sm:$0xff]  ;;  %v690_v20 = vld [vmem:[%s4671_s5 + $0x2f8] sm:$0xff]  ;;  %v683_v21 = vld [vmem:[%s4671_s5 + $0x2c0] sm:$0xff] }
  0x40   :  { %2526 = vmatpush1.bf16.msra.mxu1 %v2525_v18  ;;  %v686_v18 = vld [vmem:[%s4671_s5 + $0x2d8] sm:$0xff]  ;;  %v2419_v19 = vpack.c.bf16 %v688_v17, %v684_v16  ;;  %v687_v22 = vld [vmem:[%s4671_s5 + $0x2e0] sm:$0xff]  ;;  %v685_v25 = vld [vmem:[%s4671_s5 + $0x2d0] sm:$0xff] }
  0x41   :  { %2528 = vmatprep.subr.bf16.mxu1 %v2527_v26  ;;  %v2547_v23 = vpack.c.bf16 %v690_v20, %v686_v18  ;;  %v2421_v24 = vpack.c.bf16 %v687_v22, %v683_v21  ;;  %v689_v26 = vld [vmem:[%s4671_s5 + $0x2f0] sm:$0xff]  ;;  %v692_v28 = vld [vmem:[%s4671_s5 + $0x308] sm:$0xff]  ;;  %v698_v32 = vld [vmem:[%s4671_s5 + $0x338] sm:$0xff] }
  0x42   :  { %2406 = vmatpush1.bf16.msra.mxu0 %v2405_v39  ;;  %v2549_v27 = vpack.c.bf16 %v689_v26, %v685_v25  ;;  %v696_v29 = vld [vmem:[%s4671_s5 + $0x328] sm:$0xff]  ;;  %v691_v33 = vld [vmem:[%s4671_s5 + $0x300] sm:$0xff]  ;;  %v693_v37 = vld [vmem:[%s4671_s5 + $0x310] sm:$0xff] }
  0x43   :  { %2408 = vmatprep.subr.bf16.mxu0 %v2407_v46  ;;  %v2423_v31 = vpack.c.bf16 %v696_v29, %v692_v28  ;;  %v695_v34 = vld [vmem:[%s4671_s5 + $0x320] sm:$0xff]  ;;  %v700_v40 = vld [vmem:[%s4671_s5 + $0x348] sm:$0xff]  ;;  %v706_v44 = vld [vmem:[%s4671_s5 + $0x378] sm:$0xff] }
  0x44   :  { %2530 = vmatpush1.bf16.msra.mxu1 %v2529_v30  ;;  %v694_v30 = vld [vmem:[%s4671_s5 + $0x318] sm:$0xff]  ;;  %v2425_v36 = vpack.c.bf16 %v695_v34, %v691_v33  ;;  %v704_v41 = vld [vmem:[%s4671_s5 + $0x368] sm:$0xff]  ;;  %v699_v45 = vld [vmem:[%s4671_s5 + $0x340] sm:$0xff] }
  0x45   :  { %2532 = vmatprep.subr.bf16.mxu1 %v2531_v38  ;;  %v2551_v35 = vpack.c.bf16 %v698_v32, %v694_v30  ;;  %v697_v38 = vld [vmem:[%s4671_s5 + $0x330] sm:$0xff]  ;;  %v2427_v43 = vpack.c.bf16 %v704_v41, %v700_v40  ;;  %v703_v46 = vld [vmem:[%s4671_s5 + $0x360] sm:$0xff]  ;;  %v712_v53 = vld [vmem:[%s4671_s5 + $0x3a8] sm:$0xff] }
  0x46   :  { %2410 = vmatpush1.bf16.msra.mxu0 %v2409_v52  ;;  %v2553_v39 = vpack.c.bf16 %v697_v38, %v693_v37  ;;  %v701_v49 = vld [vmem:[%s4671_s5 + $0x350] sm:$0xff]  ;;  %v708_v52 = vld [vmem:[%s4671_s5 + $0x388] sm:$0xff]  ;;  %v714_v56 = vld [vmem:[%s4671_s5 + $0x3b8] sm:$0xff] }
  0x47   :  { %2412 = vmatprep.subr.bf16.mxu0 %v2411_v58  ;;  %v705_v50 = vld [vmem:[%s4671_s5 + $0x370] sm:$0xff]  ;;  %v2431_v55 = vpack.c.bf16 %v712_v53, %v708_v52  ;;  %v707_v57 = vld [vmem:[%s4671_s5 + $0x380] sm:$0xff]  ;;  %v716_v0 = vld [vmem:[%s4671_s5 + $0x3c8] sm:$0xff] }
  0x48   :  { %2534 = vmatpush1.bf16.msra.mxu1 %v2533_v42  ;;  %v702_v42 = vld [vmem:[%s4671_s5 + $0x358] sm:$0xff]  ;;  %v2557_v51 = vpack.c.bf16 %v705_v50, %v701_v49  ;;  %v711_v58 = vld [vmem:[%s4671_s5 + $0x3a0] sm:$0xff]  ;;  %v709_v61 = vld [vmem:[%s4671_s5 + $0x390] sm:$0xff] }
  0x49   :  { %2536 = vmatprep.subr.bf16.mxu1 %v2535_v48  ;;  %v2555_v47 = vpack.c.bf16 %v706_v44, %v702_v42  ;;  %v2429_v48 = vpack.c.bf16 %v703_v46, %v699_v45  ;;  %v2433_v60 = vpack.c.bf16 %v711_v58, %v707_v57  ;;  %v720_v1 = vld [vmem:[%s4671_s5 + $0x3e8] sm:$0xff]  ;;  %v722_v4 = vld [vmem:[%s4671_s5 + $0x3f8] sm:$0xff]  ;;  %v715_v5 = vld [vmem:[%s4671_s5 + $0x3c0] sm:$0xff] }
  0x4a   :  { %2414 = vmatpush1.bf16.msra.mxu0 %v2413_v63  ;;  %v2435_v3 = vpack.c.bf16 %v720_v1, %v716_v0  ;;  %v717_v10 = vld [vmem:[%s4671_s5 + $0x3d0] sm:$0xff]  ;;  %v724_v13 = vld [vmem:[%s4671_s5 + $0x408] sm:$0xff]  ;;  %v730_v17 = vld [vmem:[%s4671_s5 + $0x438] sm:$0xff] }
  0x4b   :  { %2416 = vmatprep.subr.bf16.mxu0 %v2415_v6  ;;  %v719_v6 = vld [vmem:[%s4671_s5 + $0x3e0] sm:$0xff]  ;;  %v728_v14 = vld [vmem:[%s4671_s5 + $0x428] sm:$0xff] }
  0x4c   :  { %2538 = vmatpush1.bf16.msra.mxu1 %v2537_v54  ;;  %v710_v54 = vld [vmem:[%s4671_s5 + $0x398] sm:$0xff]  ;;  %v2437_v9 = vpack.c.bf16 %v719_v6, %v715_v5  ;;  %v2439_v16 = vpack.c.bf16 %v728_v14, %v724_v13  ;;  %v3543_v22 = vld [vmem:[%s4668_s2] sm:$0xf] }
  0x4d   :  { %2540 = vmatprep.subr.bf16.mxu1 %v2539_v62  ;;  %v2559_v59 = vpack.c.bf16 %v714_v56, %v710_v54  ;;  %v713_v62 = vld [vmem:[%s4671_s5 + $0x3b0] sm:$0xff] }
  0x4e   :  { %2418 = vmatpush1.bf16.msra.mxu0 %v2417_v12  ;;  %v2561_v63 = vpack.c.bf16 %v713_v62, %v709_v61 }
  0x4f   :  { %2420 = vmatprep.subr.bf16.mxu0 %v2419_v19  ;;  %v152_v19 = vlaneseq }
  0x50   :  { %2542 = vmatpush1.bf16.msra.mxu1 %v2541_v2  ;;  %v718_v2 = vld [vmem:[%s4671_s5 + $0x3d8] sm:$0xff] }
  0x51   :  { %2544 = vmatprep.subr.bf16.mxu1 %v2543_v11  ;;  %v2563_v8 = vpack.c.bf16 %v722_v4, %v718_v2  ;;  %v721_v11 = vld [vmem:[%s4671_s5 + $0x3f0] sm:$0xff]  ;;  %v3535_v20 = vshrl.u32 %v152_v19, 7 }
  0x52   :  { %2422 = vmatpush1.bf16.msra.mxu0 %v2421_v24  ;;  %v2565_v12 = vpack.c.bf16 %v721_v11, %v717_v10 }
  0x53   :  { %2424 = vmatprep.subr.bf16.mxu0 %v2423_v31  ;;  %v3538_v21 = vsub.s32 0, %v3535_v20  ;;  %vm329_vm4 = vcmp.lt.s32.totalorder %v3535_v20, 2  ;;  %v3554_v26 = vsub.s32 2, %v3535_v20  ;;  %v3564_v32 = vsub.s32 3, %v3535_v20 }
  0x54   :  { %2546 = vmatpush1.bf16.msra.mxu1 %v2545_v15  ;;  %v726_v15 = vld [vmem:[%s4671_s5 + $0x418] sm:$0xff] }
  0x55   :  { %2548 = vmatprep.subr.bf16.mxu1 %v2547_v23  ;;  %v2567_v18 = vpack.c.bf16 %v730_v17, %v726_v15  ;;  %v3546_v23 = vsub.s32 1, %v3535_v20  ;;  %v155_v24 = vrot.slane %v3543_v22, %v3538_v21 }
  0x56   :  { %2426 = vmatpush1.bf16.msra.mxu0 %v2425_v36  ;;  %v163_v36 = vrot.slane %v3543_v22, %v3554_v26 }
  0x57   :  { %2428 = vmatprep.subr.bf16.mxu0 %v2427_v43  ;;  %v159_v25 = vrot.slane %v3543_v22, %v3546_v23 }
  0x58   :  { %2550 = vmatpush1.bf16.msra.mxu1 %v2549_v27  ;;  %v3557_v27 = vsel %vm329_vm4, 1.0, %v2835_v7 }
  0x59   :  { %2552 = vmatprep.subr.bf16.mxu1 %v2551_v35 }
  0x5a   :  { %2430 = vmatpush1.bf16.msra.mxu0 %v2429_v48 }
  0x5b   :  { %2432 = vmatprep.subr.bf16.mxu0 %v2431_v55 }
  0x5c   :  { %2554 = vmatpush1.bf16.msra.mxu1 %v2553_v39 }
  0x5d   :  { %2556 = vmatprep.subr.bf16.mxu1 %v2555_v47 }
  0x5e   :  { %2434 = vmatpush1.bf16.msra.mxu0 %v2433_v60 }
  0x5f   :  { %2436 = vmatprep.subr.bf16.mxu0 %v2435_v3 }
  0x60   :  { %2558 = vmatpush1.bf16.msra.mxu1 %v2557_v51 }
  0x61   :  { %2560 = vmatprep.subr.bf16.mxu1 %v2559_v59 }
  0x62   :  { %2438 = vmatpush1.bf16.msra.mxu0 %v2437_v9 }
  0x63   :  { %2440 = vmatprep.subr.bf16.mxu0 %v2439_v16 }
  0x64   :  { %2562 = vmatpush1.bf16.msra.mxu1 %v2561_v63 }
  0x65   :  { %2564 = vmatprep.subr.bf16.mxu1 %v2563_v8 }
  0x68   :  { %2566 = vmatpush1.bf16.msra.mxu1 %v2565_v12 }
  0x69   :  { %2568 = vmatprep.subr.bf16.mxu1 %v2567_v18 }
  0xf8   :  { %v249_v28 = vpop.f32.mrb[0].mxu0 }
  0xf9   :  { %v3559_v29 = vadd.f32 %v249_v28, %v155_v24  ;;  %v251_v30 = vpop.f32.mrb[1].mxu0 }
  0xfa   :  { %v3561_v31 = vadd.f32 %v251_v30, %v159_v25  ;;  %v167_v30 = vrot.slane %v3543_v22, %v3564_v32 }
  0xfb   :  { %v332_v33 = vmul.f32 %v3557_v27, %v3559_v29  ;;  %v364_v34 = vmul.f32 %v3559_v29, %v3559_v29  ;;  %v400_v35 = vsel %vm52_vm0, %v3559_v29, 0.0 }
  0xfc   :  { %v401_v37 = vrot.slane %v400_v35, 4  ;;  %v333_v38 = vmul.f32 %v3557_v27, %v3561_v31  ;;  %v365_v39 = vmul.f32 %v3561_v31, %v3561_v31  ;;  %v407_v40 = vsel %vm52_vm0, %v3561_v31, 0.0 }
  0xfd   :  { %v336_v41 = vsel %vm52_vm0, %v332_v33, 0.0  ;;  %v368_v42 = vmul.f32 %v3557_v27, %v364_v34  ;;  %v428_v43 = vsel %vm52_vm0, %v364_v34, 0.0  ;;  %v408_v44 = vrot.slane %v407_v40, 4 }
  0xfe   :  { %v337_v45 = vrot.slane %v336_v41, 4  ;;  %v402_v46 = vadd.f32 %v401_v37, %v400_v35  ;;  %v429_v47 = vrot.slane %v428_v43, 4  ;;  %v343_v48 = vsel %vm52_vm0, %v333_v38, 0.0  ;;  %v320_v57 = vpop.f32.mrb[0].mxu1 }
  0xff   :  { %v372_v49 = vsel %vm52_vm0, %v368_v42, 0.0  ;;  %v344_v50 = vrot.slane %v343_v48, 4  ;;  %v369_v51 = vmul.f32 %v3557_v27, %v365_v39  ;;  %v409_v52 = vadd.f32 %v408_v44, %v407_v40  ;;  %v322_v62 = vpop.f32.mrb[1].mxu1 }
 0x100   :  { %v338_v53 = vadd.f32 %v337_v45, %v336_v41  ;;  %v373_v54 = vrot.slane %v372_v49, 4  ;;  %v403_v55 = vrot.slane %v402_v46, 2  ;;  %v430_v56 = vadd.f32 %v429_v47, %v428_v43 }
 0x101   :  { %v345_v58 = vadd.f32 %v344_v50, %v343_v48  ;;  %v379_v59 = vsel %vm52_vm0, %v369_v51, 0.0  ;;  %v410_v60 = vrot.slane %v409_v52, 2  ;;  %v435_v61 = vsel %vm52_vm0, %v365_v39, 0.0 }
 0x102   :  { %v339_v63 = vrot.slane %v338_v53, 2  ;;  %v374_v0 = vadd.f32 %v373_v54, %v372_v49  ;;  %v404_v1 = vadd.f32 %v403_v55, %v402_v46  ;;  %v431_v2 = vrot.slane %v430_v56, 2 }
 0x103   :  { %v346_v3 = vrot.slane %v345_v58, 2  ;;  %v380_v4 = vrot.slane %v379_v59, 4  ;;  %v411_v5 = vadd.f32 %v410_v60, %v409_v52  ;;  %v436_v6 = vrot.slane %v435_v61, 4 }
 0x104   :  { %v340_v8 = vadd.f32 %v339_v63, %v338_v53  ;;  %v375_v9 = vrot.slane %v374_v0, 2  ;;  %v405_v10 = vrot.slane %v404_v1, 1  ;;  %v432_v11 = vadd.f32 %v431_v2, %v430_v56 }
 0x105   :  { %v347_v12 = vadd.f32 %v346_v3, %v345_v58  ;;  %v381_v13 = vadd.f32 %v380_v4, %v379_v59  ;;  %v412_v14 = vrot.slane %v411_v5, 1  ;;  %v437_v15 = vadd.f32 %v436_v6, %v435_v61 }
 0x106   :  { %v341_v16 = vrot.slane %v340_v8, 1  ;;  %v376_v17 = vadd.f32 %v375_v9, %v374_v0  ;;  %v433_v18 = vrot.slane %v432_v11, 1  ;;  %v406_v35 = vadd.f32 %v405_v10, %v404_v1 }
 0x107   :  { %v348_v24 = vrot.slane %v347_v12, 1  ;;  %v382_v25 = vrot.slane %v381_v13, 2  ;;  %v438_v28 = vrot.slane %v437_v15, 2  ;;  %v3590_v37 = vadd.f32 %v320_v57, %v163_v36 }
 0x108   :  { %v342_v33 = vadd.f32 %v341_v16, %v340_v8  ;;  %v377_v34 = vrot.slane %v376_v17, 1  ;;  %v413_v40 = vadd.f32 %v412_v14, %v411_v5  ;;  %v434_v43 = vadd.f32 %v433_v18, %v432_v11 }
 0x109   :  { %v349_v38 = vadd.f32 %v348_v24, %v347_v12  ;;  %v383_v39 = vadd.f32 %v382_v25, %v381_v13  ;;  %v439_v41 = vadd.f32 %v438_v28, %v437_v15  ;;  %v334_v22 = vmul.f32 %v3557_v27, %v3590_v37 }
 0x10a   :  { %v378_v42 = vadd.f32 %v377_v34, %v376_v17  ;;  %v3592_v44 = vmul.f32 0.5, %v342_v33  ;;  %v460_v45 = vsub.f32 %v406_v35, %v342_v33  ;;  %v3607_v61 = vsub.f32 1.0, %v3557_v27 }
 0x10b   :  { %v384_v46 = vrot.slane %v383_v39, 1  ;;  %v440_v47 = vrot.slane %v439_v41, 1  ;;  %v461_v48 = vsub.f32 %v413_v40, %v349_v38  ;;  %v3600_v54 = vmul.f32 0.5, %v349_v38 }
 0x10c   :  { %v3596_v49 = vmul.f32 0.5, %v460_v45  ;;  %v468_v50 = vmul.f32 0.5, %v378_v42  ;;  %v472_v36 = vmul.f32 %v3592_v44, %v3592_v44  ;;  %v480_v51 = vsub.f32 %v434_v43, %v378_v42 }
 0x10d   :  { %v385_v52 = vadd.f32 %v384_v46, %v383_v39  ;;  %v441_v53 = vadd.f32 %v440_v47, %v439_v41  ;;  %v3602_v55 = vmul.f32 0.5, %v461_v48  ;;  %v3611_v0 = vadd.f32 %v322_v62, %v167_v30 }
 0x10e   :  { %v484_v56 = vmul.f32 0.5, %v480_v51  ;;  %v488_v57 = vmul.f32 %v3596_v49, %v3596_v49  ;;  %v476_v58 = vsub.f32 %v468_v50, %v472_v36  ;;  %v3617_v2 = vmul.f32 %v3600_v54, %v3600_v54 }
 0x10f   :  { %v481_v59 = vsub.f32 %v441_v53, %v385_v52  ;;  %v489_v63 = vmul.f32 %v3602_v55, %v3602_v55  ;;  %v3613_v1 = vmul.f32 0.5, %v385_v52  ;;  %v350_v4 = vsel %vm52_vm0, %v334_v22, 0.0 }
 0x110   :  { %v492_v60 = vsub.f32 %v484_v56, %v488_v57  ;;  %v351_v6 = vrot.slane %v350_v4, 4  ;;  %v366_v8 = vmul.f32 %v3590_v37, %v3590_v37  ;;  %v509_v9 = vmul.f32 %v3557_v27, %v476_v58 }
 0x111   :  { %v485_v3 = vmul.f32 0.5, %v481_v59  ;;  %v414_v62 = vsel %vm52_vm0, %v3590_v37, 0.0  ;;  %v477_v14 = vsub.f32 %v3613_v1, %v3617_v2  ;;  %v335_v16 = vmul.f32 %v3557_v27, %v3611_v0 }
 0x112   :  { %v513_v5 = vmul.f32 %v3607_v61, %v492_v60  ;;  %v352_v11 = vadd.f32 %v351_v6, %v350_v4  ;;  %v370_v12 = vmul.f32 %v3557_v27, %v366_v8  ;;  %v415_v13 = vrot.slane %v414_v62, 4 }
 0x113   :  { %v493_v10 = vsub.f32 %v485_v3, %v489_v63  ;;  %v442_v15 = vsel %vm52_vm0, %v366_v8, 0.0  ;;  %v357_v33 = vsel %vm52_vm0, %v335_v16, 0.0  ;;  %v367_v34 = vmul.f32 %v3611_v0, %v3611_v0 }
 0x114   :  { %v517_v17 = vadd.f32 %v513_v5, %v509_v9  ;;  %v353_v18 = vrot.slane %v352_v11, 2  ;;  %v386_v24 = vsel %vm52_vm0, %v370_v12, 0.0  ;;  %v416_v25 = vadd.f32 %v415_v13, %v414_v62 }
 0x115   :  { %v387_v28 = vrot.slane %v386_v24, 4  ;;  %v443_v30 = vrot.slane %v442_v15, 4  ;;  %v514_v35 = vmul.f32 %v3607_v61, %v493_v10  ;;  %v358_v40 = vrot.slane %v357_v33, 4 }
 0x116   :  { %v354_v38 = vadd.f32 %v353_v18, %v352_v11  ;;  %v417_v39 = vrot.slane %v416_v25, 2  ;;  %v371_v43 = vmul.f32 %v3557_v27, %v367_v34  ;;  %v421_v45 = vsel %vm52_vm0, %v3611_v0, 0.0 }
 0x117   :  { %v388_v41 = vadd.f32 %v387_v28, %v386_v24  ;;  %v444_v42 = vadd.f32 %v443_v30, %v442_v15  ;;  %v521_v46 = vmax.f32 %v517_v17, 0.0  ;;  %v359_v22 = vadd.f32 %v358_v40, %v357_v33 }
 0x118   :  { %v355_v47 = vrot.slane %v354_v38, 1  ;;  %v418_v48 = vadd.f32 %v417_v39, %v416_v25  ;;  %v393_v51 = vsel %vm52_vm0, %v371_v43, 0.0  ;;  %v422_v52 = vrot.slane %v421_v45, 4 }
 0x119   :  { %v389_v50 = vrot.slane %v388_v41, 2  ;;  %v445_v36 = vrot.slane %v444_v42, 2  ;;  %v360_v57 = vrot.slane %v359_v22, 2  ;;  %v394_v58 = vrot.slane %v393_v51, 4 }
 0x11a   :  { %v356_v53 = vadd.f32 %v355_v47, %v354_v38  ;;  %v419_v56 = vrot.slane %v418_v48, 1  ;;  %v423_v63 = vadd.f32 %v422_v52, %v421_v45  ;;  %v449_v1 = vsel %vm52_vm0, %v367_v34, 0.0 }
 0x11b   :  { %v390_v59 = vadd.f32 %v389_v50, %v388_v41  ;;  %v446_v60 = vadd.f32 %v445_v36, %v444_v42  ;;  %v361_v4 = vadd.f32 %v360_v57, %v359_v22  ;;  %v395_v5 = vadd.f32 %v394_v58, %v393_v51 }
 0x11c   :  { %v420_v2 = vadd.f32 %v419_v56, %v418_v48  ;;  %v458_v3 = vmul.f32 0.5, %v356_v53  ;;  %v424_v9 = vrot.slane %v423_v63, 2  ;;  %v450_v62 = vrot.slane %v449_v1, 4 }
 0x11d   :  { %v391_v6 = vrot.slane %v390_v59, 1  ;;  %v447_v8 = vrot.slane %v446_v60, 1  ;;  %v529_v10 = vadd.f32 1e-05, %v521_v46  ;;  %v362_v13 = vrot.slane %v361_v4, 1 }
 0x11e   :  { %v462_v11 = vsub.f32 %v420_v2, %v356_v53  ;;  %v474_v12 = vmul.f32 %v458_v3, %v458_v3  ;;  %v396_v17 = vrot.slane %v395_v5, 2  ;;  %v425_v18 = vadd.f32 %v424_v9, %v423_v63 }
 0x11f   :  { %v392_v15 = vadd.f32 %v391_v6, %v390_v59  ;;  %v448_v16 = vadd.f32 %v447_v8, %v446_v60  ;;  %v510_v24 = vmul.f32 %v3557_v27, %v477_v14  ;;  %v363_v28 = vadd.f32 %v362_v13, %v361_v4  ;;  %v3657_v13 = vld [vmem:[%s4669_s3] sm:$0xf] }
 0x120   :  { %v466_v25 = vmul.f32 0.5, %v462_v11  ;;  %v451_v30 = vadd.f32 %v450_v62, %v449_v1  ;;  %v397_v38 = vadd.f32 %v396_v17, %v395_v5  ;;  %v426_v39 = vrot.slane %v425_v18, 1 }
 0x121   :  { %v470_v33 = vmul.f32 0.5, %v392_v15  ;;  %v482_v34 = vsub.f32 %v448_v16, %v392_v15  ;;  %v459_v42 = vmul.f32 0.5, %v363_v28  ;;  %v518_v43 = vadd.f32 %v514_v35, %v510_v24 }
 0x122   :  { %v490_v40 = vmul.f32 %v466_v25, %v466_v25  ;;  %v452_v41 = vrot.slane %v451_v30, 2  ;;  %2795 = vrsqrt.f32 %v529_v10  ;;  %v398_v47 = vrot.slane %v397_v38, 1 }
 0x123   :  { %v478_v45 = vsub.f32 %v470_v33, %v474_v12  ;;  %v486_v46 = vmul.f32 0.5, %v482_v34  ;;  %v427_v48 = vadd.f32 %v426_v39, %v425_v18  ;;  %v501_v14 = vmul.f32 %v3607_v61, %v3596_v49 }
 0x124   :  { %v453_v22 = vadd.f32 %v452_v41, %v451_v30  ;;  %v399_v51 = vadd.f32 %v398_v47, %v397_v38  ;;  %v475_v56 = vmul.f32 %v459_v42, %v459_v42  ;;  %v522_v57 = vmax.f32 %v518_v43, 0.0 }
 0x125   :  { %v494_v50 = vsub.f32 %v486_v46, %v490_v40  ;;  %v511_v36 = vmul.f32 %v3557_v27, %v478_v45  ;;  %v463_v53 = vsub.f32 %v427_v48, %v363_v28  ;;  %v496_v35 = vmul.f32 %v3557_v27, %v3592_v44  ;;  %v3668_v28 = vld [vmem:[%s4670_s4] sm:$0xf] }
 0x126   :  { %v454_v52 = vrot.slane %v453_v22, 1  ;;  %v471_v59 = vmul.f32 0.5, %v399_v51  ;;  %v530_v1 = vadd.f32 1e-05, %v522_v57  ;;  %v502_v8 = vmul.f32 %v3607_v61, %v3602_v55  ;;  %v734_v57 = vld [vmem:[%s4671_s5 + $0x458] sm:$0xff] }
 0x127   :  { %v515_v58 = vmul.f32 %v3607_v61, %v494_v50  ;;  %v467_v63 = vmul.f32 0.5, %v463_v53  ;;  %v505_v2 = vadd.f32 %v501_v14, %v496_v35  ;;  %v497_v11 = vmul.f32 %v3557_v27, %v3600_v54  ;;  %v727_v14 = vld [vmem:[%s4671_s5 + $0x420] sm:$0xff]  ;;  %v738_v35 = vld [vmem:[%s4671_s5 + $0x478] sm:$0xff] }
 0x128   :  { %v455_v60 = vadd.f32 %v454_v52, %v453_v22  ;;  %v479_v49 = vsub.f32 %v471_v59, %v475_v56  ;;  %2797 = vrsqrt.f32 %v530_v1  ;;  %v498_v15 = vmul.f32 %v3557_v27, %v458_v3  ;;  %v723_v22 = vld [vmem:[%s4671_s5 + $0x400] sm:$0xff]  ;;  %v736_v56 = vld [vmem:[%s4671_s5 + $0x468] sm:$0xff] }
 0x129   :  { %v519_v4 = vadd.f32 %v515_v58, %v511_v36  ;;  %v491_v6 = vmul.f32 %v467_v63, %v467_v63  ;;  %v525_v44 = vsub.f32 %v3559_v29, %v505_v2  ;;  %v503_v16 = vmul.f32 %v3607_v61, %v466_v25  ;;  %v725_v36 = vld [vmem:[%s4671_s5 + $0x410] sm:$0xff] }
 0x12a   :  { %v483_v5 = vsub.f32 %v455_v60, %v399_v51  ;;  %v512_v55 = vmul.f32 %v3557_v27, %v479_v49  ;;  %v506_v18 = vadd.f32 %v502_v8, %v497_v11  ;;  %v545_v54 = vrot.slane %v3657_v13, %v3538_v21  ;;  %v735_v49 = vld [vmem:[%s4671_s5 + $0x460] sm:$0xff]  ;;  %v744_v11 = vld [vmem:[%s4671_s5 + $0x4a8] sm:$0xff] }
 0x12b   :  { %v523_v9 = vmax.f32 %v519_v4, 0.0  ;;  %v507_v30 = vadd.f32 %v503_v16, %v498_v15  ;;  %v549_v33 = vrot.slane %v3657_v13, %v3546_v23  ;;  %v570_v39 = vrot.slane %v3668_v28, %v3538_v21  ;;  %v731_v4 = vld [vmem:[%s4671_s5 + $0x440] sm:$0xff]  ;;  %v746_v15 = vld [vmem:[%s4671_s5 + $0x4b8] sm:$0xff] }
 0x12c   :  { %v487_v62 = vmul.f32 0.5, %v483_v5  ;;  %v2796_v10 = vpop.eup %2795  ;;  %v526_v25 = vsub.f32 %v3561_v31, %v506_v18  ;;  %v574_v43 = vrot.slane %v3668_v28, %v3546_v23  ;;  %v499_v47 = vmul.f32 %v3557_v27, %v459_v42  ;;  %v732_v42 = vld [vmem:[%s4671_s5 + $0x448] sm:$0xff] }
 0x12d   :  { %v531_v12 = vadd.f32 1e-05, %v523_v9  ;;  %v537_v24 = vmul.f32 %v2796_v10, %v525_v44  ;;  %v527_v45 = vsub.f32 %v3590_v37, %v507_v30  ;;  %v504_v31 = vmul.f32 %v3607_v61, %v467_v63  ;;  %v729_v37 = vld [vmem:[%s4671_s5 + $0x430] sm:$0xff]  ;;  %v740_v10 = vld [vmem:[%s4671_s5 + $0x488] sm:$0xff] }
 0x12e   :  { %v495_v17 = vsub.f32 %v487_v62, %v491_v6  ;;  %v553_v51 = vrot.slane %v3657_v13, %v3554_v26  ;;  %v578_v59 = vrot.slane %v3668_v28, %v3554_v26  ;;  %v2441_v1 = vpack.c.bf16 %v727_v14, %v723_v22  ;;  %v733_v9 = vld [vmem:[%s4671_s5 + $0x450] sm:$0xff] }
 0x12f   :  { %2799 = vrsqrt.f32 %v531_v12  ;;  %v562_v38 = vmul.f32 %v545_v54, %v537_v24  ;;  %v508_v60 = vadd.f32 %v504_v31, %v499_v47  ;;  %v2569_v2 = vpack.c.bf16 %v729_v37, %v725_v36  ;;  %v737_v62 = vld [vmem:[%s4671_s5 + $0x470] sm:$0xff]  ;;  %v742_v12 = vld [vmem:[%s4671_s5 + $0x498] sm:$0xff]  ;;  %v739_v24 = vld [vmem:[%s4671_s5 + $0x480] sm:$0xff] }
 0x130   :  { %v516_v29 = vmul.f32 %v3607_v61, %v495_v17  ;;  %v2443_v6 = vpack.c.bf16 %v736_v56, %v732_v42  ;;  %v2571_v8 = vpack.c.bf16 %v738_v35, %v734_v57  ;;  %v2573_v18 = vpack.c.bf16 %v737_v62, %v733_v9  ;;  %v749_v22 = vld [vmem:[%s4671_s5 + $0x4d0] sm:$0xff]  ;;  %v758_v36 = vld [vmem:[%s4671_s5 + $0x518] sm:$0xff]  ;;  %v759_v56 = vld [vmem:[%s4671_s5 + $0x520] sm:$0xff] }
 0x131   :  { %v587_v50 = vadd.f32 %v570_v39, %v562_v38  ;;  %v528_v17 = vsub.f32 %v3611_v0, %v508_v60  ;;  %v2447_v54 = vpack.c.bf16 %v744_v11, %v740_v10  ;;  %v2575_v30 = vpack.c.bf16 %v746_v15, %v742_v12  ;;  %v741_v0 = vld [vmem:[%s4671_s5 + $0x490] sm:$0xff]  ;;  %v754_v38 = vld [vmem:[%s4671_s5 + $0x4f8] sm:$0xff]  ;;  %v767_v9 = vld [vmem:[%s4671_s5 + $0x560] sm:$0xff] }
 0x132   :  { %v520_v3 = vadd.f32 %v516_v29, %v512_v55  ;;  %v2798_v34 = vpop.eup %2797  ;;  %v2445_v55 = vpack.c.bf16 %v735_v49, %v731_v4  ;;  %v743_v29 = vld [vmem:[%s4671_s5 + $0x4a0] sm:$0xff]  ;;  %v557_v39 = vrot.slane %v3657_v13, %v3564_v32  ;;  %v582_v31 = vrot.slane %v3668_v28, %v3564_v32  ;;  %v753_v14 = vld [vmem:[%s4671_s5 + $0x4f0] sm:$0xff]  ;;  %v760_v28 = vld [vmem:[%s4671_s5 + $0x528] sm:$0xff] }
 0x133   :  { %v538_v41 = vmul.f32 %v2798_v34, %v526_v25  ;;  %v591_v5 = vmax.f32 %v587_v50, 0.0  ;;  %v748_v25 = vld [vmem:[%s4671_s5 + $0x4c8] sm:$0xff]  ;;  %v750_v34 = vld [vmem:[%s4671_s5 + $0x4d8] sm:$0xff]  ;;  %v761_v60 = vld [vmem:[%s4671_s5 + $0x530] sm:$0xff] }
 0x134   :  { %v524_v40 = vmax.f32 %v520_v3, 0.0  ;;  %v745_v3 = vld [vmem:[%s4671_s5 + $0x4b0] sm:$0xff]  ;;  %v756_v50 = vld [vmem:[%s4671_s5 + $0x508] sm:$0xff]  ;;  %v762_v37 = vld [vmem:[%s4671_s5 + $0x538] sm:$0xff] }
 0x135   :  { %v563_v48 = vmul.f32 %v549_v33, %v538_v41  ;;  %v752_v33 = vld [vmem:[%s4671_s5 + $0x4e8] sm:$0xff]  ;;  %v2449_v41 = vpack.c.bf16 %v743_v29, %v739_v24  ;;  %v2455_v35 = vpack.c.bf16 %v760_v28, %v756_v50  ;;  %v770_v4 = vld [vmem:[%s4671_s5 + $0x578] sm:$0xff]  ;;  %v769_v11 = vld [vmem:[%s4671_s5 + $0x570] sm:$0xff] }
 0x136   :  { %v532_v46 = vadd.f32 1e-05, %v524_v40  ;;  %v2451_v13 = vpack.c.bf16 %v752_v33, %v748_v25  ;;  %v772_v12 = vld [vmem:[%s4671_s5 + $0x588] sm:$0xff]  ;;  %v771_v29 = vld [vmem:[%s4671_s5 + $0x580] sm:$0xff]  ;;  %v777_v25 = vld [vmem:[%s4671_s5 + $0x5b0] sm:$0xff] }
 0x137   :  { %v588_v53 = vadd.f32 %v574_v43, %v563_v48  ;;  %v2577_v43 = vpack.c.bf16 %v745_v3, %v741_v0  ;;  %v2579_v48 = vpack.c.bf16 %v754_v38, %v750_v34  ;;  %v776_v15 = vld [vmem:[%s4671_s5 + $0x5a8] sm:$0xff]  ;;  %v773_v3 = vld [vmem:[%s4671_s5 + $0x590] sm:$0xff]  ;;  %v782_v38 = vld [vmem:[%s4671_s5 + $0x5d8] sm:$0xff] }
 0x138   :  { %2801 = vrsqrt.f32 %v532_v46  ;;  %v751_v46 = vld [vmem:[%s4671_s5 + $0x4e0] sm:$0xff]  ;;  %v780_v33 = vld [vmem:[%s4671_s5 + $0x5c8] sm:$0xff]  ;;  %v794_v50 = vld [vmem:[%s4671_s5 + $0x638] sm:$0xff] }
 0x139   :  { %v2800_v52 = vpop.eup %2799  ;;  %v592_v63 = vmax.f32 %v588_v53, 0.0  ;;  %v755_v53 = vld [vmem:[%s4671_s5 + $0x500] sm:$0xff]  ;;  %v784_v34 = vld [vmem:[%s4671_s5 + $0x5e8] sm:$0xff] }
 0x13a   :  { %v539_v58 = vmul.f32 %v2800_v52, %v527_v45  ;;  %v747_v45 = vld [vmem:[%s4671_s5 + $0x4c0] sm:$0xff]  ;;  %v2581_v52 = vpack.c.bf16 %v753_v14, %v749_v22  ;;  %v792_v22 = vld [vmem:[%s4671_s5 + $0x628] sm:$0xff]  ;;  %v790_v14 = vld [vmem:[%s4671_s5 + $0x618] sm:$0xff] }
 0x13b   :  { %937 = vmatprep.mubr.f32.mxu0 %v592_v63  ;;  %1079 = vmatprep.mubr.f32.mxu1 %v592_v63  ;;  %v764_v63 = vld [vmem:[%s4671_s5 + $0x548] sm:$0xff] }
 0x13c   :  { %v564_v44 = vmul.f32 %v553_v51, %v539_v58  ;;  %938 = vmatmul.mubr.f32.vlgmr.msra.gmra.mrb[2].mxu0 %v591_v5  ;;  %1080 = vmatmul.mubr.f32.vlgmr.msra.gmra.mrb[2].mxu1 %v591_v5  ;;  %v2453_v51 = vpack.c.bf16 %v751_v46, %v747_v45  ;;  %v2583_v58 = vpack.c.bf16 %v762_v37, %v758_v36  ;;  %v783_v45 = vld [vmem:[%s4671_s5 + $0x5e0] sm:$0xff] }
 0x13d   :  { %2442 = vmatpush1.bf16.msra.mxu0 %v2441_v1  ;;  %2570 = vmatpush1.bf16.msra.mxu1 %v2569_v2  ;;  %v768_v1 = vld [vmem:[%s4671_s5 + $0x568] sm:$0xff]  ;;  %v766_v2 = vld [vmem:[%s4671_s5 + $0x558] sm:$0xff]  ;;  %v2457_v5 = vpack.c.bf16 %v759_v56, %v755_v53  ;;  %v2467_v46 = vpack.c.bf16 %v784_v34, %v780_v33  ;;  %v787_v37 = vld [vmem:[%s4671_s5 + $0x600] sm:$0xff] }
 0x13e   :  { %v3732_v16 = vadd.f32 %v578_v59, %v564_v44  ;;  %2444 = vmatprep.subr.bf16.mxu0 %v2443_v6  ;;  %2572 = vmatprep.subr.bf16.mxu1 %v2571_v8  ;;  %v757_v59 = vld [vmem:[%s4671_s5 + $0x510] sm:$0xff]  ;;  %v763_v8 = vld [vmem:[%s4671_s5 + $0x540] sm:$0xff]  ;;  %v2459_v62 = vpack.c.bf16 %v768_v1, %v764_v63  ;;  %v2587_v10 = vpack.c.bf16 %v770_v4, %v766_v2 }
 0x13f   :  { %v2585_v6 = vpack.c.bf16 %v761_v60, %v757_v59  ;;  %v765_v44 = vld [vmem:[%s4671_s5 + $0x550] sm:$0xff]  ;;  %v802_v59 = vld [vmem:[%s4671_s5 + $0x678] sm:$0xff]  ;;  %v795_v1 = vld [vmem:[%s4671_s5 + $0x640] sm:$0xff] }
 0x140   :  { %v2589_v24 = vpack.c.bf16 %v769_v11, %v765_v44  ;;  %v789_v53 = vld [vmem:[%s4671_s5 + $0x610] sm:$0xff]  ;;  %v799_v2 = vld [vmem:[%s4671_s5 + $0x660] sm:$0xff] }
 0x141   :  { %2446 = vmatpush1.bf16.msra.mxu0 %v2445_v55  ;;  %2574 = vmatpush1.bf16.msra.mxu1 %v2573_v18  ;;  %v778_v55 = vld [vmem:[%s4671_s5 + $0x5b8] sm:$0xff]  ;;  %v2461_v18 = vpack.c.bf16 %v767_v9, %v763_v8  ;;  %v793_v56 = vld [vmem:[%s4671_s5 + $0x630] sm:$0xff]  ;;  %v804_v8 = vld [vmem:[%s4671_s5 + $0x688] sm:$0xff]  ;;  %v2477_v44 = vpack.c.bf16 %v799_v2, %v795_v1 }
 0x142   :  { %v2802_v40 = vpop.eup %2801  ;;  %2448 = vmatprep.subr.bf16.mxu0 %v2447_v54  ;;  %2576 = vmatprep.subr.bf16.mxu1 %v2575_v30  ;;  %v775_v54 = vld [vmem:[%s4671_s5 + $0x5a0] sm:$0xff]  ;;  %v2463_v30 = vpack.c.bf16 %v776_v15, %v772_v12  ;;  %v2601_v63 = vpack.c.bf16 %v793_v56, %v789_v53  ;;  %v808_v9 = vld [vmem:[%s4671_s5 + $0x6a8] sm:$0xff] }
 0x143   :  { %v540_v47 = vmul.f32 %v2802_v40, %v528_v17  ;;  %v774_v17 = vld [vmem:[%s4671_s5 + $0x598] sm:$0xff]  ;;  %v2465_v40 = vpack.c.bf16 %v775_v54, %v771_v29  ;;  %v803_v12 = vld [vmem:[%s4671_s5 + $0x680] sm:$0xff]  ;;  %v812_v29 = vld [vmem:[%s4671_s5 + $0x6c8] sm:$0xff] }
 0x144   :  { %v2591_v0 = vpack.c.bf16 %v778_v55, %v774_v17  ;;  %v807_v15 = vld [vmem:[%s4671_s5 + $0x6a0] sm:$0xff]  ;;  %v2479_v17 = vpack.c.bf16 %v808_v9, %v804_v8  ;;  %v816_v54 = vld [vmem:[%s4671_s5 + $0x6e8] sm:$0xff] }
 0x145   :  { %v565_v42 = vmul.f32 %v557_v39, %v540_v47  ;;  %2450 = vmatpush1.bf16.msra.mxu0 %v2449_v41  ;;  %2578 = vmatpush1.bf16.msra.mxu1 %v2577_v43  ;;  %v786_v39 = vld [vmem:[%s4671_s5 + $0x5f8] sm:$0xff]  ;;  %v2593_v41 = vpack.c.bf16 %v777_v25, %v773_v3  ;;  %v779_v43 = vld [vmem:[%s4671_s5 + $0x5c0] sm:$0xff]  ;;  %v2481_v3 = vpack.c.bf16 %v807_v15, %v803_v12  ;;  %v836_v1 = vld [vmem:[%s4671_s5 + $0x788] sm:$0xff] }
 0x146   :  { %2452 = vmatprep.subr.bf16.mxu0 %v2451_v13  ;;  %2580 = vmatprep.subr.bf16.mxu1 %v2579_v48  ;;  %v2595_v47 = vpack.c.bf16 %v786_v39, %v782_v38  ;;  %v785_v13 = vld [vmem:[%s4671_s5 + $0x5f0] sm:$0xff]  ;;  %v788_v48 = vld [vmem:[%s4671_s5 + $0x608] sm:$0xff]  ;;  %v2469_v28 = vpack.c.bf16 %v783_v45, %v779_v43  ;;  %v811_v33 = vld [vmem:[%s4671_s5 + $0x6c0] sm:$0xff]  ;;  %v2483_v38 = vpack.c.bf16 %v816_v54, %v812_v29 }
 0x147   :  { %v590_v57 = vadd.f32 %v582_v31, %v565_v42  ;;  %v781_v31 = vld [vmem:[%s4671_s5 + $0x5d0] sm:$0xff]  ;;  %v791_v42 = vld [vmem:[%s4671_s5 + $0x620] sm:$0xff]  ;;  %v820_v43 = vld [vmem:[%s4671_s5 + $0x708] sm:$0xff] }
 0x148   :  { %v2597_v36 = vpack.c.bf16 %v785_v13, %v781_v31  ;;  %v2473_v60 = vpack.c.bf16 %v791_v42, %v787_v37  ;;  %v815_v34 = vld [vmem:[%s4671_s5 + $0x6e0] sm:$0xff]  ;;  %v824_v45 = vld [vmem:[%s4671_s5 + $0x728] sm:$0xff] }
 0x149   :  { %v594_v49 = vmax.f32 %v590_v57, 0.0  ;;  %2454 = vmatpush1.bf16.msra.mxu0 %v2453_v51  ;;  %2582 = vmatpush1.bf16.msra.mxu1 %v2581_v52  ;;  %v2471_v51 = vpack.c.bf16 %v792_v22, %v788_v48  ;;  %v2599_v52 = vpack.c.bf16 %v794_v50, %v790_v14  ;;  %v796_v57 = vld [vmem:[%s4671_s5 + $0x648] sm:$0xff]  ;;  %v2485_v31 = vpack.c.bf16 %v815_v34, %v811_v33  ;;  %v819_v48 = vld [vmem:[%s4671_s5 + $0x700] sm:$0xff] }
 0x14a   :  { %2456 = vmatprep.subr.bf16.mxu0 %v2455_v35  ;;  %2584 = vmatprep.subr.bf16.mxu1 %v2583_v58  ;;  %v800_v35 = vld [vmem:[%s4671_s5 + $0x668] sm:$0xff]  ;;  %v798_v58 = vld [vmem:[%s4671_s5 + $0x658] sm:$0xff]  ;;  %v823_v22 = vld [vmem:[%s4671_s5 + $0x720] sm:$0xff]  ;;  %v2487_v14 = vpack.c.bf16 %v824_v45, %v820_v43 }
 0x14b   :  { %1008 = vmatprep.mubr.f32.mxu0 %v594_v49  ;;  %1150 = vmatprep.mubr.f32.mxu1 %v594_v49  ;;  %v2475_v4 = vpack.c.bf16 %v800_v35, %v796_v57  ;;  %v2603_v49 = vpack.c.bf16 %v802_v59, %v798_v58  ;;  %v828_v37 = vld [vmem:[%s4671_s5 + $0x748] sm:$0xff]  ;;  %v2489_v53 = vpack.c.bf16 %v823_v22, %v819_v48  ;;  %v827_v57 = vld [vmem:[%s4671_s5 + $0x740] sm:$0xff]  ;;  %v1666_v45 = vld [vmem:[%s4676_s10 + $0x90] sm:$0xff] }
 0x14c   :  { %v832_v42 = vld [vmem:[%s4671_s5 + $0x768] sm:$0xff]  ;;  %v831_v35 = vld [vmem:[%s4671_s5 + $0x760] sm:$0xff]  ;;  %v1651_v48 = vld [vmem:[%s4676_s10 + $0x18] sm:$0xff] }
 0x14d   :  { %2458 = vmatpush1.bf16.msra.mxu0 %v2457_v5  ;;  %2586 = vmatpush1.bf16.msra.mxu1 %v2585_v6  ;;  %v797_v5 = vld [vmem:[%s4671_s5 + $0x650] sm:$0xff]  ;;  %v2491_v58 = vpack.c.bf16 %v832_v42, %v828_v37  ;;  %v840_v2 = vld [vmem:[%s4671_s5 + $0x7a8] sm:$0xff]  ;;  %v835_v8 = vld [vmem:[%s4671_s5 + $0x780] sm:$0xff] }
 0x14e   :  { %2460 = vmatprep.subr.bf16.mxu0 %v2459_v62  ;;  %2588 = vmatprep.subr.bf16.mxu1 %v2587_v10  ;;  %v801_v6 = vld [vmem:[%s4671_s5 + $0x670] sm:$0xff]  ;;  %v806_v62 = vld [vmem:[%s4671_s5 + $0x698] sm:$0xff]  ;;  %v839_v9 = vld [vmem:[%s4671_s5 + $0x7a0] sm:$0xff] }
 0x14f   :  { %v810_v10 = vld [vmem:[%s4671_s5 + $0x6b8] sm:$0xff]  ;;  %v2605_v11 = vpack.c.bf16 %v801_v6, %v797_v5  ;;  %v2493_v5 = vpack.c.bf16 %v831_v35, %v827_v57  ;;  %v844_v12 = vld [vmem:[%s4671_s5 + $0x7c8] sm:$0xff]  ;;  %v843_v29 = vld [vmem:[%s4671_s5 + $0x7c0] sm:$0xff] }
 0x150   :  { %v2607_v55 = vpack.c.bf16 %v810_v10, %v806_v62  ;;  %v2495_v62 = vpack.c.bf16 %v840_v2, %v836_v1  ;;  %v848_v15 = vld [vmem:[%s4671_s5 + $0x7e8] sm:$0xff]  ;;  %v1670_v42 = vld [vmem:[%s4676_s10 + $0xb0] sm:$0xff]  ;;  %v1655_v57 = vld [vmem:[%s4676_s10 + $0x38] sm:$0xff] }
 0x151   :  { %2462 = vmatpush1.bf16.msra.mxu0 %v2461_v18  ;;  %2590 = vmatpush1.bf16.msra.mxu1 %v2589_v24  ;;  %v805_v18 = vld [vmem:[%s4671_s5 + $0x690] sm:$0xff]  ;;  %v2499_v54 = vpack.c.bf16 %v848_v15, %v844_v12  ;;  %v1653_v37 = vld [vmem:[%s4676_s10 + $0x28] sm:$0xff]  ;;  %v1672_v35 = vld [vmem:[%s4676_s10 + $0xc0] sm:$0xff] }
 0x152   :  { %2464 = vmatprep.subr.bf16.mxu0 %v2463_v30  ;;  %2592 = vmatprep.subr.bf16.mxu1 %v2591_v0  ;;  %v809_v24 = vld [vmem:[%s4671_s5 + $0x6b0] sm:$0xff]  ;;  %v814_v30 = vld [vmem:[%s4671_s5 + $0x6d8] sm:$0xff]  ;;  %v1657_v1 = vld [vmem:[%s4676_s10 + $0x48] sm:$0xff] }
 0x153   :  { %v818_v0 = vld [vmem:[%s4671_s5 + $0x6f8] sm:$0xff]  ;;  %v2609_v25 = vpack.c.bf16 %v809_v24, %v805_v18  ;;  %v2497_v18 = vpack.c.bf16 %v839_v9, %v835_v8  ;;  %v1674_v2 = vld [vmem:[%s4676_s10 + $0xd0] sm:$0xff]  ;;  %v1676_v9 = vld [vmem:[%s4676_s10 + $0xe0] sm:$0xff] }
 0x154   :  { %v2611_v39 = vpack.c.bf16 %v818_v0, %v814_v30  ;;  %v847_v0 = vld [vmem:[%s4671_s5 + $0x7e0] sm:$0xff]  ;;  %v1659_v8 = vld [vmem:[%s4676_s10 + $0x58] sm:$0xff]  ;;  %v1661_v12 = vld [vmem:[%s4676_s10 + $0x68] sm:$0xff] }
 0x155   :  { %2466 = vmatpush1.bf16.msra.mxu0 %v2465_v40  ;;  %2594 = vmatpush1.bf16.msra.mxu1 %v2593_v41  ;;  %v813_v40 = vld [vmem:[%s4671_s5 + $0x6d0] sm:$0xff]  ;;  %v2501_v33 = vpack.c.bf16 %v847_v0, %v843_v29  ;;  %v1663_v29 = vld [vmem:[%s4676_s10 + $0x78] sm:$0xff] }
 0x156   :  { %2468 = vmatprep.subr.bf16.mxu0 %v2467_v46  ;;  %2596 = vmatprep.subr.bf16.mxu1 %v2595_v47  ;;  %v817_v41 = vld [vmem:[%s4671_s5 + $0x6f0] sm:$0xff]  ;;  %v822_v46 = vld [vmem:[%s4671_s5 + $0x718] sm:$0xff] }
 0x157   :  { %v826_v47 = vld [vmem:[%s4671_s5 + $0x738] sm:$0xff]  ;;  %v2613_v13 = vpack.c.bf16 %v817_v41, %v813_v40  ;;  %v1665_v40 = vld [vmem:[%s4676_s10 + $0x88] sm:$0xff]  ;;  %v1648_v41 = vld [vmem:[%s4676_s10] sm:$0xff] }
 0x158   :  { %v2615_v50 = vpack.c.bf16 %v826_v47, %v822_v46  ;;  %v1667_v46 = vld [vmem:[%s4676_s10 + $0x98] sm:$0xff]  ;;  %v1678_v15 = vld [vmem:[%s4676_s10 + $0xf0] sm:$0xff] }
 0x159   :  { %2470 = vmatpush1.bf16.msra.mxu0 %v2469_v28  ;;  %2598 = vmatpush1.bf16.msra.mxu1 %v2597_v36  ;;  %v821_v28 = vld [vmem:[%s4671_s5 + $0x710] sm:$0xff] }
 0x15a   :  { %2472 = vmatprep.subr.bf16.mxu0 %v2471_v51  ;;  %2600 = vmatprep.subr.bf16.mxu1 %v2599_v52  ;;  %v825_v36 = vld [vmem:[%s4671_s5 + $0x730] sm:$0xff]  ;;  %v830_v51 = vld [vmem:[%s4671_s5 + $0x758] sm:$0xff] }
 0x15b   :  { %v834_v52 = vld [vmem:[%s4671_s5 + $0x778] sm:$0xff]  ;;  %v2617_v56 = vpack.c.bf16 %v825_v36, %v821_v28  ;;  %v1652_v36 = vld [vmem:[%s4676_s10 + $0x20] sm:$0xff] }
 0x15c   :  { %v2619_v59 = vpack.c.bf16 %v834_v52, %v830_v51  ;;  %v1671_v51 = vld [vmem:[%s4676_s10 + $0xb8] sm:$0xff]  ;;  %v2641_v52 = vpack.c.bf16 %v1653_v37, %v1652_v36 }
 0x15d   :  { %2474 = vmatpush1.bf16.msra.mxu0 %v2473_v60  ;;  %2602 = vmatpush1.bf16.msra.mxu1 %v2601_v63  ;;  %v829_v60 = vld [vmem:[%s4671_s5 + $0x750] sm:$0xff] }
 0x15e   :  { %2476 = vmatprep.subr.bf16.mxu0 %v2475_v4  ;;  %2604 = vmatprep.subr.bf16.mxu1 %v2603_v49  ;;  %v833_v63 = vld [vmem:[%s4671_s5 + $0x770] sm:$0xff]  ;;  %v838_v4 = vld [vmem:[%s4671_s5 + $0x798] sm:$0xff] }
 0x15f   :  { %v842_v49 = vld [vmem:[%s4671_s5 + $0x7b8] sm:$0xff]  ;;  %v2621_v6 = vpack.c.bf16 %v833_v63, %v829_v60  ;;  %v1656_v63 = vld [vmem:[%s4676_s10 + $0x40] sm:$0xff] }
 0x160   :  { %v2623_v10 = vpack.c.bf16 %v842_v49, %v838_v4  ;;  %v1675_v4 = vld [vmem:[%s4676_s10 + $0xd8] sm:$0xff]  ;;  %v2649_v49 = vpack.c.bf16 %v1657_v1, %v1656_v63 }
 0x161   :  { %2478 = vmatpush1.bf16.msra.mxu0 %v2477_v44  ;;  %2606 = vmatpush1.bf16.msra.mxu1 %v2605_v11  ;;  %v837_v44 = vld [vmem:[%s4671_s5 + $0x790] sm:$0xff] }
 0x162   :  { %2480 = vmatprep.subr.bf16.mxu0 %v2479_v17  ;;  %2608 = vmatprep.subr.bf16.mxu1 %v2607_v55  ;;  %v841_v11 = vld [vmem:[%s4671_s5 + $0x7b0] sm:$0xff]  ;;  %v846_v17 = vld [vmem:[%s4671_s5 + $0x7d8] sm:$0xff] }
 0x163   :  { %v850_v55 = vld [vmem:[%s4671_s5 + $0x7f8] sm:$0xff]  ;;  %v2625_v24 = vpack.c.bf16 %v841_v11, %v837_v44  ;;  %v1660_v11 = vld [vmem:[%s4676_s10 + $0x60] sm:$0xff] }
 0x164   :  { %v2627_v30 = vpack.c.bf16 %v850_v55, %v846_v17  ;;  %v1679_v17 = vld [vmem:[%s4676_s10 + $0xf8] sm:$0xff]  ;;  %v2657_v55 = vpack.c.bf16 %v1661_v12, %v1660_v11 }
 0x165   :  { %2482 = vmatpush1.bf16.msra.mxu0 %v2481_v3  ;;  %2610 = vmatpush1.bf16.msra.mxu1 %v2609_v25  ;;  %v845_v3 = vld [vmem:[%s4671_s5 + $0x7d0] sm:$0xff] }
 0x166   :  { %2484 = vmatprep.subr.bf16.mxu0 %v2483_v38  ;;  %2612 = vmatprep.subr.bf16.mxu1 %v2611_v39  ;;  %v849_v25 = vld [vmem:[%s4671_s5 + $0x7f0] sm:$0xff]  ;;  %v593_v38 = vmax.f32 %v3732_v16, 0.0  ;;  %v1664_v39 = vld [vmem:[%s4676_s10 + $0x80] sm:$0xff]  ;;  %v1649_v16 = vld [vmem:[%s4676_s10 + $0x8] sm:$0xff] }
 0x167   :  { %v2629_v34 = vpack.c.bf16 %v849_v25, %v845_v3  ;;  %v2631_v43 = vpack.c.bf16 %v1665_v40, %v1664_v39  ;;  %v2633_v47 = vpack.c.bf16 %v1649_v16, %v1648_v41 }
 0x169   :  { %2486 = vmatpush1.bf16.msra.mxu0 %v2485_v31  ;;  %2614 = vmatpush1.bf16.msra.mxu1 %v2613_v13  ;;  %v2635_v31 = vpack.c.bf16 %v1667_v46, %v1666_v45  ;;  %v1650_v13 = vld [vmem:[%s4676_s10 + $0x10] sm:$0xff] }
 0x16a   :  { %2488 = vmatprep.subr.bf16.mxu0 %v2487_v14  ;;  %2616 = vmatprep.subr.bf16.mxu1 %v2615_v50  ;;  %v2637_v22 = vpack.c.bf16 %v1651_v48, %v1650_v13  ;;  %v1668_v14 = vld [vmem:[%s4676_s10 + $0xa0] sm:$0xff]  ;;  %v1669_v50 = vld [vmem:[%s4676_s10 + $0xa8] sm:$0xff] }
 0x16b   :  { %v2639_v28 = vpack.c.bf16 %v1669_v50, %v1668_v14 }
 0x16d   :  { %2490 = vmatpush1.bf16.msra.mxu0 %v2489_v53  ;;  %2618 = vmatpush1.bf16.msra.mxu1 %v2617_v56  ;;  %v2643_v53 = vpack.c.bf16 %v1671_v51, %v1670_v42  ;;  %v1654_v56 = vld [vmem:[%s4676_s10 + $0x30] sm:$0xff] }
 0x16e   :  { %2492 = vmatprep.subr.bf16.mxu0 %v2491_v58  ;;  %2620 = vmatprep.subr.bf16.mxu1 %v2619_v59  ;;  %v1673_v58 = vld [vmem:[%s4676_s10 + $0xc8] sm:$0xff]  ;;  %v2645_v59 = vpack.c.bf16 %v1655_v57, %v1654_v56 }
 0x16f   :  { %v2647_v60 = vpack.c.bf16 %v1673_v58, %v1672_v35 }
 0x171   :  { %2494 = vmatpush1.bf16.msra.mxu0 %v2493_v5  ;;  %2622 = vmatpush1.bf16.msra.mxu1 %v2621_v6  ;;  %v2651_v5 = vpack.c.bf16 %v1675_v4, %v1674_v2  ;;  %v1658_v6 = vld [vmem:[%s4676_s10 + $0x50] sm:$0xff] }
 0x172   :  { %2496 = vmatprep.subr.bf16.mxu0 %v2495_v62  ;;  %2624 = vmatprep.subr.bf16.mxu1 %v2623_v10  ;;  %v1677_v62 = vld [vmem:[%s4676_s10 + $0xe8] sm:$0xff]  ;;  %v2653_v10 = vpack.c.bf16 %v1659_v8, %v1658_v6 }
 0x173   :  { %v2655_v44 = vpack.c.bf16 %v1677_v62, %v1676_v9 }
 0x175   :  { %2498 = vmatpush1.bf16.msra.mxu0 %v2497_v18  ;;  %2626 = vmatpush1.bf16.msra.mxu1 %v2625_v24  ;;  %v2659_v18 = vpack.c.bf16 %v1679_v17, %v1678_v15  ;;  %v1662_v24 = vld [vmem:[%s4676_s10 + $0x70] sm:$0xff] }
 0x176   :  { %2500 = vmatprep.subr.bf16.mxu0 %v2499_v54  ;;  %2628 = vmatprep.subr.bf16.mxu1 %v2627_v30  ;;  %v2661_v54 = vpack.c.bf16 %v1663_v29, %v1662_v24  ;;  %v4164_v30 = vld [vmem:[%s4672_s6] sm:$0xf]  ;;  %s2811_s6 = scalar_lea.vmem %s2102_s30, 32 }
 0x177   :  { %v856_v0 = vrot.slane %v4164_v30, %v3538_v21  ;;  %v864_v3 = vrot.slane %v4164_v30, %v3554_v26  ;;  %p2812_p0 = scmp.ne.s32.totalorder %s2102_s30, %s2811_s6  ;;  %p2817_p2 = scmp.lt.s32.totalorder %s2811_s6, %s2811_s6 }
 0x179   :  { %2502 = vmatpush1.bf16.msra.mxu0 %v2501_v33  ;;  %2630 = vmatpush1.bf16.msra.mxu1 %v2629_v34  ;;  %v860_v34 = vrot.slane %v4164_v30, %v3546_v23  ;;  %p2818_p3 = por %p2817_p2, %p2816_p1 }
 0x17a   :  { %2632 = vmatprep.subr.bf16.mxu0 %v2631_v43 }
 0x17b   :  { %p2819_p4 = pnand %p2818_p3, %p2812_p0 }
 0x17c   :  { %1009 = vmatmul.mubr.f32.vlgmr.msra.gmra.mrb[2].mxu0 %v593_v38  ;;  %1151 = vmatmul.mubr.f32.vlgmr.msra.gmra.mrb[2].mxu1 %v593_v38 }
 0x17d   :  { %1506 = vmatprep.mubr.f32.mxu1 %v2835_v7  ;;  %2634 = vmatpush3.bf16.msra.mxu0 %v2633_v47 }
 0x17e   :  { %2636 = vmatprep.subr.bf16.mxu0 %v2635_v31 }
 0x181   :  { %2638 = vmatpush3.bf16.msra.mxu0 %v2637_v22 }
 0x182   :  { %2640 = vmatprep.subr.bf16.mxu0 %v2639_v28 }
 0x185   :  { %2642 = vmatpush3.bf16.msra.mxu0 %v2641_v52 }
 0x186   :  { %2644 = vmatprep.subr.bf16.mxu0 %v2643_v53 }
 0x189   :  { %2646 = vmatpush3.bf16.msra.mxu0 %v2645_v59 }
 0x18a   :  { %2648 = vmatprep.subr.bf16.mxu0 %v2647_v60 }
 0x18d   :  { %2650 = vmatpush3.bf16.msra.mxu0 %v2649_v49 }
 0x18e   :  { %2652 = vmatprep.subr.bf16.mxu0 %v2651_v5 }
 0x191   :  { %2654 = vmatpush3.bf16.msra.mxu0 %v2653_v10 }
 0x192   :  { %2656 = vmatprep.subr.bf16.mxu0 %v2655_v44 }
 0x195   :  { %2658 = vmatpush3.bf16.msra.mxu0 %v2657_v55 }
 0x196   :  { %2660 = vmatprep.subr.bf16.mxu0 %v2659_v18 }
 0x199   :  { %2662 = vmatpush3.bf16.msra.mxu0 %v2661_v54 }
 0x24f   :  { %v1010_v25 = vpop.f32.mrb[2].mxu0  ;;  %v1152_v33 = vpop.f32.mrb[2].mxu1 }
 0x250   :  { %v4172_v38 = vadd.f32 %v1010_v25, %v856_v0  ;;  %v4174_v39 = vadd.f32 %v1152_v33, %v864_v3  ;;  %v1012_v40 = vpop.f32.mrb[3].mxu0  ;;  %v4176_v41 = vpop.f32.mrb[3].mxu1 }
 0x251   :  { %v4190_v48 = vadd.f32 %v1012_v40, %v860_v34 }
 0x252   :  { %v1159_v43 = vmul.f32 %v4172_v38, %v3557_v27  ;;  %v1191_v16 = vmul.f32 %v4172_v38, %v4172_v38  ;;  %v1227_v45 = vsel %vm52_vm0, %v4172_v38, 0.0  ;;  %v1161_v46 = vmul.f32 %v4174_v39, %v3557_v27 }
 0x253   :  { %v1228_v47 = vrot.slane %v1227_v45, 4  ;;  %v1193_v31 = vmul.f32 %v4174_v39, %v4174_v39  ;;  %v1241_v13 = vsel %vm52_vm0, %v4174_v39, 0.0  ;;  %v1160_v0 = vmul.f32 %v4190_v48, %v3557_v27 }
 0x254   :  { %v1163_v22 = vsel %vm52_vm0, %v1159_v43, 0.0  ;;  %v1195_v14 = vmul.f32 %v3557_v27, %v1191_v16  ;;  %v1255_v50 = vsel %vm52_vm0, %v1191_v16, 0.0  ;;  %v1177_v28 = vsel %vm52_vm0, %v1161_v46, 0.0 }
 0x255   :  { %v1164_v36 = vrot.slane %v1163_v22, 4  ;;  %v1229_v37 = vadd.f32 %v1228_v47, %v1227_v45  ;;  %v1256_v42 = vrot.slane %v1255_v50, 4  ;;  %v1178_v51 = vrot.slane %v1177_v28, 4 }
 0x256   :  { %v1199_v52 = vsel %vm52_vm0, %v1195_v14, 0.0  ;;  %v1197_v53 = vmul.f32 %v3557_v27, %v1193_v31  ;;  %v1242_v56 = vrot.slane %v1241_v13, 4  ;;  %v1269_v57 = vsel %vm52_vm0, %v1193_v31, 0.0 }
 0x257   :  { %v1165_v35 = vadd.f32 %v1164_v36, %v1163_v22  ;;  %v1200_v58 = vrot.slane %v1199_v52, 4  ;;  %v1230_v59 = vrot.slane %v1229_v37, 2  ;;  %v1257_v60 = vadd.f32 %v1256_v42, %v1255_v50 }
 0x258   :  { %v1179_v63 = vadd.f32 %v1178_v51, %v1177_v28  ;;  %v1213_v1 = vsel %vm52_vm0, %v1197_v53, 0.0  ;;  %v1243_v2 = vadd.f32 %v1242_v56, %v1241_v13  ;;  %v1270_v4 = vrot.slane %v1269_v57, 4 }
 0x259   :  { %v1166_v49 = vrot.slane %v1165_v35, 2  ;;  %v1201_v5 = vadd.f32 %v1200_v58, %v1199_v52  ;;  %v1231_v6 = vadd.f32 %v1230_v59, %v1229_v37  ;;  %v1258_v8 = vrot.slane %v1257_v60, 2 }
 0x25a   :  { %v1180_v9 = vrot.slane %v1179_v63, 2  ;;  %v1214_v62 = vrot.slane %v1213_v1, 4  ;;  %v1244_v10 = vrot.slane %v1243_v2, 2  ;;  %v1271_v44 = vadd.f32 %v1270_v4, %v1269_v57 }
 0x25b   :  { %v1167_v11 = vadd.f32 %v1166_v49, %v1165_v35  ;;  %v1202_v12 = vrot.slane %v1201_v5, 2  ;;  %v1232_v15 = vrot.slane %v1231_v6, 1  ;;  %v1259_v17 = vadd.f32 %v1258_v8, %v1257_v60 }
 0x25c   :  { %v1181_v55 = vadd.f32 %v1180_v9, %v1179_v63  ;;  %v1215_v18 = vadd.f32 %v1214_v62, %v1213_v1  ;;  %v1272_v54 = vrot.slane %v1271_v44, 2  ;;  %v1245_v25 = vadd.f32 %v1244_v10, %v1243_v2 }
 0x25d   :  { %v1168_v24 = vrot.slane %v1167_v11, 1  ;;  %v1203_v29 = vadd.f32 %v1202_v12, %v1201_v5  ;;  %v1260_v3 = vrot.slane %v1259_v17, 1  ;;  %v1233_v40 = vadd.f32 %v1232_v15, %v1231_v6 }
 0x25e   :  { %v1216_v43 = vrot.slane %v1215_v18, 2  ;;  %v1182_v16 = vrot.slane %v1181_v55, 1  ;;  %v1273_v47 = vadd.f32 %v1272_v54, %v1271_v44  ;;  %v1170_v31 = vsel %vm52_vm0, %v1160_v0, 0.0 }
 0x25f   :  { %v1169_v33 = vadd.f32 %v1168_v24, %v1167_v11  ;;  %v1204_v34 = vrot.slane %v1203_v29, 1  ;;  %v1261_v13 = vadd.f32 %v1260_v3, %v1259_v17  ;;  %v1246_v14 = vrot.slane %v1245_v25, 1 }
 0x260   :  { %v1217_v22 = vadd.f32 %v1216_v43, %v1215_v18  ;;  %v1171_v36 = vrot.slane %v1170_v31, 4  ;;  %v1183_v37 = vadd.f32 %v1182_v16, %v1181_v55  ;;  %v1274_v42 = vrot.slane %v1273_v47, 1 }
 0x261   :  { %v1205_v45 = vadd.f32 %v1204_v34, %v1203_v29  ;;  %v1287_v46 = vsub.f32 %v1233_v40, %v1169_v33  ;;  %v868_v51 = vrot.slane %v4164_v30, %v3564_v32  ;;  %v4207_v52 = vmul.f32 0.5, %v1169_v33 }
 0x262   :  { %v1218_v53 = vrot.slane %v1217_v22, 1  ;;  %v1247_v56 = vadd.f32 %v1246_v14, %v1245_v25  ;;  %v1172_v58 = vadd.f32 %v1171_v36, %v1170_v31  ;;  %v1192_v59 = vmul.f32 %v4190_v48, %v4190_v48 }
 0x263   :  { %v4203_v50 = vmul.f32 0.5, %v1287_v46  ;;  %v1307_v28 = vsub.f32 %v1261_v13, %v1205_v45  ;;  %v1275_v60 = vadd.f32 %v1274_v42, %v1273_v47  ;;  %v1234_v1 = vsel %vm52_vm0, %v4190_v48, 0.0 }
 0x264   :  { %v1289_v63 = vsub.f32 %v1247_v56, %v1183_v37  ;;  %v4216_v2 = vadd.f32 %v4176_v41, %v868_v51  ;;  %v1295_v30 = vmul.f32 0.5, %v1205_v45  ;;  %v1299_v4 = vmul.f32 %v4207_v52, %v4207_v52 }
 0x265   :  { %v1311_v57 = vmul.f32 0.5, %v1307_v28  ;;  %v1315_v35 = vmul.f32 %v4203_v50, %v4203_v50  ;;  %v1173_v49 = vrot.slane %v1172_v58, 2  ;;  %v1196_v5 = vmul.f32 %v3557_v27, %v1192_v59 }
 0x266   :  { %v1219_v6 = vadd.f32 %v1218_v53, %v1217_v22  ;;  %v4221_v8 = vmul.f32 0.5, %v1183_v37  ;;  %v1235_v9 = vrot.slane %v1234_v1, 4  ;;  %v1262_v62 = vsel %vm52_vm0, %v1192_v59, 0.0 }
 0x267   :  { %v1319_v10 = vsub.f32 %v1311_v57, %v1315_v35  ;;  %v1174_v44 = vadd.f32 %v1173_v49, %v1172_v58  ;;  %v1206_v11 = vsel %vm52_vm0, %v1196_v5, 0.0  ;;  %v1263_v12 = vrot.slane %v1262_v62, 4 }
 0x268   :  { %v4225_v41 = vmul.f32 0.5, %v1289_v63  ;;  %v1207_v15 = vrot.slane %v1206_v11, 4  ;;  %v1236_v17 = vadd.f32 %v1235_v9, %v1234_v1  ;;  %v1162_v55 = vmul.f32 %v4216_v2, %v3557_v27 }
 0x269   :  { %v1303_v18 = vsub.f32 %v1295_v30, %v1299_v4  ;;  %v1175_v24 = vrot.slane %v1174_v44, 1  ;;  %v1264_v29 = vadd.f32 %v1263_v12, %v1262_v62  ;;  %v1194_v54 = vmul.f32 %v4216_v2, %v4216_v2 }
 0x26a   :  { %v1309_v0 = vsub.f32 %v1275_v60, %v1219_v6  ;;  %v1208_v3 = vadd.f32 %v1207_v15, %v1206_v11  ;;  %v1237_v25 = vrot.slane %v1236_v17, 2  ;;  %v1184_v33 = vsel %vm52_vm0, %v1162_v55, 0.0 }
 0x26b   :  { %v1339_v34 = vmul.f32 %v1319_v10, %v3607_v61  ;;  %v1176_v40 = vadd.f32 %v1175_v24, %v1174_v44  ;;  %v1265_v43 = vrot.slane %v1264_v29, 2  ;;  %v1185_v16 = vrot.slane %v1184_v33, 4 }
 0x26c   :  { %v1301_v45 = vmul.f32 %v4221_v8, %v4221_v8  ;;  %v1209_v46 = vrot.slane %v1208_v3, 2  ;;  %v1238_v47 = vadd.f32 %v1237_v25, %v1236_v17  ;;  %v1198_v31 = vmul.f32 %v3557_v27, %v1194_v54 }
 0x26d   :  { %v1335_v13 = vmul.f32 %v3557_v27, %v1303_v18  ;;  %v1266_v22 = vadd.f32 %v1265_v43, %v1264_v29  ;;  %v4237_v14 = vmul.f32 0.5, %v1176_v40  ;;  %v1186_v28 = vadd.f32 %v1185_v16, %v1184_v33 }
 0x26e   :  { %v1210_v36 = vadd.f32 %v1209_v46, %v1208_v3  ;;  %v1239_v37 = vrot.slane %v1238_v47, 1  ;;  %v1220_v42 = vsel %vm52_vm0, %v1198_v31, 0.0  ;;  %v1248_v51 = vsel %vm52_vm0, %v4216_v2, 0.0 }
 0x26f   :  { %v1343_v53 = vadd.f32 %v1339_v34, %v1335_v13  ;;  %v1313_v56 = vmul.f32 0.5, %v1309_v0  ;;  %v1317_v57 = vmul.f32 %v4225_v41, %v4225_v41  ;;  %v1267_v35 = vrot.slane %v1266_v22, 1 }
 0x270   :  { %v1211_v58 = vrot.slane %v1210_v36, 1  ;;  %v1240_v59 = vadd.f32 %v1239_v37, %v1238_v47  ;;  %v1187_v60 = vrot.slane %v1186_v28, 2  ;;  %v1221_v63 = vrot.slane %v1220_v42, 4 }
 0x271   :  { %v1268_v1 = vadd.f32 %v1267_v35, %v1266_v22  ;;  %v1300_v30 = vmul.f32 %v4237_v14, %v4237_v14  ;;  %v1249_v4 = vrot.slane %v1248_v51, 4  ;;  %v1276_v49 = vsel %vm52_vm0, %v1194_v54, 0.0 }
 0x272   :  { %v1212_v5 = vadd.f32 %v1211_v58, %v1210_v36  ;;  %v1288_v9 = vsub.f32 %v1240_v59, %v1176_v40  ;;  %v1188_v62 = vadd.f32 %v1187_v60, %v1186_v28  ;;  %v1222_v10 = vadd.f32 %v1221_v63, %v1220_v42 }
 0x273   :  { %v1297_v44 = vmul.f32 0.5, %v1219_v6  ;;  %v1321_v11 = vsub.f32 %v1313_v56, %v1317_v57  ;;  %v1250_v12 = vadd.f32 %v1249_v4, %v1248_v51  ;;  %v1277_v15 = vrot.slane %v1276_v49, 4 }
 0x274   :  { %v1292_v17 = vmul.f32 0.5, %v1288_v9  ;;  %v1296_v55 = vmul.f32 0.5, %v1212_v5  ;;  %v1308_v18 = vsub.f32 %v1268_v1, %v1212_v5  ;;  %v1189_v24 = vrot.slane %v1188_v62, 1 }
 0x275   :  { %v1347_v29 = vmax.f32 %v1343_v53, 0.0  ;;  %v1223_v0 = vrot.slane %v1222_v10, 2  ;;  %v1251_v3 = vrot.slane %v1250_v12, 2  ;;  %v1278_v25 = vadd.f32 %v1277_v15, %v1276_v49 }
 0x276   :  { %v1304_v33 = vsub.f32 %v1296_v55, %v1300_v30  ;;  %v1312_v34 = vmul.f32 0.5, %v1308_v18  ;;  %v1316_v43 = vmul.f32 %v1292_v17, %v1292_v17  ;;  %v1305_v54 = vsub.f32 %v1297_v44, %v1301_v45 }
 0x277   :  { %v1190_v16 = vadd.f32 %v1189_v24, %v1188_v62  ;;  %v1224_v40 = vadd.f32 %v1223_v0, %v1222_v10  ;;  %v1252_v46 = vadd.f32 %v1251_v3, %v1250_v12  ;;  %v1279_v6 = vrot.slane %v1278_v25, 2 }
 0x278   :  { %v1320_v47 = vsub.f32 %v1312_v34, %v1316_v43  ;;  %v1355_v31 = vadd.f32 1e-05, %v1347_v29  ;;  %v1341_v13 = vmul.f32 %v1321_v11, %v3607_v61  ;;  %v1336_v36 = vmul.f32 %v3557_v27, %v1304_v33 }
 0x279   :  { %v1225_v22 = vrot.slane %v1224_v40, 1  ;;  %v1253_v28 = vrot.slane %v1252_v46, 1  ;;  %v1280_v42 = vadd.f32 %v1279_v6, %v1278_v25  ;;  %v1286_v51 = vmul.f32 0.5, %v1190_v16 }
 0x27a   :  { %v1340_v37 = vmul.f32 %v1320_v47, %v3607_v61  ;;  %v1337_v53 = vmul.f32 %v3557_v27, %v1305_v54  ;;  %2803 = vrsqrt.f32 %v1355_v31  ;;  %v1327_v49 = vmul.f32 %v4203_v50, %v3607_v61 }
 0x27b   :  { %v1226_v56 = vadd.f32 %v1225_v22, %v1224_v40  ;;  %v1254_v45 = vadd.f32 %v1253_v28, %v1252_v46  ;;  %v1281_v35 = vrot.slane %v1280_v42, 1  ;;  %v1302_v30 = vmul.f32 %v1286_v51, %v1286_v51  ;;  %v1158_v40 = vld [vmem:[%s4674_s8] sm:$0xf] }
 0x27c   :  { %v1344_v57 = vadd.f32 %v1340_v37, %v1336_v36  ;;  %v1345_v58 = vadd.f32 %v1341_v13, %v1337_v53  ;;  %v1323_v44 = vmul.f32 %v3557_v27, %v4207_v52  ;;  %v1328_v15 = vmul.f32 %v1292_v17, %v3607_v61  ;;  %v1157_v52 = vld [vmem:[%s4673_s7] sm:$0xf] }
 0x27d   :  { %v1290_v59 = vsub.f32 %v1254_v45, %v1190_v16  ;;  %v1282_v63 = vadd.f32 %v1281_v35, %v1280_v42  ;;  %v1298_v1 = vmul.f32 0.5, %v1226_v56  ;;  %v1418_v24 = vand.u32 127, %v152_v19 }
 0x27e   :  { %v1348_v60 = vmax.f32 %v1344_v57, 0.0  ;;  %v1349_v62 = vmax.f32 %v1345_v58, 0.0  ;;  %v1331_v55 = vadd.f32 %v1327_v49, %v1323_v44  ;;  %v1324_v50 = vmul.f32 %v3557_v27, %v4237_v14  ;;  %v1682_v44 = vld [vmem:[%s4676_s10 + $0x110] sm:$0xff] }
 0x27f   :  { %v1294_v4 = vmul.f32 0.5, %v1290_v59  ;;  %v1310_v9 = vsub.f32 %v1282_v63, %v1226_v56  ;;  %v1306_v11 = vsub.f32 %v1298_v1, %v1302_v30  ;;  %v1419_v43 = vadd.s32 2, %v3535_v20  ;;  %v1696_v63 = vld [vmem:[%s4676_s10 + $0x180] sm:$0xff]  ;;  %v1697_v1 = vld [vmem:[%s4676_s10 + $0x188] sm:$0xff] }
 0x280   :  { %v1356_v5 = vadd.f32 1e-05, %v1348_v60  ;;  %v1357_v29 = vadd.f32 1e-05, %v1349_v62  ;;  %v1332_v33 = vadd.f32 %v1328_v15, %v1324_v50  ;;  %v1351_v17 = vsub.f32 %v4172_v38, %v1331_v55  ;;  %v1701_v15 = vld [vmem:[%s4676_s10 + $0x1a8] sm:$0xff]  ;;  %v1702_v50 = vld [vmem:[%s4676_s10 + $0x1b0] sm:$0xff] }
 0x281   :  { %v1318_v10 = vmul.f32 %v1294_v4, %v1294_v4  ;;  %v1314_v12 = vmul.f32 0.5, %v1310_v9  ;;  %v1338_v0 = vmul.f32 %v3557_v27, %v1306_v11  ;;  %v1421_v19 = vadd.s32 2, %v1418_v24  ;;  %v1683_v11 = vld [vmem:[%s4676_s10 + $0x118] sm:$0xff] }
 0x282   :  { %2805 = vrsqrt.f32 %v1356_v5  ;;  %v1371_v14 = vrot.slane %v1157_v52, %v3538_v21  ;;  %v1352_v46 = vsub.f32 %v4190_v48, %v1332_v33  ;;  %v1375_v47 = vrot.slane %v1157_v52, %v3546_v23  ;;  %v1687_v33 = vld [vmem:[%s4676_s10 + $0x138] sm:$0xff] }
 0x283   :  { %v1322_v18 = vsub.f32 %v1314_v12, %v1318_v10  ;;  %2807 = vrsqrt.f32 %v1357_v29  ;;  %v1329_v38 = vmul.f32 %v4225_v41, %v3607_v61  ;;  %vm1420_vm5 = vcmp.eq.s32.totalorder %v1418_v24, %v1419_v43  ;;  %v1700_v12 = vld [vmem:[%s4676_s10 + $0x1a0] sm:$0xff]  ;;  %v1685_v29 = vld [vmem:[%s4676_s10 + $0x128] sm:$0xff] }
 0x284   :  { %v2804_v25 = vpop.eup %2803  ;;  %vm1422_vm6 = vcmp.eq.s32.totalorder %v1421_v19, %v3535_v20  ;;  %v1400_v22 = vrot.slane %v1158_v40, %v3546_v23  ;;  %v1325_v36 = vmul.f32 %v3557_v27, %v4221_v8  ;;  %v1396_v48 = vrot.slane %v1158_v40, %v3538_v21  ;;  %v1684_v24 = vld [vmem:[%s4676_s10 + $0x120] sm:$0xff] }
 0x285   :  { %v1342_v3 = vmul.f32 %v1322_v18, %v3607_v61  ;;  %v1363_v54 = vmul.f32 %v2804_v25, %v1351_v17  ;;  %v1330_v37 = vmul.f32 %v1294_v4, %v3607_v61  ;;  %vm1423_vm7 = vmor %vm1420_vm5, %vm1422_vm6  ;;  %v1326_v41 = vmul.f32 %v3557_v27, %v1286_v51  ;;  %v1699_v4 = vld [vmem:[%s4676_s10 + $0x198] sm:$0xff]  ;;  %v1704_v17 = vld [vmem:[%s4676_s10 + $0x1c0] sm:$0xff] }
 0x286   :  { %v1333_v53 = vadd.f32 %v1329_v38, %v1325_v36  ;;  %v2110_v23 = vsel %vm1423_vm7, 1.0, %v2835_v7  ;;  %v1379_v61 = vrot.slane %v1157_v52, %v3554_v26  ;;  %v1383_v51 = vrot.slane %v1157_v52, %v3564_v32  ;;  %v1686_v52 = vld [vmem:[%s4676_s10 + $0x130] sm:$0xff]  ;;  %v1691_v38 = vld [vmem:[%s4676_s10 + $0x158] sm:$0xff]  ;;  %v1692_v36 = vld [vmem:[%s4676_s10 + $0x160] sm:$0xff] }
 0x287   :  { %v1346_v34 = vadd.f32 %v1342_v3, %v1338_v0  ;;  %v1388_v28 = vmul.f32 %v1371_v14, %v1363_v54  ;;  %v1334_v57 = vadd.f32 %v1330_v37, %v1326_v41  ;;  %v1408_v59 = vrot.slane %v1158_v40, %v3564_v32  ;;  %v1681_v32 = vld [vmem:[%s4676_s10 + $0x108] sm:$0xff]  ;;  %v1703_v0 = vld [vmem:[%s4676_s10 + $0x1b8] sm:$0xff]  ;;  %v1688_v54 = vld [vmem:[%s4676_s10 + $0x140] sm:$0xff] }
 0x288   :  { %v1353_v21 = vsub.f32 %v4174_v39, %v1333_v53  ;;  %v1404_v39 = vrot.slane %v1158_v40, %v3554_v26  ;;  %v1698_v26 = vld [vmem:[%s4676_s10 + $0x190] sm:$0xff]  ;;  %v2663_v5 = vpack.c.bf16 %v1697_v1, %v1696_v63  ;;  %v2669_v55 = vpack.c.bf16 %v1683_v11, %v1682_v44  ;;  %v1689_v14 = vld [vmem:[%s4676_s10 + $0x148] sm:$0xff]  ;;  %v1707_v40 = vld [vmem:[%s4676_s10 + $0x1d8] sm:$0xff] }
 0x289   :  { %v1350_v16 = vmax.f32 %v1346_v34, 0.0  ;;  %v4283_v20 = vadd.f32 %v1396_v48, %v1388_v28  ;;  %v1354_v8 = vsub.f32 %v4216_v2, %v1334_v57  ;;  %v1680_v2 = vld [vmem:[%s4676_s10 + $0x100] sm:$0xff]  ;;  %v2667_v10 = vpack.c.bf16 %v1699_v4, %v1698_v26  ;;  %v1705_v34 = vld [vmem:[%s4676_s10 + $0x1c8] sm:$0xff]  ;;  %v1711_v53 = vld [vmem:[%s4676_s10 + $0x1f8] sm:$0xff] }
 0x28a   :  { %v2665_v62 = vpack.c.bf16 %v1681_v32, %v1680_v2  ;;  %v2671_v18 = vpack.c.bf16 %v1701_v15, %v1700_v12  ;;  %v2673_v3 = vpack.c.bf16 %v1685_v29, %v1684_v24  ;;  %v2675_v25 = vpack.c.bf16 %v1703_v0, %v1702_v50  ;;  %v1693_v48 = vld [vmem:[%s4676_s10 + $0x168] sm:$0xff]  ;;  %v1600_v41 = vld [vmem:[%s4675_s9 + $0x80] sm:$0xff]  ;;  %v1694_v57 = vld [vmem:[%s4676_s10 + $0x170] sm:$0xff] }
 0x28b   :  { %v1358_v31 = vadd.f32 1e-05, %v1350_v16  ;;  %v2677_v43 = vpack.c.bf16 %v1687_v33, %v1686_v52  ;;  %v2679_v19 = vpack.c.bf16 %v1705_v34, %v1704_v17  ;;  %v1706_v16 = vld [vmem:[%s4676_s10 + $0x1d0] sm:$0xff]  ;;  %v2689_v37 = vpack.c.bf16 %v1693_v48, %v1692_v36  ;;  %v1587_v26 = vld [vmem:[%s4675_s9 + $0x18] sm:$0xff]  ;;  %v1604_v4 = vld [vmem:[%s4675_s9 + $0xa0] sm:$0xff] }
 0x28c   :  { %v2806_v6 = vpop.eup %2805  ;;  %v1586_v32 = vld [vmem:[%s4675_s9 + $0x10] sm:$0xff]  ;;  %v1588_v44 = vld [vmem:[%s4675_s9 + $0x20] sm:$0xff]  ;;  %v1589_v11 = vld [vmem:[%s4675_s9 + $0x28] sm:$0xff] }
 0x28d   :  { %v1364_v13 = vmul.f32 %v2806_v6, %v1352_v46  ;;  %2809 = vrsqrt.f32 %v1358_v31  ;;  %v2808_v45 = vpop.eup %2807  ;;  %v2681_v46 = vpack.c.bf16 %v1689_v14, %v1688_v54  ;;  %v1690_v6 = vld [vmem:[%s4676_s10 + $0x150] sm:$0xff]  ;;  %v1708_v31 = vld [vmem:[%s4676_s10 + $0x1e0] sm:$0xff]  ;;  %v1607_v15 = vld [vmem:[%s4675_s9 + $0xb8] sm:$0xff] }
 0x28e   :  { %v1365_v27 = vmul.f32 %v2808_v45, %v1353_v21  ;;  %v1601_v45 = vld [vmem:[%s4675_s9 + $0x88] sm:$0xff]  ;;  %v1695_v21 = vld [vmem:[%s4676_s10 + $0x178] sm:$0xff]  ;;  %v1606_v12 = vld [vmem:[%s4675_s9 + $0xb0] sm:$0xff] }
 0x28f   :  { %v1389_v42 = vmul.f32 %v1375_v47, %v1364_v13  ;;  %v2683_v47 = vpack.c.bf16 %v1707_v40, %v1706_v16  ;;  %v1709_v13 = vld [vmem:[%s4676_s10 + $0x1e8] sm:$0xff]  ;;  %v1634_v24 = vld [vmem:[%s4675_s9 + $0x190] sm:$0xff]  ;;  %v2707_v29 = vpack.c.bf16 %v1607_v15, %v1606_v12  ;;  %v1635_v50 = vld [vmem:[%s4675_s9 + $0x198] sm:$0xff] }
 0x290   :  { %v1390_v60 = vmul.f32 %v1379_v61, %v1365_v27  ;;  %v2687_v28 = vpack.c.bf16 %v1709_v13, %v1708_v31  ;;  %v2695_v27 = vpack.c.bf16 %v1601_v45, %v1600_v41  ;;  %v2693_v61 = vpack.c.bf16 %v1695_v21, %v1694_v57  ;;  %v1590_v0 = vld [vmem:[%s4675_s9 + $0x30] sm:$0xff]  ;;  %v1609_v52 = vld [vmem:[%s4675_s9 + $0xc8] sm:$0xff]  ;;  %v1619_v54 = vld [vmem:[%s4675_s9 + $0x118] sm:$0xff] }
 0x291   :  { %v4281_v56 = vadd.f32 %v1400_v22, %v1389_v42  ;;  %v2685_v22 = vpack.c.bf16 %v1691_v38, %v1690_v6  ;;  %v1710_v42 = vld [vmem:[%s4676_s10 + $0x1f0] sm:$0xff]  ;;  %v1636_v14 = vld [vmem:[%s4675_s9 + $0x1a0] sm:$0xff]  ;;  %v1637_v40 = vld [vmem:[%s4675_s9 + $0x1a8] sm:$0xff] }
 0x292   :  { %v4318_v9 = vadd.f32 %v1404_v39, %v1390_v60  ;;  %2696 = vmatprep.subr.bf16.mxu0 %v2695_v27  ;;  %v1602_v60 = vld [vmem:[%s4675_s9 + $0x90] sm:$0xff]  ;;  %v1603_v39 = vld [vmem:[%s4675_s9 + $0x98] sm:$0xff]  ;;  %v1593_v6 = vld [vmem:[%s4675_s9 + $0x48] sm:$0xff] }
 0x293   :  { %2111 = vmatprep.subr.msk.mxu1 %vm52_vm0, %v4281_v56  ;;  %v2699_v2 = vpack.c.bf16 %v1603_v39, %v1602_v60  ;;  %v1610_v38 = vld [vmem:[%s4675_s9 + $0xd0] sm:$0xff]  ;;  %v1611_v31 = vld [vmem:[%s4675_s9 + $0xd8] sm:$0xff]  ;;  %v1621_v36 = vld [vmem:[%s4675_s9 + $0x128] sm:$0xff] }
 0x294   :  { %2112 = vmatpush1.msk.msra.mxu1 %vm52_vm0, %v4283_v20  ;;  %v1638_v48 = vld [vmem:[%s4675_s9 + $0x1b0] sm:$0xff]  ;;  %v1595_v41 = vld [vmem:[%s4675_s9 + $0x58] sm:$0xff]  ;;  %v1613_v45 = vld [vmem:[%s4675_s9 + $0xe8] sm:$0xff] }
 0x295   :  { %2113 = vmatmul.mubr.msk.f32.vlgmr.msra.gmra.mrb[4].mxu1 %vm1426_vm8, %v2110_v23  ;;  %v1622_v27 = vld [vmem:[%s4675_s9 + $0x130] sm:$0xff]  ;;  %v1597_v60 = vld [vmem:[%s4675_s9 + $0x68] sm:$0xff] }
 0x296   :  { %1577 = vmatprep.mubr.f32.mxu1 %v2835_v7  ;;  %v1614_v39 = vld [vmem:[%s4675_s9 + $0xf0] sm:$0xff] }
 0x297   :  { %v2810_v35 = vpop.eup %2809  ;;  %v1626_v15 = vld [vmem:[%s4675_s9 + $0x150] sm:$0xff] }
 0x298   :  { %v1366_v58 = vmul.f32 %v2810_v35, %v1354_v8  ;;  %v1632_v8 = vld [vmem:[%s4675_s9 + $0x180] sm:$0xff] }
 0x29a   :  { %v1391_v30 = vmul.f32 %v1383_v51, %v1366_v58  ;;  %v1633_v51 = vld [vmem:[%s4675_s9 + $0x188] sm:$0xff]  ;;  %v1584_v58 = vld [vmem:[%s4675_s9] sm:$0xff] }
 0x29b   :  { %v2727_v35 = vpack.c.bf16 %v1633_v51, %v1632_v8  ;;  %v1640_v8 = vld [vmem:[%s4675_s9 + $0x1c0] sm:$0xff] }
 0x29c   :  { %v4316_v49 = vadd.f32 %v1408_v59, %v1391_v30  ;;  %v1585_v59 = vld [vmem:[%s4675_s9 + $0x8] sm:$0xff] }
 0x29d   :  { %v2697_v1 = vpack.c.bf16 %v1585_v59, %v1584_v58  ;;  %v1596_v59 = vld [vmem:[%s4675_s9 + $0x60] sm:$0xff] }
 0x29e   :  { %2114 = vmatprep.subr.msk.mxu1 %vm52_vm0, %v4316_v49 }
 0x29f   :  { %2115 = vmatpush1.msk.msra.mxu1 %vm52_vm0, %v4318_v9 }
 0x2a0   :  { %2116 = vmatmul.mubr.msk.f32.vlgmr.msra.gmra.mrb[6].mxu1 %vm1426_vm8, %v2110_v23  ;;  %2664 = vmatprep.subr.bf16.mxu1 %v2663_v5  ;;  %v2691_v23 = vpack.c.bf16 %v1711_v53, %v1710_v42  ;;  %v1605_v5 = vld [vmem:[%s4675_s9 + $0xa8] sm:$0xff]  ;;  %v2715_v42 = vpack.c.bf16 %v1611_v31, %v1610_v38  ;;  %v1594_v53 = vld [vmem:[%s4675_s9 + $0x50] sm:$0xff] }
 0x2a1   :  { %2666 = vmatpush3.bf16.msra.mxu1 %v2665_v62  ;;  %v2701_v62 = vpack.c.bf16 %v1587_v26, %v1586_v32  ;;  %v2717_v51 = vpack.c.bf16 %v1595_v41, %v1594_v53  ;;  %v1625_v32 = vld [vmem:[%s4675_s9 + $0x148] sm:$0xff]  ;;  %v1642_v26 = vld [vmem:[%s4675_s9 + $0x1d0] sm:$0xff]  ;;  %v2012_v53 = vld [vmem:[%s4678_s12 + $0x60] sm:$0xff] }
 0x2a2   :  { %2668 = vmatprep.subr.bf16.mxu1 %v2667_v10  ;;  %v2703_v10 = vpack.c.bf16 %v1605_v5, %v1604_v4  ;;  %v2721_v4 = vpack.c.bf16 %v1597_v60, %v1596_v59  ;;  %v1643_v5 = vld [vmem:[%s4675_s9 + $0x1d8] sm:$0xff]  ;;  %v2006_v31 = vld [vmem:[%s4678_s12 + $0x30] sm:$0xff]  ;;  %v2013_v41 = vld [vmem:[%s4678_s12 + $0x68] sm:$0xff] }
 0x2a3   :  { %v2747_v12 = vpack.c.bf16 %v1643_v5, %v1642_v26  ;;  %v2117_v26 = vld [vmem:[%s4677_s11] ss:$0 sm:$0xff] }
 0x2a4   :  { %v2118_v5 = vld [vmem:[%s4679_s13] ss:$0 sm:$0xff] }
 0x2a5   :  { %2670 = vmatpush3.bf16.msra.mxu1 %v2669_v55  ;;  %v1616_v55 = vld [vmem:[%s4675_s9 + $0x100] sm:$0xff] }
 0x2a6   :  { %2672 = vmatprep.subr.bf16.mxu1 %v2671_v18  ;;  %v1617_v18 = vld [vmem:[%s4675_s9 + $0x108] sm:$0xff] }
 0x2a7   :  { %v2729_v17 = vpack.c.bf16 %v1617_v18, %v1616_v55  ;;  %v1644_v18 = vld [vmem:[%s4675_s9 + $0x1e0] sm:$0xff] }
 0x2a9   :  { %2674 = vmatpush3.bf16.msra.mxu1 %v2673_v3  ;;  %v1591_v3 = vld [vmem:[%s4675_s9 + $0x38] sm:$0xff] }
 0x2aa   :  { %2676 = vmatprep.subr.bf16.mxu1 %v2675_v25  ;;  %v1608_v25 = vld [vmem:[%s4675_s9 + $0xc0] sm:$0xff]  ;;  %v2709_v16 = vpack.c.bf16 %v1591_v3, %v1590_v0  ;;  %v1629_v3 = vld [vmem:[%s4675_s9 + $0x168] sm:$0xff] }
 0x2ab   :  { %v1628_v0 = vld [vmem:[%s4675_s9 + $0x160] sm:$0xff] }
 0x2ad   :  { %2678 = vmatpush3.bf16.msra.mxu1 %v2677_v43  ;;  %v2731_v43 = vpack.c.bf16 %v1635_v50, %v1634_v24  ;;  %v1645_v24 = vld [vmem:[%s4675_s9 + $0x1e8] sm:$0xff] }
 0x2ae   :  { %2680 = vmatprep.subr.bf16.mxu1 %v2679_v19  ;;  %v1618_v19 = vld [vmem:[%s4675_s9 + $0x110] sm:$0xff]  ;;  %v2751_v50 = vpack.c.bf16 %v1645_v24, %v1644_v18 }
 0x2af   :  { %v2733_v13 = vpack.c.bf16 %v1619_v54, %v1618_v19  ;;  %v2001_v54 = vld [vmem:[%s4678_s12 + $0x8] sm:$0xff] }
 0x2b1   :  { %2682 = vmatpush3.bf16.msra.mxu1 %v2681_v46  ;;  %v2711_v46 = vpack.c.bf16 %v1609_v52, %v1608_v25  ;;  %v1646_v25 = vld [vmem:[%s4675_s9 + $0x1f0] sm:$0xff]  ;;  %v1647_v52 = vld [vmem:[%s4675_s9 + $0x1f8] sm:$0xff] }
 0x2b2   :  { %2684 = vmatprep.subr.bf16.mxu1 %v2683_v47  ;;  %v1592_v47 = vld [vmem:[%s4675_s9 + $0x40] sm:$0xff] }
 0x2b5   :  { %2686 = vmatpush3.bf16.msra.mxu1 %v2685_v22  ;;  %v2735_v22 = vpack.c.bf16 %v1637_v40, %v1636_v14  ;;  %v2002_v14 = vld [vmem:[%s4678_s12 + $0x10] sm:$0xff] }
 0x2b6   :  { %2688 = vmatprep.subr.bf16.mxu1 %v2687_v28  ;;  %v1620_v28 = vld [vmem:[%s4675_s9 + $0x120] sm:$0xff] }
 0x2b7   :  { %v2737_v57 = vpack.c.bf16 %v1621_v36, %v1620_v28  ;;  %v2008_v28 = vld [vmem:[%s4678_s12 + $0x40] sm:$0xff]  ;;  %v2009_v36 = vld [vmem:[%s4678_s12 + $0x48] sm:$0xff] }
 0x2b9   :  { %2690 = vmatpush3.bf16.msra.mxu1 %v2689_v37  ;;  %v2713_v37 = vpack.c.bf16 %v1593_v6, %v1592_v47  ;;  %v2004_v47 = vld [vmem:[%s4678_s12 + $0x20] sm:$0xff]  ;;  %v2005_v6 = vld [vmem:[%s4678_s12 + $0x28] sm:$0xff] }
 0x2ba   :  { %2692 = vmatprep.subr.bf16.mxu1 %v2691_v23  ;;  %v1612_v23 = vld [vmem:[%s4675_s9 + $0xe0] sm:$0xff]  ;;  %v2766_v38 = vpack.c.bf16 %v2005_v6, %v2004_v47 }
 0x2bb   :  { %v2719_v58 = vpack.c.bf16 %v1613_v45, %v1612_v23  ;;  %v2778_v23 = vpack.c.bf16 %v2013_v41, %v2012_v53  ;;  %v2014_v45 = vld [vmem:[%s4678_s12 + $0x70] sm:$0xff] }
 0x2bd   :  { %2694 = vmatpush3.bf16.msra.mxu1 %v2693_v61  ;;  %v1623_v61 = vld [vmem:[%s4675_s9 + $0x138] sm:$0xff] }
 0x2be   :  { %2728 = vmatprep.subr.bf16.mxu1 %v2727_v35  ;;  %v1641_v35 = vld [vmem:[%s4675_s9 + $0x1c8] sm:$0xff] }
 0x368   :  { %v1508_v63 = vpop.f32.mrb[4].mxu1 }
 0x369   :  { %v1510_v30 = vpop.f32.mrb[5].mxu1 }
 0x36a   :  { %1776 = vmatprep.mubr.f32.mxu0 %v1510_v30  ;;  %v2743_v30 = vpack.c.bf16 %v1641_v35, %v1640_v8 }
 0x36b   :  { %1777 = vmatmul.mubr.f32.vlgmr.msra.gmra.mrb[4].mxu0 %v1508_v63  ;;  %v1615_v63 = vld [vmem:[%s4675_s9 + $0xf8] sm:$0xff] }
 0x36c   :  { %2698 = vmatpush3.bf16.msra.mxu0 %v2697_v1  ;;  %1916 = vmatprep.mubr.f32.mxu0 %v4281_v56  ;;  %v2705_v56 = vpack.c.bf16 %v1589_v11, %v1588_v44  ;;  %v2741_v1 = vpack.c.bf16 %v1623_v61, %v1622_v27  ;;  %v1599_v44 = vld [vmem:[%s4675_s9 + $0x78] sm:$0xff] }
 0x36d   :  { %2700 = vmatprep.subr.bf16.mxu0 %v2699_v2  ;;  %v1624_v2 = vld [vmem:[%s4675_s9 + $0x140] sm:$0xff] }
 0x36e   :  { %v2745_v11 = vpack.c.bf16 %v1625_v32, %v1624_v2 }
 0x370   :  { %2702 = vmatpush3.bf16.msra.mxu0 %v2701_v62  ;;  %v2723_v62 = vpack.c.bf16 %v1615_v63, %v1614_v39 }
 0x371   :  { %2704 = vmatprep.subr.bf16.mxu0 %v2703_v10  ;;  %v1598_v10 = vld [vmem:[%s4675_s9 + $0x70] sm:$0xff] }
 0x372   :  { %v2725_v55 = vpack.c.bf16 %v1599_v44, %v1598_v10 }
 0x373   :  { %v1579_v33 = vpop.f32.mrb[6].mxu1 }
 0x374   :  { %2706 = vmatpush3.bf16.msra.mxu0 %v2705_v56  ;;  %v1581_v34 = vpop.f32.mrb[7].mxu1  ;;  %v1627_v56 = vld [vmem:[%s4675_s9 + $0x158] sm:$0xff] }
 0x375   :  { %2708 = vmatprep.subr.bf16.mxu0 %v2707_v29  ;;  %1846 = vmatprep.mubr.f32.mxu1 %v1581_v34  ;;  %v2749_v29 = vpack.c.bf16 %v1627_v56, %v1626_v15  ;;  %v1630_v34 = vld [vmem:[%s4675_s9 + $0x170] sm:$0xff] }
 0x376   :  { %1847 = vmatmul.mubr.f32.vlgmr.msra.gmra.mrb[8].mxu1 %v1579_v33  ;;  %v2753_v33 = vpack.c.bf16 %v1629_v3, %v1628_v0 }
 0x377   :  { %2730 = vmatpush3.bf16.msra.mxu1 %v2729_v17  ;;  %1986 = vmatprep.mubr.f32.mxu1 %v4316_v49  ;;  %v1639_v49 = vld [vmem:[%s4675_s9 + $0x1b8] sm:$0xff]  ;;  %v2755_v17 = vpack.c.bf16 %v1647_v52, %v1646_v25 }
 0x378   :  { %2732 = vmatprep.subr.bf16.mxu1 %v2731_v43  ;;  %2710 = vmatpush3.bf16.msra.mxu0 %v2709_v16  ;;  %v2739_v21 = vpack.c.bf16 %v1639_v49, %v1638_v48  ;;  %v1631_v43 = vld [vmem:[%s4675_s9 + $0x178] sm:$0xff]  ;;  %v2836_v16 = vmov 0.0|0.0   ;;  %v2772_v48 = vpack.c.bf16 %v2009_v36, %v2008_v28 }
 0x379   :  { %2712 = vmatprep.subr.bf16.mxu0 %v2711_v46  ;;  %v2757_v19 = vpack.c.bf16 %v1631_v43, %v1630_v34  ;;  %v2003_v46 = vld [vmem:[%s4678_s12 + $0x18] sm:$0xff] }
 0x37a   :  { %v2011_v49 = vld [vmem:[%s4678_s12 + $0x58] sm:$0xff] }
 0x37b   :  { %2734 = vmatpush3.bf16.msra.mxu1 %v2733_v13  ;;  %v2007_v13 = vld [vmem:[%s4678_s12 + $0x38] sm:$0xff] }
 0x37c   :  { %2736 = vmatprep.subr.bf16.mxu1 %v2735_v22  ;;  %2714 = vmatpush3.bf16.msra.mxu0 %v2713_v37  ;;  %v2769_v22 = vpack.c.bf16 %v2007_v13, %v2006_v31  ;;  %v2010_v37 = vld [vmem:[%s4678_s12 + $0x50] sm:$0xff] }
 0x37d   :  { %2716 = vmatprep.subr.bf16.mxu0 %v2715_v42  ;;  %v2775_v42 = vpack.c.bf16 %v2011_v49, %v2010_v37 }
 0x37f   :  { %2738 = vmatpush3.bf16.msra.mxu1 %v2737_v57  ;;  %v2015_v57 = vld [vmem:[%s4678_s12 + $0x78] sm:$0xff] }
 0x380   :  { %2740 = vmatprep.subr.bf16.mxu1 %v2739_v21  ;;  %2718 = vmatpush3.bf16.msra.mxu0 %v2717_v51  ;;  %v2781_v21 = vpack.c.bf16 %v2015_v57, %v2014_v45 }
 0x381   :  { %2720 = vmatprep.subr.bf16.mxu0 %v2719_v58 }
 0x383   :  { %2742 = vmatpush3.bf16.msra.mxu1 %v2741_v1 }
 0x384   :  { %2744 = vmatprep.subr.bf16.mxu1 %v2743_v30  ;;  %2722 = vmatpush3.bf16.msra.mxu0 %v2721_v4 }
 0x385   :  { %2724 = vmatprep.subr.bf16.mxu0 %v2723_v62 }
 0x387   :  { %2746 = vmatpush3.bf16.msra.mxu1 %v2745_v11 }
 0x388   :  { %2748 = vmatprep.subr.bf16.mxu1 %v2747_v12  ;;  %2726 = vmatpush3.bf16.msra.mxu0 %v2725_v55 }
 0x389   :  { %2759 = vmatprep.subr.bf16.mxu0 %v2836_v16 }
 0x38b   :  { %2750 = vmatpush3.bf16.msra.mxu1 %v2749_v29  ;;  %1917 = vmatmul.mubr.f32.vlgmr.msra.gmra.mrb[6].mxu0 %v4283_v20  ;;  %v2000_v20 = vld [vmem:[%s4678_s12] sm:$0xff] }
 0x38c   :  { %2752 = vmatprep.subr.bf16.mxu1 %v2751_v50  ;;  %v2760_v40 = vpack.c.bf16 %v2001_v54, %v2000_v20  ;;  %2308 = vmatprep.mubr.msk.f32.mxu0 %vm2837_vm9, %v2835_v7 }
 0x38e   :  { %2761 = vmatpush3.bf16.msra.mxu0 %v2760_v40 }
 0x38f   :  { %2754 = vmatpush3.bf16.msra.mxu1 %v2753_v33  ;;  %2762 = vmatprep.subr.bf16.mxu0 %v2836_v16 }
 0x390   :  { %2756 = vmatprep.subr.bf16.mxu1 %v2755_v17 }
 0x393   :  { %2758 = vmatpush3.bf16.msra.mxu1 %v2757_v19 }
 0x396   :  { %1987 = vmatmul.mubr.f32.vlgmr.msra.gmra.mrb[10].mxu1 %v4318_v9  ;;  %v2763_v9 = vpack.c.bf16 %v2003_v46, %v2002_v14 }
 0x398   :  { %2764 = vmatpush3.bf16.msra.mxu0 %v2763_v9 }
 0x399   :  { %2765 = vmatprep.subr.bf16.mxu0 %v2836_v16 }
 0x39c   :  { %2767 = vmatpush3.bf16.msra.mxu0 %v2766_v38 }
 0x39d   :  { %2768 = vmatprep.subr.bf16.mxu0 %v2836_v16 }
 0x3a0   :  { %2770 = vmatpush3.bf16.msra.mxu0 %v2769_v22 }
 0x3a1   :  { %2771 = vmatprep.subr.bf16.mxu0 %v2836_v16 }
 0x3a4   :  { %2773 = vmatpush3.bf16.msra.mxu0 %v2772_v48 }
 0x3a5   :  { %2774 = vmatprep.subr.bf16.mxu0 %v2836_v16 }
 0x3a8   :  { %2776 = vmatpush3.bf16.msra.mxu0 %v2775_v42 }
 0x3a9   :  { %2777 = vmatprep.subr.bf16.mxu0 %v2836_v16 }
 0x3ac   :  { %2779 = vmatpush3.bf16.msra.mxu0 %v2778_v23 }
 0x3ad   :  { %2780 = vmatprep.subr.bf16.mxu0 %v2836_v16 }
 0x3b0   :  { %2782 = vmatpush3.bf16.msra.mxu0 %v2781_v21 }
 0x43e   :  { %v2151_v27 = vpop.f32.mrb[4].mxu0 }
 0x43f   :  { %v2152_v61 = vpop.f32.mrb[5].mxu0 }
 0x440   :  { %v2153_v8 = vadd.f32 %v2152_v61, %v2151_v27 }
 0x449   :  { %v2186_v51 = vpop.f32.mrb[8].mxu1 }
 0x44a   :  { %v2187_v35 = vpop.f32.mrb[9].mxu1 }
 0x44b   :  { %v2188_v58 = vadd.f32 %v2187_v35, %v2186_v51 }
 0x44d   :  { %v1849_v59 = vadd.f32 %v2188_v58, %v2153_v8 }
 0x45e   :  { %v2221_v60 = vpop.f32.mrb[6].mxu0 }
 0x45f   :  { %v2222_v39 = vpop.f32.mrb[7].mxu0 }
 0x460   :  { %v2223_v63 = vadd.f32 %v2222_v39, %v2221_v60 }
 0x462   :  { %v1919_v1 = vadd.f32 %v2223_v63, %v1849_v59 }
 0x469   :  { %v2256_v30 = vpop.f32.mrb[10].mxu1 }
 0x46a   :  { %v2257_v2 = vpop.f32.mrb[11].mxu1 }
 0x46b   :  { %v2258_v32 = vadd.f32 %v2257_v2, %v2256_v30 }
 0x46d   :  { %v1989_v7 = vadd.f32 %v2258_v32, %v1919_v1 }
 0x46f   :  { %v1999_v4 = vadd.f32 %v2117_v26, %v1989_v7 }
 0x471   :  { %2309 = vmatmul.mubr.f32.vlgmr.msra.gmra.mrb[8].mxu0 %v1999_v4 }
 0x544   :  { %v2089_v62 = vpop.f32.mrb[8].mxu0 }
 0x545   :  { %v2090_v10 = vadd.f32 %v2118_v5, %v2089_v62  ;;  %v2310_v44 = vpop.f32.mrb[9].mxu0 }
 0x547   :  { %2094 = vst.msk [vmem:[#allocation2] sm:$0x3] %vm2093_vm10, %v2090_v10 }
 0x548   :  { %2822 = shalt.err (!%p2819_p4)
}
 0x549   :  { %s2823_s15 = scalar_lea.hbm %s4680_s14, 32 }
 0x54a   :  { %p2824_p5 = scmp.ne.s32.totalorder %s4680_s14, %s2823_s15  ;;  %p2827_p6 = scmp.lt.u32.totalorder %s2823_s15, %s4680_s14 }
 0x54c   :  { %p2829_p7 = pnand %p2827_p6, %p2824_p5 }
 0x54e   :  { %2832 = shalt.err (!%p2829_p7)
}
 0x54f   :  { %2104 = dma.vmem_to_hbm [thread:$0]  %s2102_s30, 32, %s4680_s14, [#allocation3]  }
 0x550   :  { %2833 = dma.done.wait [#allocation3], 32  }
 0x551   :  { %2834 = vsyncadd [#allocation3], 4294967264 }
 0x552   :  { %2108 = vsyncpa [#allocation3], 1 }

</bundles_post_ra>
